<compile_context>
chip_gen: v7x
topology: tpu7x:2x2x1
jax: 0.10.0
libtpu: 0.0.40
codegen_flags: <defaults>
</compile_context>

<pallas_src>
import jax
import jax.numpy as jnp
from jax.experimental import pallas as pl
from jax.experimental.pallas import tpu as pltpu


_LANE = 128                    # lane-dense padded channel / feature width
_NP = 8                        # padded batch rows for the MLP (sublane multiple)
_K1_PAD = 8192                 # fc1 input dim 7744 -> 64*128 (tileable)
_K1_TILE = 1024                # fc1 contraction tile (8 pipelined grid steps)
_NUM_CLASSES = 12
_VMEM_LIMIT = 32 * 1024 * 1024


# ----------------------------- Pallas kernels ------------------------------ #

def _conv_relu_pool_kernel(p_ref, w_ref, b_ref, o_ref):
    """Fused conv (im2col matmul) + 2x2 max-pool + bias + ReLU.

    p_ref : (4, tm, K) bf16  patch rows for the 4 positions of each pool window
                             (the 4 groups partition the un-pooled positions)
    w_ref : (K, 128)   bf16  flattened conv weight, rows ordered (kh, kw, cin),
                             output channels zero-padded to 128 lanes
    b_ref : (1, 128)   f32   zero-padded bias
    o_ref : (tm, 128)  bf16  pooled + activated rows (lane-dense store)
    """
    g, tm, k = p_ref.shape
    # Single long MXU push stream over all 4 pool positions (one dot, not four).
    y = jnp.dot(p_ref[...].reshape(g * tm, k), w_ref[...],
                preferred_element_type=jnp.float32)                  # (4*tm, 128) f32
    # 2x2 max-pool = elementwise max of the 4 row groups (static, aligned slices).
    y = jnp.maximum(jnp.maximum(y[:tm], y[tm:2 * tm]),
                    jnp.maximum(y[2 * tm:3 * tm], y[3 * tm:]))
    # Bias + ReLU once, after the max (monotone, so identical to pool(relu(conv+b))).
    y = jnp.maximum(y + b_ref[...], 0.0)
    o_ref[...] = y.astype(o_ref.dtype)


def _mlp_kernel(x_ref, w1_ref, b1_ref, w2_ref, b2_ref, w3_ref, b3_ref,
                o_ref, acc_ref):
    """fc1 (K-tiled, accumulated) -> relu -> fc2 -> relu -> fc3, fused at last step."""
    kk = pl.program_id(0)

    @pl.when(kk == 0)
    def _():
        acc_ref[...] = jnp.zeros_like(acc_ref)

    acc_ref[...] += jnp.dot(x_ref[...], w1_ref[...],
                            preferred_element_type=jnp.float32)

    @pl.when(kk == pl.num_programs(0) - 1)
    def _():
        h = jnp.maximum(acc_ref[...] + b1_ref[...], 0.0)
        h = jnp.maximum(
            jnp.dot(h, w2_ref[...], preferred_element_type=jnp.float32) + b2_ref[...],
            0.0)
        o_ref[...] = (jnp.dot(h, w3_ref[...], preferred_element_type=jnp.float32)
                      + b3_ref[...]).astype(o_ref.dtype)


# ------------------------------- JAX glue ---------------------------------- #

def _round_up(x, m):
    return (x + m - 1) // m * m


def _choose_row_tile(m, cap=512):
    """Pad-and-tile row tiling: tm is a multiple of 8, grid >= 2 whenever possible
    (v7x megacore), and we never fall back to a single whole-array block."""
    if m >= 2 * cap:
        tm = cap
    else:
        tm = max(8, _round_up((m + 1) // 2, 8))
    grid = (m + tm - 1) // tm
    return tm, grid, tm * grid


def conv_relu_pool(x_nhwc, w_mat, b_row, cout):
    """F.max_pool2d(F.relu(conv5x5(x)), 2); x NHWC bf16 -> (N, Hp, Wp, cout) bf16."""
    kh = kw = 5
    n, h, w, c = x_nhwc.shape
    ho, wo = h - kh + 1, w - kw + 1
    hp, wp = ho // 2, wo // 2
    k = kh * kw * c
    cp = w_mat.shape[1]            # 128 (lane-padded output channels)

    # Single un-pooled im2col tensor (bf16), column order (kh, kw, cin).
    # TODO(synk): build the 5x5 patches fully in-kernel from raw NHWC rows to also
    # remove the 25x im2col inflation in HBM (kept wrapper-side here for robustness).
    cols = [x_nhwc[:, i:i + ho, j:j + wo, :] for i in range(kh) for j in range(kw)]
    p = jnp.concatenate(cols, axis=-1)                         # (N, Ho, Wo, K)
    # Group the 4 pool positions on a leading axis; the 4 groups partition the
    # un-pooled positions (no duplication), so the kernel can do one matmul + max.
    p = p.reshape(n, hp, 2, wp, 2, k)
    p = jnp.transpose(p, (2, 4, 0, 1, 3, 5)).reshape(4, n * hp * wp, k)

    m = n * hp * wp
    tm, grid, mp = _choose_row_tile(m)
    if mp > m:
        p = jnp.pad(p, ((0, 0), (0, mp - m), (0, 0)))          # zero rows, sliced later

    flops = 2 * 4 * mp * k * cp
    bytes_accessed = 4 * mp * k * 2 + k * cp * 2 + cp * 4 + mp * cp * 2

    out = pl.pallas_call(
        _conv_relu_pool_kernel,
        out_shape=jax.ShapeDtypeStruct((mp, cp), jnp.bfloat16),
        grid=(grid,),
        in_specs=[
            pl.BlockSpec((4, tm, k), lambda i: (0, i, 0)),
            pl.BlockSpec((k, cp), lambda i: (0, 0)),
            pl.BlockSpec((1, cp), lambda i: (0, 0)),
        ],
        out_specs=pl.BlockSpec((tm, cp), lambda i: (i, 0)),
        compiler_params=pltpu.CompilerParams(
            dimension_semantics=("parallel",),
            vmem_limit_bytes=_VMEM_LIMIT),
        cost_estimate=pl.CostEstimate(flops=flops, transcendentals=0,
                                      bytes_accessed=bytes_accessed),
    )(p, w_mat, b_row)

    return out[:m, :cout].reshape(n, hp, wp, cout)


def mlp(x2d, params):
    """fc1 -> relu -> fc2 -> relu -> fc3 on (N, 7744) bf16 input; returns (N, 12) f32."""
    n, kin = x2d.shape
    xp = jnp.pad(x2d, ((0, _NP - n), (0, _K1_PAD - kin)))       # zero-padded rows/cols

    flops = 2 * _NP * _K1_PAD * _LANE + 2 * 2 * _NP * _LANE * _LANE
    bytes_accessed = (_NP * _K1_PAD + _K1_PAD * _LANE) * 2 \
        + 2 * _LANE * _LANE * 4 + 3 * _LANE * 4 + _NP * _LANE * 4

    out = pl.pallas_call(
        _mlp_kernel,
        out_shape=jax.ShapeDtypeStruct((_NP, _LANE), jnp.float32),
        grid=(_K1_PAD // _K1_TILE,),
        in_specs=[
            pl.BlockSpec((_NP, _K1_TILE), lambda kk: (0, kk)),
            pl.BlockSpec((_K1_TILE, _LANE), lambda kk: (kk, 0)),
            pl.BlockSpec((1, _LANE), lambda kk: (0, 0)),
            pl.BlockSpec((_LANE, _LANE), lambda kk: (0, 0)),
            pl.BlockSpec((1, _LANE), lambda kk: (0, 0)),
            pl.BlockSpec((_LANE, _LANE), lambda kk: (0, 0)),
            pl.BlockSpec((1, _LANE), lambda kk: (0, 0)),
        ],
        out_specs=pl.BlockSpec((_NP, _LANE), lambda kk: (0, 0)),
        scratch_shapes=[pltpu.VMEM((_NP, _LANE), jnp.float32)],
        compiler_params=pltpu.CompilerParams(
            dimension_semantics=("arbitrary",),
            vmem_limit_bytes=_VMEM_LIMIT),
        cost_estimate=pl.CostEstimate(flops=flops, transcendentals=0,
                                      bytes_accessed=bytes_accessed),
    )(xp, params["fw1"], params["fb1"], params["fw2"], params["fb2"],
      params["fw3"], params["fb3"])

    return out[:n, :_NUM_CLASSES]


def seedling_forward(x_nchw, params):
    # NCHW -> NHWC once, cast the conv stack to bf16 (f32 accumulation in the dots).
    x = jnp.transpose(x_nchw, (0, 2, 3, 1)).astype(jnp.bfloat16)    # (N, 100, 100, 3)
    x = conv_relu_pool(x, params["cw1"], params["cb1"], cout=6)     # (N, 48, 48, 6)
    x = conv_relu_pool(x, params["cw2"], params["cb2"], cout=16)    # (N, 22, 22, 16)
    # NHWC flatten (free reshape); fw1 rows were permuted at init to match this order,
    # so no channel-major transpose is needed before the MLP.
    x = x.reshape(x.shape[0], -1)                                   # (N, 7744) bf16
    return mlp(x, params)                                           # (N, 12) f32


# --------------------------- deterministic init ----------------------------- #

def init_params(key):
    ks = jax.random.split(key, 10)

    def conv_w(k, cout, cin, kh, kw):
        fan_in = cin * kh * kw
        w = jax.random.normal(k, (cout, cin, kh, kw), jnp.float32) / jnp.sqrt(fan_in)
        # torch (cout,cin,kh,kw) -> rows ordered (kh,kw,cin), cols = cout,
        # zero-padded to 128 output lanes so conv stores are lane-dense.
        w = jnp.transpose(w, (2, 3, 1, 0)).reshape(kh * kw * cin, cout)
        return jnp.pad(w, ((0, 0), (0, _LANE - cout))).astype(jnp.bfloat16)

    def bias(k, fout):
        b = jax.random.normal(k, (fout,), jnp.float32) * 0.01
        return jnp.pad(b, (0, _LANE - fout)).reshape(1, _LANE)

    def fc1_w(k):
        # torch fc1 weight is (120, 16*22*22) with column order (c, h, w);
        # permute rows to the NHWC flatten order (h, w, c) and zero-pad to (8192, 128).
        fin = 16 * 22 * 22
        w = jax.random.normal(k, (120, 16, 22, 22), jnp.float32) / jnp.sqrt(fin)
        w = jnp.transpose(w, (2, 3, 1, 0)).reshape(fin, 120)
        return jnp.pad(w, ((0, _K1_PAD - fin), (0, _LANE - 120))).astype(jnp.bfloat16)

    def fc_w(k, fin, fout):
        w = jax.random.normal(k, (fin, fout), jnp.float32) / jnp.sqrt(fin)
        return jnp.pad(w, ((0, _LANE - fin), (0, _LANE - fout)))   # f32, 128x128

    return {
        "cw1": conv_w(ks[0], 6, 3, 5, 5),   "cb1": bias(ks[1], 6),
        "cw2": conv_w(ks[2], 16, 6, 5, 5),  "cb2": bias(ks[3], 16),
        "fw1": fc1_w(ks[4]),                "fb1": bias(ks[5], 120),
        "fw2": fc_w(ks[6], 120, 84),        "fb2": bias(ks[7], 84),
        "fw3": fc_w(ks[8], 84, 12),         "fb3": bias(ks[9], 12),
    }


if __name__ == "__main__":
    key = jax.random.PRNGKey(0)
    kx, kp = jax.random.split(key)
    # Spatial size is pinned to 100x100 by fc1.in_features = 16*22*22; small batch.
    x = jax.random.normal(kx, (2, 3, 100, 100), jnp.float32)
    params = init_params(kp)

    out = jax.jit(seedling_forward)(x, params)
    out = jax.block_until_ready(out)
    assert out.shape == (2, _NUM_CLASSES) and out.dtype == jnp.float32
    print("KERNEL_OK")
</pallas_src>

<mosaic_0001>
module attributes {stable_mosaic.version = 11 : i64} {
  func.func @_conv_relu_pool_kernel(%arg0: i32, %arg1: memref<4x512x75xbf16, #tpu.memory_space<vmem>>, %arg2: memref<75x128xbf16, #tpu.memory_space<vmem>>, %arg3: memref<1x128xf32, #tpu.memory_space<vmem>>, %arg4: memref<512x128xbf16, #tpu.memory_space<vmem>>) attributes {dimension_semantics = [#tpu.dimension_semantics<parallel>], iteration_bounds = array<i64: 9>, scalar_prefetch = 0 : i64, scratch_operands = 0 : i64, tpu.core_type = #tpu.core_type<tc>, window_params = [{transform_indices = @transform_0, window_bounds = array<i64: 4, 512, 75>}, {pipeline_mode = #tpu.pipeline_mode<synchronous>, transform_indices = @transform_1, window_bounds = array<i64: 75, 128>}, {pipeline_mode = #tpu.pipeline_mode<synchronous>, transform_indices = @transform_2, window_bounds = array<i64: 1, 128>}, {transform_indices = @transform_3, window_bounds = array<i64: 512, 128>}]} {
    %c0 = arith.constant 0 : index
    %c0_0 = arith.constant 0 : index
    %c0_1 = arith.constant 0 : index
    %0 = vector.load %arg1[%c0, %c0_0, %c0_1] : memref<4x512x75xbf16, #tpu.memory_space<vmem>>, vector<4x512x75xbf16>
    %1 = vector.shape_cast %0 : vector<4x512x75xbf16> to vector<2048x75xbf16>
    %c0_2 = arith.constant 0 : index
    %c0_3 = arith.constant 0 : index
    %2 = vector.load %arg2[%c0_2, %c0_3] : memref<75x128xbf16, #tpu.memory_space<vmem>>, vector<75x128xbf16>
    %cst = arith.constant dense<0.000000e+00> : vector<2048x128xf32>
    %3 = tpu.matmul %1, %2, %cst {dimension_numbers = #tpu.dot_dimension_numbers<[1], [0], [0], [1], [0, 0, 1, 1], [], []>} : vector<2048x75xbf16>, vector<75x128xbf16>, vector<2048x128xf32> -> vector<2048x128xf32>
    %4 = vector.extract_strided_slice %3 {offsets = [0, 0], sizes = [512, 128], strides = [1, 1]} : vector<2048x128xf32> to vector<512x128xf32>
    %5 = vector.extract_strided_slice %3 {offsets = [512, 0], sizes = [512, 128], strides = [1, 1]} : vector<2048x128xf32> to vector<512x128xf32>
    %6 = arith.maximumf %4, %5 : vector<512x128xf32>
    %7 = vector.extract_strided_slice %3 {offsets = [1024, 0], sizes = [512, 128], strides = [1, 1]} : vector<2048x128xf32> to vector<512x128xf32>
    %8 = vector.extract_strided_slice %3 {offsets = [1536, 0], sizes = [512, 128], strides = [1, 1]} : vector<2048x128xf32> to vector<512x128xf32>
    %9 = arith.maximumf %7, %8 : vector<512x128xf32>
    %10 = arith.maximumf %6, %9 : vector<512x128xf32>
    %c0_4 = arith.constant 0 : index
    %c0_5 = arith.constant 0 : index
    %11 = vector.load %arg3[%c0_4, %c0_5] : memref<1x128xf32, #tpu.memory_space<vmem>>, vector<1x128xf32>
    %12 = vector.broadcast %11 : vector<1x128xf32> to vector<512x128xf32>
    %13 = arith.addf %10, %12 : vector<512x128xf32>
    %cst_6 = arith.constant 0.000000e+00 : f32
    %14 = vector.broadcast %cst_6 : f32 to vector<512x128xf32>
    %15 = arith.maximumf %13, %14 : vector<512x128xf32>
    %16 = arith.truncf %15 : vector<512x128xf32> to vector<512x128xbf16>
    %c0_7 = arith.constant 0 : index
    %c0_8 = arith.constant 0 : index
    %17 = vector.load %arg4[%c0_7, %c0_8] : memref<512x128xbf16, #tpu.memory_space<vmem>>, vector<512x128xbf16>
    tpu.vector_store %arg4[%c0_7, %c0_8], %16 {strides = array<i32>} : memref<512x128xbf16, #tpu.memory_space<vmem>>, vector<512x128xbf16>,
    return
  }
  func.func @transform_0(%arg0: i32) -> (i32, i32, i32) {
    %c0_i32 = arith.constant 0 : i32
    %c0_i32_0 = arith.constant 0 : i32
    %c0_i32_1 = arith.constant 0 : i32
    return %c0_i32, %arg0, %c0_i32_0 : i32, i32, i32
  }
  func.func @transform_1(%arg0: i32) -> (i32, i32) {
    %c0_i32 = arith.constant 0 : i32
    %c0_i32_0 = arith.constant 0 : i32
    %c0_i32_1 = arith.constant 0 : i32
    return %c0_i32, %c0_i32_0 : i32, i32
  }
  func.func @transform_2(%arg0: i32) -> (i32, i32) {
    %c0_i32 = arith.constant 0 : i32
    %c0_i32_0 = arith.constant 0 : i32
    %c0_i32_1 = arith.constant 0 : i32
    return %c0_i32, %c0_i32_0 : i32, i32
  }
  func.func @transform_3(%arg0: i32) -> (i32, i32) {
    %c0_i32 = arith.constant 0 : i32
    %c0_i32_0 = arith.constant 0 : i32
    return %arg0, %c0_i32 : i32, i32
  }
}

module attributes {stable_mosaic.version = 11 : i64} {
  func.func @_conv_relu_pool_kernel(%arg0: i32, %arg1: memref<4x488x150xbf16, #tpu.memory_space<vmem>>, %arg2: memref<150x128xbf16, #tpu.memory_space<vmem>>, %arg3: memref<1x128xf32, #tpu.memory_space<vmem>>, %arg4: memref<488x128xbf16, #tpu.memory_space<vmem>>) attributes {dimension_semantics = [#tpu.dimension_semantics<parallel>], iteration_bounds = array<i64: 2>, scalar_prefetch = 0 : i64, scratch_operands = 0 : i64, tpu.core_type = #tpu.core_type<tc>, window_params = [{transform_indices = @transform_0, window_bounds = array<i64: 4, 488, 150>}, {pipeline_mode = #tpu.pipeline_mode<synchronous>, transform_indices = @transform_1, window_bounds = array<i64: 150, 128>}, {pipeline_mode = #tpu.pipeline_mode<synchronous>, transform_indices = @transform_2, window_bounds = array<i64: 1, 128>}, {transform_indices = @transform_3, window_bounds = array<i64: 488, 128>}]} {
    %c0 = arith.constant 0 : index
    %c0_0 = arith.constant 0 : index
    %c0_1 = arith.constant 0 : index
    %0 = vector.load %arg1[%c0, %c0_0, %c0_1] : memref<4x488x150xbf16, #tpu.memory_space<vmem>>, vector<4x488x150xbf16>
    %1 = vector.shape_cast %0 : vector<4x488x150xbf16> to vector<1952x150xbf16>
    %c0_2 = arith.constant 0 : index
    %c0_3 = arith.constant 0 : index
    %2 = vector.load %arg2[%c0_2, %c0_3] : memref<150x128xbf16, #tpu.memory_space<vmem>>, vector<150x128xbf16>
    %cst = arith.constant dense<0.000000e+00> : vector<1952x128xf32>
    %3 = tpu.matmul %1, %2, %cst {dimension_numbers = #tpu.dot_dimension_numbers<[1], [0], [0], [1], [0, 0, 1, 1], [], []>} : vector<1952x150xbf16>, vector<150x128xbf16>, vector<1952x128xf32> -> vector<1952x128xf32>
    %4 = vector.extract_strided_slice %3 {offsets = [0, 0], sizes = [488, 128], strides = [1, 1]} : vector<1952x128xf32> to vector<488x128xf32>
    %5 = vector.extract_strided_slice %3 {offsets = [488, 0], sizes = [488, 128], strides = [1, 1]} : vector<1952x128xf32> to vector<488x128xf32>
    %6 = arith.maximumf %4, %5 : vector<488x128xf32>
    %7 = vector.extract_strided_slice %3 {offsets = [976, 0], sizes = [488, 128], strides = [1, 1]} : vector<1952x128xf32> to vector<488x128xf32>
    %8 = vector.extract_strided_slice %3 {offsets = [1464, 0], sizes = [488, 128], strides = [1, 1]} : vector<1952x128xf32> to vector<488x128xf32>
    %9 = arith.maximumf %7, %8 : vector<488x128xf32>
    %10 = arith.maximumf %6, %9 : vector<488x128xf32>
    %c0_4 = arith.constant 0 : index
    %c0_5 = arith.constant 0 : index
    %11 = vector.load %arg3[%c0_4, %c0_5] : memref<1x128xf32, #tpu.memory_space<vmem>>, vector<1x128xf32>
    %12 = vector.broadcast %11 : vector<1x128xf32> to vector<488x128xf32>
    %13 = arith.addf %10, %12 : vector<488x128xf32>
    %cst_6 = arith.constant 0.000000e+00 : f32
    %14 = vector.broadcast %cst_6 : f32 to vector<488x128xf32>
    %15 = arith.maximumf %13, %14 : vector<488x128xf32>
    %16 = arith.truncf %15 : vector<488x128xf32> to vector<488x128xbf16>
    %c0_7 = arith.constant 0 : index
    %c0_8 = arith.constant 0 : index
    %17 = vector.load %arg4[%c0_7, %c0_8] : memref<488x128xbf16, #tpu.memory_space<vmem>>, vector<488x128xbf16>
    tpu.vector_store %arg4[%c0_7, %c0_8], %16 {strides = array<i32>} : memref<488x128xbf16, #tpu.memory_space<vmem>>, vector<488x128xbf16>,
    return
  }
  func.func @transform_0(%arg0: i32) -> (i32, i32, i32) {
    %c0_i32 = arith.constant 0 : i32
    %c0_i32_0 = arith.constant 0 : i32
    %c0_i32_1 = arith.constant 0 : i32
    return %c0_i32, %arg0, %c0_i32_0 : i32, i32, i32
  }
  func.func @transform_1(%arg0: i32) -> (i32, i32) {
    %c0_i32 = arith.constant 0 : i32
    %c0_i32_0 = arith.constant 0 : i32
    %c0_i32_1 = arith.constant 0 : i32
    return %c0_i32, %c0_i32_0 : i32, i32
  }
  func.func @transform_2(%arg0: i32) -> (i32, i32) {
    %c0_i32 = arith.constant 0 : i32
    %c0_i32_0 = arith.constant 0 : i32
    %c0_i32_1 = arith.constant 0 : i32
    return %c0_i32, %c0_i32_0 : i32, i32
  }
  func.func @transform_3(%arg0: i32) -> (i32, i32) {
    %c0_i32 = arith.constant 0 : i32
    %c0_i32_0 = arith.constant 0 : i32
    return %arg0, %c0_i32 : i32, i32
  }
}

module attributes {stable_mosaic.version = 11 : i64} {
  func.func @_mlp_kernel(%arg0: i32, %arg1: memref<8x1024xbf16, #tpu.memory_space<vmem>>, %arg2: memref<1024x128xbf16, #tpu.memory_space<vmem>>, %arg3: memref<1x128xf32, #tpu.memory_space<vmem>>, %arg4: memref<128x128xf32, #tpu.memory_space<vmem>>, %arg5: memref<1x128xf32, #tpu.memory_space<vmem>>, %arg6: memref<128x128xf32, #tpu.memory_space<vmem>>, %arg7: memref<1x128xf32, #tpu.memory_space<vmem>>, %arg8: memref<8x128xf32, #tpu.memory_space<vmem>>, %arg9: memref<8x128xf32, #tpu.memory_space<vmem>>) attributes {dimension_semantics = [#tpu.dimension_semantics<arbitrary>], iteration_bounds = array<i64: 8>, scalar_prefetch = 0 : i64, scratch_operands = 1 : i64, tpu.core_type = #tpu.core_type<tc>, window_params = [{transform_indices = @transform_0, window_bounds = array<i64: 8, 1024>}, {transform_indices = @transform_1, window_bounds = array<i64: 1024, 128>}, {pipeline_mode = #tpu.pipeline_mode<synchronous>, transform_indices = @transform_2, window_bounds = array<i64: 1, 128>}, {pipeline_mode = #tpu.pipeline_mode<synchronous>, transform_indices = @transform_3, window_bounds = array<i64: 128, 128>}, {pipeline_mode = #tpu.pipeline_mode<synchronous>, transform_indices = @transform_4, window_bounds = array<i64: 1, 128>}, {pipeline_mode = #tpu.pipeline_mode<synchronous>, transform_indices = @transform_5, window_bounds = array<i64: 128, 128>}, {pipeline_mode = #tpu.pipeline_mode<synchronous>, transform_indices = @transform_6, window_bounds = array<i64: 1, 128>}, {pipeline_mode = #tpu.pipeline_mode<synchronous>, transform_indices = @transform_7, window_bounds = array<i64: 8, 128>}]} {
    %c0_i32 = arith.constant 0 : i32
    %0 = arith.cmpi eq, %arg0, %c0_i32 : i32
    %1 = arith.extui %0 : i1 to i32
    %c0_i32_0 = arith.constant 0 : i32
    %2 = arith.cmpi ne, %1, %c0_i32_0 : i32
    scf.if %2 {
      %cst_9 = arith.constant 0.000000e+00 : f32
      %12 = vector.broadcast %cst_9 : f32 to vector<8x128xf32>
      %c0_10 = arith.constant 0 : index
      %c0_11 = arith.constant 0 : index
      %13 = vector.load %arg9[%c0_10, %c0_11] : memref<8x128xf32, #tpu.memory_space<vmem>>, vector<8x128xf32>
      tpu.vector_store %arg9[%c0_10, %c0_11], %12 {strides = array<i32>} : memref<8x128xf32, #tpu.memory_space<vmem>>, vector<8x128xf32>,
    } else {
    }
    %c0 = arith.constant 0 : index
    %c0_1 = arith.constant 0 : index
    %3 = vector.load %arg9[%c0, %c0_1] : memref<8x128xf32, #tpu.memory_space<vmem>>, vector<8x128xf32>
    %c0_2 = arith.constant 0 : index
    %c0_3 = arith.constant 0 : index
    %4 = vector.load %arg1[%c0_2, %c0_3] : memref<8x1024xbf16, #tpu.memory_space<vmem>>, vector<8x1024xbf16>
    %c0_4 = arith.constant 0 : index
    %c0_5 = arith.constant 0 : index
    %5 = vector.load %arg2[%c0_4, %c0_5] : memref<1024x128xbf16, #tpu.memory_space<vmem>>, vector<1024x128xbf16>
    %cst = arith.constant dense<0.000000e+00> : vector<8x128xf32>
    %6 = tpu.matmul %4, %5, %cst {dimension_numbers = #tpu.dot_dimension_numbers<[1], [0], [0], [1], [0, 0, 1, 1], [], []>} : vector<8x1024xbf16>, vector<1024x128xbf16>, vector<8x128xf32> -> vector<8x128xf32>
    %7 = arith.addf %3, %6 : vector<8x128xf32>
    %c0_6 = arith.constant 0 : index
    %c0_7 = arith.constant 0 : index
    %8 = vector.load %arg9[%c0_6, %c0_7] : memref<8x128xf32, #tpu.memory_space<vmem>>, vector<8x128xf32>
    tpu.vector_store %arg9[%c0_6, %c0_7], %7 {strides = array<i32>} : memref<8x128xf32, #tpu.memory_space<vmem>>, vector<8x128xf32>,
    %c7_i32 = arith.constant 7 : i32
    %9 = arith.cmpi eq, %arg0, %c7_i32 : i32
    %10 = arith.extui %9 : i1 to i32
    %c0_i32_8 = arith.constant 0 : i32
    %11 = arith.cmpi ne, %10, %c0_i32_8 : i32
    scf.if %11 {
      %c0_9 = arith.constant 0 : index
      %c0_10 = arith.constant 0 : index
      %12 = vector.load %arg9[%c0_9, %c0_10] : memref<8x128xf32, #tpu.memory_space<vmem>>, vector<8x128xf32>
      %c0_11 = arith.constant 0 : index
      %c0_12 = arith.constant 0 : index
      %13 = vector.load %arg3[%c0_11, %c0_12] : memref<1x128xf32, #tpu.memory_space<vmem>>, vector<1x128xf32>
      %14 = vector.broadcast %13 : vector<1x128xf32> to vector<8x128xf32>
      %15 = arith.addf %12, %14 : vector<8x128xf32>
      %cst_13 = arith.constant 0.000000e+00 : f32
      %16 = vector.broadcast %cst_13 : f32 to vector<8x128xf32>
      %17 = arith.maximumf %15, %16 : vector<8x128xf32>
      %c0_14 = arith.constant 0 : index
      %c0_15 = arith.constant 0 : index
      %18 = vector.load %arg4[%c0_14, %c0_15] : memref<128x128xf32, #tpu.memory_space<vmem>>, vector<128x128xf32>
      %cst_16 = arith.constant dense<0.000000e+00> : vector<8x128xf32>
      %19 = tpu.matmul %17, %18, %cst_16 {dimension_numbers = #tpu.dot_dimension_numbers<[1], [0], [0], [1], [0, 0, 1, 1], [], []>} : vector<8x128xf32>, vector<128x128xf32>, vector<8x128xf32> -> vector<8x128xf32>
      %c0_17 = arith.constant 0 : index
      %c0_18 = arith.constant 0 : index
      %20 = vector.load %arg5[%c0_17, %c0_18] : memref<1x128xf32, #tpu.memory_space<vmem>>, vector<1x128xf32>
      %21 = vector.broadcast %20 : vector<1x128xf32> to vector<8x128xf32>
      %22 = arith.addf %19, %21 : vector<8x128xf32>
      %cst_19 = arith.constant 0.000000e+00 : f32
      %23 = vector.broadcast %cst_19 : f32 to vector<8x128xf32>
      %24 = arith.maximumf %22, %23 : vector<8x128xf32>
      %c0_20 = arith.constant 0 : index
      %c0_21 = arith.constant 0 : index
      %25 = vector.load %arg6[%c0_20, %c0_21] : memref<128x128xf32, #tpu.memory_space<vmem>>, vector<128x128xf32>
      %cst_22 = arith.constant dense<0.000000e+00> : vector<8x128xf32>
      %26 = tpu.matmul %24, %25, %cst_22 {dimension_numbers = #tpu.dot_dimension_numbers<[1], [0], [0], [1], [0, 0, 1, 1], [], []>} : vector<8x128xf32>, vector<128x128xf32>, vector<8x128xf32> -> vector<8x128xf32>
      %c0_23 = arith.constant 0 : index
      %c0_24 = arith.constant 0 : index
      %27 = vector.load %arg7[%c0_23, %c0_24] : memref<1x128xf32, #tpu.memory_space<vmem>>, vector<1x128xf32>
      %28 = vector.broadcast %27 : vector<1x128xf32> to vector<8x128xf32>
      %29 = arith.addf %26, %28 : vector<8x128xf32>
      %c0_25 = arith.constant 0 : index
      %c0_26 = arith.constant 0 : index
      %30 = vector.load %arg8[%c0_25, %c0_26] : memref<8x128xf32, #tpu.memory_space<vmem>>, vector<8x128xf32>
      tpu.vector_store %arg8[%c0_25, %c0_26], %29 {strides = array<i32>} : memref<8x128xf32, #tpu.memory_space<vmem>>, vector<8x128xf32>,
    } else {
    }
    return
  }
  func.func @transform_0(%arg0: i32) -> (i32, i32) {
    %c0_i32 = arith.constant 0 : i32
    %c0_i32_0 = arith.constant 0 : i32
    return %c0_i32, %arg0 : i32, i32
  }
  func.func @transform_1(%arg0: i32) -> (i32, i32) {
    %c0_i32 = arith.constant 0 : i32
    %c0_i32_0 = arith.constant 0 : i32
    return %arg0, %c0_i32 : i32, i32
  }
  func.func @transform_2(%arg0: i32) -> (i32, i32) {
    %c0_i32 = arith.constant 0 : i32
    %c0_i32_0 = arith.constant 0 : i32
    %c0_i32_1 = arith.constant 0 : i32
    return %c0_i32, %c0_i32_0 : i32, i32
  }
  func.func @transform_3(%arg0: i32) -> (i32, i32) {
    %c0_i32 = arith.constant 0 : i32
    %c0_i32_0 = arith.constant 0 : i32
    %c0_i32_1 = arith.constant 0 : i32
    return %c0_i32, %c0_i32_0 : i32, i32
  }
  func.func @transform_4(%arg0: i32) -> (i32, i32) {
    %c0_i32 = arith.constant 0 : i32
    %c0_i32_0 = arith.constant 0 : i32
    %c0_i32_1 = arith.constant 0 : i32
    return %c0_i32, %c0_i32_0 : i32, i32
  }
  func.func @transform_5(%arg0: i32) -> (i32, i32) {
    %c0_i32 = arith.constant 0 : i32
    %c0_i32_0 = arith.constant 0 : i32
    %c0_i32_1 = arith.constant 0 : i32
    return %c0_i32, %c0_i32_0 : i32, i32
  }
  func.func @transform_6(%arg0: i32) -> (i32, i32) {
    %c0_i32 = arith.constant 0 : i32
    %c0_i32_0 = arith.constant 0 : i32
    %c0_i32_1 = arith.constant 0 : i32
    return %c0_i32, %c0_i32_0 : i32, i32
  }
  func.func @transform_7(%arg0: i32) -> (i32, i32) {
    %c0_i32 = arith.constant 0 : i32
    %c0_i32_0 = arith.constant 0 : i32
    %c0_i32_1 = arith.constant 0 : i32
    return %c0_i32, %c0_i32_0 : i32, i32
  }
}

</mosaic_0001>

<bundles_post_ra>
// kernel: seedling_forward.3
= control target key start
LH: loop header
LB: loop body
LE: loop exit
PB: predicated region body
PF: predicated region fallthrough
CT: control target
= control target key end

     0   :  { %s5536_s12 = smov 0   ;;  %s5538_s13 = smov 0   ;;  %s6609_s0 = inlined_call_operand.vmem [shape: bf16[4,4608,75], index: 0, kind: input, shape index: {}]   ;;  %s6610_s1 = inlined_call_operand.vmem [shape: bf16[75,128], index: 1, kind: input, shape index: {}]   ;;  %s6611_s2 = inlined_call_operand.vmem [shape: f32[1,128], index: 2, kind: input, shape index: {}]   ;;  %s6612_s3 = inlined_call_operand.vmem [shape: bf16[4608,128], index: 3, kind: output, shape index: {}]  }
   0x1   :  { %s5540_s14 = smov 0  }
   0x2 LB: > { %s4329_s15 = sadd.s32 4294967295, %s5513_s14   ;;  %s5553_s16 = sadd.s32 1, %s5513_s14   ;;  %s5513_s14 = sphi %s5540_s14, %s6773_s14   ;;  %s5509_s13 = sphi %s5538_s13, %s6772_s13   ;;  %s5505_s12 = sphi %s5536_s12, %s6771_s12  }
   0x3   : > { %s17_s17 = ssub.s32 %s5513_s14, %s5553_s16  ;;  %s20_s18 = sadd.s32 1, %s5509_s13 }
   0x4   : > { %p18_p0 = scmp.eq.s32.totalorder %s17_s17, 0  ;;  %p27_p1 = scmp.ne.s32.totalorder %s5509_s13, %s5505_s12 }
   0x5   : > { %p28_p2 = scmp.eq.s32.totalorder %s5513_s14, 0  ;;  %p4332_p4 = scmp.ge.s32.totalorder %s5513_s14, 9 }
   0x6   : > { %s5562_s19 = scalar_select %p18_p0, %s5509_s13, %s20_s18  }
   0x7   : > { %p29_p3 = por %p28_p2, %p27_p1  ;;  %127 = sbr.rel (%p4332_p4) target bundleno = 82 (0x52), region = 24 }
   0xe   : > { %130 = sbr.rel (!%p29_p3) target bundleno = 82 (0x52), region = 28  ;;  %s132_s20 = sand.u32 (%p29_p3), 1, %s5509_s13  }
   0xf   : > { %s4668_s21 = sshll.u32 (%p29_p3), %s5513_s14, 8  ;;  %s4333_s22 = sshll.u32 (%p29_p3), %s132_s20, 10 }
  0x10   : > { %s5570_s25 = scalar_lea.vmem (%p29_p3), %s6609_s0, %s4668_s21  ;;  %s5575_s26 = scalar_lea.vmem (%p29_p3), [#allocation2], %s4333_s22 }
  0x11   : > { %v153_v0 = vld [vmem:[%s5570_s25] sm:$0xff] (%p29_p3)   ;;  %v157_v1 = vld [vmem:[%s5570_s25 + $0x8] sm:$0xff] (%p29_p3)   ;;  %v161_v2 = vld [vmem:[%s5570_s25 + $0x10] sm:$0xff] (%p29_p3)  }
  0x12   : > { %154 = vst [vmem:[%s5575_s26] sm:$0xff] (%p29_p3), %v153_v0   ;;  %158 = vst [vmem:[%s5575_s26 + $0x8] sm:$0xff] (%p29_p3), %v157_v1   ;;  %v165_v3 = vld [vmem:[%s5570_s25 + $0x18] sm:$0xff] (%p29_p3)   ;;  %v169_v4 = vld [vmem:[%s5570_s25 + $0x20] sm:$0xff] (%p29_p3)  }
  0x13   : > { %162 = vst [vmem:[%s5575_s26 + $0x10] sm:$0xff] (%p29_p3), %v161_v2   ;;  %v173_v5 = vld [vmem:[%s5570_s25 + $0x28] sm:$0xff] (%p29_p3)   ;;  %166 = vst [vmem:[%s5575_s26 + $0x18] sm:$0xff] (%p29_p3), %v165_v3   ;;  %v177_v6 = vld [vmem:[%s5570_s25 + $0x30] sm:$0xff] (%p29_p3)  }
  0x14   : > { %170 = vst [vmem:[%s5575_s26 + $0x20] sm:$0xff] (%p29_p3), %v169_v4   ;;  %174 = vst [vmem:[%s5575_s26 + $0x28] sm:$0xff] (%p29_p3), %v173_v5   ;;  %v181_v7 = vld [vmem:[%s5570_s25 + $0x38] sm:$0xff] (%p29_p3)   ;;  %v185_v8 = vld [vmem:[%s5570_s25 + $0x40] sm:$0xff] (%p29_p3)  }
  0x15   : > { %178 = vst [vmem:[%s5575_s26 + $0x30] sm:$0xff] %v177_v6   ;;  %182 = vst [vmem:[%s5575_s26 + $0x38] sm:$0xff] %v181_v7   ;;  %v189_v9 = vld [vmem:[%s5570_s25 + $0x48] sm:$0xff]   ;;  %v193_v10 = vld [vmem:[%s5570_s25 + $0x50] sm:$0xff]  }
  0x16   : > { %186 = vst [vmem:[%s5575_s26 + $0x40] sm:$0xff] %v185_v8   ;;  %v197_v11 = vld [vmem:[%s5570_s25 + $0x58] sm:$0xff]   ;;  %190 = vst [vmem:[%s5575_s26 + $0x48] sm:$0xff] %v189_v9   ;;  %v201_v12 = vld [vmem:[%s5570_s25 + $0x60] sm:$0xff]  }
  0x17   : > { %194 = vst [vmem:[%s5575_s26 + $0x50] sm:$0xff] %v193_v10   ;;  %198 = vst [vmem:[%s5575_s26 + $0x58] sm:$0xff] %v197_v11   ;;  %v205_v13 = vld [vmem:[%s5570_s25 + $0x68] sm:$0xff]   ;;  %v209_v14 = vld [vmem:[%s5570_s25 + $0x70] sm:$0xff]  }
  0x18   : > { %202 = vst [vmem:[%s5575_s26 + $0x60] sm:$0xff] %v201_v12   ;;  %206 = vst [vmem:[%s5575_s26 + $0x68] sm:$0xff] %v205_v13   ;;  %v213_v15 = vld [vmem:[%s5570_s25 + $0x78] sm:$0xff]   ;;  %v217_v16 = vld [vmem:[%s5570_s25 + $0x80] sm:$0xff]  }
  0x19   : > { %210 = vst [vmem:[%s5575_s26 + $0x70] sm:$0xff] %v209_v14   ;;  %v221_v17 = vld [vmem:[%s5570_s25 + $0x88] sm:$0xff]   ;;  %214 = vst [vmem:[%s5575_s26 + $0x78] sm:$0xff] %v213_v15   ;;  %v225_v18 = vld [vmem:[%s5570_s25 + $0x90] sm:$0xff]  }
  0x1a   : > { %218 = vst [vmem:[%s5575_s26 + $0x80] sm:$0xff] %v217_v16   ;;  %222 = vst [vmem:[%s5575_s26 + $0x88] sm:$0xff] %v221_v17   ;;  %v229_v19 = vld [vmem:[%s5570_s25 + $0x98] sm:$0xff]   ;;  %v233_v20 = vld [vmem:[%s5570_s25 + $0xa0] sm:$0xff]  }
  0x1b   : > { %226 = vst [vmem:[%s5575_s26 + $0x90] sm:$0xff] %v225_v18   ;;  %230 = vst [vmem:[%s5575_s26 + $0x98] sm:$0xff] %v229_v19   ;;  %v237_v21 = vld [vmem:[%s5570_s25 + $0xa8] sm:$0xff]   ;;  %v241_v22 = vld [vmem:[%s5570_s25 + $0xb0] sm:$0xff]  }
  0x1c   : > { %234 = vst [vmem:[%s5575_s26 + $0xa0] sm:$0xff] %v233_v20   ;;  %v245_v23 = vld [vmem:[%s5570_s25 + $0xb8] sm:$0xff]   ;;  %238 = vst [vmem:[%s5575_s26 + $0xa8] sm:$0xff] %v237_v21   ;;  %v249_v24 = vld [vmem:[%s5570_s25 + $0xc0] sm:$0xff]  }
  0x1d   : > { %242 = vst [vmem:[%s5575_s26 + $0xb0] sm:$0xff] %v241_v22   ;;  %246 = vst [vmem:[%s5575_s26 + $0xb8] sm:$0xff] %v245_v23   ;;  %v253_v25 = vld [vmem:[%s5570_s25 + $0xc8] sm:$0xff]   ;;  %v257_v26 = vld [vmem:[%s5570_s25 + $0xd0] sm:$0xff]  }
  0x1e   : > { %250 = vst [vmem:[%s5575_s26 + $0xc0] sm:$0xff] %v249_v24   ;;  %254 = vst [vmem:[%s5575_s26 + $0xc8] sm:$0xff] %v253_v25   ;;  %v261_v27 = vld [vmem:[%s5570_s25 + $0xd8] sm:$0xff]   ;;  %v265_v28 = vld [vmem:[%s5570_s25 + $0xe0] sm:$0xff]  }
  0x1f   : > { %258 = vst [vmem:[%s5575_s26 + $0xd0] sm:$0xff] %v257_v26   ;;  %v269_v29 = vld [vmem:[%s5570_s25 + $0xe8] sm:$0xff]   ;;  %262 = vst [vmem:[%s5575_s26 + $0xd8] sm:$0xff] %v261_v27   ;;  %v273_v30 = vld [vmem:[%s5570_s25 + $0xf0] sm:$0xff]  }
  0x20   : > { %266 = vst [vmem:[%s5575_s26 + $0xe0] sm:$0xff] %v265_v28   ;;  %270 = vst [vmem:[%s5575_s26 + $0xe8] sm:$0xff] %v269_v29   ;;  %v277_v31 = vld [vmem:[%s5570_s25 + $0xf8] sm:$0xff]   ;;  %v281_v32 = vld [vmem:[%s5570_s25 + $0x900] sm:$0xff]  }
  0x21   : > { %274 = vst [vmem:[%s5575_s26 + $0xf0] sm:$0xff] %v273_v30   ;;  %278 = vst [vmem:[%s5575_s26 + $0xf8] sm:$0xff] %v277_v31   ;;  %v285_v33 = vld [vmem:[%s5570_s25 + $0x908] sm:$0xff]   ;;  %v289_v34 = vld [vmem:[%s5570_s25 + $0x910] sm:$0xff]  }
  0x22   : > { %282 = vst [vmem:[%s5575_s26 + $0x100] sm:$0xff] %v281_v32   ;;  %v293_v35 = vld [vmem:[%s5570_s25 + $0x918] sm:$0xff]   ;;  %286 = vst [vmem:[%s5575_s26 + $0x108] sm:$0xff] %v285_v33   ;;  %v297_v36 = vld [vmem:[%s5570_s25 + $0x920] sm:$0xff]  }
  0x23   : > { %290 = vst [vmem:[%s5575_s26 + $0x110] sm:$0xff] %v289_v34   ;;  %294 = vst [vmem:[%s5575_s26 + $0x118] sm:$0xff] %v293_v35   ;;  %v301_v37 = vld [vmem:[%s5570_s25 + $0x928] sm:$0xff]   ;;  %v305_v38 = vld [vmem:[%s5570_s25 + $0x930] sm:$0xff]  }
  0x24   : > { %298 = vst [vmem:[%s5575_s26 + $0x120] sm:$0xff] %v297_v36   ;;  %302 = vst [vmem:[%s5575_s26 + $0x128] sm:$0xff] %v301_v37   ;;  %v309_v39 = vld [vmem:[%s5570_s25 + $0x938] sm:$0xff]   ;;  %v313_v40 = vld [vmem:[%s5570_s25 + $0x940] sm:$0xff]  }
  0x25   : > { %306 = vst [vmem:[%s5575_s26 + $0x130] sm:$0xff] %v305_v38   ;;  %v317_v41 = vld [vmem:[%s5570_s25 + $0x948] sm:$0xff]   ;;  %310 = vst [vmem:[%s5575_s26 + $0x138] sm:$0xff] %v309_v39   ;;  %v321_v42 = vld [vmem:[%s5570_s25 + $0x950] sm:$0xff]  }
  0x26   : > { %314 = vst [vmem:[%s5575_s26 + $0x140] sm:$0xff] %v313_v40   ;;  %318 = vst [vmem:[%s5575_s26 + $0x148] sm:$0xff] %v317_v41   ;;  %v325_v43 = vld [vmem:[%s5570_s25 + $0x958] sm:$0xff]   ;;  %v329_v44 = vld [vmem:[%s5570_s25 + $0x960] sm:$0xff]  }
  0x27   : > { %322 = vst [vmem:[%s5575_s26 + $0x150] sm:$0xff] %v321_v42   ;;  %326 = vst [vmem:[%s5575_s26 + $0x158] sm:$0xff] %v325_v43   ;;  %v333_v45 = vld [vmem:[%s5570_s25 + $0x968] sm:$0xff]   ;;  %v337_v46 = vld [vmem:[%s5570_s25 + $0x970] sm:$0xff]  }
  0x28   : > { %330 = vst [vmem:[%s5575_s26 + $0x160] sm:$0xff] %v329_v44   ;;  %v341_v47 = vld [vmem:[%s5570_s25 + $0x978] sm:$0xff]   ;;  %334 = vst [vmem:[%s5575_s26 + $0x168] sm:$0xff] %v333_v45   ;;  %v345_v48 = vld [vmem:[%s5570_s25 + $0x980] sm:$0xff]  }
  0x29   : > { %338 = vst [vmem:[%s5575_s26 + $0x170] sm:$0xff] %v337_v46   ;;  %342 = vst [vmem:[%s5575_s26 + $0x178] sm:$0xff] %v341_v47   ;;  %v349_v49 = vld [vmem:[%s5570_s25 + $0x988] sm:$0xff]   ;;  %v353_v50 = vld [vmem:[%s5570_s25 + $0x990] sm:$0xff]  }
  0x2a   : > { %346 = vst [vmem:[%s5575_s26 + $0x180] sm:$0xff] %v345_v48   ;;  %350 = vst [vmem:[%s5575_s26 + $0x188] sm:$0xff] %v349_v49   ;;  %v357_v51 = vld [vmem:[%s5570_s25 + $0x998] sm:$0xff]   ;;  %v361_v52 = vld [vmem:[%s5570_s25 + $0x9a0] sm:$0xff]  }
  0x2b   : > { %354 = vst [vmem:[%s5575_s26 + $0x190] sm:$0xff] %v353_v50   ;;  %v365_v53 = vld [vmem:[%s5570_s25 + $0x9a8] sm:$0xff]   ;;  %358 = vst [vmem:[%s5575_s26 + $0x198] sm:$0xff] %v357_v51   ;;  %v369_v54 = vld [vmem:[%s5570_s25 + $0x9b0] sm:$0xff]  }
  0x2c   : > { %362 = vst [vmem:[%s5575_s26 + $0x1a0] sm:$0xff] %v361_v52   ;;  %366 = vst [vmem:[%s5575_s26 + $0x1a8] sm:$0xff] %v365_v53   ;;  %v373_v55 = vld [vmem:[%s5570_s25 + $0x9b8] sm:$0xff]   ;;  %v377_v56 = vld [vmem:[%s5570_s25 + $0x9c0] sm:$0xff]  }
  0x2d   : > { %370 = vst [vmem:[%s5575_s26 + $0x1b0] sm:$0xff] %v369_v54   ;;  %374 = vst [vmem:[%s5575_s26 + $0x1b8] sm:$0xff] %v373_v55   ;;  %v381_v57 = vld [vmem:[%s5570_s25 + $0x9c8] sm:$0xff]   ;;  %v385_v58 = vld [vmem:[%s5570_s25 + $0x9d0] sm:$0xff]  }
  0x2e   : > { %378 = vst [vmem:[%s5575_s26 + $0x1c0] sm:$0xff] %v377_v56   ;;  %v389_v59 = vld [vmem:[%s5570_s25 + $0x9d8] sm:$0xff]   ;;  %382 = vst [vmem:[%s5575_s26 + $0x1c8] sm:$0xff] %v381_v57   ;;  %v393_v60 = vld [vmem:[%s5570_s25 + $0x9e0] sm:$0xff]  }
  0x2f   : > { %386 = vst [vmem:[%s5575_s26 + $0x1d0] sm:$0xff] %v385_v58   ;;  %390 = vst [vmem:[%s5575_s26 + $0x1d8] sm:$0xff] %v389_v59   ;;  %v397_v61 = vld [vmem:[%s5570_s25 + $0x9e8] sm:$0xff]   ;;  %v401_v62 = vld [vmem:[%s5570_s25 + $0x9f0] sm:$0xff]  }
  0x30   : > { %394 = vst [vmem:[%s5575_s26 + $0x1e0] sm:$0xff] %v393_v60   ;;  %398 = vst [vmem:[%s5575_s26 + $0x1e8] sm:$0xff] %v397_v61   ;;  %v405_v63 = vld [vmem:[%s5570_s25 + $0x9f8] sm:$0xff]   ;;  %v409_v0 = vld [vmem:[%s5570_s25 + $0x1200] sm:$0xff]  }
  0x31   : > { %402 = vst [vmem:[%s5575_s26 + $0x1f0] sm:$0xff] %v401_v62   ;;  %v413_v1 = vld [vmem:[%s5570_s25 + $0x1208] sm:$0xff]   ;;  %406 = vst [vmem:[%s5575_s26 + $0x1f8] sm:$0xff] %v405_v63   ;;  %v417_v2 = vld [vmem:[%s5570_s25 + $0x1210] sm:$0xff]  }
  0x32   : > { %410 = vst [vmem:[%s5575_s26 + $0x200] sm:$0xff] %v409_v0   ;;  %414 = vst [vmem:[%s5575_s26 + $0x208] sm:$0xff] %v413_v1   ;;  %v421_v3 = vld [vmem:[%s5570_s25 + $0x1218] sm:$0xff]   ;;  %v425_v4 = vld [vmem:[%s5570_s25 + $0x1220] sm:$0xff]  }
  0x33   : > { %418 = vst [vmem:[%s5575_s26 + $0x210] sm:$0xff] %v417_v2   ;;  %422 = vst [vmem:[%s5575_s26 + $0x218] sm:$0xff] %v421_v3   ;;  %v429_v5 = vld [vmem:[%s5570_s25 + $0x1228] sm:$0xff]   ;;  %v433_v6 = vld [vmem:[%s5570_s25 + $0x1230] sm:$0xff]  }
  0x34   : > { %426 = vst [vmem:[%s5575_s26 + $0x220] sm:$0xff] %v425_v4   ;;  %v437_v7 = vld [vmem:[%s5570_s25 + $0x1238] sm:$0xff]   ;;  %430 = vst [vmem:[%s5575_s26 + $0x228] sm:$0xff] %v429_v5   ;;  %v441_v8 = vld [vmem:[%s5570_s25 + $0x1240] sm:$0xff]  }
  0x35   : > { %434 = vst [vmem:[%s5575_s26 + $0x230] sm:$0xff] %v433_v6   ;;  %438 = vst [vmem:[%s5575_s26 + $0x238] sm:$0xff] %v437_v7   ;;  %v445_v9 = vld [vmem:[%s5570_s25 + $0x1248] sm:$0xff]   ;;  %v449_v10 = vld [vmem:[%s5570_s25 + $0x1250] sm:$0xff]  }
  0x36   : > { %442 = vst [vmem:[%s5575_s26 + $0x240] sm:$0xff] %v441_v8   ;;  %446 = vst [vmem:[%s5575_s26 + $0x248] sm:$0xff] %v445_v9   ;;  %v453_v11 = vld [vmem:[%s5570_s25 + $0x1258] sm:$0xff]   ;;  %v457_v12 = vld [vmem:[%s5570_s25 + $0x1260] sm:$0xff]  }
  0x37   : > { %450 = vst [vmem:[%s5575_s26 + $0x250] sm:$0xff] %v449_v10   ;;  %v461_v13 = vld [vmem:[%s5570_s25 + $0x1268] sm:$0xff]   ;;  %454 = vst [vmem:[%s5575_s26 + $0x258] sm:$0xff] %v453_v11   ;;  %v465_v14 = vld [vmem:[%s5570_s25 + $0x1270] sm:$0xff]  }
  0x38   : > { %458 = vst [vmem:[%s5575_s26 + $0x260] sm:$0xff] %v457_v12   ;;  %462 = vst [vmem:[%s5575_s26 + $0x268] sm:$0xff] %v461_v13   ;;  %v469_v15 = vld [vmem:[%s5570_s25 + $0x1278] sm:$0xff]   ;;  %v473_v16 = vld [vmem:[%s5570_s25 + $0x1280] sm:$0xff]  }
  0x39   : > { %466 = vst [vmem:[%s5575_s26 + $0x270] sm:$0xff] %v465_v14   ;;  %470 = vst [vmem:[%s5575_s26 + $0x278] sm:$0xff] %v469_v15   ;;  %v477_v17 = vld [vmem:[%s5570_s25 + $0x1288] sm:$0xff]   ;;  %v481_v18 = vld [vmem:[%s5570_s25 + $0x1290] sm:$0xff]  }
  0x3a   : > { %474 = vst [vmem:[%s5575_s26 + $0x280] sm:$0xff] %v473_v16   ;;  %v485_v19 = vld [vmem:[%s5570_s25 + $0x1298] sm:$0xff]   ;;  %478 = vst [vmem:[%s5575_s26 + $0x288] sm:$0xff] %v477_v17   ;;  %v489_v20 = vld [vmem:[%s5570_s25 + $0x12a0] sm:$0xff]  }
  0x3b   : > { %482 = vst [vmem:[%s5575_s26 + $0x290] sm:$0xff] %v481_v18   ;;  %486 = vst [vmem:[%s5575_s26 + $0x298] sm:$0xff] %v485_v19   ;;  %v493_v21 = vld [vmem:[%s5570_s25 + $0x12a8] sm:$0xff]   ;;  %v497_v22 = vld [vmem:[%s5570_s25 + $0x12b0] sm:$0xff]  }
  0x3c   : > { %490 = vst [vmem:[%s5575_s26 + $0x2a0] sm:$0xff] %v489_v20   ;;  %494 = vst [vmem:[%s5575_s26 + $0x2a8] sm:$0xff] %v493_v21   ;;  %v501_v23 = vld [vmem:[%s5570_s25 + $0x12b8] sm:$0xff]   ;;  %v505_v24 = vld [vmem:[%s5570_s25 + $0x12c0] sm:$0xff]  }
  0x3d   : > { %498 = vst [vmem:[%s5575_s26 + $0x2b0] sm:$0xff] %v497_v22   ;;  %v509_v25 = vld [vmem:[%s5570_s25 + $0x12c8] sm:$0xff]   ;;  %502 = vst [vmem:[%s5575_s26 + $0x2b8] sm:$0xff] %v501_v23   ;;  %v513_v26 = vld [vmem:[%s5570_s25 + $0x12d0] sm:$0xff]  }
  0x3e   : > { %506 = vst [vmem:[%s5575_s26 + $0x2c0] sm:$0xff] %v505_v24   ;;  %510 = vst [vmem:[%s5575_s26 + $0x2c8] sm:$0xff] %v509_v25   ;;  %v517_v27 = vld [vmem:[%s5570_s25 + $0x12d8] sm:$0xff]   ;;  %v521_v28 = vld [vmem:[%s5570_s25 + $0x12e0] sm:$0xff]  }
  0x3f   : > { %514 = vst [vmem:[%s5575_s26 + $0x2d0] sm:$0xff] %v513_v26   ;;  %518 = vst [vmem:[%s5575_s26 + $0x2d8] sm:$0xff] %v517_v27   ;;  %v525_v29 = vld [vmem:[%s5570_s25 + $0x12e8] sm:$0xff]   ;;  %v529_v30 = vld [vmem:[%s5570_s25 + $0x12f0] sm:$0xff]  }
  0x40   : > { %522 = vst [vmem:[%s5575_s26 + $0x2e0] sm:$0xff] %v521_v28   ;;  %v533_v31 = vld [vmem:[%s5570_s25 + $0x12f8] sm:$0xff]   ;;  %526 = vst [vmem:[%s5575_s26 + $0x2e8] sm:$0xff] %v525_v29   ;;  %v537_v32 = vld [vmem:[%s5570_s25 + $0x1b00] sm:$0xff]  }
  0x41   : > { %530 = vst [vmem:[%s5575_s26 + $0x2f0] sm:$0xff] %v529_v30   ;;  %534 = vst [vmem:[%s5575_s26 + $0x2f8] sm:$0xff] %v533_v31   ;;  %v541_v33 = vld [vmem:[%s5570_s25 + $0x1b08] sm:$0xff]   ;;  %v545_v34 = vld [vmem:[%s5570_s25 + $0x1b10] sm:$0xff]  }
  0x42   : > { %538 = vst [vmem:[%s5575_s26 + $0x300] sm:$0xff] %v537_v32   ;;  %542 = vst [vmem:[%s5575_s26 + $0x308] sm:$0xff] %v541_v33   ;;  %v549_v35 = vld [vmem:[%s5570_s25 + $0x1b18] sm:$0xff]   ;;  %v553_v36 = vld [vmem:[%s5570_s25 + $0x1b20] sm:$0xff]  }
  0x43   : > { %546 = vst [vmem:[%s5575_s26 + $0x310] sm:$0xff] %v545_v34   ;;  %v557_v37 = vld [vmem:[%s5570_s25 + $0x1b28] sm:$0xff]   ;;  %550 = vst [vmem:[%s5575_s26 + $0x318] sm:$0xff] %v549_v35   ;;  %v561_v38 = vld [vmem:[%s5570_s25 + $0x1b30] sm:$0xff]  }
  0x44   : > { %554 = vst [vmem:[%s5575_s26 + $0x320] sm:$0xff] %v553_v36   ;;  %558 = vst [vmem:[%s5575_s26 + $0x328] sm:$0xff] %v557_v37   ;;  %v565_v39 = vld [vmem:[%s5570_s25 + $0x1b38] sm:$0xff]   ;;  %v569_v40 = vld [vmem:[%s5570_s25 + $0x1b40] sm:$0xff]  }
  0x45   : > { %562 = vst [vmem:[%s5575_s26 + $0x330] sm:$0xff] %v561_v38   ;;  %566 = vst [vmem:[%s5575_s26 + $0x338] sm:$0xff] %v565_v39   ;;  %v573_v41 = vld [vmem:[%s5570_s25 + $0x1b48] sm:$0xff]   ;;  %v577_v42 = vld [vmem:[%s5570_s25 + $0x1b50] sm:$0xff]  }
  0x46   : > { %570 = vst [vmem:[%s5575_s26 + $0x340] sm:$0xff] %v569_v40   ;;  %v581_v43 = vld [vmem:[%s5570_s25 + $0x1b58] sm:$0xff]   ;;  %574 = vst [vmem:[%s5575_s26 + $0x348] sm:$0xff] %v573_v41   ;;  %v585_v44 = vld [vmem:[%s5570_s25 + $0x1b60] sm:$0xff]  }
  0x47   : > { %578 = vst [vmem:[%s5575_s26 + $0x350] sm:$0xff] %v577_v42   ;;  %582 = vst [vmem:[%s5575_s26 + $0x358] sm:$0xff] %v581_v43   ;;  %v589_v45 = vld [vmem:[%s5570_s25 + $0x1b68] sm:$0xff]   ;;  %v593_v46 = vld [vmem:[%s5570_s25 + $0x1b70] sm:$0xff]  }
  0x48   : > { %586 = vst [vmem:[%s5575_s26 + $0x360] sm:$0xff] %v585_v44   ;;  %590 = vst [vmem:[%s5575_s26 + $0x368] sm:$0xff] %v589_v45   ;;  %v597_v47 = vld [vmem:[%s5570_s25 + $0x1b78] sm:$0xff]   ;;  %v601_v48 = vld [vmem:[%s5570_s25 + $0x1b80] sm:$0xff]  }
  0x49   : > { %594 = vst [vmem:[%s5575_s26 + $0x370] sm:$0xff] %v593_v46   ;;  %v605_v49 = vld [vmem:[%s5570_s25 + $0x1b88] sm:$0xff]   ;;  %598 = vst [vmem:[%s5575_s26 + $0x378] sm:$0xff] %v597_v47   ;;  %v609_v50 = vld [vmem:[%s5570_s25 + $0x1b90] sm:$0xff]  }
  0x4a   : > { %602 = vst [vmem:[%s5575_s26 + $0x380] sm:$0xff] %v601_v48   ;;  %606 = vst [vmem:[%s5575_s26 + $0x388] sm:$0xff] %v605_v49   ;;  %v613_v51 = vld [vmem:[%s5570_s25 + $0x1b98] sm:$0xff]   ;;  %v617_v52 = vld [vmem:[%s5570_s25 + $0x1ba0] sm:$0xff]  }
  0x4b   : > { %610 = vst [vmem:[%s5575_s26 + $0x390] sm:$0xff] %v609_v50   ;;  %614 = vst [vmem:[%s5575_s26 + $0x398] sm:$0xff] %v613_v51   ;;  %v621_v53 = vld [vmem:[%s5570_s25 + $0x1ba8] sm:$0xff]   ;;  %v625_v54 = vld [vmem:[%s5570_s25 + $0x1bb0] sm:$0xff]  }
  0x4c   : > { %618 = vst [vmem:[%s5575_s26 + $0x3a0] sm:$0xff] %v617_v52   ;;  %v629_v55 = vld [vmem:[%s5570_s25 + $0x1bb8] sm:$0xff]   ;;  %622 = vst [vmem:[%s5575_s26 + $0x3a8] sm:$0xff] %v621_v53   ;;  %v633_v56 = vld [vmem:[%s5570_s25 + $0x1bc0] sm:$0xff]  }
  0x4d   : > { %626 = vst [vmem:[%s5575_s26 + $0x3b0] sm:$0xff] %v625_v54   ;;  %630 = vst [vmem:[%s5575_s26 + $0x3b8] sm:$0xff] %v629_v55   ;;  %v637_v57 = vld [vmem:[%s5570_s25 + $0x1bc8] sm:$0xff]   ;;  %v641_v58 = vld [vmem:[%s5570_s25 + $0x1bd0] sm:$0xff]  }
  0x4e   : > { %634 = vst [vmem:[%s5575_s26 + $0x3c0] sm:$0xff] %v633_v56   ;;  %638 = vst [vmem:[%s5575_s26 + $0x3c8] sm:$0xff] %v637_v57   ;;  %v645_v59 = vld [vmem:[%s5570_s25 + $0x1bd8] sm:$0xff]   ;;  %v649_v60 = vld [vmem:[%s5570_s25 + $0x1be0] sm:$0xff]  }
  0x4f   : > { %642 = vst [vmem:[%s5575_s26 + $0x3d0] sm:$0xff] %v641_v58   ;;  %v653_v61 = vld [vmem:[%s5570_s25 + $0x1be8] sm:$0xff]   ;;  %646 = vst [vmem:[%s5575_s26 + $0x3d8] sm:$0xff] %v645_v59   ;;  %v657_v62 = vld [vmem:[%s5570_s25 + $0x1bf0] sm:$0xff]  }
  0x50   : > { %650 = vst [vmem:[%s5575_s26 + $0x3e0] sm:$0xff] %v649_v60   ;;  %654 = vst [vmem:[%s5575_s26 + $0x3e8] sm:$0xff] %v653_v61   ;;  %v661_v63 = vld [vmem:[%s5570_s25 + $0x1bf8] sm:$0xff]  }
  0x51   : > { %658 = vst [vmem:[%s5575_s26 + $0x3f0] sm:$0xff] %v657_v62   ;;  %662 = vst [vmem:[%s5575_s26 + $0x3f8] sm:$0xff] %v661_v63  }
  0x52 PF: > { %p4336_p5 = scmp.ge.s32.totalorder %s5513_s14, 1  ;;  %p1198_p6 = scmp.lt.s32.totalorder %s5513_s14, 10 }
  0x54   : > { %p1199_p7 = pnand %p4336_p5, %p1198_p6 }
  0x56   : > { %1202 = sbr.rel (%p1199_p7) target bundleno = 588 (0x24c), region = 69 }
  0x5d   : > { %v5358_v0 = vld [vmem:[%s6610_s1] sm:$0xff]   ;;  %v5359_v1 = vld [vmem:[%s6610_s1 + $0x8] sm:$0xff]   ;;  %vm2556_vm0 = vcmask 1044480   ;;  %v5360_v2 = vld [vmem:[%s6610_s1 + $0x10] sm:$0xff]   ;;  %s1205_s6 = sand.u32 1, %s5505_s12   ;;  %vm2557_vm1 = vcmask 1045504  }
  0x5e   : > { %5057 = vmatprep.subr.bf16.mxu0 %v5358_v0  ;;  %5323 = vmatprep.subr.bf16.mxu1 %v5358_v0  ;;  %v5515_v3 = vmov 65535   ;;  %s4337_s7 = sshll.u32 %s1205_s6, 10  ;;  %v5361_v5 = vld [vmem:[%s6610_s1 + $0x18] sm:$0xff]   ;;  %v5362_v6 = vld [vmem:[%s6610_s1 + $0x20] sm:$0x3f]   ;;  %vm2171_vm2 = vcmask 613376  }
  0x5f   : > { %5058 = vmatpush3.bf16.msra.mxu0 %v5358_v0  ;;  %5328 = vmatpush3.bf16.msra.mxu1 %v5358_v0  ;;  %v2558_v4 = vsel %vm2556_vm0, 4294967295, %v5515_v3  ;;  %s5848_s17 = scalar_lea.vmem [#allocation2], %s4337_s7  ;;  %s4338_s12 = sshll.u32 %s4329_s15, 6 }
  0x60   : > { %5059 = vmatprep.subr.bf16.mxu0 %v5359_v1  ;;  %5324 = vmatprep.subr.bf16.mxu1 %v5359_v1  ;;  %v5363_v7 = vld [vmem:[%s5848_s17] sm:$0xff]   ;;  %v2559_v8 = vsel %vm2557_vm1, %v2558_v4, 0  ;;  %v5365_v11 = vld [vmem:[%s5848_s17 + $0x8] sm:$0xff]   ;;  %v5367_v13 = vld [vmem:[%s5848_s17 + $0x10] sm:$0xff]   ;;  %p1230_p8 = scmp.lt.s32.totalorder %s4338_s12, 575 }
  0x61   : > { %v5364_v9 = vld [vmem:[%s5848_s17 + $0x200] sm:$0xff]   ;;  %5067 = vmatprep.mubr.msk.bf16.mxu0 %vm2171_vm2, %v5363_v7  ;;  %v2561_v10 = vand.u32 %v5362_v6, %v2559_v8  ;;  %v5366_v12 = vld [vmem:[%s5848_s17 + $0x208] sm:$0xff]   ;;  %v5368_v14 = vld [vmem:[%s5848_s17 + $0x210] sm:$0xff]  }
  0x62   : > { %5195 = vmatprep.mubr.msk.bf16.mxu1 %vm2171_vm2, %v5364_v9  ;;  %v5369_v15 = vld [vmem:[%s5848_s17 + $0x18] sm:$0xff]   ;;  %v5371_v17 = vld [vmem:[%s5848_s17 + $0x20] sm:$0xff]   ;;  %v5373_v19 = vld [vmem:[%s5848_s17 + $0x28] sm:$0xff]   ;;  %s6775_s12 = smov (!%p1230_p8, %s4338_s12), 575 }
  0x63   : > { %5060 = vmatpush3.bf16.msra.mxu0 %v5359_v1  ;;  %5329 = vmatpush3.bf16.msra.mxu1 %v5359_v1  ;;  %v5370_v16 = vld [vmem:[%s5848_s17 + $0x218] sm:$0xff]   ;;  %v5372_v18 = vld [vmem:[%s5848_s17 + $0x220] sm:$0xff]   ;;  %v5374_v20 = vld [vmem:[%s5848_s17 + $0x228] sm:$0xff]   ;;  %s4339_s14 = sshll.u32 %s6775_s12, 2 }
  0x64   : > { %5061 = vmatprep.subr.bf16.mxu0 %v5360_v2  ;;  %5325 = vmatprep.subr.bf16.mxu1 %v5360_v2  ;;  %v5375_v21 = vld [vmem:[%s5848_s17 + $0x30] sm:$0xff]   ;;  %v5377_v23 = vld [vmem:[%s5848_s17 + $0x38] sm:$0xff]   ;;  %v5379_v25 = vld [vmem:[%s5848_s17 + $0x40] sm:$0xff]   ;;  %s6387_s22 = scalar_lea.vmem %s6612_s3, %s4339_s14 }
  0x65   : > { %v5376_v22 = vld [vmem:[%s5848_s17 + $0x230] sm:$0xff]   ;;  %v5378_v24 = vld [vmem:[%s5848_s17 + $0x238] sm:$0xff]   ;;  %v5380_v26 = vld [vmem:[%s5848_s17 + $0x240] sm:$0xff]  }
  0x66   : > { %v5381_v27 = vld [vmem:[%s5848_s17 + $0x48] sm:$0xff]   ;;  %v5383_v29 = vld [vmem:[%s5848_s17 + $0x50] sm:$0xff]   ;;  %v5385_v31 = vld [vmem:[%s5848_s17 + $0x58] sm:$0xff]  }
  0x67   : > { %5062 = vmatpush3.bf16.msra.mxu0 %v5360_v2  ;;  %5330 = vmatpush3.bf16.msra.mxu1 %v5360_v2  ;;  %v5382_v28 = vld [vmem:[%s5848_s17 + $0x248] sm:$0xff]   ;;  %v5384_v30 = vld [vmem:[%s5848_s17 + $0x250] sm:$0xff]   ;;  %v5386_v32 = vld [vmem:[%s5848_s17 + $0x258] sm:$0xff]  }
  0x68   : > { %5063 = vmatprep.subr.bf16.mxu0 %v5361_v5  ;;  %5326 = vmatprep.subr.bf16.mxu1 %v5361_v5  ;;  %v5387_v33 = vld [vmem:[%s5848_s17 + $0x60] sm:$0xff]   ;;  %v5389_v35 = vld [vmem:[%s5848_s17 + $0x68] sm:$0xff]   ;;  %v5391_v37 = vld [vmem:[%s5848_s17 + $0x70] sm:$0xff]  }
  0x69   : > { %v5388_v34 = vld [vmem:[%s5848_s17 + $0x260] sm:$0xff]   ;;  %v5390_v36 = vld [vmem:[%s5848_s17 + $0x268] sm:$0xff]   ;;  %v5392_v38 = vld [vmem:[%s5848_s17 + $0x270] sm:$0xff]  }
  0x6a   : > { %v5393_v39 = vld [vmem:[%s5848_s17 + $0x78] sm:$0xff]   ;;  %v5395_v41 = vld [vmem:[%s5848_s17 + $0x80] sm:$0xff]   ;;  %v5397_v43 = vld [vmem:[%s5848_s17 + $0x88] sm:$0xff]  }
  0x6b   : > { %5064 = vmatpush3.bf16.msra.mxu0 %v5361_v5  ;;  %5331 = vmatpush3.bf16.msra.mxu1 %v5361_v5  ;;  %v5394_v40 = vld [vmem:[%s5848_s17 + $0x278] sm:$0xff]   ;;  %v5396_v42 = vld [vmem:[%s5848_s17 + $0x280] sm:$0xff]   ;;  %v5398_v44 = vld [vmem:[%s5848_s17 + $0x288] sm:$0xff]  }
  0x6c   : > { %5065 = vmatprep.subr.bf16.mxu0 %v2561_v10  ;;  %5327 = vmatprep.subr.bf16.mxu1 %v2561_v10  ;;  %v5399_v45 = vld [vmem:[%s5848_s17 + $0x90] sm:$0xff]   ;;  %v5401_v47 = vld [vmem:[%s5848_s17 + $0x98] sm:$0xff]   ;;  %v5403_v49 = vld [vmem:[%s5848_s17 + $0xa0] sm:$0xff]  }
  0x6d   : > { %v5400_v46 = vld [vmem:[%s5848_s17 + $0x290] sm:$0xff]   ;;  %v5402_v48 = vld [vmem:[%s5848_s17 + $0x298] sm:$0xff]   ;;  %v5404_v50 = vld [vmem:[%s5848_s17 + $0x2a0] sm:$0xff]  }
  0x6e   : > { %v5405_v51 = vld [vmem:[%s5848_s17 + $0xa8] sm:$0xff]   ;;  %v5407_v53 = vld [vmem:[%s5848_s17 + $0xb0] sm:$0xff]   ;;  %v5409_v55 = vld [vmem:[%s5848_s17 + $0xb8] sm:$0xff]  }
  0x6f   : > { %5066 = vmatpush3.bf16.msra.mxu0 %v2561_v10  ;;  %5332 = vmatpush3.bf16.msra.mxu1 %v2561_v10  ;;  %v5406_v52 = vld [vmem:[%s5848_s17 + $0x2a8] sm:$0xff]   ;;  %v5408_v54 = vld [vmem:[%s5848_s17 + $0x2b0] sm:$0xff]   ;;  %v5410_v56 = vld [vmem:[%s5848_s17 + $0x2b8] sm:$0xff]  }
  0x70   : > { %v5411_v57 = vld [vmem:[%s5848_s17 + $0xc0] sm:$0xff]   ;;  %v5413_v59 = vld [vmem:[%s5848_s17 + $0xc8] sm:$0xff]   ;;  %v5415_v61 = vld [vmem:[%s5848_s17 + $0xd0] sm:$0xff]  }
  0x71   : > { %v5412_v58 = vld [vmem:[%s5848_s17 + $0x2c0] sm:$0xff]   ;;  %v5414_v60 = vld [vmem:[%s5848_s17 + $0x2c8] sm:$0xff]   ;;  %v5416_v62 = vld [vmem:[%s5848_s17 + $0x2d0] sm:$0xff]  }
  0x72   : > { %5068 = vmatmul.mubr.msk.bf16.vlgmr.msra.gmra.mrb[0].mxu0 %vm2171_vm2, %v5365_v11  ;;  %5196 = vmatmul.mubr.msk.bf16.vlgmr.msra.gmra.mrb[0].mxu1 %vm2171_vm2, %v5366_v12  ;;  %v5417_v63 = vld [vmem:[%s5848_s17 + $0xd8] sm:$0xff]   ;;  %v5419_v1 = vld [vmem:[%s5848_s17 + $0xe0] sm:$0xff]   ;;  %v5421_v3 = vld [vmem:[%s5848_s17 + $0xe8] sm:$0xff]  }
  0x73   : > { %5071 = vmatprep.mubr.msk.bf16.mxu0 %vm2171_vm2, %v5367_v13  ;;  %5199 = vmatprep.mubr.msk.bf16.mxu1 %vm2171_vm2, %v5368_v14  ;;  %v5418_v0 = vld [vmem:[%s5848_s17 + $0x2d8] sm:$0xff]   ;;  %v5420_v2 = vld [vmem:[%s5848_s17 + $0x2e0] sm:$0xff]   ;;  %v5422_v4 = vld [vmem:[%s5848_s17 + $0x2e8] sm:$0xff]  }
  0x74   : > { %v5423_v5 = vld [vmem:[%s5848_s17 + $0xf0] sm:$0xff]   ;;  %v5425_v7 = vld [vmem:[%s5848_s17 + $0xf8] sm:$0xff]   ;;  %v5427_v9 = vld [vmem:[%s5848_s17 + $0x100] sm:$0xff]  }
  0x75   : > { %v5424_v6 = vld [vmem:[%s5848_s17 + $0x2f0] sm:$0xff]   ;;  %v5426_v8 = vld [vmem:[%s5848_s17 + $0x2f8] sm:$0xff]   ;;  %v5428_v10 = vld [vmem:[%s5848_s17 + $0x300] sm:$0xff]  }
  0x76   : > { %v5429_v11 = vld [vmem:[%s5848_s17 + $0x108] sm:$0xff]   ;;  %v5431_v13 = vld [vmem:[%s5848_s17 + $0x110] sm:$0xff]  }
  0x77   : > { %v5430_v12 = vld [vmem:[%s5848_s17 + $0x308] sm:$0xff]   ;;  %v5432_v14 = vld [vmem:[%s5848_s17 + $0x310] sm:$0xff]  }
  0x7a   : > { %5072 = vmatmul.mubr.msk.bf16.gmra.mrb[4].mxu0 %vm2171_vm2, %v5369_v15  ;;  %5200 = vmatmul.mubr.msk.bf16.gmra.mrb[4].mxu1 %vm2171_vm2, %v5370_v16  ;;  %v5433_v15 = vld [vmem:[%s5848_s17 + $0x118] sm:$0xff]  }
  0x7b   : > { %5075 = vmatprep.mubr.msk.bf16.mxu0 %vm2171_vm2, %v5371_v17  ;;  %5203 = vmatprep.mubr.msk.bf16.mxu1 %vm2171_vm2, %v5372_v18  ;;  %v5434_v16 = vld [vmem:[%s5848_s17 + $0x318] sm:$0xff]   ;;  %v5435_v17 = vld [vmem:[%s5848_s17 + $0x120] sm:$0xff]  }
  0x7c   : > { %v5436_v18 = vld [vmem:[%s5848_s17 + $0x320] sm:$0xff]  }
  0x82   : > { %5076 = vmatmul.mubr.msk.bf16.gmra.mrb[8].mxu0 %vm2171_vm2, %v5373_v19  ;;  %5204 = vmatmul.mubr.msk.bf16.gmra.mrb[8].mxu1 %vm2171_vm2, %v5374_v20  ;;  %v5437_v19 = vld [vmem:[%s5848_s17 + $0x128] sm:$0xff]  }
  0x83   : > { %5079 = vmatprep.mubr.msk.bf16.mxu0 %vm2171_vm2, %v5375_v21  ;;  %5207 = vmatprep.mubr.msk.bf16.mxu1 %vm2171_vm2, %v5376_v22  ;;  %v5438_v20 = vld [vmem:[%s5848_s17 + $0x328] sm:$0xff]   ;;  %v5439_v21 = vld [vmem:[%s5848_s17 + $0x130] sm:$0xff]  }
  0x84   : > { %v5440_v22 = vld [vmem:[%s5848_s17 + $0x330] sm:$0xff]  }
  0x8a   : > { %5080 = vmatmul.mubr.msk.bf16.gmra.mrb[12].mxu0 %vm2171_vm2, %v5377_v23  ;;  %5208 = vmatmul.mubr.msk.bf16.gmra.mrb[12].mxu1 %vm2171_vm2, %v5378_v24  ;;  %v5441_v23 = vld [vmem:[%s5848_s17 + $0x138] sm:$0xff]  }
  0x8b   : > { %5083 = vmatprep.mubr.msk.bf16.mxu0 %vm2171_vm2, %v5379_v25  ;;  %5211 = vmatprep.mubr.msk.bf16.mxu1 %vm2171_vm2, %v5380_v26  ;;  %v5442_v24 = vld [vmem:[%s5848_s17 + $0x338] sm:$0xff]   ;;  %v5443_v25 = vld [vmem:[%s5848_s17 + $0x140] sm:$0xff]  }
  0x8c   : > { %v5444_v26 = vld [vmem:[%s5848_s17 + $0x340] sm:$0xff]  }
  0x92   : > { %5084 = vmatmul.mubr.msk.bf16.gmra.mrb[16].mxu0 %vm2171_vm2, %v5381_v27  ;;  %5212 = vmatmul.mubr.msk.bf16.gmra.mrb[16].mxu1 %vm2171_vm2, %v5382_v28  ;;  %v5445_v27 = vld [vmem:[%s5848_s17 + $0x148] sm:$0xff]  }
  0x93   : > { %5087 = vmatprep.mubr.msk.bf16.mxu0 %vm2171_vm2, %v5383_v29  ;;  %5215 = vmatprep.mubr.msk.bf16.mxu1 %vm2171_vm2, %v5384_v30  ;;  %v5446_v28 = vld [vmem:[%s5848_s17 + $0x348] sm:$0xff]   ;;  %v5447_v29 = vld [vmem:[%s5848_s17 + $0x150] sm:$0xff]  }
  0x94   : > { %v5448_v30 = vld [vmem:[%s5848_s17 + $0x350] sm:$0xff]  }
  0x9a   : > { %5088 = vmatmul.mubr.msk.bf16.gmra.mrb[20].mxu0 %vm2171_vm2, %v5385_v31  ;;  %5216 = vmatmul.mubr.msk.bf16.gmra.mrb[20].mxu1 %vm2171_vm2, %v5386_v32  ;;  %v5449_v31 = vld [vmem:[%s5848_s17 + $0x158] sm:$0xff]  }
  0x9b   : > { %5091 = vmatprep.mubr.msk.bf16.mxu0 %vm2171_vm2, %v5387_v33  ;;  %5219 = vmatprep.mubr.msk.bf16.mxu1 %vm2171_vm2, %v5388_v34  ;;  %v5450_v32 = vld [vmem:[%s5848_s17 + $0x358] sm:$0xff]   ;;  %v5451_v33 = vld [vmem:[%s5848_s17 + $0x160] sm:$0xff]  }
  0x9c   : > { %v5452_v34 = vld [vmem:[%s5848_s17 + $0x360] sm:$0xff]  }
  0xa2   : > { %5092 = vmatmul.mubr.msk.bf16.gmra.mrb[24].mxu0 %vm2171_vm2, %v5389_v35  ;;  %5220 = vmatmul.mubr.msk.bf16.gmra.mrb[24].mxu1 %vm2171_vm2, %v5390_v36  ;;  %v5453_v35 = vld [vmem:[%s5848_s17 + $0x168] sm:$0xff]  }
  0xa3   : > { %5095 = vmatprep.mubr.msk.bf16.mxu0 %vm2171_vm2, %v5391_v37  ;;  %5223 = vmatprep.mubr.msk.bf16.mxu1 %vm2171_vm2, %v5392_v38  ;;  %v5454_v36 = vld [vmem:[%s5848_s17 + $0x368] sm:$0xff]   ;;  %v5455_v37 = vld [vmem:[%s5848_s17 + $0x170] sm:$0xff]  }
  0xa4   : > { %v5456_v38 = vld [vmem:[%s5848_s17 + $0x370] sm:$0xff]  }
  0xaa   : > { %5096 = vmatmul.mubr.msk.bf16.gmra.mrb[28].mxu0 %vm2171_vm2, %v5393_v39  ;;  %5224 = vmatmul.mubr.msk.bf16.gmra.mrb[28].mxu1 %vm2171_vm2, %v5394_v40  ;;  %v5457_v39 = vld [vmem:[%s5848_s17 + $0x178] sm:$0xff]  }
  0xab   : > { %5099 = vmatprep.mubr.msk.bf16.mxu0 %vm2171_vm2, %v5395_v41  ;;  %5227 = vmatprep.mubr.msk.bf16.mxu1 %vm2171_vm2, %v5396_v42  ;;  %v5458_v40 = vld [vmem:[%s5848_s17 + $0x378] sm:$0xff]   ;;  %v5459_v41 = vld [vmem:[%s5848_s17 + $0x180] sm:$0xff]  }
  0xac   : > { %v5460_v42 = vld [vmem:[%s5848_s17 + $0x380] sm:$0xff]  }
  0xb2   : > { %5100 = vmatmul.mubr.msk.bf16.gmra.mrb[32].mxu0 %vm2171_vm2, %v5397_v43  ;;  %5228 = vmatmul.mubr.msk.bf16.gmra.mrb[32].mxu1 %vm2171_vm2, %v5398_v44  ;;  %v5461_v43 = vld [vmem:[%s5848_s17 + $0x188] sm:$0xff]  }
  0xb3   : > { %5103 = vmatprep.mubr.msk.bf16.mxu0 %vm2171_vm2, %v5399_v45  ;;  %5231 = vmatprep.mubr.msk.bf16.mxu1 %vm2171_vm2, %v5400_v46  ;;  %v5462_v44 = vld [vmem:[%s5848_s17 + $0x388] sm:$0xff]   ;;  %v5463_v45 = vld [vmem:[%s5848_s17 + $0x190] sm:$0xff]  }
  0xb4   : > { %v5464_v46 = vld [vmem:[%s5848_s17 + $0x390] sm:$0xff]  }
  0xba   : > { %5104 = vmatmul.mubr.msk.bf16.gmra.mrb[36].mxu0 %vm2171_vm2, %v5401_v47  ;;  %5232 = vmatmul.mubr.msk.bf16.gmra.mrb[36].mxu1 %vm2171_vm2, %v5402_v48  ;;  %v5465_v47 = vld [vmem:[%s5848_s17 + $0x198] sm:$0xff]  }
  0xbb   : > { %5107 = vmatprep.mubr.msk.bf16.mxu0 %vm2171_vm2, %v5403_v49  ;;  %5235 = vmatprep.mubr.msk.bf16.mxu1 %vm2171_vm2, %v5404_v50  ;;  %v5466_v48 = vld [vmem:[%s5848_s17 + $0x398] sm:$0xff]   ;;  %v5467_v49 = vld [vmem:[%s5848_s17 + $0x1a0] sm:$0xff]  }
  0xbc   : > { %v5468_v50 = vld [vmem:[%s5848_s17 + $0x3a0] sm:$0xff]  }
  0xc2   : > { %5108 = vmatmul.mubr.msk.bf16.gmra.mrb[40].mxu0 %vm2171_vm2, %v5405_v51  ;;  %5236 = vmatmul.mubr.msk.bf16.gmra.mrb[40].mxu1 %vm2171_vm2, %v5406_v52  ;;  %v5469_v51 = vld [vmem:[%s5848_s17 + $0x1a8] sm:$0xff]  }
  0xc3   : > { %5111 = vmatprep.mubr.msk.bf16.mxu0 %vm2171_vm2, %v5407_v53  ;;  %5239 = vmatprep.mubr.msk.bf16.mxu1 %vm2171_vm2, %v5408_v54  ;;  %v5470_v52 = vld [vmem:[%s5848_s17 + $0x3a8] sm:$0xff]   ;;  %v5471_v53 = vld [vmem:[%s5848_s17 + $0x1b0] sm:$0xff]  }
  0xc4   : > { %v5472_v54 = vld [vmem:[%s5848_s17 + $0x3b0] sm:$0xff]  }
  0xca   : > { %5112 = vmatmul.mubr.msk.bf16.gmra.mrb[44].mxu0 %vm2171_vm2, %v5409_v55  ;;  %5240 = vmatmul.mubr.msk.bf16.gmra.mrb[44].mxu1 %vm2171_vm2, %v5410_v56 }
  0xcb   : > { %5115 = vmatprep.mubr.msk.bf16.mxu0 %vm2171_vm2, %v5411_v57  ;;  %5243 = vmatprep.mubr.msk.bf16.mxu1 %vm2171_vm2, %v5412_v58 }
  0xd2   : > { %5116 = vmatmul.mubr.msk.bf16.gmra.mrb[48].mxu0 %vm2171_vm2, %v5413_v59  ;;  %5244 = vmatmul.mubr.msk.bf16.gmra.mrb[48].mxu1 %vm2171_vm2, %v5414_v60  ;;  %v5473_v59 = vld [vmem:[%s5848_s17 + $0x1b8] sm:$0xff]  }
  0xd3   : > { %5119 = vmatprep.mubr.msk.bf16.mxu0 %vm2171_vm2, %v5415_v61  ;;  %5247 = vmatprep.mubr.msk.bf16.mxu1 %vm2171_vm2, %v5416_v62  ;;  %v5474_v60 = vld [vmem:[%s5848_s17 + $0x3b8] sm:$0xff]  }
  0xda   : > { %5120 = vmatmul.mubr.msk.bf16.gmra.mrb[52].mxu0 %vm2171_vm2, %v5417_v63  ;;  %5248 = vmatmul.mubr.msk.bf16.gmra.mrb[52].mxu1 %vm2171_vm2, %v5418_v0  ;;  %v5475_v63 = vld [vmem:[%s5848_s17 + $0x1c0] sm:$0xff]  }
  0xdb   : > { %5123 = vmatprep.mubr.msk.bf16.mxu0 %vm2171_vm2, %v5419_v1  ;;  %5251 = vmatprep.mubr.msk.bf16.mxu1 %vm2171_vm2, %v5420_v2  ;;  %v5476_v0 = vld [vmem:[%s5848_s17 + $0x3c0] sm:$0xff]  }
  0xe2   : > { %5124 = vmatmul.mubr.msk.bf16.gmra.mrb[56].mxu0 %vm2171_vm2, %v5421_v3  ;;  %5252 = vmatmul.mubr.msk.bf16.gmra.mrb[56].mxu1 %vm2171_vm2, %v5422_v4 }
  0xe3   : > { %5127 = vmatprep.mubr.msk.bf16.mxu0 %vm2171_vm2, %v5423_v5  ;;  %5255 = vmatprep.mubr.msk.bf16.mxu1 %vm2171_vm2, %v5424_v6 }
  0xea   : > { %5128 = vmatmul.mubr.msk.bf16.gmra.mrb[60].mxu0 %vm2171_vm2, %v5425_v7  ;;  %5256 = vmatmul.mubr.msk.bf16.gmra.mrb[60].mxu1 %vm2171_vm2, %v5426_v8  ;;  %v5477_v7 = vld [vmem:[%s5848_s17 + $0x1c8] sm:$0xff]  }
  0xeb   : > { %5131 = vmatprep.mubr.msk.bf16.mxu0 %vm2171_vm2, %v5427_v9  ;;  %5259 = vmatprep.mubr.msk.bf16.mxu1 %vm2171_vm2, %v5428_v10  ;;  %v5478_v8 = vld [vmem:[%s5848_s17 + $0x3c8] sm:$0xff]  }
  0xf2   : > { %5132 = vmatmul.mubr.msk.bf16.gmra.mrb[64].mxu0 %vm2171_vm2, %v5429_v11  ;;  %5260 = vmatmul.mubr.msk.bf16.gmra.mrb[64].mxu1 %vm2171_vm2, %v5430_v12  ;;  %v5479_v11 = vld [vmem:[%s5848_s17 + $0x1d0] sm:$0xff]  }
  0xf3   : > { %5135 = vmatprep.mubr.msk.bf16.mxu0 %vm2171_vm2, %v5431_v13  ;;  %5263 = vmatprep.mubr.msk.bf16.mxu1 %vm2171_vm2, %v5432_v14  ;;  %v5480_v12 = vld [vmem:[%s5848_s17 + $0x3d0] sm:$0xff]  }
  0xfa   : > { %5136 = vmatmul.mubr.msk.bf16.gmra.mrb[68].mxu0 %vm2171_vm2, %v5433_v15  ;;  %5264 = vmatmul.mubr.msk.bf16.gmra.mrb[68].mxu1 %vm2171_vm2, %v5434_v16 }
  0xfb   : > { %5139 = vmatprep.mubr.msk.bf16.mxu0 %vm2171_vm2, %v5435_v17  ;;  %5267 = vmatprep.mubr.msk.bf16.mxu1 %vm2171_vm2, %v5436_v18 }
 0x102   : > { %5140 = vmatmul.mubr.msk.bf16.gmra.mrb[72].mxu0 %vm2171_vm2, %v5437_v19  ;;  %5268 = vmatmul.mubr.msk.bf16.gmra.mrb[72].mxu1 %vm2171_vm2, %v5438_v20  ;;  %v5481_v19 = vld [vmem:[%s5848_s17 + $0x1d8] sm:$0xff]  }
 0x103   : > { %5143 = vmatprep.mubr.msk.bf16.mxu0 %vm2171_vm2, %v5439_v21  ;;  %5271 = vmatprep.mubr.msk.bf16.mxu1 %vm2171_vm2, %v5440_v22  ;;  %v5482_v20 = vld [vmem:[%s5848_s17 + $0x3d8] sm:$0xff]  }
 0x10a   : > { %5144 = vmatmul.mubr.msk.bf16.gmra.mrb[76].mxu0 %vm2171_vm2, %v5441_v23  ;;  %5272 = vmatmul.mubr.msk.bf16.gmra.mrb[76].mxu1 %vm2171_vm2, %v5442_v24  ;;  %v5483_v23 = vld [vmem:[%s5848_s17 + $0x1e0] sm:$0xff]  }
 0x10b   : > { %5147 = vmatprep.mubr.msk.bf16.mxu0 %vm2171_vm2, %v5443_v25  ;;  %5275 = vmatprep.mubr.msk.bf16.mxu1 %vm2171_vm2, %v5444_v26  ;;  %v5484_v24 = vld [vmem:[%s5848_s17 + $0x3e0] sm:$0xff]  }
 0x112   : > { %5148 = vmatmul.mubr.msk.bf16.gmra.mrb[80].mxu0 %vm2171_vm2, %v5445_v27  ;;  %5276 = vmatmul.mubr.msk.bf16.gmra.mrb[80].mxu1 %vm2171_vm2, %v5446_v28 }
 0x113   : > { %5151 = vmatprep.mubr.msk.bf16.mxu0 %vm2171_vm2, %v5447_v29  ;;  %5279 = vmatprep.mubr.msk.bf16.mxu1 %vm2171_vm2, %v5448_v30 }
 0x11a   : > { %5152 = vmatmul.mubr.msk.bf16.gmra.mrb[84].mxu0 %vm2171_vm2, %v5449_v31  ;;  %5280 = vmatmul.mubr.msk.bf16.gmra.mrb[84].mxu1 %vm2171_vm2, %v5450_v32  ;;  %v5485_v31 = vld [vmem:[%s5848_s17 + $0x1e8] sm:$0xff]  }
 0x11b   : > { %5155 = vmatprep.mubr.msk.bf16.mxu0 %vm2171_vm2, %v5451_v33  ;;  %5283 = vmatprep.mubr.msk.bf16.mxu1 %vm2171_vm2, %v5452_v34  ;;  %v5486_v32 = vld [vmem:[%s5848_s17 + $0x3e8] sm:$0xff]  }
 0x122   : > { %5156 = vmatmul.mubr.msk.bf16.gmra.mrb[88].mxu0 %vm2171_vm2, %v5453_v35  ;;  %5284 = vmatmul.mubr.msk.bf16.gmra.mrb[88].mxu1 %vm2171_vm2, %v5454_v36  ;;  %v5487_v35 = vld [vmem:[%s5848_s17 + $0x1f0] sm:$0xff]  }
 0x123   : > { %5159 = vmatprep.mubr.msk.bf16.mxu0 %vm2171_vm2, %v5455_v37  ;;  %5287 = vmatprep.mubr.msk.bf16.mxu1 %vm2171_vm2, %v5456_v38  ;;  %v5488_v36 = vld [vmem:[%s5848_s17 + $0x3f0] sm:$0xff]  }
 0x12a   : > { %5160 = vmatmul.mubr.msk.bf16.gmra.mrb[92].mxu0 %vm2171_vm2, %v5457_v39  ;;  %5288 = vmatmul.mubr.msk.bf16.gmra.mrb[92].mxu1 %vm2171_vm2, %v5458_v40 }
 0x12b   : > { %5163 = vmatprep.mubr.msk.bf16.mxu0 %vm2171_vm2, %v5459_v41  ;;  %5291 = vmatprep.mubr.msk.bf16.mxu1 %vm2171_vm2, %v5460_v42 }
 0x132   : > { %5164 = vmatmul.mubr.msk.bf16.gmra.mrb[96].mxu0 %vm2171_vm2, %v5461_v43  ;;  %5292 = vmatmul.mubr.msk.bf16.gmra.mrb[96].mxu1 %vm2171_vm2, %v5462_v44  ;;  %v5489_v43 = vld [vmem:[%s5848_s17 + $0x1f8] sm:$0xff]  }
 0x133   : > { %5167 = vmatprep.mubr.msk.bf16.mxu0 %vm2171_vm2, %v5463_v45  ;;  %5295 = vmatprep.mubr.msk.bf16.mxu1 %vm2171_vm2, %v5464_v46  ;;  %v5490_v44 = vld [vmem:[%s5848_s17 + $0x3f8] sm:$0xff]  }
 0x13a   : > { %5168 = vmatmul.mubr.msk.bf16.gmra.mrb[100].mxu0 %vm2171_vm2, %v5465_v47  ;;  %5296 = vmatmul.mubr.msk.bf16.gmra.mrb[100].mxu1 %vm2171_vm2, %v5466_v48 }
 0x13b   : > { %5171 = vmatprep.mubr.msk.bf16.mxu0 %vm2171_vm2, %v5467_v49  ;;  %5299 = vmatprep.mubr.msk.bf16.mxu1 %vm2171_vm2, %v5468_v50 }
 0x142   : > { %5172 = vmatmul.mubr.msk.bf16.gmra.mrb[104].mxu0 %vm2171_vm2, %v5469_v51  ;;  %5300 = vmatmul.mubr.msk.bf16.gmra.mrb[104].mxu1 %vm2171_vm2, %v5470_v52 }
 0x143   : > { %5175 = vmatprep.mubr.msk.bf16.mxu0 %vm2171_vm2, %v5471_v53  ;;  %5303 = vmatprep.mubr.msk.bf16.mxu1 %vm2171_vm2, %v5472_v54 }
 0x145   : > { %v6070_v55 = vpop.f32.mrb[0].mxu0  ;;  %v6072_v56 = vpop.f32.mrb[0].mxu1 }
 0x146   : > { %v6074_v57 = vpop.f32.mrb[1].mxu0  ;;  %v6076_v58 = vpop.f32.mrb[1].mxu1 }
 0x147   : > { %v6080_v61 = vpop.f32.mrb[2].mxu0  ;;  %v6082_v62 = vpop.f32.mrb[2].mxu1 }
 0x148   : > { %v6086_v1 = vpop.f32.mrb[3].mxu0  ;;  %v6088_v2 = vpop.f32.mrb[3].mxu1 }
 0x14a   : > { %5176 = vmatmul.mubr.msk.bf16.gmra.mrb[108].mxu0 %vm2171_vm2, %v5473_v59  ;;  %5304 = vmatmul.mubr.msk.bf16.gmra.mrb[108].mxu1 %vm2171_vm2, %v5474_v60 }
 0x14b   : > { %5179 = vmatprep.mubr.msk.bf16.mxu0 %vm2171_vm2, %v5475_v63  ;;  %5307 = vmatprep.mubr.msk.bf16.mxu1 %vm2171_vm2, %v5476_v0 }
 0x14d   : > { %v6094_v3 = vpop.f32.mrb[4].mxu0  ;;  %v6096_v4 = vpop.f32.mrb[4].mxu1 }
 0x14e   : > { %v6098_v5 = vpop.f32.mrb[5].mxu0  ;;  %v6100_v6 = vpop.f32.mrb[5].mxu1 }
 0x14f   : > { %v6104_v9 = vpop.f32.mrb[6].mxu0  ;;  %v6106_v10 = vpop.f32.mrb[6].mxu1 }
 0x150   : > { %v6110_v13 = vpop.f32.mrb[7].mxu0  ;;  %v6112_v14 = vpop.f32.mrb[7].mxu1 }
 0x152   : > { %5180 = vmatmul.mubr.msk.bf16.gmra.mrb[112].mxu0 %vm2171_vm2, %v5477_v7  ;;  %5308 = vmatmul.mubr.msk.bf16.gmra.mrb[112].mxu1 %vm2171_vm2, %v5478_v8 }
 0x153   : > { %5183 = vmatprep.mubr.msk.bf16.mxu0 %vm2171_vm2, %v5479_v11  ;;  %5311 = vmatprep.mubr.msk.bf16.mxu1 %vm2171_vm2, %v5480_v12 }
 0x155   : > { %v6118_v15 = vpop.f32.mrb[8].mxu0  ;;  %v6120_v16 = vpop.f32.mrb[8].mxu1 }
 0x156   : > { %v6122_v17 = vpop.f32.mrb[9].mxu0  ;;  %v6124_v18 = vpop.f32.mrb[9].mxu1 }
 0x157   : > { %v6128_v21 = vpop.f32.mrb[10].mxu0  ;;  %v6130_v22 = vpop.f32.mrb[10].mxu1 }
 0x158   : > { %v6134_v25 = vpop.f32.mrb[11].mxu0  ;;  %v6136_v26 = vpop.f32.mrb[11].mxu1 }
 0x15a   : > { %5184 = vmatmul.mubr.msk.bf16.gmra.mrb[116].mxu0 %vm2171_vm2, %v5481_v19  ;;  %5312 = vmatmul.mubr.msk.bf16.gmra.mrb[116].mxu1 %vm2171_vm2, %v5482_v20 }
 0x15b   : > { %5187 = vmatprep.mubr.msk.bf16.mxu0 %vm2171_vm2, %v5483_v23  ;;  %5315 = vmatprep.mubr.msk.bf16.mxu1 %vm2171_vm2, %v5484_v24 }
 0x15d   : > { %v6142_v27 = vpop.f32.mrb[12].mxu0  ;;  %v6144_v28 = vpop.f32.mrb[12].mxu1 }
 0x15e   : > { %v6146_v29 = vpop.f32.mrb[13].mxu0  ;;  %v6148_v30 = vpop.f32.mrb[13].mxu1 }
 0x15f   : > { %v6152_v33 = vpop.f32.mrb[14].mxu0  ;;  %v6154_v34 = vpop.f32.mrb[14].mxu1 }
 0x160   : > { %v6158_v37 = vpop.f32.mrb[15].mxu0  ;;  %v6160_v38 = vpop.f32.mrb[15].mxu1 }
 0x162   : > { %5188 = vmatmul.mubr.msk.bf16.gmra.mrb[120].mxu0 %vm2171_vm2, %v5485_v31  ;;  %5316 = vmatmul.mubr.msk.bf16.gmra.mrb[120].mxu1 %vm2171_vm2, %v5486_v32 }
 0x163   : > { %5191 = vmatprep.mubr.msk.bf16.mxu0 %vm2171_vm2, %v5487_v35  ;;  %5319 = vmatprep.mubr.msk.bf16.mxu1 %vm2171_vm2, %v5488_v36 }
 0x165   : > { %v6166_v39 = vpop.f32.mrb[16].mxu0  ;;  %v6168_v40 = vpop.f32.mrb[16].mxu1 }
 0x166   : > { %v6170_v41 = vpop.f32.mrb[17].mxu0  ;;  %v6172_v42 = vpop.f32.mrb[17].mxu1 }
 0x167   : > { %v6176_v45 = vpop.f32.mrb[18].mxu0  ;;  %v6178_v46 = vpop.f32.mrb[18].mxu1 }
 0x168   : > { %v6180_v47 = vpop.f32.mrb[19].mxu0  ;;  %v6182_v48 = vpop.f32.mrb[19].mxu1 }
 0x16a   : > { %5192 = vmatmul.mubr.msk.bf16.gmra.mrb[124].mxu0 %vm2171_vm2, %v5489_v43  ;;  %5320 = vmatmul.mubr.msk.bf16.gmra.mrb[124].mxu1 %vm2171_vm2, %v5490_v44 }
 0x16d   : > { %v6186_v49 = vpop.f32.mrb[20].mxu0  ;;  %v6188_v50 = vpop.f32.mrb[20].mxu1 }
 0x16e   : > { %v6190_v51 = vpop.f32.mrb[21].mxu0  ;;  %v6192_v52 = vpop.f32.mrb[21].mxu1 }
 0x16f   : > { %v6194_v53 = vpop.f32.mrb[22].mxu0  ;;  %v6196_v54 = vpop.f32.mrb[22].mxu1 }
 0x170   : > { %v6198_v59 = vpop.f32.mrb[23].mxu0  ;;  %v6200_v60 = vpop.f32.mrb[23].mxu1 }
 0x175   : > { %v6202_v63 = vpop.f32.mrb[24].mxu0  ;;  %v6204_v0 = vpop.f32.mrb[24].mxu1 }
 0x176   : > { %6613 = vst [vmem:[#allocation3_spill] sm:$0xff] %v6204_v0  ;;  %v6206_v7 = vpop.f32.mrb[25].mxu0  ;;  %v6208_v8 = vpop.f32.mrb[25].mxu1 }
 0x177   : > { %6614 = vst [vmem:[#allocation4_spill] sm:$0xff] %v6206_v7  ;;  %6615 = vst [vmem:[#allocation5_spill] sm:$0xff] %v6208_v8  ;;  %v6210_v11 = vpop.f32.mrb[26].mxu0  ;;  %v6212_v12 = vpop.f32.mrb[26].mxu1 }
 0x178   : > { %6616 = vst [vmem:[#allocation6_spill] sm:$0xff] %v6210_v11  ;;  %6617 = vst [vmem:[#allocation7_spill] sm:$0xff] %v6212_v12  ;;  %v6214_v19 = vpop.f32.mrb[27].mxu0  ;;  %v6216_v20 = vpop.f32.mrb[27].mxu1 }
 0x179   : > { %6618 = vst [vmem:[#allocation8_spill] sm:$0xff] %v6214_v19  ;;  %6619 = vst [vmem:[#allocation9_spill] sm:$0xff] %v6216_v20 }
 0x17d   : > { %v6218_v23 = vpop.f32.mrb[28].mxu0  ;;  %v6220_v24 = vpop.f32.mrb[28].mxu1 }
 0x17e   : > { %6620 = vst [vmem:[#allocation10_spill] sm:$0xff] %v6218_v23  ;;  %6621 = vst [vmem:[#allocation11_spill] sm:$0xff] %v6220_v24  ;;  %v6222_v31 = vpop.f32.mrb[29].mxu0  ;;  %v6224_v32 = vpop.f32.mrb[29].mxu1 }
 0x17f   : > { %6622 = vst [vmem:[#allocation12_spill] sm:$0xff] %v6222_v31  ;;  %6623 = vst [vmem:[#allocation13_spill] sm:$0xff] %v6224_v32  ;;  %v6226_v35 = vpop.f32.mrb[30].mxu0  ;;  %v6228_v36 = vpop.f32.mrb[30].mxu1 }
 0x180   : > { %6624 = vst [vmem:[#allocation14_spill] sm:$0xff] %v6226_v35  ;;  %6625 = vst [vmem:[#allocation15_spill] sm:$0xff] %v6228_v36  ;;  %v6230_v43 = vpop.f32.mrb[31].mxu0  ;;  %v6232_v44 = vpop.f32.mrb[31].mxu1 }
 0x181   : > { %6626 = vst [vmem:[#allocation16_spill] sm:$0xff] %v6230_v43  ;;  %6627 = vst [vmem:[#allocation17_spill] sm:$0xff] %v6232_v44 }
 0x185   : > { %v6234_v12 = vpop.f32.mrb[32].mxu0  ;;  %v6236_v19 = vpop.f32.mrb[32].mxu1 }
 0x186   : > { %6628 = vst [vmem:[#allocation18_spill] sm:$0xff] %v6234_v12  ;;  %6629 = vst [vmem:[#allocation19_spill] sm:$0xff] %v6236_v19  ;;  %v6238_v20 = vpop.f32.mrb[33].mxu0  ;;  %v6240_v23 = vpop.f32.mrb[33].mxu1 }
 0x187   : > { %6630 = vst [vmem:[#allocation20_spill] sm:$0xff] %v6238_v20  ;;  %6631 = vst [vmem:[#allocation21_spill] sm:$0xff] %v6240_v23  ;;  %v6242_v24 = vpop.f32.mrb[34].mxu0  ;;  %v6244_v31 = vpop.f32.mrb[34].mxu1 }
 0x188   : > { %6632 = vst [vmem:[#allocation22_spill] sm:$0xff] %v6242_v24  ;;  %6633 = vst [vmem:[#allocation23_spill] sm:$0xff] %v6244_v31  ;;  %v6246_v32 = vpop.f32.mrb[35].mxu0  ;;  %v6248_v35 = vpop.f32.mrb[35].mxu1 }
 0x189   : > { %6634 = vst [vmem:[#allocation24_spill] sm:$0xff] %v6246_v32  ;;  %6635 = vst [vmem:[#allocation25_spill] sm:$0xff] %v6248_v35 }
 0x18d   : > { %v6250_v36 = vpop.f32.mrb[36].mxu0  ;;  %v6252_v43 = vpop.f32.mrb[36].mxu1 }
 0x18e   : > { %6636 = vst [vmem:[#allocation26_spill] sm:$0xff] %v6250_v36  ;;  %6637 = vst [vmem:[#allocation27_spill] sm:$0xff] %v6252_v43  ;;  %v6254_v44 = vpop.f32.mrb[37].mxu0  ;;  %v6256_v12 = vpop.f32.mrb[37].mxu1 }
 0x18f   : > { %6638 = vst [vmem:[#allocation28_spill] sm:$0xff] %v6254_v44  ;;  %6639 = vst [vmem:[#allocation29_spill] sm:$0xff] %v6256_v12  ;;  %v6258_v19 = vpop.f32.mrb[38].mxu0  ;;  %v6260_v20 = vpop.f32.mrb[38].mxu1 }
 0x190   : > { %6640 = vst [vmem:[#allocation30_spill] sm:$0xff] %v6258_v19  ;;  %6641 = vst [vmem:[#allocation31_spill] sm:$0xff] %v6260_v20  ;;  %v6262_v23 = vpop.f32.mrb[39].mxu0  ;;  %v6264_v24 = vpop.f32.mrb[39].mxu1 }
 0x191   : > { %6642 = vst [vmem:[#allocation32_spill] sm:$0xff] %v6262_v23  ;;  %6643 = vst [vmem:[#allocation33_spill] sm:$0xff] %v6264_v24 }
 0x195   : > { %v6266_v31 = vpop.f32.mrb[40].mxu0  ;;  %v6268_v32 = vpop.f32.mrb[40].mxu1 }
 0x196   : > { %6644 = vst [vmem:[#allocation34_spill] sm:$0xff] %v6266_v31  ;;  %6645 = vst [vmem:[#allocation35_spill] sm:$0xff] %v6268_v32  ;;  %v6270_v35 = vpop.f32.mrb[41].mxu0  ;;  %v6272_v36 = vpop.f32.mrb[41].mxu1 }
 0x197   : > { %6646 = vst [vmem:[#allocation36_spill] sm:$0xff] %v6270_v35  ;;  %6647 = vst [vmem:[#allocation37_spill] sm:$0xff] %v6272_v36  ;;  %v6274_v43 = vpop.f32.mrb[42].mxu0  ;;  %v6276_v44 = vpop.f32.mrb[42].mxu1 }
 0x198   : > { %6648 = vst [vmem:[#allocation38_spill] sm:$0xff] %v6274_v43  ;;  %6649 = vst [vmem:[#allocation39_spill] sm:$0xff] %v6276_v44  ;;  %v6278_v12 = vpop.f32.mrb[43].mxu0  ;;  %v6280_v19 = vpop.f32.mrb[43].mxu1 }
 0x199   : > { %6650 = vst [vmem:[#allocation40_spill] sm:$0xff] %v6278_v12  ;;  %6651 = vst [vmem:[#allocation41_spill] sm:$0xff] %v6280_v19 }
 0x19d   : > { %v6282_v20 = vpop.f32.mrb[44].mxu0  ;;  %v6284_v23 = vpop.f32.mrb[44].mxu1 }
 0x19e   : > { %6652 = vst [vmem:[#allocation42_spill] sm:$0xff] %v6282_v20  ;;  %6653 = vst [vmem:[#allocation43_spill] sm:$0xff] %v6284_v23  ;;  %v6286_v24 = vpop.f32.mrb[45].mxu0  ;;  %v6288_v31 = vpop.f32.mrb[45].mxu1 }
 0x19f   : > { %6654 = vst [vmem:[#allocation44_spill] sm:$0xff] %v6286_v24  ;;  %6655 = vst [vmem:[#allocation45_spill] sm:$0xff] %v6288_v31  ;;  %v6290_v32 = vpop.f32.mrb[46].mxu0  ;;  %v6292_v35 = vpop.f32.mrb[46].mxu1 }
 0x1a0   : > { %6656 = vst [vmem:[#allocation46_spill] sm:$0xff] %v6290_v32  ;;  %6657 = vst [vmem:[#allocation47_spill] sm:$0xff] %v6292_v35  ;;  %v6294_v36 = vpop.f32.mrb[47].mxu0  ;;  %v6296_v43 = vpop.f32.mrb[47].mxu1 }
 0x1a1   : > { %6658 = vst [vmem:[#allocation48_spill] sm:$0xff] %v6294_v36  ;;  %6659 = vst [vmem:[#allocation49_spill] sm:$0xff] %v6296_v43 }
 0x1a5   : > { %v6298_v44 = vpop.f32.mrb[48].mxu0  ;;  %v6300_v12 = vpop.f32.mrb[48].mxu1 }
 0x1a6   : > { %6660 = vst [vmem:[#allocation50_spill] sm:$0xff] %v6298_v44  ;;  %6661 = vst [vmem:[#allocation51_spill] sm:$0xff] %v6300_v12  ;;  %v6302_v19 = vpop.f32.mrb[49].mxu0  ;;  %v6304_v20 = vpop.f32.mrb[49].mxu1 }
 0x1a7   : > { %6662 = vst [vmem:[#allocation52_spill] sm:$0xff] %v6302_v19  ;;  %6663 = vst [vmem:[#allocation53_spill] sm:$0xff] %v6304_v20  ;;  %v6306_v23 = vpop.f32.mrb[50].mxu0  ;;  %v6308_v24 = vpop.f32.mrb[50].mxu1 }
 0x1a8   : > { %6664 = vst [vmem:[#allocation54_spill] sm:$0xff] %v6306_v23  ;;  %6665 = vst [vmem:[#allocation55_spill] sm:$0xff] %v6308_v24  ;;  %v6310_v31 = vpop.f32.mrb[51].mxu0  ;;  %v6312_v32 = vpop.f32.mrb[51].mxu1 }
 0x1a9   : > { %6666 = vst [vmem:[#allocation56_spill] sm:$0xff] %v6310_v31  ;;  %6667 = vst [vmem:[#allocation57_spill] sm:$0xff] %v6312_v32 }
 0x1ad   : > { %v6314_v35 = vpop.f32.mrb[52].mxu0  ;;  %v6316_v36 = vpop.f32.mrb[52].mxu1 }
 0x1ae   : > { %6668 = vst [vmem:[#allocation58_spill] sm:$0xff] %v6314_v35  ;;  %6669 = vst [vmem:[#allocation59_spill] sm:$0xff] %v6316_v36  ;;  %v6318_v43 = vpop.f32.mrb[53].mxu0  ;;  %v6320_v44 = vpop.f32.mrb[53].mxu1 }
 0x1af   : > { %6670 = vst [vmem:[#allocation60_spill] sm:$0xff] %v6318_v43  ;;  %6671 = vst [vmem:[#allocation61_spill] sm:$0xff] %v6320_v44  ;;  %v6322_v12 = vpop.f32.mrb[54].mxu0  ;;  %v6324_v19 = vpop.f32.mrb[54].mxu1 }
 0x1b0   : > { %6672 = vst [vmem:[#allocation62_spill] sm:$0xff] %v6322_v12  ;;  %6673 = vst [vmem:[#allocation63_spill] sm:$0xff] %v6324_v19  ;;  %v6326_v20 = vpop.f32.mrb[55].mxu0  ;;  %v6328_v23 = vpop.f32.mrb[55].mxu1 }
 0x1b1   : > { %6674 = vst [vmem:[#allocation64_spill] sm:$0xff] %v6326_v20  ;;  %6675 = vst [vmem:[#allocation65_spill] sm:$0xff] %v6328_v23 }
 0x1b5   : > { %v6330_v24 = vpop.f32.mrb[56].mxu0  ;;  %v6332_v32 = vpop.f32.mrb[56].mxu1 }
 0x1b6   : > { %6676 = vst [vmem:[#allocation66_spill] sm:$0xff] %v6330_v24  ;;  %6677 = vst [vmem:[#allocation67_spill] sm:$0xff] %v6332_v32  ;;  %v6334_v35 = vpop.f32.mrb[57].mxu0  ;;  %v6336_v36 = vpop.f32.mrb[57].mxu1 }
 0x1b7   : > { %6678 = vst [vmem:[#allocation68_spill] sm:$0xff] %v6334_v35  ;;  %6679 = vst [vmem:[#allocation69_spill] sm:$0xff] %v6336_v36  ;;  %v6338_v43 = vpop.f32.mrb[58].mxu0  ;;  %v6340_v44 = vpop.f32.mrb[58].mxu1 }
 0x1b8   : > { %6680 = vst [vmem:[#allocation70_spill] sm:$0xff] %v6338_v43  ;;  %6681 = vst [vmem:[#allocation71_spill] sm:$0xff] %v6340_v44  ;;  %v6342_v12 = vpop.f32.mrb[59].mxu0  ;;  %v6344_v19 = vpop.f32.mrb[59].mxu1 }
 0x1b9   : > { %6682 = vst [vmem:[#allocation72_spill] sm:$0xff] %v6342_v12  ;;  %6683 = vst [vmem:[#allocation73_spill] sm:$0xff] %v6344_v19 }
 0x1bd   : > { %v6346_v20 = vpop.f32.mrb[60].mxu0  ;;  %v6348_v23 = vpop.f32.mrb[60].mxu1 }
 0x1be   : > { %6684 = vst [vmem:[#allocation74_spill] sm:$0xff] %v6346_v20  ;;  %6685 = vst [vmem:[#allocation75_spill] sm:$0xff] %v6348_v23  ;;  %v6350_v24 = vpop.f32.mrb[61].mxu0  ;;  %v6352_v31 = vpop.f32.mrb[61].mxu1 }
 0x1bf   : > { %6686 = vst [vmem:[#allocation76_spill] sm:$0xff] %v6350_v24  ;;  %6687 = vst [vmem:[#allocation77_spill] sm:$0xff] %v6352_v31  ;;  %v6354_v32 = vpop.f32.mrb[62].mxu0  ;;  %v6356_v35 = vpop.f32.mrb[62].mxu1 }
 0x1c0   : > { %6688 = vst [vmem:[#allocation78_spill] sm:$0xff] %v6354_v32  ;;  %6689 = vst [vmem:[#allocation79_spill] sm:$0xff] %v6356_v35  ;;  %v6358_v36 = vpop.f32.mrb[63].mxu0  ;;  %v6360_v43 = vpop.f32.mrb[63].mxu1  ;;  %v6369_v32 = vld [vmem:[%s6611_s2] ss:$0 sm:$0xff] }
 0x1c1   : > { %6690 = vst [vmem:[#allocation80_spill] sm:$0xff] %v6358_v36  ;;  %6691 = vst [vmem:[#allocation81_spill] sm:$0xff] %v6360_v43 }
 0x1c5   : > { %v5133_v19 = vpop.f32.mrb[64].mxu0  ;;  %v5261_v12 = vpop.f32.mrb[64].mxu1 }
 0x1c6   : > { %v3622_v20 = vmax.f32 %v6070_v55, %v5133_v19  ;;  %v3686_v23 = vmax.f32 %v6072_v56, %v5261_v12  ;;  %v2853_v24 = vpop.f32.mrb[65].mxu0  ;;  %v3365_v44 = vpop.f32.mrb[65].mxu1 }
 0x1c7   : > { %v3620_v36 = vmax.f32 %v6074_v57, %v2853_v24  ;;  %v3684_v43 = vmax.f32 %v6076_v58, %v3365_v44  ;;  %v5134_v35 = vpop.f32.mrb[66].mxu0  ;;  %v5262_v31 = vpop.f32.mrb[66].mxu1 }
 0x1c8   : > { %v3750_v11 = vmax.f32 %v3622_v20, %v3686_v23  ;;  %v3623_v8 = vmax.f32 %v6080_v61, %v5134_v35  ;;  %v3687_v55 = vmax.f32 %v6082_v62, %v5262_v31  ;;  %v2856_v56 = vpop.f32.mrb[67].mxu0  ;;  %v3368_v12 = vpop.f32.mrb[67].mxu1 }
 0x1c9   : > { %v3748_v19 = vmax.f32 %v3620_v36, %v3684_v43  ;;  %v3621_v7 = vmax.f32 %v6086_v1, %v2856_v56  ;;  %v3685_v0 = vmax.f32 %v6088_v2, %v3368_v12 }
 0x1ca   : > { %v3821_v57 = vadd.f32 %v6369_v32, %v3750_v11  ;;  %v3751_v24 = vmax.f32 %v3623_v8, %v3687_v55 }
 0x1cb   : > { %v3819_v58 = vadd.f32 %v6369_v32, %v3748_v19  ;;  %v3749_v44 = vmax.f32 %v3621_v7, %v3685_v0 }
 0x1cc   : > { %v3822_v61 = vadd.f32 %v6369_v32, %v3751_v24  ;;  %v3885_v31 = vmax.f32 %v3821_v57, 0.0 }
 0x1cd   : > { %v3820_v20 = vadd.f32 %v6369_v32, %v3749_v44  ;;  %v5137_v23 = vpop.f32.mrb[68].mxu0  ;;  %v5265_v62 = vpop.f32.mrb[68].mxu1  ;;  %v3883_v11 = vmax.f32 %v3819_v58, 0.0 }
 0x1ce   : > { %v3886_v35 = vmax.f32 %v3822_v61, 0.0  ;;  %v3626_v36 = vmax.f32 %v6094_v3, %v5137_v23  ;;  %v3690_v1 = vmax.f32 %v6096_v4, %v5265_v62  ;;  %v2869_v2 = vpop.f32.mrb[69].mxu0  ;;  %v3381_v43 = vpop.f32.mrb[69].mxu1 }
 0x1cf   : > { %v3884_v0 = vmax.f32 %v3820_v20, 0.0  ;;  %v3624_v7 = vmax.f32 %v6098_v5, %v2869_v2  ;;  %v3688_v8 = vmax.f32 %v6100_v6, %v3381_v43  ;;  %v5138_v55 = vpop.f32.mrb[70].mxu0  ;;  %v5266_v56 = vpop.f32.mrb[70].mxu1 }
 0x1d0   : > { %v4741_v3 = vpack.c.bf16 %v3886_v35, %v3885_v31  ;;  %v3754_v12 = vmax.f32 %v3626_v36, %v3690_v1  ;;  %v3627_v4 = vmax.f32 %v6104_v9, %v5138_v55  ;;  %v3691_v19 = vmax.f32 %v6106_v10, %v5266_v56  ;;  %v2872_v57 = vpop.f32.mrb[71].mxu0  ;;  %v3384_v24 = vpop.f32.mrb[71].mxu1 }
 0x1d1   : > { %v4736_v58 = vpack.c.bf16 %v3884_v0, %v3883_v11  ;;  %v3752_v44 = vmax.f32 %v3624_v7, %v3688_v8  ;;  %v3625_v61 = vmax.f32 %v6110_v13, %v2872_v57  ;;  %v3689_v20 = vmax.f32 %v6112_v14, %v3384_v24 }
 0x1d2   : > { %4893 = vst [vmem:[%s6387_s22 + $0x8] sm:$0xff] %v4741_v3   ;;  %v3825_v5 = vadd.f32 %v6369_v32, %v3754_v12  ;;  %v3755_v6 = vmax.f32 %v3627_v4, %v3691_v19 }
 0x1d3   : > { %4737 = vst [vmem:[%s6387_s22] sm:$0xff] %v4736_v58   ;;  %v3823_v23 = vadd.f32 %v6369_v32, %v3752_v44  ;;  %v3753_v62 = vmax.f32 %v3625_v61, %v3689_v20 }
 0x1d4   : > { %v3826_v9 = vadd.f32 %v6369_v32, %v3755_v6  ;;  %v3889_v36 = vmax.f32 %v3825_v5, 0.0 }
 0x1d5   : > { %v3824_v10 = vadd.f32 %v6369_v32, %v3753_v62  ;;  %v5141_v31 = vpop.f32.mrb[72].mxu0  ;;  %v5269_v35 = vpop.f32.mrb[72].mxu1  ;;  %v3887_v11 = vmax.f32 %v3823_v23, 0.0 }
 0x1d6   : > { %v3890_v1 = vmax.f32 %v3826_v9, 0.0  ;;  %v3630_v13 = vmax.f32 %v6118_v15, %v5141_v31  ;;  %v3694_v14 = vmax.f32 %v6120_v16, %v5269_v35  ;;  %v2885_v2 = vpop.f32.mrb[73].mxu0  ;;  %v3397_v43 = vpop.f32.mrb[73].mxu1 }
 0x1d7   : > { %v3888_v0 = vmax.f32 %v3824_v10, 0.0  ;;  %v3628_v7 = vmax.f32 %v6122_v17, %v2885_v2  ;;  %v3692_v8 = vmax.f32 %v6124_v18, %v3397_v43  ;;  %v5142_v55 = vpop.f32.mrb[74].mxu0  ;;  %v5270_v56 = vpop.f32.mrb[74].mxu1 }
 0x1d8   : > { %v4751_v3 = vpack.c.bf16 %v3890_v1, %v3889_v36  ;;  %v3758_v12 = vmax.f32 %v3630_v13, %v3694_v14  ;;  %v3631_v4 = vmax.f32 %v6128_v21, %v5142_v55  ;;  %v3695_v15 = vmax.f32 %v6130_v22, %v5270_v56  ;;  %v2888_v19 = vpop.f32.mrb[75].mxu0  ;;  %v3400_v16 = vpop.f32.mrb[75].mxu1 }
 0x1d9   : > { %v4746_v57 = vpack.c.bf16 %v3888_v0, %v3887_v11  ;;  %v3756_v24 = vmax.f32 %v3628_v7, %v3692_v8  ;;  %v3629_v58 = vmax.f32 %v6134_v25, %v2888_v19  ;;  %v3693_v44 = vmax.f32 %v6136_v26, %v3400_v16 }
 0x1da   : > { %4895 = vst [vmem:[%s6387_s22 + $0x18] sm:$0xff] %v4751_v3   ;;  %v3829_v17 = vadd.f32 %v6369_v32, %v3758_v12  ;;  %v3759_v18 = vmax.f32 %v3631_v4, %v3695_v15 }
 0x1db   : > { %4894 = vst [vmem:[%s6387_s22 + $0x10] sm:$0xff] %v4746_v57   ;;  %v3827_v61 = vadd.f32 %v6369_v32, %v3756_v24  ;;  %v3757_v20 = vmax.f32 %v3629_v58, %v3693_v44 }
 0x1dc   : > { %v3830_v21 = vadd.f32 %v6369_v32, %v3759_v18  ;;  %v3893_v23 = vmax.f32 %v3829_v17, 0.0 }
 0x1dd   : > { %v3828_v22 = vadd.f32 %v6369_v32, %v3757_v20  ;;  %v5145_v5 = vpop.f32.mrb[76].mxu0  ;;  %v5273_v6 = vpop.f32.mrb[76].mxu1  ;;  %v3891_v31 = vmax.f32 %v3827_v61, 0.0 }
 0x1de   : > { %v3894_v62 = vmax.f32 %v3830_v21, 0.0  ;;  %v3634_v25 = vmax.f32 %v6142_v27, %v5145_v5  ;;  %v3698_v26 = vmax.f32 %v6144_v28, %v5273_v6  ;;  %v2901_v9 = vpop.f32.mrb[77].mxu0  ;;  %v3413_v10 = vpop.f32.mrb[77].mxu1 }
 0x1df   : > { %v3892_v35 = vmax.f32 %v3828_v22, 0.0  ;;  %v3632_v36 = vmax.f32 %v6146_v29, %v2901_v9  ;;  %v3696_v1 = vmax.f32 %v6148_v30, %v3413_v10  ;;  %v5146_v13 = vpop.f32.mrb[78].mxu0  ;;  %v5274_v14 = vpop.f32.mrb[78].mxu1 }
 0x1e0   : > { %v4761_v2 = vpack.c.bf16 %v3894_v62, %v3893_v23  ;;  %v3762_v43 = vmax.f32 %v3634_v25, %v3698_v26  ;;  %v3635_v11 = vmax.f32 %v6152_v33, %v5146_v13  ;;  %v3699_v27 = vmax.f32 %v6154_v34, %v5274_v14  ;;  %v2904_v0 = vpop.f32.mrb[79].mxu0  ;;  %v3416_v28 = vpop.f32.mrb[79].mxu1 }
 0x1e1   : > { %v4756_v7 = vpack.c.bf16 %v3892_v35, %v3891_v31  ;;  %v3760_v8 = vmax.f32 %v3632_v36, %v3696_v1  ;;  %v3633_v55 = vmax.f32 %v6158_v37, %v2904_v0  ;;  %v3697_v56 = vmax.f32 %v6160_v38, %v3416_v28 }
 0x1e2   : > { %4897 = vst [vmem:[%s6387_s22 + $0x28] sm:$0xff] %v4761_v2   ;;  %v3833_v29 = vadd.f32 %v6369_v32, %v3762_v43  ;;  %v3763_v30 = vmax.f32 %v3635_v11, %v3699_v27 }
 0x1e3   : > { %4896 = vst [vmem:[%s6387_s22 + $0x20] sm:$0xff] %v4756_v7   ;;  %v3831_v3 = vadd.f32 %v6369_v32, %v3760_v8  ;;  %v3761_v12 = vmax.f32 %v3633_v55, %v3697_v56 }
 0x1e4   : > { %v3834_v33 = vadd.f32 %v6369_v32, %v3763_v30  ;;  %v3897_v19 = vmax.f32 %v3833_v29, 0.0 }
 0x1e5   : > { %v3832_v34 = vadd.f32 %v6369_v32, %v3761_v12  ;;  %v5149_v4 = vpop.f32.mrb[80].mxu0  ;;  %v5277_v15 = vpop.f32.mrb[80].mxu1  ;;  %v3895_v58 = vmax.f32 %v3831_v3, 0.0 }
 0x1e6   : > { %v3898_v16 = vmax.f32 %v3834_v33, 0.0  ;;  %v3638_v37 = vmax.f32 %v6166_v39, %v5149_v4  ;;  %v3702_v38 = vmax.f32 %v6168_v40, %v5277_v15  ;;  %v2917_v57 = vpop.f32.mrb[81].mxu0  ;;  %v3429_v24 = vpop.f32.mrb[81].mxu1 }
 0x1e7   : > { %v3896_v44 = vmax.f32 %v3832_v34, 0.0  ;;  %v3636_v17 = vmax.f32 %v6170_v41, %v2917_v57  ;;  %v3700_v18 = vmax.f32 %v6172_v42, %v3429_v24  ;;  %v5150_v61 = vpop.f32.mrb[82].mxu0  ;;  %v5278_v20 = vpop.f32.mrb[82].mxu1 }
 0x1e8   : > { %v4771_v21 = vpack.c.bf16 %v3898_v16, %v3897_v19  ;;  %v3766_v22 = vmax.f32 %v3638_v37, %v3702_v38  ;;  %v3639_v5 = vmax.f32 %v6176_v45, %v5150_v61  ;;  %v3703_v39 = vmax.f32 %v6178_v46, %v5278_v20  ;;  %v2920_v6 = vpop.f32.mrb[83].mxu0  ;;  %v3432_v40 = vpop.f32.mrb[83].mxu1  ;;  %v6692_v37 = vld [vmem:[#allocation3_spill] sm:$0xff] }
 0x1e9   : > { %v4766_v23 = vpack.c.bf16 %v3896_v44, %v3895_v58  ;;  %v3764_v62 = vmax.f32 %v3636_v17, %v3700_v18  ;;  %v3637_v25 = vmax.f32 %v6180_v47, %v2920_v6  ;;  %v3701_v26 = vmax.f32 %v6182_v48, %v3432_v40  ;;  %v6693_v44 = vld [vmem:[#allocation4_spill] sm:$0xff]  ;;  %v6694_v18 = vld [vmem:[#allocation5_spill] sm:$0xff]  ;;  %v6696_v40 = vld [vmem:[#allocation7_spill] sm:$0xff] }
 0x1ea   : > { %4899 = vst [vmem:[%s6387_s22 + $0x38] sm:$0xff] %v4771_v21   ;;  %v3837_v41 = vadd.f32 %v6369_v32, %v3766_v22  ;;  %v3767_v42 = vmax.f32 %v3639_v5, %v3703_v39  ;;  %v6695_v39 = vld [vmem:[#allocation6_spill] sm:$0xff] }
 0x1eb   : > { %4898 = vst [vmem:[%s6387_s22 + $0x30] sm:$0xff] %v4766_v23   ;;  %v3835_v9 = vadd.f32 %v6369_v32, %v3764_v62  ;;  %v3765_v10 = vmax.f32 %v3637_v25, %v3701_v26 }
 0x1ec   : > { %v3838_v45 = vadd.f32 %v6369_v32, %v3767_v42  ;;  %v3901_v36 = vmax.f32 %v3837_v41, 0.0  ;;  %v6697_v41 = vld [vmem:[#allocation8_spill] sm:$0xff] }
 0x1ed   : > { %v3836_v46 = vadd.f32 %v6369_v32, %v3765_v10  ;;  %v5153_v31 = vpop.f32.mrb[84].mxu0  ;;  %v5281_v35 = vpop.f32.mrb[84].mxu1  ;;  %v3899_v2 = vmax.f32 %v3835_v9, 0.0  ;;  %v6698_v9 = vld [vmem:[#allocation9_spill] sm:$0xff] }
 0x1ee   : > { %v3902_v1 = vmax.f32 %v3838_v45, 0.0  ;;  %v3642_v47 = vmax.f32 %v6186_v49, %v5153_v31  ;;  %v3706_v48 = vmax.f32 %v6188_v50, %v5281_v35  ;;  %v2933_v13 = vpop.f32.mrb[85].mxu0  ;;  %v3445_v14 = vpop.f32.mrb[85].mxu1 }
 0x1ef   : > { %v3900_v43 = vmax.f32 %v3836_v46, 0.0  ;;  %v3640_v11 = vmax.f32 %v6190_v51, %v2933_v13  ;;  %v3704_v27 = vmax.f32 %v6192_v52, %v3445_v14  ;;  %v5154_v0 = vpop.f32.mrb[86].mxu0  ;;  %v5282_v28 = vpop.f32.mrb[86].mxu1 }
 0x1f0   : > { %v4781_v7 = vpack.c.bf16 %v3902_v1, %v3901_v36  ;;  %v3770_v8 = vmax.f32 %v3642_v47, %v3706_v48  ;;  %v3643_v55 = vmax.f32 %v6194_v53, %v5154_v0  ;;  %v3707_v49 = vmax.f32 %v6196_v54, %v5282_v28  ;;  %v2936_v56 = vpop.f32.mrb[87].mxu0  ;;  %v3448_v50 = vpop.f32.mrb[87].mxu1 }
 0x1f1   : > { %v4776_v29 = vpack.c.bf16 %v3900_v43, %v3899_v2  ;;  %v3768_v30 = vmax.f32 %v3640_v11, %v3704_v27  ;;  %v3641_v3 = vmax.f32 %v6198_v59, %v2936_v56  ;;  %v3705_v12 = vmax.f32 %v6200_v60, %v3448_v50  ;;  %v6699_v2 = vld [vmem:[#allocation10_spill] sm:$0xff]  ;;  %v6700_v11 = vld [vmem:[#allocation11_spill] sm:$0xff]  ;;  %v6702_v56 = vld [vmem:[#allocation13_spill] sm:$0xff] }
 0x1f2   : > { %4901 = vst [vmem:[%s6387_s22 + $0x48] sm:$0xff] %v4781_v7   ;;  %v3841_v51 = vadd.f32 %v6369_v32, %v3770_v8  ;;  %v3771_v52 = vmax.f32 %v3643_v55, %v3707_v49  ;;  %v6701_v55 = vld [vmem:[#allocation12_spill] sm:$0xff] }
 0x1f3   : > { %4900 = vst [vmem:[%s6387_s22 + $0x40] sm:$0xff] %v4776_v29   ;;  %v3839_v33 = vadd.f32 %v6369_v32, %v3768_v30  ;;  %v3769_v34 = vmax.f32 %v3641_v3, %v3705_v12 }
 0x1f4   : > { %v3842_v53 = vadd.f32 %v6369_v32, %v3771_v52  ;;  %v3905_v19 = vmax.f32 %v3841_v51, 0.0  ;;  %v6703_v51 = vld [vmem:[#allocation14_spill] sm:$0xff] }
 0x1f5   : > { %v3840_v54 = vadd.f32 %v6369_v32, %v3769_v34  ;;  %v5157_v4 = vpop.f32.mrb[88].mxu0  ;;  %v5285_v15 = vpop.f32.mrb[88].mxu1  ;;  %v3903_v24 = vmax.f32 %v3839_v33, 0.0  ;;  %v6704_v33 = vld [vmem:[#allocation15_spill] sm:$0xff] }
 0x1f6   : > { %v3906_v16 = vmax.f32 %v3842_v53, 0.0  ;;  %v3646_v59 = vmax.f32 %v6202_v63, %v5157_v4  ;;  %v3710_v60 = vmax.f32 %v6692_v37, %v5285_v15  ;;  %v2949_v38 = vpop.f32.mrb[89].mxu0  ;;  %v3461_v57 = vpop.f32.mrb[89].mxu1 }
 0x1f7   : > { %v3904_v58 = vmax.f32 %v3840_v54, 0.0  ;;  %v3644_v17 = vmax.f32 %v6693_v44, %v2949_v38  ;;  %v3708_v61 = vmax.f32 %v6694_v18, %v3461_v57  ;;  %v5158_v20 = vpop.f32.mrb[90].mxu0  ;;  %v5286_v21 = vpop.f32.mrb[90].mxu1 }
 0x1f8   : > { %v4791_v22 = vpack.c.bf16 %v3906_v16, %v3905_v19  ;;  %v3774_v5 = vmax.f32 %v3646_v59, %v3710_v60  ;;  %v3647_v6 = vmax.f32 %v6695_v39, %v5158_v20  ;;  %v3711_v63 = vmax.f32 %v6696_v40, %v5286_v21  ;;  %v2952_v23 = vpop.f32.mrb[91].mxu0  ;;  %v3464_v62 = vpop.f32.mrb[91].mxu1  ;;  %v6705_v19 = vld [vmem:[#allocation16_spill] sm:$0xff]  ;;  %v6706_v59 = vld [vmem:[#allocation17_spill] sm:$0xff]  ;;  %v6707_v21 = vld [vmem:[#allocation18_spill] sm:$0xff] }
 0x1f9   : > { %v4786_v25 = vpack.c.bf16 %v3904_v58, %v3903_v24  ;;  %v3772_v26 = vmax.f32 %v3644_v17, %v3708_v61  ;;  %v3645_v42 = vmax.f32 %v6697_v41, %v2952_v23  ;;  %v3709_v10 = vmax.f32 %v6698_v9, %v3464_v62  ;;  %v6709_v62 = vld [vmem:[#allocation20_spill] sm:$0xff] }
 0x1fa   : > { %4903 = vst [vmem:[%s6387_s22 + $0x58] sm:$0xff] %v4791_v22   ;;  %v3845_v45 = vadd.f32 %v6369_v32, %v3774_v5  ;;  %v3775_v46 = vmax.f32 %v3647_v6, %v3711_v63  ;;  %v6708_v5 = vld [vmem:[#allocation19_spill] sm:$0xff] }
 0x1fb   : > { %4902 = vst [vmem:[%s6387_s22 + $0x50] sm:$0xff] %v4786_v25   ;;  %v3843_v31 = vadd.f32 %v6369_v32, %v3772_v26  ;;  %v3773_v35 = vmax.f32 %v3645_v42, %v3709_v10  ;;  %v6710_v26 = vld [vmem:[#allocation21_spill] sm:$0xff] }
 0x1fc   : > { %v3846_v36 = vadd.f32 %v6369_v32, %v3775_v46  ;;  %v3909_v13 = vmax.f32 %v3845_v45, 0.0  ;;  %v6711_v46 = vld [vmem:[#allocation22_spill] sm:$0xff] }
 0x1fd   : > { %v3844_v1 = vadd.f32 %v6369_v32, %v3773_v35  ;;  %v5161_v47 = vpop.f32.mrb[92].mxu0  ;;  %v5289_v48 = vpop.f32.mrb[92].mxu1  ;;  %v3907_v7 = vmax.f32 %v3843_v31, 0.0  ;;  %v6712_v35 = vld [vmem:[#allocation23_spill] sm:$0xff] }
 0x1fe   : > { %v3910_v14 = vmax.f32 %v3846_v36, 0.0  ;;  %v3650_v43 = vmax.f32 %v6699_v2, %v5161_v47  ;;  %v3714_v27 = vmax.f32 %v6700_v11, %v5289_v48  ;;  %v2965_v0 = vpop.f32.mrb[93].mxu0  ;;  %v3477_v28 = vpop.f32.mrb[93].mxu1 }
 0x1ff   : > { %v3908_v8 = vmax.f32 %v3844_v1, 0.0  ;;  %v3648_v49 = vmax.f32 %v6701_v55, %v2965_v0  ;;  %v3712_v50 = vmax.f32 %v6702_v56, %v3477_v28  ;;  %v5162_v29 = vpop.f32.mrb[94].mxu0  ;;  %v5290_v30 = vpop.f32.mrb[94].mxu1 }
 0x200   : > { %v4801_v3 = vpack.c.bf16 %v3910_v14, %v3909_v13  ;;  %v3778_v12 = vmax.f32 %v3650_v43, %v3714_v27  ;;  %v3651_v52 = vmax.f32 %v6703_v51, %v5162_v29  ;;  %v3715_v34 = vmax.f32 %v6704_v33, %v5290_v30  ;;  %v2968_v53 = vpop.f32.mrb[95].mxu0  ;;  %v3480_v54 = vpop.f32.mrb[95].mxu1  ;;  %v6713_v14 = vld [vmem:[#allocation24_spill] sm:$0xff]  ;;  %v6714_v43 = vld [vmem:[#allocation25_spill] sm:$0xff]  ;;  %v6715_v30 = vld [vmem:[#allocation26_spill] sm:$0xff] }
 0x201   : > { %v4796_v4 = vpack.c.bf16 %v3908_v8, %v3907_v7  ;;  %v3776_v15 = vmax.f32 %v3648_v49, %v3712_v50  ;;  %v3649_v16 = vmax.f32 %v6705_v19, %v2968_v53  ;;  %v3713_v37 = vmax.f32 %v6706_v59, %v3480_v54  ;;  %v6717_v54 = vld [vmem:[#allocation28_spill] sm:$0xff] }
 0x202   : > { %4905 = vst [vmem:[%s6387_s22 + $0x68] sm:$0xff] %v4801_v3   ;;  %v3849_v60 = vadd.f32 %v6369_v32, %v3778_v12  ;;  %v3779_v38 = vmax.f32 %v3651_v52, %v3715_v34  ;;  %v6716_v12 = vld [vmem:[#allocation27_spill] sm:$0xff] }
 0x203   : > { %4904 = vst [vmem:[%s6387_s22 + $0x60] sm:$0xff] %v4796_v4   ;;  %v3847_v57 = vadd.f32 %v6369_v32, %v3776_v15  ;;  %v3777_v24 = vmax.f32 %v3649_v16, %v3713_v37  ;;  %v6718_v15 = vld [vmem:[#allocation29_spill] sm:$0xff] }
 0x204   : > { %v3850_v58 = vadd.f32 %v6369_v32, %v3779_v38  ;;  %v3913_v61 = vmax.f32 %v3849_v60, 0.0  ;;  %v6719_v38 = vld [vmem:[#allocation30_spill] sm:$0xff] }
 0x205   : > { %v3848_v44 = vadd.f32 %v6369_v32, %v3777_v24  ;;  %v5165_v17 = vpop.f32.mrb[96].mxu0  ;;  %v5293_v18 = vpop.f32.mrb[96].mxu1  ;;  %v3911_v63 = vmax.f32 %v3847_v57, 0.0  ;;  %v6720_v24 = vld [vmem:[#allocation31_spill] sm:$0xff] }
 0x206   : > { %v3914_v20 = vmax.f32 %v3850_v58, 0.0  ;;  %v3654_v22 = vmax.f32 %v6707_v21, %v5165_v17  ;;  %v3718_v39 = vmax.f32 %v6708_v5, %v5293_v18  ;;  %v2981_v6 = vpop.f32.mrb[97].mxu0  ;;  %v3493_v40 = vpop.f32.mrb[97].mxu1 }
 0x207   : > { %v3912_v23 = vmax.f32 %v3848_v44, 0.0  ;;  %v3652_v25 = vmax.f32 %v6709_v62, %v2981_v6  ;;  %v3716_v41 = vmax.f32 %v6710_v26, %v3493_v40  ;;  %v5166_v42 = vpop.f32.mrb[98].mxu0  ;;  %v5294_v9 = vpop.f32.mrb[98].mxu1 }
 0x208   : > { %v4811_v10 = vpack.c.bf16 %v3914_v20, %v3913_v61  ;;  %v3782_v45 = vmax.f32 %v3654_v22, %v3718_v39  ;;  %v3655_v31 = vmax.f32 %v6711_v46, %v5166_v42  ;;  %v3719_v36 = vmax.f32 %v6712_v35, %v5294_v9  ;;  %v2984_v1 = vpop.f32.mrb[99].mxu0  ;;  %v3496_v47 = vpop.f32.mrb[99].mxu1  ;;  %v6721_v20 = vld [vmem:[#allocation32_spill] sm:$0xff]  ;;  %v6722_v22 = vld [vmem:[#allocation33_spill] sm:$0xff]  ;;  %v6723_v9 = vld [vmem:[#allocation34_spill] sm:$0xff] }
 0x209   : > { %v4806_v48 = vpack.c.bf16 %v3912_v23, %v3911_v63  ;;  %v3780_v13 = vmax.f32 %v3652_v25, %v3716_v41  ;;  %v3653_v2 = vmax.f32 %v6713_v14, %v2984_v1  ;;  %v3717_v11 = vmax.f32 %v6714_v43, %v3496_v47  ;;  %v6725_v47 = vld [vmem:[#allocation36_spill] sm:$0xff] }
 0x20a   : > { %4907 = vst [vmem:[%s6387_s22 + $0x78] sm:$0xff] %v4811_v10   ;;  %v3853_v27 = vadd.f32 %v6369_v32, %v3782_v45  ;;  %v3783_v0 = vmax.f32 %v3655_v31, %v3719_v36  ;;  %v6724_v45 = vld [vmem:[#allocation35_spill] sm:$0xff] }
 0x20b   : > { %4906 = vst [vmem:[%s6387_s22 + $0x70] sm:$0xff] %v4806_v48   ;;  %v3851_v28 = vadd.f32 %v6369_v32, %v3780_v13  ;;  %v3781_v7 = vmax.f32 %v3653_v2, %v3717_v11  ;;  %v6726_v13 = vld [vmem:[#allocation37_spill] sm:$0xff] }
 0x20c   : > { %v3854_v8 = vadd.f32 %v6369_v32, %v3783_v0  ;;  %v3917_v50 = vmax.f32 %v3853_v27, 0.0  ;;  %v6727_v0 = vld [vmem:[#allocation38_spill] sm:$0xff] }
 0x20d   : > { %v3852_v55 = vadd.f32 %v6369_v32, %v3781_v7  ;;  %v5169_v49 = vpop.f32.mrb[100].mxu0  ;;  %v5297_v56 = vpop.f32.mrb[100].mxu1  ;;  %v3915_v34 = vmax.f32 %v3851_v28, 0.0  ;;  %v6728_v7 = vld [vmem:[#allocation39_spill] sm:$0xff] }
 0x20e   : > { %v3918_v29 = vmax.f32 %v3854_v8, 0.0  ;;  %v3658_v3 = vmax.f32 %v6715_v30, %v5169_v49  ;;  %v3722_v51 = vmax.f32 %v6716_v12, %v5297_v56  ;;  %v2997_v52 = vpop.f32.mrb[101].mxu0  ;;  %v3509_v33 = vpop.f32.mrb[101].mxu1 }
 0x20f   : > { %v3916_v53 = vmax.f32 %v3852_v55, 0.0  ;;  %v3656_v4 = vmax.f32 %v6717_v54, %v2997_v52  ;;  %v3720_v19 = vmax.f32 %v6718_v15, %v3509_v33  ;;  %v5170_v16 = vpop.f32.mrb[102].mxu0  ;;  %v5298_v59 = vpop.f32.mrb[102].mxu1 }
 0x210   : > { %v4821_v37 = vpack.c.bf16 %v3918_v29, %v3917_v50  ;;  %v3786_v60 = vmax.f32 %v3658_v3, %v3722_v51  ;;  %v3659_v57 = vmax.f32 %v6719_v38, %v5170_v16  ;;  %v3723_v58 = vmax.f32 %v6720_v24, %v5298_v59  ;;  %v3000_v44 = vpop.f32.mrb[103].mxu0  ;;  %v3512_v17 = vpop.f32.mrb[103].mxu1  ;;  %v6729_v29 = vld [vmem:[#allocation40_spill] sm:$0xff]  ;;  %v6730_v3 = vld [vmem:[#allocation41_spill] sm:$0xff]  ;;  %v6731_v59 = vld [vmem:[#allocation42_spill] sm:$0xff] }
 0x211   : > { %v4816_v18 = vpack.c.bf16 %v3916_v53, %v3915_v34  ;;  %v3784_v61 = vmax.f32 %v3656_v4, %v3720_v19  ;;  %v3657_v21 = vmax.f32 %v6721_v20, %v3000_v44  ;;  %v3721_v5 = vmax.f32 %v6722_v22, %v3512_v17  ;;  %v6733_v17 = vld [vmem:[#allocation44_spill] sm:$0xff] }
 0x212   : > { %4909 = vst [vmem:[%s6387_s22 + $0x88] sm:$0xff] %v4821_v37   ;;  %v3857_v39 = vadd.f32 %v6369_v32, %v3786_v60  ;;  %v3787_v6 = vmax.f32 %v3659_v57, %v3723_v58  ;;  %v6732_v60 = vld [vmem:[#allocation43_spill] sm:$0xff] }
 0x213   : > { %4908 = vst [vmem:[%s6387_s22 + $0x80] sm:$0xff] %v4816_v18   ;;  %v3855_v40 = vadd.f32 %v6369_v32, %v3784_v61  ;;  %v3785_v63 = vmax.f32 %v3657_v21, %v3721_v5  ;;  %v6734_v61 = vld [vmem:[#allocation45_spill] sm:$0xff] }
 0x214   : > { %v3858_v23 = vadd.f32 %v6369_v32, %v3787_v6  ;;  %v3921_v41 = vmax.f32 %v3857_v39, 0.0  ;;  %v6735_v6 = vld [vmem:[#allocation46_spill] sm:$0xff] }
 0x215   : > { %v3856_v62 = vadd.f32 %v6369_v32, %v3785_v63  ;;  %v5173_v25 = vpop.f32.mrb[104].mxu0  ;;  %v5301_v26 = vpop.f32.mrb[104].mxu1  ;;  %v3919_v36 = vmax.f32 %v3855_v40, 0.0  ;;  %v6736_v63 = vld [vmem:[#allocation47_spill] sm:$0xff] }
 0x216   : > { %v3922_v42 = vmax.f32 %v3858_v23, 0.0  ;;  %v3662_v10 = vmax.f32 %v6723_v9, %v5173_v25  ;;  %v3726_v46 = vmax.f32 %v6724_v45, %v5301_v26  ;;  %v3013_v31 = vpop.f32.mrb[105].mxu0  ;;  %v3525_v35 = vpop.f32.mrb[105].mxu1 }
 0x217   : > { %v3920_v1 = vmax.f32 %v3856_v62, 0.0  ;;  %v3660_v48 = vmax.f32 %v6725_v47, %v3013_v31  ;;  %v3724_v14 = vmax.f32 %v6726_v13, %v3525_v35  ;;  %v5174_v2 = vpop.f32.mrb[106].mxu0  ;;  %v5302_v43 = vpop.f32.mrb[106].mxu1 }
 0x218   : > { %v4831_v11 = vpack.c.bf16 %v3922_v42, %v3921_v41  ;;  %v3790_v27 = vmax.f32 %v3662_v10, %v3726_v46  ;;  %v3663_v28 = vmax.f32 %v6727_v0, %v5174_v2  ;;  %v3727_v8 = vmax.f32 %v6728_v7, %v5302_v43  ;;  %v3016_v55 = vpop.f32.mrb[107].mxu0  ;;  %v3528_v49 = vpop.f32.mrb[107].mxu1  ;;  %v6737_v42 = vld [vmem:[#allocation48_spill] sm:$0xff]  ;;  %v6738_v10 = vld [vmem:[#allocation49_spill] sm:$0xff]  ;;  %v6739_v43 = vld [vmem:[#allocation50_spill] sm:$0xff] }
 0x219   : > { %v4826_v56 = vpack.c.bf16 %v3920_v1, %v3919_v36  ;;  %v3788_v50 = vmax.f32 %v3660_v48, %v3724_v14  ;;  %v3661_v30 = vmax.f32 %v6729_v29, %v3016_v55  ;;  %v3725_v12 = vmax.f32 %v6730_v3, %v3528_v49  ;;  %v6741_v49 = vld [vmem:[#allocation52_spill] sm:$0xff] }
 0x21a   : > { %4911 = vst [vmem:[%s6387_s22 + $0x98] sm:$0xff] %v4831_v11   ;;  %v3861_v51 = vadd.f32 %v6369_v32, %v3790_v27  ;;  %v3791_v52 = vmax.f32 %v3663_v28, %v3727_v8  ;;  %v6740_v27 = vld [vmem:[#allocation51_spill] sm:$0xff] }
 0x21b   : > { %4910 = vst [vmem:[%s6387_s22 + $0x90] sm:$0xff] %v4826_v56   ;;  %v3859_v33 = vadd.f32 %v6369_v32, %v3788_v50  ;;  %v3789_v34 = vmax.f32 %v3661_v30, %v3725_v12  ;;  %v6742_v50 = vld [vmem:[#allocation53_spill] sm:$0xff] }
 0x21c   : > { %v3862_v53 = vadd.f32 %v6369_v32, %v3791_v52  ;;  %v3925_v19 = vmax.f32 %v3861_v51, 0.0  ;;  %v6743_v52 = vld [vmem:[#allocation54_spill] sm:$0xff] }
 0x21d   : > { %v3860_v54 = vadd.f32 %v6369_v32, %v3789_v34  ;;  %v5177_v4 = vpop.f32.mrb[108].mxu0  ;;  %v5305_v15 = vpop.f32.mrb[108].mxu1  ;;  %v3923_v58 = vmax.f32 %v3859_v33, 0.0  ;;  %v6744_v34 = vld [vmem:[#allocation55_spill] sm:$0xff] }
 0x21e   : > { %v3926_v16 = vmax.f32 %v3862_v53, 0.0  ;;  %v3666_v37 = vmax.f32 %v6731_v59, %v5177_v4  ;;  %v3730_v38 = vmax.f32 %v6732_v60, %v5305_v15  ;;  %v3029_v57 = vpop.f32.mrb[109].mxu0  ;;  %v3541_v24 = vpop.f32.mrb[109].mxu1 }
 0x21f   : > { %v3924_v44 = vmax.f32 %v3860_v54, 0.0  ;;  %v3664_v18 = vmax.f32 %v6733_v17, %v3029_v57  ;;  %v3728_v20 = vmax.f32 %v6734_v61, %v3541_v24  ;;  %v5178_v21 = vpop.f32.mrb[110].mxu0  ;;  %v5306_v22 = vpop.f32.mrb[110].mxu1 }
 0x220   : > { %v4841_v5 = vpack.c.bf16 %v3926_v16, %v3925_v19  ;;  %v3794_v39 = vmax.f32 %v3666_v37, %v3730_v38  ;;  %v3667_v40 = vmax.f32 %v6735_v6, %v5178_v21  ;;  %v3731_v23 = vmax.f32 %v6736_v63, %v5306_v22  ;;  %v3032_v62 = vpop.f32.mrb[111].mxu0  ;;  %v3544_v25 = vpop.f32.mrb[111].mxu1  ;;  %v6745_v16 = vld [vmem:[#allocation56_spill] sm:$0xff]  ;;  %v6746_v37 = vld [vmem:[#allocation57_spill] sm:$0xff]  ;;  %v6747_v22 = vld [vmem:[#allocation58_spill] sm:$0xff] }
 0x221   : > { %v4836_v26 = vpack.c.bf16 %v3924_v44, %v3923_v58  ;;  %v3792_v41 = vmax.f32 %v3664_v18, %v3728_v20  ;;  %v3665_v9 = vmax.f32 %v6737_v42, %v3032_v62  ;;  %v3729_v45 = vmax.f32 %v6738_v10, %v3544_v25  ;;  %v6749_v25 = vld [vmem:[#allocation60_spill] sm:$0xff] }
 0x222   : > { %4913 = vst [vmem:[%s6387_s22 + $0xa8] sm:$0xff] %v4841_v5   ;;  %v3865_v46 = vadd.f32 %v6369_v32, %v3794_v39  ;;  %v3795_v31 = vmax.f32 %v3667_v40, %v3731_v23  ;;  %v6748_v39 = vld [vmem:[#allocation59_spill] sm:$0xff] }
 0x223   : > { %4912 = vst [vmem:[%s6387_s22 + $0xa0] sm:$0xff] %v4836_v26   ;;  %v3863_v35 = vadd.f32 %v6369_v32, %v3792_v41  ;;  %v3793_v36 = vmax.f32 %v3665_v9, %v3729_v45  ;;  %v6750_v41 = vld [vmem:[#allocation61_spill] sm:$0xff] }
 0x224   : > { %v3866_v1 = vadd.f32 %v6369_v32, %v3795_v31  ;;  %v3929_v14 = vmax.f32 %v3865_v46, 0.0  ;;  %v6751_v31 = vld [vmem:[#allocation62_spill] sm:$0xff] }
 0x225   : > { %v3864_v47 = vadd.f32 %v6369_v32, %v3793_v36  ;;  %v5181_v48 = vpop.f32.mrb[112].mxu0  ;;  %v5309_v13 = vpop.f32.mrb[112].mxu1  ;;  %v3927_v8 = vmax.f32 %v3863_v35, 0.0  ;;  %v6752_v36 = vld [vmem:[#allocation63_spill] sm:$0xff] }
 0x226   : > { %v3930_v2 = vmax.f32 %v3866_v1, 0.0  ;;  %v3670_v11 = vmax.f32 %v6739_v43, %v5181_v48  ;;  %v3734_v0 = vmax.f32 %v6740_v27, %v5309_v13  ;;  %v3045_v28 = vpop.f32.mrb[113].mxu0  ;;  %v3557_v7 = vpop.f32.mrb[113].mxu1 }
 0x227   : > { %v3928_v55 = vmax.f32 %v3864_v47, 0.0  ;;  %v3668_v56 = vmax.f32 %v6741_v49, %v3045_v28  ;;  %v3732_v29 = vmax.f32 %v6742_v50, %v3557_v7  ;;  %v5182_v30 = vpop.f32.mrb[114].mxu0  ;;  %v5310_v3 = vpop.f32.mrb[114].mxu1 }
 0x228   : > { %v4851_v12 = vpack.c.bf16 %v3930_v2, %v3929_v14  ;;  %v3798_v51 = vmax.f32 %v3670_v11, %v3734_v0  ;;  %v3671_v33 = vmax.f32 %v6743_v52, %v5182_v30  ;;  %v3735_v53 = vmax.f32 %v6744_v34, %v5310_v3  ;;  %v3048_v54 = vpop.f32.mrb[115].mxu0  ;;  %v3560_v4 = vpop.f32.mrb[115].mxu1  ;;  %v6753_v2 = vld [vmem:[#allocation64_spill] sm:$0xff]  ;;  %v6754_v11 = vld [vmem:[#allocation65_spill] sm:$0xff]  ;;  %v6755_v3 = vld [vmem:[#allocation66_spill] sm:$0xff] }
 0x229   : > { %v4846_v15 = vpack.c.bf16 %v3928_v55, %v3927_v8  ;;  %v3796_v19 = vmax.f32 %v3668_v56, %v3732_v29  ;;  %v3669_v59 = vmax.f32 %v6745_v16, %v3048_v54  ;;  %v3733_v60 = vmax.f32 %v6746_v37, %v3560_v4  ;;  %v6757_v4 = vld [vmem:[#allocation68_spill] sm:$0xff] }
 0x22a   : > { %4915 = vst [vmem:[%s6387_s22 + $0xb8] sm:$0xff] %v4851_v12   ;;  %v3869_v38 = vadd.f32 %v6369_v32, %v3798_v51  ;;  %v3799_v57 = vmax.f32 %v3671_v33, %v3735_v53  ;;  %v6756_v51 = vld [vmem:[#allocation67_spill] sm:$0xff] }
 0x22b   : > { %4914 = vst [vmem:[%s6387_s22 + $0xb0] sm:$0xff] %v4846_v15   ;;  %v3867_v24 = vadd.f32 %v6369_v32, %v3796_v19  ;;  %v3797_v58 = vmax.f32 %v3669_v59, %v3733_v60  ;;  %v6758_v19 = vld [vmem:[#allocation69_spill] sm:$0xff] }
 0x22c   : > { %v3870_v44 = vadd.f32 %v6369_v32, %v3799_v57  ;;  %v3933_v20 = vmax.f32 %v3869_v38, 0.0  ;;  %v6759_v57 = vld [vmem:[#allocation70_spill] sm:$0xff] }
 0x22d   : > { %v3868_v17 = vadd.f32 %v6369_v32, %v3797_v58  ;;  %v5185_v18 = vpop.f32.mrb[116].mxu0  ;;  %v5313_v61 = vpop.f32.mrb[116].mxu1  ;;  %v3931_v23 = vmax.f32 %v3867_v24, 0.0  ;;  %v6760_v58 = vld [vmem:[#allocation71_spill] sm:$0xff] }
 0x22e   : > { %v3934_v21 = vmax.f32 %v3870_v44, 0.0  ;;  %v3674_v5 = vmax.f32 %v6747_v22, %v5185_v18  ;;  %v3738_v6 = vmax.f32 %v6748_v39, %v5313_v61  ;;  %v3061_v40 = vpop.f32.mrb[117].mxu0  ;;  %v3573_v63 = vpop.f32.mrb[117].mxu1 }
 0x22f   : > { %v3932_v62 = vmax.f32 %v3868_v17, 0.0  ;;  %v3672_v26 = vmax.f32 %v6749_v25, %v3061_v40  ;;  %v3736_v42 = vmax.f32 %v6750_v41, %v3573_v63  ;;  %v5186_v9 = vpop.f32.mrb[118].mxu0  ;;  %v5314_v10 = vpop.f32.mrb[118].mxu1 }
 0x230   : > { %v4861_v45 = vpack.c.bf16 %v3934_v21, %v3933_v20  ;;  %v3802_v46 = vmax.f32 %v3674_v5, %v3738_v6  ;;  %v3675_v35 = vmax.f32 %v6751_v31, %v5186_v9  ;;  %v3739_v1 = vmax.f32 %v6752_v36, %v5314_v10  ;;  %v3064_v47 = vpop.f32.mrb[119].mxu0  ;;  %v3576_v48 = vpop.f32.mrb[119].mxu1  ;;  %v6761_v21 = vld [vmem:[#allocation72_spill] sm:$0xff]  ;;  %v6762_v5 = vld [vmem:[#allocation73_spill] sm:$0xff]  ;;  %v6763_v10 = vld [vmem:[#allocation74_spill] sm:$0xff] }
 0x231   : > { %v4856_v13 = vpack.c.bf16 %v3932_v62, %v3931_v23  ;;  %v3800_v14 = vmax.f32 %v3672_v26, %v3736_v42  ;;  %v3673_v43 = vmax.f32 %v6753_v2, %v3064_v47  ;;  %v3737_v27 = vmax.f32 %v6754_v11, %v3576_v48  ;;  %v6765_v48 = vld [vmem:[#allocation76_spill] sm:$0xff] }
 0x232   : > { %4917 = vst [vmem:[%s6387_s22 + $0xc8] sm:$0xff] %v4861_v45   ;;  %v3873_v0 = vadd.f32 %v6369_v32, %v3802_v46  ;;  %v3803_v28 = vmax.f32 %v3675_v35, %v3739_v1  ;;  %v6764_v46 = vld [vmem:[#allocation75_spill] sm:$0xff] }
 0x233   : > { %4916 = vst [vmem:[%s6387_s22 + $0xc0] sm:$0xff] %v4856_v13   ;;  %v3871_v7 = vadd.f32 %v6369_v32, %v3800_v14  ;;  %v3801_v8 = vmax.f32 %v3673_v43, %v3737_v27  ;;  %v6766_v14 = vld [vmem:[#allocation77_spill] sm:$0xff] }
 0x234   : > { %v3874_v55 = vadd.f32 %v6369_v32, %v3803_v28  ;;  %v3937_v29 = vmax.f32 %v3873_v0, 0.0  ;;  %v6767_v28 = vld [vmem:[#allocation78_spill] sm:$0xff] }
 0x235   : > { %v3872_v49 = vadd.f32 %v6369_v32, %v3801_v8  ;;  %v5189_v56 = vpop.f32.mrb[120].mxu0  ;;  %v5317_v50 = vpop.f32.mrb[120].mxu1  ;;  %v3935_v53 = vmax.f32 %v3871_v7, 0.0  ;;  %v6768_v8 = vld [vmem:[#allocation79_spill] sm:$0xff] }
 0x236   : > { %v3938_v30 = vmax.f32 %v3874_v55, 0.0  ;;  %v3678_v12 = vmax.f32 %v6755_v3, %v5189_v56  ;;  %v3742_v52 = vmax.f32 %v6756_v51, %v5317_v50  ;;  %v3077_v33 = vpop.f32.mrb[121].mxu0  ;;  %v3589_v34 = vpop.f32.mrb[121].mxu1 }
 0x237   : > { %v3936_v54 = vmax.f32 %v3872_v49, 0.0  ;;  %v3676_v15 = vmax.f32 %v6757_v4, %v3077_v33  ;;  %v3740_v16 = vmax.f32 %v6758_v19, %v3589_v34  ;;  %v5190_v59 = vpop.f32.mrb[122].mxu0  ;;  %v5318_v37 = vpop.f32.mrb[122].mxu1 }
 0x238   : > { %v4871_v60 = vpack.c.bf16 %v3938_v30, %v3937_v29  ;;  %v3806_v38 = vmax.f32 %v3678_v12, %v3742_v52  ;;  %v3679_v24 = vmax.f32 %v6759_v57, %v5190_v59  ;;  %v3743_v44 = vmax.f32 %v6760_v58, %v5318_v37  ;;  %v3080_v17 = vpop.f32.mrb[123].mxu0  ;;  %v3592_v18 = vpop.f32.mrb[123].mxu1  ;;  %v6769_v30 = vld [vmem:[#allocation80_spill] sm:$0xff]  ;;  %v6770_v12 = vld [vmem:[#allocation81_spill] sm:$0xff] }
 0x239   : > { %v4866_v61 = vpack.c.bf16 %v3936_v54, %v3935_v53  ;;  %v3804_v20 = vmax.f32 %v3676_v15, %v3740_v16  ;;  %v3677_v22 = vmax.f32 %v6761_v21, %v3080_v17  ;;  %v3741_v39 = vmax.f32 %v6762_v5, %v3592_v18 }
 0x23a   : > { %4919 = vst [vmem:[%s6387_s22 + $0xd8] sm:$0xff] %v4871_v60   ;;  %v3877_v6 = vadd.f32 %v6369_v32, %v3806_v38  ;;  %v3807_v40 = vmax.f32 %v3679_v24, %v3743_v44 }
 0x23b   : > { %4918 = vst [vmem:[%s6387_s22 + $0xd0] sm:$0xff] %v4866_v61   ;;  %v3875_v63 = vadd.f32 %v6369_v32, %v3804_v20  ;;  %v3805_v23 = vmax.f32 %v3677_v22, %v3741_v39 }
 0x23c   : > { %v3878_v62 = vadd.f32 %v6369_v32, %v3807_v40  ;;  %v3941_v42 = vmax.f32 %v3877_v6, 0.0 }
 0x23d   : > { %v3876_v25 = vadd.f32 %v6369_v32, %v3805_v23  ;;  %v5193_v26 = vpop.f32.mrb[124].mxu0  ;;  %v5321_v41 = vpop.f32.mrb[124].mxu1  ;;  %v3939_v1 = vmax.f32 %v3875_v63, 0.0 }
 0x23e   : > { %v3942_v9 = vmax.f32 %v3878_v62, 0.0  ;;  %v3682_v45 = vmax.f32 %v6763_v10, %v5193_v26  ;;  %v3746_v31 = vmax.f32 %v6764_v46, %v5321_v41  ;;  %v3093_v35 = vpop.f32.mrb[125].mxu0  ;;  %v3605_v36 = vpop.f32.mrb[125].mxu1 }
 0x23f   : > { %v3940_v47 = vmax.f32 %v3876_v25, 0.0  ;;  %v3680_v13 = vmax.f32 %v6765_v48, %v3093_v35  ;;  %v3744_v2 = vmax.f32 %v6766_v14, %v3605_v36  ;;  %v5194_v43 = vpop.f32.mrb[126].mxu0  ;;  %v5322_v11 = vpop.f32.mrb[126].mxu1 }
 0x240   : > { %v4881_v27 = vpack.c.bf16 %v3942_v9, %v3941_v42  ;;  %v3810_v0 = vmax.f32 %v3682_v45, %v3746_v31  ;;  %v3683_v7 = vmax.f32 %v6767_v28, %v5194_v43  ;;  %v3747_v55 = vmax.f32 %v6768_v8, %v5322_v11  ;;  %v3096_v49 = vpop.f32.mrb[127].mxu0  ;;  %v3608_v56 = vpop.f32.mrb[127].mxu1 }
 0x241   : > { %v4876_v50 = vpack.c.bf16 %v3940_v47, %v3939_v1  ;;  %v3808_v29 = vmax.f32 %v3680_v13, %v3744_v2  ;;  %v3681_v3 = vmax.f32 %v6769_v30, %v3096_v49  ;;  %v3745_v51 = vmax.f32 %v6770_v12, %v3608_v56 }
 0x242   : > { %4921 = vst [vmem:[%s6387_s22 + $0xe8] sm:$0xff] %v4881_v27   ;;  %v3881_v52 = vadd.f32 %v6369_v32, %v3810_v0  ;;  %v3811_v33 = vmax.f32 %v3683_v7, %v3747_v55 }
 0x243   : > { %4920 = vst [vmem:[%s6387_s22 + $0xe0] sm:$0xff] %v4876_v50   ;;  %v3879_v34 = vadd.f32 %v6369_v32, %v3808_v29  ;;  %v3809_v53 = vmax.f32 %v3681_v3, %v3745_v51 }
 0x244   : > { %v3882_v54 = vadd.f32 %v6369_v32, %v3811_v33  ;;  %v3945_v15 = vmax.f32 %v3881_v52, 0.0 }
 0x245   : > { %v3880_v4 = vadd.f32 %v6369_v32, %v3809_v53  ;;  %v3943_v16 = vmax.f32 %v3879_v34, 0.0 }
 0x246   : > { %v3946_v19 = vmax.f32 %v3882_v54, 0.0 }
 0x247   : > { %v3944_v59 = vmax.f32 %v3880_v4, 0.0 }
 0x248   : > { %v4891_v37 = vpack.c.bf16 %v3946_v19, %v3945_v15 }
 0x249   : > { %v4886_v60 = vpack.c.bf16 %v3944_v59, %v3943_v16 }
 0x24a   : > { %4923 = vst [vmem:[%s6387_s22 + $0xf8] sm:$0xff] %v4891_v37  }
 0x24b   : > { %4922 = vst [vmem:[%s6387_s22 + $0xf0] sm:$0xff] %v4886_v60  }
 0x24c PF: > { %p10_p9 = scmp.ge.s32.totalorder %s5553_s16, 11   ;;  %s6771_s12 = smov %s5509_s13 }
 0x24d   : > { %s6772_s13 = smov %s5562_s19  ;;  %s6773_s14 = smov %s5553_s16 }
 0x24e   :  { %12 = sbr.rel (!%p10_p9) target bundleno = 2 (0x2), region = 108 }

// kernel: seedling_forward.4
= control target key start
LH: loop header
LB: loop body
LE: loop exit
PB: predicated region body
PF: predicated region fallthrough
CT: control target
= control target key end

     0   :  { %s5820_s12 = smov 0   ;;  %s5822_s13 = smov 0   ;;  %s7232_s0 = inlined_call_operand.vmem [shape: bf16[4,976,150], index: 0, kind: input, shape index: {}]   ;;  %s7233_s1 = inlined_call_operand.vmem [shape: bf16[150,128], index: 1, kind: input, shape index: {}]   ;;  %s7234_s2 = inlined_call_operand.vmem [shape: f32[1,128], index: 2, kind: input, shape index: {}]   ;;  %s7235_s3 = inlined_call_operand.vmem [shape: bf16[976,128], index: 3, kind: output, shape index: {}]  }
   0x1   :  { %s5824_s14 = smov 0  }
   0x2 LB: > { %s4660_s15 = sadd.s32 4294967295, %s5797_s14   ;;  %s5837_s16 = sadd.s32 1, %s5797_s14   ;;  %s5797_s14 = sphi %s5824_s14, %s7390_s14   ;;  %s5793_s13 = sphi %s5822_s13, %s7389_s13   ;;  %s5789_s12 = sphi %s5820_s12, %s7388_s12  }
   0x3   : > { %s17_s17 = ssub.s32 %s5797_s14, %s5837_s16  ;;  %s20_s18 = sadd.s32 1, %s5793_s13 }
   0x4   : > { %p18_p0 = scmp.eq.s32.totalorder %s17_s17, 0  ;;  %p27_p1 = scmp.ne.s32.totalorder %s5793_s13, %s5789_s12 }
   0x5   : > { %p28_p2 = scmp.eq.s32.totalorder %s5797_s14, 0  ;;  %p4663_p4 = scmp.ge.s32.totalorder %s5797_s14, 2 }
   0x6   : > { %s5846_s19 = scalar_select %p18_p0, %s5793_s13, %s20_s18  }
   0x7   : > { %p29_p3 = por %p28_p2, %p27_p1  ;;  %127 = sbr.rel (%p4663_p4) target bundleno = 141 (0x8d), region = 24 }
   0xe   : > { %130 = sbr.rel (!%p29_p3) target bundleno = 141 (0x8d), region = 28  ;;  %s132_s20 = sand.u32 (%p29_p3), 1, %s5793_s13  }
   0xf   : > { %s5321_s21 = smul.u32 (%p29_p3), 488, %s5797_s14 }
  0x10   : > { %s5371_s22 = smul.u32 (%p29_p3), 1952, %s132_s20 }
  0x11   : > { %s5854_s25 = scalar_lea.vmem (%p29_p3), %s7232_s0, %s5321_s21 }
  0x12   : > { %v652_v0 = vld [vmem:[%s5854_s25] sm:$0xff] (%p29_p3)  ;;  %v654_v1 = vld [vmem:[%s5854_s25 + $0x8] sm:$0xff] (%p29_p3)  ;;  %v656_v2 = vld [vmem:[%s5854_s25 + $0x10] sm:$0xff] (%p29_p3)  ;;  %s5859_s26 = scalar_lea.vmem (%p29_p3), [#allocation2], %s5371_s22 }
  0x13   : > { %653 = vst [vmem:[%s5859_s26] sm:$0xff] (%p29_p3), %v652_v0  ;;  %655 = vst [vmem:[%s5859_s26 + $0x8] sm:$0xff] (%p29_p3), %v654_v1  ;;  %v658_v3 = vld [vmem:[%s5854_s25 + $0x18] sm:$0xff] (%p29_p3)  ;;  %v660_v4 = vld [vmem:[%s5854_s25 + $0x20] sm:$0xff] (%p29_p3) }
  0x14   : > { %657 = vst [vmem:[%s5859_s26 + $0x10] sm:$0xff] (%p29_p3), %v656_v2  ;;  %v662_v5 = vld [vmem:[%s5854_s25 + $0x28] sm:$0xff] (%p29_p3)  ;;  %659 = vst [vmem:[%s5859_s26 + $0x18] sm:$0xff] (%p29_p3), %v658_v3  ;;  %v664_v6 = vld [vmem:[%s5854_s25 + $0x30] sm:$0xff] (%p29_p3) }
  0x15   : > { %661 = vst [vmem:[%s5859_s26 + $0x20] sm:$0xff] %v660_v4  ;;  %663 = vst [vmem:[%s5859_s26 + $0x28] sm:$0xff] %v662_v5  ;;  %v666_v7 = vld [vmem:[%s5854_s25 + $0x38] sm:$0xff]  ;;  %v668_v8 = vld [vmem:[%s5854_s25 + $0x40] sm:$0xff] }
  0x16   : > { %665 = vst [vmem:[%s5859_s26 + $0x30] sm:$0xff] %v664_v6  ;;  %667 = vst [vmem:[%s5859_s26 + $0x38] sm:$0xff] %v666_v7  ;;  %v670_v9 = vld [vmem:[%s5854_s25 + $0x48] sm:$0xff]  ;;  %v672_v10 = vld [vmem:[%s5854_s25 + $0x50] sm:$0xff] }
  0x17   : > { %669 = vst [vmem:[%s5859_s26 + $0x40] sm:$0xff] %v668_v8  ;;  %v674_v11 = vld [vmem:[%s5854_s25 + $0x58] sm:$0xff]  ;;  %671 = vst [vmem:[%s5859_s26 + $0x48] sm:$0xff] %v670_v9  ;;  %v676_v12 = vld [vmem:[%s5854_s25 + $0x60] sm:$0xff] }
  0x18   : > { %673 = vst [vmem:[%s5859_s26 + $0x50] sm:$0xff] %v672_v10  ;;  %675 = vst [vmem:[%s5859_s26 + $0x58] sm:$0xff] %v674_v11  ;;  %v678_v13 = vld [vmem:[%s5854_s25 + $0x68] sm:$0xff]  ;;  %v680_v14 = vld [vmem:[%s5854_s25 + $0x70] sm:$0xff] }
  0x19   : > { %677 = vst [vmem:[%s5859_s26 + $0x60] sm:$0xff] %v676_v12  ;;  %679 = vst [vmem:[%s5859_s26 + $0x68] sm:$0xff] %v678_v13  ;;  %v682_v15 = vld [vmem:[%s5854_s25 + $0x78] sm:$0xff]  ;;  %v684_v16 = vld [vmem:[%s5854_s25 + $0x80] sm:$0xff] }
  0x1a   : > { %681 = vst [vmem:[%s5859_s26 + $0x70] sm:$0xff] %v680_v14  ;;  %v686_v17 = vld [vmem:[%s5854_s25 + $0x88] sm:$0xff]  ;;  %683 = vst [vmem:[%s5859_s26 + $0x78] sm:$0xff] %v682_v15  ;;  %v688_v18 = vld [vmem:[%s5854_s25 + $0x90] sm:$0xff] }
  0x1b   : > { %685 = vst [vmem:[%s5859_s26 + $0x80] sm:$0xff] %v684_v16  ;;  %687 = vst [vmem:[%s5859_s26 + $0x88] sm:$0xff] %v686_v17  ;;  %v690_v19 = vld [vmem:[%s5854_s25 + $0x98] sm:$0xff]  ;;  %v692_v20 = vld [vmem:[%s5854_s25 + $0xa0] sm:$0xff] }
  0x1c   : > { %689 = vst [vmem:[%s5859_s26 + $0x90] sm:$0xff] %v688_v18  ;;  %691 = vst [vmem:[%s5859_s26 + $0x98] sm:$0xff] %v690_v19  ;;  %v694_v21 = vld [vmem:[%s5854_s25 + $0xa8] sm:$0xff]  ;;  %v696_v22 = vld [vmem:[%s5854_s25 + $0xb0] sm:$0xff] }
  0x1d   : > { %693 = vst [vmem:[%s5859_s26 + $0xa0] sm:$0xff] %v692_v20  ;;  %v698_v23 = vld [vmem:[%s5854_s25 + $0xb8] sm:$0xff]  ;;  %695 = vst [vmem:[%s5859_s26 + $0xa8] sm:$0xff] %v694_v21  ;;  %v700_v24 = vld [vmem:[%s5854_s25 + $0xc0] sm:$0xff] }
  0x1e   : > { %697 = vst [vmem:[%s5859_s26 + $0xb0] sm:$0xff] %v696_v22  ;;  %699 = vst [vmem:[%s5859_s26 + $0xb8] sm:$0xff] %v698_v23  ;;  %v702_v25 = vld [vmem:[%s5854_s25 + $0xc8] sm:$0xff]  ;;  %v704_v26 = vld [vmem:[%s5854_s25 + $0xd0] sm:$0xff] }
  0x1f   : > { %701 = vst [vmem:[%s5859_s26 + $0xc0] sm:$0xff] %v700_v24  ;;  %703 = vst [vmem:[%s5859_s26 + $0xc8] sm:$0xff] %v702_v25  ;;  %v706_v27 = vld [vmem:[%s5854_s25 + $0xd8] sm:$0xff]  ;;  %v708_v28 = vld [vmem:[%s5854_s25 + $0xe0] sm:$0xff] }
  0x20   : > { %705 = vst [vmem:[%s5859_s26 + $0xd0] sm:$0xff] %v704_v26  ;;  %v710_v29 = vld [vmem:[%s5854_s25 + $0xe8] sm:$0xff]  ;;  %707 = vst [vmem:[%s5859_s26 + $0xd8] sm:$0xff] %v706_v27  ;;  %v712_v30 = vld [vmem:[%s5854_s25 + $0xf0] sm:$0xff] }
  0x21   : > { %709 = vst [vmem:[%s5859_s26 + $0xe0] sm:$0xff] %v708_v28  ;;  %711 = vst [vmem:[%s5859_s26 + $0xe8] sm:$0xff] %v710_v29  ;;  %v714_v31 = vld [vmem:[%s5854_s25 + $0xf8] sm:$0xff]  ;;  %v716_v32 = vld [vmem:[%s5854_s25 + $0x100] sm:$0xff] }
  0x22   : > { %713 = vst [vmem:[%s5859_s26 + $0xf0] sm:$0xff] %v712_v30  ;;  %715 = vst [vmem:[%s5859_s26 + $0xf8] sm:$0xff] %v714_v31  ;;  %v718_v33 = vld [vmem:[%s5854_s25 + $0x108] sm:$0xff]  ;;  %v720_v34 = vld [vmem:[%s5854_s25 + $0x110] sm:$0xff] }
  0x23   : > { %717 = vst [vmem:[%s5859_s26 + $0x100] sm:$0xff] %v716_v32  ;;  %v722_v35 = vld [vmem:[%s5854_s25 + $0x118] sm:$0xff]  ;;  %719 = vst [vmem:[%s5859_s26 + $0x108] sm:$0xff] %v718_v33  ;;  %v724_v36 = vld [vmem:[%s5854_s25 + $0x120] sm:$0xff] }
  0x24   : > { %721 = vst [vmem:[%s5859_s26 + $0x110] sm:$0xff] %v720_v34  ;;  %723 = vst [vmem:[%s5859_s26 + $0x118] sm:$0xff] %v722_v35  ;;  %v726_v37 = vld [vmem:[%s5854_s25 + $0x128] sm:$0xff]  ;;  %v728_v38 = vld [vmem:[%s5854_s25 + $0x130] sm:$0xff] }
  0x25   : > { %725 = vst [vmem:[%s5859_s26 + $0x120] sm:$0xff] %v724_v36  ;;  %727 = vst [vmem:[%s5859_s26 + $0x128] sm:$0xff] %v726_v37  ;;  %v730_v39 = vld [vmem:[%s5854_s25 + $0x138] sm:$0xff]  ;;  %v732_v40 = vld [vmem:[%s5854_s25 + $0x140] sm:$0xff] }
  0x26   : > { %729 = vst [vmem:[%s5859_s26 + $0x130] sm:$0xff] %v728_v38  ;;  %v734_v41 = vld [vmem:[%s5854_s25 + $0x148] sm:$0xff]  ;;  %731 = vst [vmem:[%s5859_s26 + $0x138] sm:$0xff] %v730_v39  ;;  %v736_v42 = vld [vmem:[%s5854_s25 + $0x150] sm:$0xff] }
  0x27   : > { %733 = vst [vmem:[%s5859_s26 + $0x140] sm:$0xff] %v732_v40  ;;  %735 = vst [vmem:[%s5859_s26 + $0x148] sm:$0xff] %v734_v41  ;;  %v738_v43 = vld [vmem:[%s5854_s25 + $0x158] sm:$0xff]  ;;  %v740_v44 = vld [vmem:[%s5854_s25 + $0x160] sm:$0xff] }
  0x28   : > { %737 = vst [vmem:[%s5859_s26 + $0x150] sm:$0xff] %v736_v42  ;;  %739 = vst [vmem:[%s5859_s26 + $0x158] sm:$0xff] %v738_v43  ;;  %v742_v45 = vld [vmem:[%s5854_s25 + $0x168] sm:$0xff]  ;;  %v744_v46 = vld [vmem:[%s5854_s25 + $0x170] sm:$0xff] }
  0x29   : > { %741 = vst [vmem:[%s5859_s26 + $0x160] sm:$0xff] %v740_v44  ;;  %v746_v47 = vld [vmem:[%s5854_s25 + $0x178] sm:$0xff]  ;;  %743 = vst [vmem:[%s5859_s26 + $0x168] sm:$0xff] %v742_v45  ;;  %v748_v48 = vld [vmem:[%s5854_s25 + $0x180] sm:$0xff] }
  0x2a   : > { %745 = vst [vmem:[%s5859_s26 + $0x170] sm:$0xff] %v744_v46  ;;  %747 = vst [vmem:[%s5859_s26 + $0x178] sm:$0xff] %v746_v47  ;;  %v750_v49 = vld [vmem:[%s5854_s25 + $0x188] sm:$0xff]  ;;  %v752_v50 = vld [vmem:[%s5854_s25 + $0x190] sm:$0xff] }
  0x2b   : > { %749 = vst [vmem:[%s5859_s26 + $0x180] sm:$0xff] %v748_v48  ;;  %751 = vst [vmem:[%s5859_s26 + $0x188] sm:$0xff] %v750_v49  ;;  %v754_v51 = vld [vmem:[%s5854_s25 + $0x198] sm:$0xff]  ;;  %v756_v52 = vld [vmem:[%s5854_s25 + $0x1a0] sm:$0xff] }
  0x2c   : > { %753 = vst [vmem:[%s5859_s26 + $0x190] sm:$0xff] %v752_v50  ;;  %v758_v53 = vld [vmem:[%s5854_s25 + $0x1a8] sm:$0xff]  ;;  %755 = vst [vmem:[%s5859_s26 + $0x198] sm:$0xff] %v754_v51  ;;  %v760_v54 = vld [vmem:[%s5854_s25 + $0x1b0] sm:$0xff] }
  0x2d   : > { %757 = vst [vmem:[%s5859_s26 + $0x1a0] sm:$0xff] %v756_v52  ;;  %759 = vst [vmem:[%s5859_s26 + $0x1a8] sm:$0xff] %v758_v53  ;;  %v762_v55 = vld [vmem:[%s5854_s25 + $0x1b8] sm:$0xff]  ;;  %v764_v56 = vld [vmem:[%s5854_s25 + $0x1c0] sm:$0xff] }
  0x2e   : > { %761 = vst [vmem:[%s5859_s26 + $0x1b0] sm:$0xff] %v760_v54  ;;  %763 = vst [vmem:[%s5859_s26 + $0x1b8] sm:$0xff] %v762_v55  ;;  %v766_v57 = vld [vmem:[%s5854_s25 + $0x1c8] sm:$0xff]  ;;  %v768_v58 = vld [vmem:[%s5854_s25 + $0x1d0] sm:$0xff] }
  0x2f   : > { %765 = vst [vmem:[%s5859_s26 + $0x1c0] sm:$0xff] %v764_v56  ;;  %v770_v59 = vld [vmem:[%s5854_s25 + $0x1d8] sm:$0xff]  ;;  %767 = vst [vmem:[%s5859_s26 + $0x1c8] sm:$0xff] %v766_v57  ;;  %v772_v60 = vld [vmem:[%s5854_s25 + $0x1e0] sm:$0xff] }
  0x30   : > { %769 = vst [vmem:[%s5859_s26 + $0x1d0] sm:$0xff] %v768_v58  ;;  %771 = vst [vmem:[%s5859_s26 + $0x1d8] sm:$0xff] %v770_v59  ;;  %v774_v61 = vld [vmem:[%s5854_s25 + $0x3d0] sm:$0xff]  ;;  %v776_v62 = vld [vmem:[%s5854_s25 + $0x3d8] sm:$0xff] }
  0x31   : > { %773 = vst [vmem:[%s5859_s26 + $0x1e0] sm:$0xff] %v772_v60  ;;  %775 = vst [vmem:[%s5859_s26 + $0x1e8] sm:$0xff] %v774_v61  ;;  %v778_v63 = vld [vmem:[%s5854_s25 + $0x3e0] sm:$0xff]  ;;  %v780_v0 = vld [vmem:[%s5854_s25 + $0x3e8] sm:$0xff] }
  0x32   : > { %777 = vst [vmem:[%s5859_s26 + $0x1f0] sm:$0xff] %v776_v62  ;;  %v782_v1 = vld [vmem:[%s5854_s25 + $0x3f0] sm:$0xff]  ;;  %779 = vst [vmem:[%s5859_s26 + $0x1f8] sm:$0xff] %v778_v63  ;;  %v784_v2 = vld [vmem:[%s5854_s25 + $0x3f8] sm:$0xff] }
  0x33   : > { %781 = vst [vmem:[%s5859_s26 + $0x200] sm:$0xff] %v780_v0  ;;  %783 = vst [vmem:[%s5859_s26 + $0x208] sm:$0xff] %v782_v1  ;;  %v786_v3 = vld [vmem:[%s5854_s25 + $0x400] sm:$0xff]  ;;  %v788_v4 = vld [vmem:[%s5854_s25 + $0x408] sm:$0xff] }
  0x34   : > { %785 = vst [vmem:[%s5859_s26 + $0x210] sm:$0xff] %v784_v2  ;;  %787 = vst [vmem:[%s5859_s26 + $0x218] sm:$0xff] %v786_v3  ;;  %v790_v5 = vld [vmem:[%s5854_s25 + $0x410] sm:$0xff]  ;;  %v792_v6 = vld [vmem:[%s5854_s25 + $0x418] sm:$0xff] }
  0x35   : > { %789 = vst [vmem:[%s5859_s26 + $0x220] sm:$0xff] %v788_v4  ;;  %v794_v7 = vld [vmem:[%s5854_s25 + $0x420] sm:$0xff]  ;;  %791 = vst [vmem:[%s5859_s26 + $0x228] sm:$0xff] %v790_v5  ;;  %v796_v8 = vld [vmem:[%s5854_s25 + $0x428] sm:$0xff] }
  0x36   : > { %793 = vst [vmem:[%s5859_s26 + $0x230] sm:$0xff] %v792_v6  ;;  %795 = vst [vmem:[%s5859_s26 + $0x238] sm:$0xff] %v794_v7  ;;  %v798_v9 = vld [vmem:[%s5854_s25 + $0x430] sm:$0xff]  ;;  %v800_v10 = vld [vmem:[%s5854_s25 + $0x438] sm:$0xff] }
  0x37   : > { %797 = vst [vmem:[%s5859_s26 + $0x240] sm:$0xff] %v796_v8  ;;  %799 = vst [vmem:[%s5859_s26 + $0x248] sm:$0xff] %v798_v9  ;;  %v802_v11 = vld [vmem:[%s5854_s25 + $0x440] sm:$0xff]  ;;  %v804_v12 = vld [vmem:[%s5854_s25 + $0x448] sm:$0xff] }
  0x38   : > { %801 = vst [vmem:[%s5859_s26 + $0x250] sm:$0xff] %v800_v10  ;;  %v806_v13 = vld [vmem:[%s5854_s25 + $0x450] sm:$0xff]  ;;  %803 = vst [vmem:[%s5859_s26 + $0x258] sm:$0xff] %v802_v11  ;;  %v808_v14 = vld [vmem:[%s5854_s25 + $0x458] sm:$0xff] }
  0x39   : > { %805 = vst [vmem:[%s5859_s26 + $0x260] sm:$0xff] %v804_v12  ;;  %807 = vst [vmem:[%s5859_s26 + $0x268] sm:$0xff] %v806_v13  ;;  %v810_v15 = vld [vmem:[%s5854_s25 + $0x460] sm:$0xff]  ;;  %v812_v16 = vld [vmem:[%s5854_s25 + $0x468] sm:$0xff] }
  0x3a   : > { %809 = vst [vmem:[%s5859_s26 + $0x270] sm:$0xff] %v808_v14  ;;  %811 = vst [vmem:[%s5859_s26 + $0x278] sm:$0xff] %v810_v15  ;;  %v814_v17 = vld [vmem:[%s5854_s25 + $0x470] sm:$0xff]  ;;  %v816_v18 = vld [vmem:[%s5854_s25 + $0x478] sm:$0xff] }
  0x3b   : > { %813 = vst [vmem:[%s5859_s26 + $0x280] sm:$0xff] %v812_v16  ;;  %v818_v19 = vld [vmem:[%s5854_s25 + $0x480] sm:$0xff]  ;;  %815 = vst [vmem:[%s5859_s26 + $0x288] sm:$0xff] %v814_v17  ;;  %v820_v20 = vld [vmem:[%s5854_s25 + $0x488] sm:$0xff] }
  0x3c   : > { %817 = vst [vmem:[%s5859_s26 + $0x290] sm:$0xff] %v816_v18  ;;  %819 = vst [vmem:[%s5859_s26 + $0x298] sm:$0xff] %v818_v19  ;;  %v822_v21 = vld [vmem:[%s5854_s25 + $0x490] sm:$0xff]  ;;  %v824_v22 = vld [vmem:[%s5854_s25 + $0x498] sm:$0xff] }
  0x3d   : > { %821 = vst [vmem:[%s5859_s26 + $0x2a0] sm:$0xff] %v820_v20  ;;  %823 = vst [vmem:[%s5859_s26 + $0x2a8] sm:$0xff] %v822_v21  ;;  %v826_v23 = vld [vmem:[%s5854_s25 + $0x4a0] sm:$0xff]  ;;  %v828_v24 = vld [vmem:[%s5854_s25 + $0x4a8] sm:$0xff] }
  0x3e   : > { %825 = vst [vmem:[%s5859_s26 + $0x2b0] sm:$0xff] %v824_v22  ;;  %v830_v25 = vld [vmem:[%s5854_s25 + $0x4b0] sm:$0xff]  ;;  %827 = vst [vmem:[%s5859_s26 + $0x2b8] sm:$0xff] %v826_v23  ;;  %v832_v26 = vld [vmem:[%s5854_s25 + $0x4b8] sm:$0xff] }
  0x3f   : > { %829 = vst [vmem:[%s5859_s26 + $0x2c0] sm:$0xff] %v828_v24  ;;  %831 = vst [vmem:[%s5859_s26 + $0x2c8] sm:$0xff] %v830_v25  ;;  %v834_v27 = vld [vmem:[%s5854_s25 + $0x4c0] sm:$0xff]  ;;  %v836_v28 = vld [vmem:[%s5854_s25 + $0x4c8] sm:$0xff] }
  0x40   : > { %833 = vst [vmem:[%s5859_s26 + $0x2d0] sm:$0xff] %v832_v26  ;;  %835 = vst [vmem:[%s5859_s26 + $0x2d8] sm:$0xff] %v834_v27  ;;  %v838_v29 = vld [vmem:[%s5854_s25 + $0x4d0] sm:$0xff]  ;;  %v840_v30 = vld [vmem:[%s5854_s25 + $0x4d8] sm:$0xff] }
  0x41   : > { %837 = vst [vmem:[%s5859_s26 + $0x2e0] sm:$0xff] %v836_v28  ;;  %v842_v31 = vld [vmem:[%s5854_s25 + $0x4e0] sm:$0xff]  ;;  %839 = vst [vmem:[%s5859_s26 + $0x2e8] sm:$0xff] %v838_v29  ;;  %v844_v32 = vld [vmem:[%s5854_s25 + $0x4e8] sm:$0xff] }
  0x42   : > { %841 = vst [vmem:[%s5859_s26 + $0x2f0] sm:$0xff] %v840_v30  ;;  %843 = vst [vmem:[%s5859_s26 + $0x2f8] sm:$0xff] %v842_v31  ;;  %v846_v33 = vld [vmem:[%s5854_s25 + $0x4f0] sm:$0xff]  ;;  %v848_v34 = vld [vmem:[%s5854_s25 + $0x4f8] sm:$0xff] }
  0x43   : > { %845 = vst [vmem:[%s5859_s26 + $0x300] sm:$0xff] %v844_v32  ;;  %847 = vst [vmem:[%s5859_s26 + $0x308] sm:$0xff] %v846_v33  ;;  %v850_v35 = vld [vmem:[%s5854_s25 + $0x500] sm:$0xff]  ;;  %v852_v36 = vld [vmem:[%s5854_s25 + $0x508] sm:$0xff] }
  0x44   : > { %849 = vst [vmem:[%s5859_s26 + $0x310] sm:$0xff] %v848_v34  ;;  %v854_v37 = vld [vmem:[%s5854_s25 + $0x510] sm:$0xff]  ;;  %851 = vst [vmem:[%s5859_s26 + $0x318] sm:$0xff] %v850_v35  ;;  %v856_v38 = vld [vmem:[%s5854_s25 + $0x518] sm:$0xff] }
  0x45   : > { %853 = vst [vmem:[%s5859_s26 + $0x320] sm:$0xff] %v852_v36  ;;  %855 = vst [vmem:[%s5859_s26 + $0x328] sm:$0xff] %v854_v37  ;;  %v858_v39 = vld [vmem:[%s5854_s25 + $0x520] sm:$0xff]  ;;  %v860_v40 = vld [vmem:[%s5854_s25 + $0x528] sm:$0xff] }
  0x46   : > { %857 = vst [vmem:[%s5859_s26 + $0x330] sm:$0xff] %v856_v38  ;;  %859 = vst [vmem:[%s5859_s26 + $0x338] sm:$0xff] %v858_v39  ;;  %v862_v41 = vld [vmem:[%s5854_s25 + $0x530] sm:$0xff]  ;;  %v864_v42 = vld [vmem:[%s5854_s25 + $0x538] sm:$0xff] }
  0x47   : > { %861 = vst [vmem:[%s5859_s26 + $0x340] sm:$0xff] %v860_v40  ;;  %v866_v43 = vld [vmem:[%s5854_s25 + $0x540] sm:$0xff]  ;;  %863 = vst [vmem:[%s5859_s26 + $0x348] sm:$0xff] %v862_v41  ;;  %v868_v44 = vld [vmem:[%s5854_s25 + $0x548] sm:$0xff] }
  0x48   : > { %865 = vst [vmem:[%s5859_s26 + $0x350] sm:$0xff] %v864_v42  ;;  %867 = vst [vmem:[%s5859_s26 + $0x358] sm:$0xff] %v866_v43  ;;  %v870_v45 = vld [vmem:[%s5854_s25 + $0x550] sm:$0xff]  ;;  %v872_v46 = vld [vmem:[%s5854_s25 + $0x558] sm:$0xff] }
  0x49   : > { %869 = vst [vmem:[%s5859_s26 + $0x360] sm:$0xff] %v868_v44  ;;  %871 = vst [vmem:[%s5859_s26 + $0x368] sm:$0xff] %v870_v45  ;;  %v874_v47 = vld [vmem:[%s5854_s25 + $0x560] sm:$0xff]  ;;  %v876_v48 = vld [vmem:[%s5854_s25 + $0x568] sm:$0xff] }
  0x4a   : > { %873 = vst [vmem:[%s5859_s26 + $0x370] sm:$0xff] %v872_v46  ;;  %v878_v49 = vld [vmem:[%s5854_s25 + $0x570] sm:$0xff]  ;;  %875 = vst [vmem:[%s5859_s26 + $0x378] sm:$0xff] %v874_v47  ;;  %v880_v50 = vld [vmem:[%s5854_s25 + $0x578] sm:$0xff] }
  0x4b   : > { %877 = vst [vmem:[%s5859_s26 + $0x380] sm:$0xff] %v876_v48  ;;  %879 = vst [vmem:[%s5859_s26 + $0x388] sm:$0xff] %v878_v49  ;;  %v882_v51 = vld [vmem:[%s5854_s25 + $0x580] sm:$0xff]  ;;  %v884_v52 = vld [vmem:[%s5854_s25 + $0x588] sm:$0xff] }
  0x4c   : > { %881 = vst [vmem:[%s5859_s26 + $0x390] sm:$0xff] %v880_v50  ;;  %883 = vst [vmem:[%s5859_s26 + $0x398] sm:$0xff] %v882_v51  ;;  %v886_v53 = vld [vmem:[%s5854_s25 + $0x590] sm:$0xff]  ;;  %v888_v54 = vld [vmem:[%s5854_s25 + $0x598] sm:$0xff] }
  0x4d   : > { %885 = vst [vmem:[%s5859_s26 + $0x3a0] sm:$0xff] %v884_v52  ;;  %v890_v55 = vld [vmem:[%s5854_s25 + $0x5a0] sm:$0xff]  ;;  %887 = vst [vmem:[%s5859_s26 + $0x3a8] sm:$0xff] %v886_v53  ;;  %v892_v56 = vld [vmem:[%s5854_s25 + $0x5a8] sm:$0xff] }
  0x4e   : > { %889 = vst [vmem:[%s5859_s26 + $0x3b0] sm:$0xff] %v888_v54  ;;  %891 = vst [vmem:[%s5859_s26 + $0x3b8] sm:$0xff] %v890_v55  ;;  %v894_v57 = vld [vmem:[%s5854_s25 + $0x5b0] sm:$0xff]  ;;  %v896_v58 = vld [vmem:[%s5854_s25 + $0x7a0] sm:$0xff] }
  0x4f   : > { %893 = vst [vmem:[%s5859_s26 + $0x3c0] sm:$0xff] %v892_v56  ;;  %895 = vst [vmem:[%s5859_s26 + $0x3c8] sm:$0xff] %v894_v57  ;;  %v898_v59 = vld [vmem:[%s5854_s25 + $0x7a8] sm:$0xff]  ;;  %v900_v60 = vld [vmem:[%s5854_s25 + $0x7b0] sm:$0xff] }
  0x50   : > { %897 = vst [vmem:[%s5859_s26 + $0x3d0] sm:$0xff] %v896_v58  ;;  %v902_v61 = vld [vmem:[%s5854_s25 + $0x7b8] sm:$0xff]  ;;  %899 = vst [vmem:[%s5859_s26 + $0x3d8] sm:$0xff] %v898_v59  ;;  %v904_v62 = vld [vmem:[%s5854_s25 + $0x7c0] sm:$0xff] }
  0x51   : > { %901 = vst [vmem:[%s5859_s26 + $0x3e0] sm:$0xff] %v900_v60  ;;  %903 = vst [vmem:[%s5859_s26 + $0x3e8] sm:$0xff] %v902_v61  ;;  %v906_v63 = vld [vmem:[%s5854_s25 + $0x7c8] sm:$0xff]  ;;  %v908_v0 = vld [vmem:[%s5854_s25 + $0x7d0] sm:$0xff] }
  0x52   : > { %905 = vst [vmem:[%s5859_s26 + $0x3f0] sm:$0xff] %v904_v62  ;;  %907 = vst [vmem:[%s5859_s26 + $0x3f8] sm:$0xff] %v906_v63  ;;  %v910_v1 = vld [vmem:[%s5854_s25 + $0x7d8] sm:$0xff]  ;;  %v912_v2 = vld [vmem:[%s5854_s25 + $0x7e0] sm:$0xff] }
  0x53   : > { %909 = vst [vmem:[%s5859_s26 + $0x400] sm:$0xff] %v908_v0  ;;  %v914_v3 = vld [vmem:[%s5854_s25 + $0x7e8] sm:$0xff]  ;;  %911 = vst [vmem:[%s5859_s26 + $0x408] sm:$0xff] %v910_v1  ;;  %v916_v4 = vld [vmem:[%s5854_s25 + $0x7f0] sm:$0xff] }
  0x54   : > { %913 = vst [vmem:[%s5859_s26 + $0x410] sm:$0xff] %v912_v2  ;;  %915 = vst [vmem:[%s5859_s26 + $0x418] sm:$0xff] %v914_v3  ;;  %v918_v5 = vld [vmem:[%s5854_s25 + $0x7f8] sm:$0xff]  ;;  %v920_v6 = vld [vmem:[%s5854_s25 + $0x800] sm:$0xff] }
  0x55   : > { %917 = vst [vmem:[%s5859_s26 + $0x420] sm:$0xff] %v916_v4  ;;  %919 = vst [vmem:[%s5859_s26 + $0x428] sm:$0xff] %v918_v5  ;;  %v922_v7 = vld [vmem:[%s5854_s25 + $0x808] sm:$0xff]  ;;  %v924_v8 = vld [vmem:[%s5854_s25 + $0x810] sm:$0xff] }
  0x56   : > { %921 = vst [vmem:[%s5859_s26 + $0x430] sm:$0xff] %v920_v6  ;;  %v926_v9 = vld [vmem:[%s5854_s25 + $0x818] sm:$0xff]  ;;  %923 = vst [vmem:[%s5859_s26 + $0x438] sm:$0xff] %v922_v7  ;;  %v928_v10 = vld [vmem:[%s5854_s25 + $0x820] sm:$0xff] }
  0x57   : > { %925 = vst [vmem:[%s5859_s26 + $0x440] sm:$0xff] %v924_v8  ;;  %927 = vst [vmem:[%s5859_s26 + $0x448] sm:$0xff] %v926_v9  ;;  %v930_v11 = vld [vmem:[%s5854_s25 + $0x828] sm:$0xff]  ;;  %v932_v12 = vld [vmem:[%s5854_s25 + $0x830] sm:$0xff] }
  0x58   : > { %929 = vst [vmem:[%s5859_s26 + $0x450] sm:$0xff] %v928_v10  ;;  %931 = vst [vmem:[%s5859_s26 + $0x458] sm:$0xff] %v930_v11  ;;  %v934_v13 = vld [vmem:[%s5854_s25 + $0x838] sm:$0xff]  ;;  %v936_v14 = vld [vmem:[%s5854_s25 + $0x840] sm:$0xff] }
  0x59   : > { %933 = vst [vmem:[%s5859_s26 + $0x460] sm:$0xff] %v932_v12  ;;  %v938_v15 = vld [vmem:[%s5854_s25 + $0x848] sm:$0xff]  ;;  %935 = vst [vmem:[%s5859_s26 + $0x468] sm:$0xff] %v934_v13  ;;  %v940_v16 = vld [vmem:[%s5854_s25 + $0x850] sm:$0xff] }
  0x5a   : > { %937 = vst [vmem:[%s5859_s26 + $0x470] sm:$0xff] %v936_v14  ;;  %939 = vst [vmem:[%s5859_s26 + $0x478] sm:$0xff] %v938_v15  ;;  %v942_v17 = vld [vmem:[%s5854_s25 + $0x858] sm:$0xff]  ;;  %v944_v18 = vld [vmem:[%s5854_s25 + $0x860] sm:$0xff] }
  0x5b   : > { %941 = vst [vmem:[%s5859_s26 + $0x480] sm:$0xff] %v940_v16  ;;  %943 = vst [vmem:[%s5859_s26 + $0x488] sm:$0xff] %v942_v17  ;;  %v946_v19 = vld [vmem:[%s5854_s25 + $0x868] sm:$0xff]  ;;  %v948_v20 = vld [vmem:[%s5854_s25 + $0x870] sm:$0xff] }
  0x5c   : > { %945 = vst [vmem:[%s5859_s26 + $0x490] sm:$0xff] %v944_v18  ;;  %v950_v21 = vld [vmem:[%s5854_s25 + $0x878] sm:$0xff]  ;;  %947 = vst [vmem:[%s5859_s26 + $0x498] sm:$0xff] %v946_v19  ;;  %v952_v22 = vld [vmem:[%s5854_s25 + $0x880] sm:$0xff] }
  0x5d   : > { %949 = vst [vmem:[%s5859_s26 + $0x4a0] sm:$0xff] %v948_v20  ;;  %951 = vst [vmem:[%s5859_s26 + $0x4a8] sm:$0xff] %v950_v21  ;;  %v954_v23 = vld [vmem:[%s5854_s25 + $0x888] sm:$0xff]  ;;  %v956_v24 = vld [vmem:[%s5854_s25 + $0x890] sm:$0xff] }
  0x5e   : > { %953 = vst [vmem:[%s5859_s26 + $0x4b0] sm:$0xff] %v952_v22  ;;  %955 = vst [vmem:[%s5859_s26 + $0x4b8] sm:$0xff] %v954_v23  ;;  %v958_v25 = vld [vmem:[%s5854_s25 + $0x898] sm:$0xff]  ;;  %v960_v26 = vld [vmem:[%s5854_s25 + $0x8a0] sm:$0xff] }
  0x5f   : > { %957 = vst [vmem:[%s5859_s26 + $0x4c0] sm:$0xff] %v956_v24  ;;  %v962_v27 = vld [vmem:[%s5854_s25 + $0x8a8] sm:$0xff]  ;;  %959 = vst [vmem:[%s5859_s26 + $0x4c8] sm:$0xff] %v958_v25  ;;  %v964_v28 = vld [vmem:[%s5854_s25 + $0x8b0] sm:$0xff] }
  0x60   : > { %961 = vst [vmem:[%s5859_s26 + $0x4d0] sm:$0xff] %v960_v26  ;;  %963 = vst [vmem:[%s5859_s26 + $0x4d8] sm:$0xff] %v962_v27  ;;  %v966_v29 = vld [vmem:[%s5854_s25 + $0x8b8] sm:$0xff]  ;;  %v968_v30 = vld [vmem:[%s5854_s25 + $0x8c0] sm:$0xff] }
  0x61   : > { %965 = vst [vmem:[%s5859_s26 + $0x4e0] sm:$0xff] %v964_v28  ;;  %967 = vst [vmem:[%s5859_s26 + $0x4e8] sm:$0xff] %v966_v29  ;;  %v970_v31 = vld [vmem:[%s5854_s25 + $0x8c8] sm:$0xff]  ;;  %v972_v32 = vld [vmem:[%s5854_s25 + $0x8d0] sm:$0xff] }
  0x62   : > { %969 = vst [vmem:[%s5859_s26 + $0x4f0] sm:$0xff] %v968_v30  ;;  %v974_v33 = vld [vmem:[%s5854_s25 + $0x8d8] sm:$0xff]  ;;  %971 = vst [vmem:[%s5859_s26 + $0x4f8] sm:$0xff] %v970_v31  ;;  %v976_v34 = vld [vmem:[%s5854_s25 + $0x8e0] sm:$0xff] }
  0x63   : > { %973 = vst [vmem:[%s5859_s26 + $0x500] sm:$0xff] %v972_v32  ;;  %975 = vst [vmem:[%s5859_s26 + $0x508] sm:$0xff] %v974_v33  ;;  %v978_v35 = vld [vmem:[%s5854_s25 + $0x8e8] sm:$0xff]  ;;  %v980_v36 = vld [vmem:[%s5854_s25 + $0x8f0] sm:$0xff] }
  0x64   : > { %977 = vst [vmem:[%s5859_s26 + $0x510] sm:$0xff] %v976_v34  ;;  %979 = vst [vmem:[%s5859_s26 + $0x518] sm:$0xff] %v978_v35  ;;  %v982_v37 = vld [vmem:[%s5854_s25 + $0x8f8] sm:$0xff]  ;;  %v984_v38 = vld [vmem:[%s5854_s25 + $0x900] sm:$0xff] }
  0x65   : > { %981 = vst [vmem:[%s5859_s26 + $0x520] sm:$0xff] %v980_v36  ;;  %v986_v39 = vld [vmem:[%s5854_s25 + $0x908] sm:$0xff]  ;;  %983 = vst [vmem:[%s5859_s26 + $0x528] sm:$0xff] %v982_v37  ;;  %v988_v40 = vld [vmem:[%s5854_s25 + $0x910] sm:$0xff] }
  0x66   : > { %985 = vst [vmem:[%s5859_s26 + $0x530] sm:$0xff] %v984_v38  ;;  %987 = vst [vmem:[%s5859_s26 + $0x538] sm:$0xff] %v986_v39  ;;  %v990_v41 = vld [vmem:[%s5854_s25 + $0x918] sm:$0xff]  ;;  %v992_v42 = vld [vmem:[%s5854_s25 + $0x920] sm:$0xff] }
  0x67   : > { %989 = vst [vmem:[%s5859_s26 + $0x540] sm:$0xff] %v988_v40  ;;  %991 = vst [vmem:[%s5859_s26 + $0x548] sm:$0xff] %v990_v41  ;;  %v994_v43 = vld [vmem:[%s5854_s25 + $0x928] sm:$0xff]  ;;  %v996_v44 = vld [vmem:[%s5854_s25 + $0x930] sm:$0xff] }
  0x68   : > { %993 = vst [vmem:[%s5859_s26 + $0x550] sm:$0xff] %v992_v42  ;;  %v998_v45 = vld [vmem:[%s5854_s25 + $0x938] sm:$0xff]  ;;  %995 = vst [vmem:[%s5859_s26 + $0x558] sm:$0xff] %v994_v43  ;;  %v1000_v46 = vld [vmem:[%s5854_s25 + $0x940] sm:$0xff] }
  0x69   : > { %997 = vst [vmem:[%s5859_s26 + $0x560] sm:$0xff] %v996_v44  ;;  %999 = vst [vmem:[%s5859_s26 + $0x568] sm:$0xff] %v998_v45  ;;  %v1002_v47 = vld [vmem:[%s5854_s25 + $0x948] sm:$0xff]  ;;  %v1004_v48 = vld [vmem:[%s5854_s25 + $0x950] sm:$0xff] }
  0x6a   : > { %1001 = vst [vmem:[%s5859_s26 + $0x570] sm:$0xff] %v1000_v46  ;;  %1003 = vst [vmem:[%s5859_s26 + $0x578] sm:$0xff] %v1002_v47  ;;  %v1006_v49 = vld [vmem:[%s5854_s25 + $0x958] sm:$0xff]  ;;  %v1008_v50 = vld [vmem:[%s5854_s25 + $0x960] sm:$0xff] }
  0x6b   : > { %1005 = vst [vmem:[%s5859_s26 + $0x580] sm:$0xff] %v1004_v48  ;;  %v1010_v51 = vld [vmem:[%s5854_s25 + $0x968] sm:$0xff]  ;;  %1007 = vst [vmem:[%s5859_s26 + $0x588] sm:$0xff] %v1006_v49  ;;  %v1012_v52 = vld [vmem:[%s5854_s25 + $0x970] sm:$0xff] }
  0x6c   : > { %1009 = vst [vmem:[%s5859_s26 + $0x590] sm:$0xff] %v1008_v50  ;;  %1011 = vst [vmem:[%s5859_s26 + $0x598] sm:$0xff] %v1010_v51  ;;  %v1014_v53 = vld [vmem:[%s5854_s25 + $0x978] sm:$0xff]  ;;  %v1016_v54 = vld [vmem:[%s5854_s25 + $0x980] sm:$0xff] }
  0x6d   : > { %1013 = vst [vmem:[%s5859_s26 + $0x5a0] sm:$0xff] %v1012_v52  ;;  %1015 = vst [vmem:[%s5859_s26 + $0x5a8] sm:$0xff] %v1014_v53  ;;  %v1018_v55 = vld [vmem:[%s5854_s25 + $0xb70] sm:$0xff]  ;;  %v1020_v56 = vld [vmem:[%s5854_s25 + $0xb78] sm:$0xff] }
  0x6e   : > { %1017 = vst [vmem:[%s5859_s26 + $0x5b0] sm:$0xff] %v1016_v54  ;;  %v1022_v57 = vld [vmem:[%s5854_s25 + $0xb80] sm:$0xff]  ;;  %1019 = vst [vmem:[%s5859_s26 + $0x5b8] sm:$0xff] %v1018_v55  ;;  %v1024_v58 = vld [vmem:[%s5854_s25 + $0xb88] sm:$0xff] }
  0x6f   : > { %1021 = vst [vmem:[%s5859_s26 + $0x5c0] sm:$0xff] %v1020_v56  ;;  %1023 = vst [vmem:[%s5859_s26 + $0x5c8] sm:$0xff] %v1022_v57  ;;  %v1026_v59 = vld [vmem:[%s5854_s25 + $0xb90] sm:$0xff]  ;;  %v1028_v60 = vld [vmem:[%s5854_s25 + $0xb98] sm:$0xff] }
  0x70   : > { %1025 = vst [vmem:[%s5859_s26 + $0x5d0] sm:$0xff] %v1024_v58  ;;  %1027 = vst [vmem:[%s5859_s26 + $0x5d8] sm:$0xff] %v1026_v59  ;;  %v1030_v61 = vld [vmem:[%s5854_s25 + $0xba0] sm:$0xff]  ;;  %v1032_v62 = vld [vmem:[%s5854_s25 + $0xba8] sm:$0xff] }
  0x71   : > { %1029 = vst [vmem:[%s5859_s26 + $0x5e0] sm:$0xff] %v1028_v60  ;;  %v1034_v63 = vld [vmem:[%s5854_s25 + $0xbb0] sm:$0xff]  ;;  %1031 = vst [vmem:[%s5859_s26 + $0x5e8] sm:$0xff] %v1030_v61  ;;  %v1036_v0 = vld [vmem:[%s5854_s25 + $0xbb8] sm:$0xff] }
  0x72   : > { %1033 = vst [vmem:[%s5859_s26 + $0x5f0] sm:$0xff] %v1032_v62  ;;  %1035 = vst [vmem:[%s5859_s26 + $0x5f8] sm:$0xff] %v1034_v63  ;;  %v1038_v1 = vld [vmem:[%s5854_s25 + $0xbc0] sm:$0xff]  ;;  %v1040_v2 = vld [vmem:[%s5854_s25 + $0xbc8] sm:$0xff] }
  0x73   : > { %1037 = vst [vmem:[%s5859_s26 + $0x600] sm:$0xff] %v1036_v0  ;;  %1039 = vst [vmem:[%s5859_s26 + $0x608] sm:$0xff] %v1038_v1  ;;  %v1042_v3 = vld [vmem:[%s5854_s25 + $0xbd0] sm:$0xff]  ;;  %v1044_v4 = vld [vmem:[%s5854_s25 + $0xbd8] sm:$0xff] }
  0x74   : > { %1041 = vst [vmem:[%s5859_s26 + $0x610] sm:$0xff] %v1040_v2  ;;  %v1046_v5 = vld [vmem:[%s5854_s25 + $0xbe0] sm:$0xff]  ;;  %1043 = vst [vmem:[%s5859_s26 + $0x618] sm:$0xff] %v1042_v3  ;;  %v1048_v6 = vld [vmem:[%s5854_s25 + $0xbe8] sm:$0xff] }
  0x75   : > { %1045 = vst [vmem:[%s5859_s26 + $0x620] sm:$0xff] %v1044_v4  ;;  %1047 = vst [vmem:[%s5859_s26 + $0x628] sm:$0xff] %v1046_v5  ;;  %v1050_v7 = vld [vmem:[%s5854_s25 + $0xbf0] sm:$0xff]  ;;  %v1052_v8 = vld [vmem:[%s5854_s25 + $0xbf8] sm:$0xff] }
  0x76   : > { %1049 = vst [vmem:[%s5859_s26 + $0x630] sm:$0xff] %v1048_v6  ;;  %1051 = vst [vmem:[%s5859_s26 + $0x638] sm:$0xff] %v1050_v7  ;;  %v1054_v9 = vld [vmem:[%s5854_s25 + $0xc00] sm:$0xff]  ;;  %v1056_v10 = vld [vmem:[%s5854_s25 + $0xc08] sm:$0xff] }
  0x77   : > { %1053 = vst [vmem:[%s5859_s26 + $0x640] sm:$0xff] %v1052_v8  ;;  %v1058_v11 = vld [vmem:[%s5854_s25 + $0xc10] sm:$0xff]  ;;  %1055 = vst [vmem:[%s5859_s26 + $0x648] sm:$0xff] %v1054_v9  ;;  %v1060_v12 = vld [vmem:[%s5854_s25 + $0xc18] sm:$0xff] }
  0x78   : > { %1057 = vst [vmem:[%s5859_s26 + $0x650] sm:$0xff] %v1056_v10  ;;  %1059 = vst [vmem:[%s5859_s26 + $0x658] sm:$0xff] %v1058_v11  ;;  %v1062_v13 = vld [vmem:[%s5854_s25 + $0xc20] sm:$0xff]  ;;  %v1064_v14 = vld [vmem:[%s5854_s25 + $0xc28] sm:$0xff] }
  0x79   : > { %1061 = vst [vmem:[%s5859_s26 + $0x660] sm:$0xff] %v1060_v12  ;;  %1063 = vst [vmem:[%s5859_s26 + $0x668] sm:$0xff] %v1062_v13  ;;  %v1066_v15 = vld [vmem:[%s5854_s25 + $0xc30] sm:$0xff]  ;;  %v1068_v16 = vld [vmem:[%s5854_s25 + $0xc38] sm:$0xff] }
  0x7a   : > { %1065 = vst [vmem:[%s5859_s26 + $0x670] sm:$0xff] %v1064_v14  ;;  %v1070_v17 = vld [vmem:[%s5854_s25 + $0xc40] sm:$0xff]  ;;  %1067 = vst [vmem:[%s5859_s26 + $0x678] sm:$0xff] %v1066_v15  ;;  %v1072_v18 = vld [vmem:[%s5854_s25 + $0xc48] sm:$0xff] }
  0x7b   : > { %1069 = vst [vmem:[%s5859_s26 + $0x680] sm:$0xff] %v1068_v16  ;;  %1071 = vst [vmem:[%s5859_s26 + $0x688] sm:$0xff] %v1070_v17  ;;  %v1074_v19 = vld [vmem:[%s5854_s25 + $0xc50] sm:$0xff]  ;;  %v1076_v20 = vld [vmem:[%s5854_s25 + $0xc58] sm:$0xff] }
  0x7c   : > { %1073 = vst [vmem:[%s5859_s26 + $0x690] sm:$0xff] %v1072_v18  ;;  %1075 = vst [vmem:[%s5859_s26 + $0x698] sm:$0xff] %v1074_v19  ;;  %v1078_v21 = vld [vmem:[%s5854_s25 + $0xc60] sm:$0xff]  ;;  %v1080_v22 = vld [vmem:[%s5854_s25 + $0xc68] sm:$0xff] }
  0x7d   : > { %1077 = vst [vmem:[%s5859_s26 + $0x6a0] sm:$0xff] %v1076_v20  ;;  %v1082_v23 = vld [vmem:[%s5854_s25 + $0xc70] sm:$0xff]  ;;  %1079 = vst [vmem:[%s5859_s26 + $0x6a8] sm:$0xff] %v1078_v21  ;;  %v1084_v24 = vld [vmem:[%s5854_s25 + $0xc78] sm:$0xff] }
  0x7e   : > { %1081 = vst [vmem:[%s5859_s26 + $0x6b0] sm:$0xff] %v1080_v22  ;;  %1083 = vst [vmem:[%s5859_s26 + $0x6b8] sm:$0xff] %v1082_v23  ;;  %v1086_v25 = vld [vmem:[%s5854_s25 + $0xc80] sm:$0xff]  ;;  %v1088_v26 = vld [vmem:[%s5854_s25 + $0xc88] sm:$0xff] }
  0x7f   : > { %1085 = vst [vmem:[%s5859_s26 + $0x6c0] sm:$0xff] %v1084_v24  ;;  %1087 = vst [vmem:[%s5859_s26 + $0x6c8] sm:$0xff] %v1086_v25  ;;  %v1090_v27 = vld [vmem:[%s5854_s25 + $0xc90] sm:$0xff]  ;;  %v1092_v28 = vld [vmem:[%s5854_s25 + $0xc98] sm:$0xff] }
  0x80   : > { %1089 = vst [vmem:[%s5859_s26 + $0x6d0] sm:$0xff] %v1088_v26  ;;  %v1094_v29 = vld [vmem:[%s5854_s25 + $0xca0] sm:$0xff]  ;;  %1091 = vst [vmem:[%s5859_s26 + $0x6d8] sm:$0xff] %v1090_v27  ;;  %v1096_v30 = vld [vmem:[%s5854_s25 + $0xca8] sm:$0xff] }
  0x81   : > { %1093 = vst [vmem:[%s5859_s26 + $0x6e0] sm:$0xff] %v1092_v28  ;;  %1095 = vst [vmem:[%s5859_s26 + $0x6e8] sm:$0xff] %v1094_v29  ;;  %v1098_v31 = vld [vmem:[%s5854_s25 + $0xcb0] sm:$0xff]  ;;  %v1100_v32 = vld [vmem:[%s5854_s25 + $0xcb8] sm:$0xff] }
  0x82   : > { %1097 = vst [vmem:[%s5859_s26 + $0x6f0] sm:$0xff] %v1096_v30  ;;  %1099 = vst [vmem:[%s5859_s26 + $0x6f8] sm:$0xff] %v1098_v31  ;;  %v1102_v33 = vld [vmem:[%s5854_s25 + $0xcc0] sm:$0xff]  ;;  %v1104_v34 = vld [vmem:[%s5854_s25 + $0xcc8] sm:$0xff] }
  0x83   : > { %1101 = vst [vmem:[%s5859_s26 + $0x700] sm:$0xff] %v1100_v32  ;;  %v1106_v35 = vld [vmem:[%s5854_s25 + $0xcd0] sm:$0xff]  ;;  %1103 = vst [vmem:[%s5859_s26 + $0x708] sm:$0xff] %v1102_v33  ;;  %v1108_v36 = vld [vmem:[%s5854_s25 + $0xcd8] sm:$0xff] }
  0x84   : > { %1105 = vst [vmem:[%s5859_s26 + $0x710] sm:$0xff] %v1104_v34  ;;  %1107 = vst [vmem:[%s5859_s26 + $0x718] sm:$0xff] %v1106_v35  ;;  %v1110_v37 = vld [vmem:[%s5854_s25 + $0xce0] sm:$0xff]  ;;  %v1112_v38 = vld [vmem:[%s5854_s25 + $0xce8] sm:$0xff] }
  0x85   : > { %1109 = vst [vmem:[%s5859_s26 + $0x720] sm:$0xff] %v1108_v36  ;;  %1111 = vst [vmem:[%s5859_s26 + $0x728] sm:$0xff] %v1110_v37  ;;  %v1114_v39 = vld [vmem:[%s5854_s25 + $0xcf0] sm:$0xff]  ;;  %v1116_v40 = vld [vmem:[%s5854_s25 + $0xcf8] sm:$0xff] }
  0x86   : > { %1113 = vst [vmem:[%s5859_s26 + $0x730] sm:$0xff] %v1112_v38  ;;  %v1118_v41 = vld [vmem:[%s5854_s25 + $0xd00] sm:$0xff]  ;;  %1115 = vst [vmem:[%s5859_s26 + $0x738] sm:$0xff] %v1114_v39  ;;  %v1120_v42 = vld [vmem:[%s5854_s25 + $0xd08] sm:$0xff] }
  0x87   : > { %1117 = vst [vmem:[%s5859_s26 + $0x740] sm:$0xff] %v1116_v40  ;;  %1119 = vst [vmem:[%s5859_s26 + $0x748] sm:$0xff] %v1118_v41  ;;  %v1122_v43 = vld [vmem:[%s5854_s25 + $0xd10] sm:$0xff]  ;;  %v1124_v44 = vld [vmem:[%s5854_s25 + $0xd18] sm:$0xff] }
  0x88   : > { %1121 = vst [vmem:[%s5859_s26 + $0x750] sm:$0xff] %v1120_v42  ;;  %1123 = vst [vmem:[%s5859_s26 + $0x758] sm:$0xff] %v1122_v43  ;;  %v1126_v45 = vld [vmem:[%s5854_s25 + $0xd20] sm:$0xff]  ;;  %v1128_v46 = vld [vmem:[%s5854_s25 + $0xd28] sm:$0xff] }
  0x89   : > { %1125 = vst [vmem:[%s5859_s26 + $0x760] sm:$0xff] %v1124_v44  ;;  %v1130_v47 = vld [vmem:[%s5854_s25 + $0xd30] sm:$0xff]  ;;  %1127 = vst [vmem:[%s5859_s26 + $0x768] sm:$0xff] %v1126_v45  ;;  %v1132_v48 = vld [vmem:[%s5854_s25 + $0xd38] sm:$0xff] }
  0x8a   : > { %1129 = vst [vmem:[%s5859_s26 + $0x770] sm:$0xff] %v1128_v46  ;;  %1131 = vst [vmem:[%s5859_s26 + $0x778] sm:$0xff] %v1130_v47  ;;  %v1134_v49 = vld [vmem:[%s5854_s25 + $0xd40] sm:$0xff]  ;;  %v1136_v50 = vld [vmem:[%s5854_s25 + $0xd48] sm:$0xff] }
  0x8b   : > { %1133 = vst [vmem:[%s5859_s26 + $0x780] sm:$0xff] %v1132_v48  ;;  %1135 = vst [vmem:[%s5859_s26 + $0x788] sm:$0xff] %v1134_v49  ;;  %v1138_v51 = vld [vmem:[%s5854_s25 + $0xd50] sm:$0xff] }
  0x8c   : > { %1137 = vst [vmem:[%s5859_s26 + $0x790] sm:$0xff] %v1136_v50  ;;  %1139 = vst [vmem:[%s5859_s26 + $0x798] sm:$0xff] %v1138_v51 }
  0x8d PF: > { %p4666_p5 = scmp.ge.s32.totalorder %s5797_s14, 1  ;;  %p1144_p6 = scmp.lt.s32.totalorder %s5797_s14, 3 }
  0x8f   : > { %p1145_p7 = pnand %p4666_p5, %p1144_p6 }
  0x91   : > { %1148 = sbr.rel (%p1145_p7) target bundleno = 898 (0x382), region = 66 }
  0x98   : > { %v5398_v52 = vld [vmem:[%s7233_s1] sm:$0xff]   ;;  %v5799_v53 = vmov 0   ;;  %v5399_v54 = vld [vmem:[%s7233_s1 + $0x8] sm:$0xff]   ;;  %s1151_s4 = sand.u32 1, %s5789_s12   ;;  %v5400_v55 = vld [vmem:[%s7233_s1 + $0x10] sm:$0xff]   ;;  %vm2600_vm0 = vcmask 179200  }
  0x99   : > { %2971 = vmatprep.subr.bf16.mxu0 %v5799_v53  ;;  %5351 = vmatprep.subr.bf16.mxu1 %v5799_v53  ;;  %s5372_s5 = smul.u32 1952, %s1151_s4  ;;  %v5401_v56 = vld [vmem:[%s7233_s1 + $0x18] sm:$0xff]   ;;  %v5402_v59 = vld [vmem:[%s7233_s1 + $0x20] sm:$0xff]   ;;  %v5403_v60 = vld [vmem:[%s7233_s1 + $0x28] sm:$0xff]   ;;  %vm2967_vm1 = vcmask 1042432  }
  0x9a   : > { %2972 = vmatpush1.bf16.msra.mxu0 %v5398_v52  ;;  %5361 = vmatpush1.bf16.msra.mxu1 %v5398_v52  ;;  %v5404_v61 = vld [vmem:[%s7233_s1 + $0x30] sm:$0xff]   ;;  %v5405_v62 = vld [vmem:[%s7233_s1 + $0x38] sm:$0xff]   ;;  %v5406_v63 = vld [vmem:[%s7233_s1 + $0x40] sm:$0xff]   ;;  %s1175_s28 = smul.u32 61, %s4660_s15 }
  0x9b   : > { %2973 = vmatprep.subr.bf16.mxu0 %v5799_v53  ;;  %5352 = vmatprep.subr.bf16.mxu1 %v5799_v53  ;;  %s6358_s8 = scalar_lea.vmem [#allocation2], %s5372_s5  ;;  %v5407_v0 = vld [vmem:[%s7233_s1 + $0x48] ss:$0 sps:$4 sm:$0x77]  }
  0x9c   : > { %v5410_v57 = vld [vmem:[%s6358_s8 + $0x4] ss:$8 sps:$4 sm:$0xff]   ;;  %v5413_v58 = vld [vmem:[%s6358_s8 + $0x3d4] ss:$8 sps:$4 sm:$0xff]   ;;  %v2969_v1 = vsel %vm2967_vm1, %v5407_v0, 0  ;;  %p1176_p8 = scmp.lt.s32.totalorder %s1175_s28, 121 }
  0x9d   : > { %4922 = vmatprep.mubr.msk.bf16.mxu0 %vm2600_vm0, %v5410_v57  ;;  %4983 = vmatprep.mubr.msk.bf16.mxu1 %vm2600_vm0, %v5413_v58  ;;  %v5408_v2 = vld [vmem:[%s6358_s8] ss:$8 sps:$4 sm:$0xff]   ;;  %v5411_v3 = vld [vmem:[%s6358_s8 + $0x3d0] ss:$8 sps:$4 sm:$0xff]   ;;  %v5414_v4 = vld [vmem:[%s6358_s8 + $0x14] ss:$8 sps:$4 sm:$0xff]  }
  0x9e   : > { %2974 = vmatpush1.bf16.msra.mxu0 %v5399_v54  ;;  %5362 = vmatpush1.bf16.msra.mxu1 %v5399_v54  ;;  %v5416_v5 = vld [vmem:[%s6358_s8 + $0x3e4] ss:$8 sps:$4 sm:$0xff]   ;;  %v5418_v6 = vld [vmem:[%s6358_s8 + $0x10] ss:$8 sps:$4 sm:$0xff]   ;;  %v5419_v7 = vld [vmem:[%s6358_s8 + $0x3e0] ss:$8 sps:$4 sm:$0xff]  }
  0x9f   : > { %2975 = vmatprep.subr.bf16.mxu0 %v5799_v53  ;;  %5353 = vmatprep.subr.bf16.mxu1 %v5799_v53  ;;  %v5420_v8 = vld [vmem:[%s6358_s8 + $0x24] ss:$8 sps:$4 sm:$0xff]   ;;  %v5422_v9 = vld [vmem:[%s6358_s8 + $0x3f4] ss:$8 sps:$4 sm:$0xff]   ;;  %v5424_v10 = vld [vmem:[%s6358_s8 + $0x20] ss:$8 sps:$4 sm:$0xff]  }
  0xa0   : > { %v5425_v11 = vld [vmem:[%s6358_s8 + $0x3f0] ss:$8 sps:$4 sm:$0xff]   ;;  %v5426_v12 = vld [vmem:[%s6358_s8 + $0x34] ss:$8 sps:$4 sm:$0xff]   ;;  %v5428_v13 = vld [vmem:[%s6358_s8 + $0x404] ss:$8 sps:$4 sm:$0xff]  }
  0xa1   : > { %v5430_v14 = vld [vmem:[%s6358_s8 + $0x30] ss:$8 sps:$4 sm:$0xff]   ;;  %v5431_v15 = vld [vmem:[%s6358_s8 + $0x400] ss:$8 sps:$4 sm:$0xff]   ;;  %v5432_v16 = vld [vmem:[%s6358_s8 + $0x44] ss:$8 sps:$4 sm:$0xff]  }
  0xa2   : > { %2976 = vmatpush1.bf16.msra.mxu0 %v5400_v55  ;;  %5363 = vmatpush1.bf16.msra.mxu1 %v5400_v55  ;;  %v5434_v17 = vld [vmem:[%s6358_s8 + $0x414] ss:$8 sps:$4 sm:$0xff]   ;;  %v5436_v18 = vld [vmem:[%s6358_s8 + $0x40] ss:$8 sps:$4 sm:$0xff]   ;;  %v5437_v19 = vld [vmem:[%s6358_s8 + $0x410] ss:$8 sps:$4 sm:$0xff]  }
  0xa3   : > { %2977 = vmatprep.subr.bf16.mxu0 %v5799_v53  ;;  %5354 = vmatprep.subr.bf16.mxu1 %v5799_v53  ;;  %v5438_v20 = vld [vmem:[%s6358_s8 + $0x54] ss:$8 sps:$4 sm:$0xff]   ;;  %v5440_v21 = vld [vmem:[%s6358_s8 + $0x424] ss:$8 sps:$4 sm:$0xff]   ;;  %v5442_v22 = vld [vmem:[%s6358_s8 + $0x50] ss:$8 sps:$4 sm:$0xff]  }
  0xa4   : > { %v5443_v23 = vld [vmem:[%s6358_s8 + $0x420] ss:$8 sps:$4 sm:$0xff]   ;;  %v5444_v24 = vld [vmem:[%s6358_s8 + $0x64] ss:$8 sps:$4 sm:$0xff]   ;;  %v5446_v25 = vld [vmem:[%s6358_s8 + $0x434] ss:$8 sps:$4 sm:$0xff]  }
  0xa5   : > { %v5448_v26 = vld [vmem:[%s6358_s8 + $0x60] ss:$8 sps:$4 sm:$0xff]   ;;  %v5449_v27 = vld [vmem:[%s6358_s8 + $0x430] ss:$8 sps:$4 sm:$0xff]   ;;  %v5450_v28 = vld [vmem:[%s6358_s8 + $0x74] ss:$8 sps:$4 sm:$0xff]  }
  0xa6   : > { %2978 = vmatpush1.bf16.msra.mxu0 %v5401_v56  ;;  %5364 = vmatpush1.bf16.msra.mxu1 %v5401_v56  ;;  %v5452_v29 = vld [vmem:[%s6358_s8 + $0x444] ss:$8 sps:$4 sm:$0xff]   ;;  %v5454_v30 = vld [vmem:[%s6358_s8 + $0x70] ss:$8 sps:$4 sm:$0xff]   ;;  %v5455_v31 = vld [vmem:[%s6358_s8 + $0x440] ss:$8 sps:$4 sm:$0xff]  }
  0xa7   : > { %2979 = vmatprep.subr.bf16.mxu0 %v5799_v53  ;;  %5355 = vmatprep.subr.bf16.mxu1 %v5799_v53  ;;  %v5456_v32 = vld [vmem:[%s6358_s8 + $0x84] ss:$8 sps:$4 sm:$0xff]   ;;  %v5458_v33 = vld [vmem:[%s6358_s8 + $0x454] ss:$8 sps:$4 sm:$0xff]   ;;  %v5460_v34 = vld [vmem:[%s6358_s8 + $0x80] ss:$8 sps:$4 sm:$0xff]  }
  0xa8   : > { %v5461_v35 = vld [vmem:[%s6358_s8 + $0x450] ss:$8 sps:$4 sm:$0xff]   ;;  %v5462_v36 = vld [vmem:[%s6358_s8 + $0x94] ss:$8 sps:$4 sm:$0xff]   ;;  %v5464_v37 = vld [vmem:[%s6358_s8 + $0x464] ss:$8 sps:$4 sm:$0xff]  }
  0xa9   : > { %v5466_v38 = vld [vmem:[%s6358_s8 + $0x90] ss:$8 sps:$4 sm:$0xff]   ;;  %v5467_v39 = vld [vmem:[%s6358_s8 + $0x460] ss:$8 sps:$4 sm:$0xff]   ;;  %v5468_v40 = vld [vmem:[%s6358_s8 + $0xa4] ss:$8 sps:$4 sm:$0xff]  }
  0xaa   : > { %2980 = vmatpush1.bf16.msra.mxu0 %v5402_v59  ;;  %5365 = vmatpush1.bf16.msra.mxu1 %v5402_v59  ;;  %v5470_v41 = vld [vmem:[%s6358_s8 + $0x474] ss:$8 sps:$4 sm:$0xff]   ;;  %v5472_v42 = vld [vmem:[%s6358_s8 + $0xa0] ss:$8 sps:$4 sm:$0xff]   ;;  %v5473_v43 = vld [vmem:[%s6358_s8 + $0x470] ss:$8 sps:$4 sm:$0xff]  }
  0xab   : > { %2981 = vmatprep.subr.bf16.mxu0 %v5799_v53  ;;  %5356 = vmatprep.subr.bf16.mxu1 %v5799_v53  ;;  %v5474_v44 = vld [vmem:[%s6358_s8 + $0xb4] ss:$8 sps:$4 sm:$0xff]   ;;  %v5476_v45 = vld [vmem:[%s6358_s8 + $0x484] ss:$8 sps:$4 sm:$0xff]   ;;  %v5478_v46 = vld [vmem:[%s6358_s8 + $0xb0] ss:$8 sps:$4 sm:$0xff]  }
  0xac   : > { %v5479_v47 = vld [vmem:[%s6358_s8 + $0x480] ss:$8 sps:$4 sm:$0xff]   ;;  %v5480_v48 = vld [vmem:[%s6358_s8 + $0xc4] ss:$8 sps:$4 sm:$0xff]   ;;  %v5482_v49 = vld [vmem:[%s6358_s8 + $0x494] ss:$8 sps:$4 sm:$0xff]  }
  0xad   : > { %v5484_v50 = vld [vmem:[%s6358_s8 + $0xc0] ss:$8 sps:$4 sm:$0xff]   ;;  %v5485_v51 = vld [vmem:[%s6358_s8 + $0x490] ss:$8 sps:$4 sm:$0xff]   ;;  %v5486_v52 = vld [vmem:[%s6358_s8 + $0xd4] ss:$8 sps:$4 sm:$0xff]  }
  0xae   : > { %2982 = vmatpush1.bf16.msra.mxu0 %v5403_v60  ;;  %5366 = vmatpush1.bf16.msra.mxu1 %v5403_v60  ;;  %v5490_v54 = vld [vmem:[%s6358_s8 + $0xd0] ss:$8 sps:$4 sm:$0xff]   ;;  %v5491_v55 = vld [vmem:[%s6358_s8 + $0x4a0] ss:$8 sps:$4 sm:$0xff]   ;;  %v5492_v56 = vld [vmem:[%s6358_s8 + $0xe4] ss:$8 sps:$4 sm:$0xff]  }
  0xaf   : > { %2983 = vmatprep.subr.bf16.mxu0 %v5799_v53  ;;  %5357 = vmatprep.subr.bf16.mxu1 %v5799_v53  ;;  %v5494_v57 = vld [vmem:[%s6358_s8 + $0x4b4] ss:$8 sps:$4 sm:$0xff]   ;;  %v5496_v58 = vld [vmem:[%s6358_s8 + $0xe0] ss:$8 sps:$4 sm:$0xff]   ;;  %v5497_v59 = vld [vmem:[%s6358_s8 + $0x4b0] ss:$8 sps:$4 sm:$0xff]  }
  0xb0   : > { %v5498_v60 = vld [vmem:[%s6358_s8 + $0xf4] ss:$8 sps:$4 sm:$0xff]   ;;  %v5504_v0 = vld [vmem:[%s6358_s8 + $0x104] ss:$8 sps:$4 sm:$0xff]   ;;  %s7392_s28 = smov (!%p1176_p8, %s1175_s28), 121 }
  0xb1   : > { %s4667_s29 = sshll.u32 %s7392_s28, 2 }
  0xb2   : > { %2984 = vmatpush1.bf16.msra.mxu0 %v5404_v61  ;;  %5367 = vmatpush1.bf16.msra.mxu1 %v5404_v61  ;;  %v5500_v61 = vld [vmem:[%s6358_s8 + $0x4c4] ss:$8 sps:$4 sm:$0xff]   ;;  %s7001_s5 = scalar_lea.vmem %s7235_s3, %s4667_s29 }
  0xb3   : > { %2985 = vmatprep.subr.bf16.mxu0 %v5799_v53  ;;  %5358 = vmatprep.subr.bf16.mxu1 %v5799_v53 }
  0xb6   : > { %2986 = vmatpush1.bf16.msra.mxu0 %v5405_v62  ;;  %5368 = vmatpush1.bf16.msra.mxu1 %v5405_v62  ;;  %v5502_v62 = vld [vmem:[%s6358_s8 + $0xf0] ss:$8 sps:$4 sm:$0xff]  }
  0xb7   : > { %2987 = vmatprep.subr.bf16.mxu0 %v5799_v53  ;;  %5359 = vmatprep.subr.bf16.mxu1 %v5799_v53 }
  0xba   : > { %2988 = vmatpush1.bf16.msra.mxu0 %v5406_v63  ;;  %5369 = vmatpush1.bf16.msra.mxu1 %v5406_v63  ;;  %v5503_v63 = vld [vmem:[%s6358_s8 + $0x4c0] ss:$8 sps:$4 sm:$0xff]  }
  0xbb   : > { %2989 = vmatprep.subr.bf16.mxu0 %v5799_v53  ;;  %5360 = vmatprep.subr.bf16.mxu1 %v5799_v53  ;;  %v5488_v53 = vld [vmem:[%s6358_s8 + $0x4a4] ss:$8 sps:$4 sm:$0xff]  }
  0xbe   : > { %2990 = vmatpush1.bf16.msra.mxu0 %v2969_v1  ;;  %5370 = vmatpush1.bf16.msra.mxu1 %v2969_v1  ;;  %v5506_v1 = vld [vmem:[%s6358_s8 + $0x4d4] ss:$8 sps:$4 sm:$0xff]  }
  0xc1   : > { %3004 = vmatmul.mubr.bf16.vlgmr.msra.gmra.mrb[0].mxu0 %v5408_v2  ;;  %3492 = vmatmul.mubr.bf16.vlgmr.msra.gmra.mrb[0].mxu1 %v5411_v3  ;;  %v5508_v2 = vld [vmem:[%s6358_s8 + $0x100] ss:$8 sps:$4 sm:$0xff]   ;;  %v5509_v3 = vld [vmem:[%s6358_s8 + $0x4d0] ss:$8 sps:$4 sm:$0xff]  }
  0xc2   : > { %4923 = vmatprep.mubr.msk.bf16.mxu0 %vm2600_vm0, %v5414_v4  ;;  %4984 = vmatprep.mubr.msk.bf16.mxu1 %vm2600_vm0, %v5416_v5  ;;  %v5510_v4 = vld [vmem:[%s6358_s8 + $0x114] ss:$8 sps:$4 sm:$0xff]   ;;  %v5512_v5 = vld [vmem:[%s6358_s8 + $0x4e4] ss:$8 sps:$4 sm:$0xff]  }
  0xc9   : > { %3012 = vmatmul.mubr.bf16.gmra.mrb[4].mxu0 %v5418_v6  ;;  %3500 = vmatmul.mubr.bf16.gmra.mrb[4].mxu1 %v5419_v7  ;;  %v5514_v6 = vld [vmem:[%s6358_s8 + $0x110] ss:$8 sps:$4 sm:$0xff]   ;;  %v5515_v7 = vld [vmem:[%s6358_s8 + $0x4e0] ss:$8 sps:$4 sm:$0xff]  }
  0xca   : > { %4924 = vmatprep.mubr.msk.bf16.mxu0 %vm2600_vm0, %v5420_v8  ;;  %4985 = vmatprep.mubr.msk.bf16.mxu1 %vm2600_vm0, %v5422_v9  ;;  %v5516_v8 = vld [vmem:[%s6358_s8 + $0x124] ss:$8 sps:$4 sm:$0xff]   ;;  %v5518_v9 = vld [vmem:[%s6358_s8 + $0x4f4] ss:$8 sps:$4 sm:$0xff]  }
  0xd1   : > { %3020 = vmatmul.mubr.bf16.gmra.mrb[8].mxu0 %v5424_v10  ;;  %3508 = vmatmul.mubr.bf16.gmra.mrb[8].mxu1 %v5425_v11  ;;  %v5520_v10 = vld [vmem:[%s6358_s8 + $0x120] ss:$8 sps:$4 sm:$0xff]   ;;  %v5521_v11 = vld [vmem:[%s6358_s8 + $0x4f0] ss:$8 sps:$4 sm:$0xff]  }
  0xd2   : > { %4925 = vmatprep.mubr.msk.bf16.mxu0 %vm2600_vm0, %v5426_v12  ;;  %4986 = vmatprep.mubr.msk.bf16.mxu1 %vm2600_vm0, %v5428_v13  ;;  %v5522_v12 = vld [vmem:[%s6358_s8 + $0x134] ss:$8 sps:$4 sm:$0xff]   ;;  %v5524_v13 = vld [vmem:[%s6358_s8 + $0x504] ss:$8 sps:$4 sm:$0xff]  }
  0xd9   : > { %3028 = vmatmul.mubr.bf16.gmra.mrb[12].mxu0 %v5430_v14  ;;  %3516 = vmatmul.mubr.bf16.gmra.mrb[12].mxu1 %v5431_v15  ;;  %v5526_v14 = vld [vmem:[%s6358_s8 + $0x130] ss:$8 sps:$4 sm:$0xff]   ;;  %v5527_v15 = vld [vmem:[%s6358_s8 + $0x500] ss:$8 sps:$4 sm:$0xff]  }
  0xda   : > { %4926 = vmatprep.mubr.msk.bf16.mxu0 %vm2600_vm0, %v5432_v16  ;;  %4987 = vmatprep.mubr.msk.bf16.mxu1 %vm2600_vm0, %v5434_v17  ;;  %v5528_v16 = vld [vmem:[%s6358_s8 + $0x144] ss:$8 sps:$4 sm:$0xff]   ;;  %v5530_v17 = vld [vmem:[%s6358_s8 + $0x514] ss:$8 sps:$4 sm:$0xff]  }
  0xe1   : > { %3036 = vmatmul.mubr.bf16.gmra.mrb[16].mxu0 %v5436_v18  ;;  %3524 = vmatmul.mubr.bf16.gmra.mrb[16].mxu1 %v5437_v19  ;;  %v5532_v18 = vld [vmem:[%s6358_s8 + $0x140] ss:$8 sps:$4 sm:$0xff]   ;;  %v5533_v19 = vld [vmem:[%s6358_s8 + $0x510] ss:$8 sps:$4 sm:$0xff]  }
  0xe2   : > { %4927 = vmatprep.mubr.msk.bf16.mxu0 %vm2600_vm0, %v5438_v20  ;;  %4988 = vmatprep.mubr.msk.bf16.mxu1 %vm2600_vm0, %v5440_v21  ;;  %v5534_v20 = vld [vmem:[%s6358_s8 + $0x154] ss:$8 sps:$4 sm:$0xff]   ;;  %v5536_v21 = vld [vmem:[%s6358_s8 + $0x524] ss:$8 sps:$4 sm:$0xff]  }
  0xe9   : > { %3044 = vmatmul.mubr.bf16.gmra.mrb[20].mxu0 %v5442_v22  ;;  %3532 = vmatmul.mubr.bf16.gmra.mrb[20].mxu1 %v5443_v23  ;;  %v5538_v22 = vld [vmem:[%s6358_s8 + $0x150] ss:$8 sps:$4 sm:$0xff]   ;;  %v5539_v23 = vld [vmem:[%s6358_s8 + $0x520] ss:$8 sps:$4 sm:$0xff]  }
  0xea   : > { %4928 = vmatprep.mubr.msk.bf16.mxu0 %vm2600_vm0, %v5444_v24  ;;  %4989 = vmatprep.mubr.msk.bf16.mxu1 %vm2600_vm0, %v5446_v25  ;;  %v5540_v24 = vld [vmem:[%s6358_s8 + $0x164] ss:$8 sps:$4 sm:$0xff]   ;;  %v5542_v25 = vld [vmem:[%s6358_s8 + $0x534] ss:$8 sps:$4 sm:$0xff]  }
  0xf1   : > { %3052 = vmatmul.mubr.bf16.gmra.mrb[24].mxu0 %v5448_v26  ;;  %3540 = vmatmul.mubr.bf16.gmra.mrb[24].mxu1 %v5449_v27  ;;  %v5544_v26 = vld [vmem:[%s6358_s8 + $0x160] ss:$8 sps:$4 sm:$0xff]   ;;  %v5545_v27 = vld [vmem:[%s6358_s8 + $0x530] ss:$8 sps:$4 sm:$0xff]  }
  0xf2   : > { %4929 = vmatprep.mubr.msk.bf16.mxu0 %vm2600_vm0, %v5450_v28  ;;  %4990 = vmatprep.mubr.msk.bf16.mxu1 %vm2600_vm0, %v5452_v29  ;;  %v5546_v28 = vld [vmem:[%s6358_s8 + $0x174] ss:$8 sps:$4 sm:$0xff]   ;;  %v5548_v29 = vld [vmem:[%s6358_s8 + $0x544] ss:$8 sps:$4 sm:$0xff]  }
  0xf9   : > { %3060 = vmatmul.mubr.bf16.gmra.mrb[28].mxu0 %v5454_v30  ;;  %3548 = vmatmul.mubr.bf16.gmra.mrb[28].mxu1 %v5455_v31  ;;  %v5550_v30 = vld [vmem:[%s6358_s8 + $0x170] ss:$8 sps:$4 sm:$0xff]   ;;  %v5551_v31 = vld [vmem:[%s6358_s8 + $0x540] ss:$8 sps:$4 sm:$0xff]  }
  0xfa   : > { %4930 = vmatprep.mubr.msk.bf16.mxu0 %vm2600_vm0, %v5456_v32  ;;  %4991 = vmatprep.mubr.msk.bf16.mxu1 %vm2600_vm0, %v5458_v33  ;;  %v5552_v32 = vld [vmem:[%s6358_s8 + $0x184] ss:$8 sps:$4 sm:$0xff]   ;;  %v5554_v33 = vld [vmem:[%s6358_s8 + $0x554] ss:$8 sps:$4 sm:$0xff]  }
 0x101   : > { %3068 = vmatmul.mubr.bf16.gmra.mrb[32].mxu0 %v5460_v34  ;;  %3556 = vmatmul.mubr.bf16.gmra.mrb[32].mxu1 %v5461_v35  ;;  %v5556_v34 = vld [vmem:[%s6358_s8 + $0x180] ss:$8 sps:$4 sm:$0xff]   ;;  %v5557_v35 = vld [vmem:[%s6358_s8 + $0x550] ss:$8 sps:$4 sm:$0xff]  }
 0x102   : > { %4931 = vmatprep.mubr.msk.bf16.mxu0 %vm2600_vm0, %v5462_v36  ;;  %4992 = vmatprep.mubr.msk.bf16.mxu1 %vm2600_vm0, %v5464_v37  ;;  %v5558_v36 = vld [vmem:[%s6358_s8 + $0x194] ss:$8 sps:$4 sm:$0xff]   ;;  %v5560_v37 = vld [vmem:[%s6358_s8 + $0x564] ss:$8 sps:$4 sm:$0xff]  }
 0x109   : > { %3076 = vmatmul.mubr.bf16.gmra.mrb[36].mxu0 %v5466_v38  ;;  %3564 = vmatmul.mubr.bf16.gmra.mrb[36].mxu1 %v5467_v39  ;;  %v5562_v38 = vld [vmem:[%s6358_s8 + $0x190] ss:$8 sps:$4 sm:$0xff]   ;;  %v5563_v39 = vld [vmem:[%s6358_s8 + $0x560] ss:$8 sps:$4 sm:$0xff]  }
 0x10a   : > { %4932 = vmatprep.mubr.msk.bf16.mxu0 %vm2600_vm0, %v5468_v40  ;;  %4993 = vmatprep.mubr.msk.bf16.mxu1 %vm2600_vm0, %v5470_v41  ;;  %v5564_v40 = vld [vmem:[%s6358_s8 + $0x1a4] ss:$8 sps:$4 sm:$0xff]   ;;  %v5566_v41 = vld [vmem:[%s6358_s8 + $0x574] ss:$8 sps:$4 sm:$0xff]  }
 0x111   : > { %3084 = vmatmul.mubr.bf16.gmra.mrb[40].mxu0 %v5472_v42  ;;  %3572 = vmatmul.mubr.bf16.gmra.mrb[40].mxu1 %v5473_v43  ;;  %v5568_v42 = vld [vmem:[%s6358_s8 + $0x1a0] ss:$8 sps:$4 sm:$0xff]   ;;  %v5569_v43 = vld [vmem:[%s6358_s8 + $0x570] ss:$8 sps:$4 sm:$0xff]  }
 0x112   : > { %4933 = vmatprep.mubr.msk.bf16.mxu0 %vm2600_vm0, %v5474_v44  ;;  %4994 = vmatprep.mubr.msk.bf16.mxu1 %vm2600_vm0, %v5476_v45  ;;  %v5570_v44 = vld [vmem:[%s6358_s8 + $0x1b4] ss:$8 sps:$4 sm:$0xff]   ;;  %v5572_v45 = vld [vmem:[%s6358_s8 + $0x584] ss:$8 sps:$4 sm:$0xff]  }
 0x119   : > { %3092 = vmatmul.mubr.bf16.gmra.mrb[44].mxu0 %v5478_v46  ;;  %3580 = vmatmul.mubr.bf16.gmra.mrb[44].mxu1 %v5479_v47 }
 0x11a   : > { %4934 = vmatprep.mubr.msk.bf16.mxu0 %vm2600_vm0, %v5480_v48  ;;  %4995 = vmatprep.mubr.msk.bf16.mxu1 %vm2600_vm0, %v5482_v49 }
 0x121   : > { %3100 = vmatmul.mubr.bf16.gmra.mrb[48].mxu0 %v5484_v50  ;;  %3588 = vmatmul.mubr.bf16.gmra.mrb[48].mxu1 %v5485_v51  ;;  %v5574_v50 = vld [vmem:[%s6358_s8 + $0x1b0] ss:$8 sps:$4 sm:$0xff]   ;;  %v5575_v51 = vld [vmem:[%s6358_s8 + $0x580] ss:$8 sps:$4 sm:$0xff]  }
 0x122   : > { %4935 = vmatprep.mubr.msk.bf16.mxu0 %vm2600_vm0, %v5486_v52  ;;  %4996 = vmatprep.mubr.msk.bf16.mxu1 %vm2600_vm0, %v5488_v53 }
 0x129   : > { %3108 = vmatmul.mubr.bf16.gmra.mrb[52].mxu0 %v5490_v54  ;;  %3596 = vmatmul.mubr.bf16.gmra.mrb[52].mxu1 %v5491_v55  ;;  %v5576_v54 = vld [vmem:[%s6358_s8 + $0x1c4] ss:$8 sps:$4 sm:$0xff]   ;;  %v5578_v55 = vld [vmem:[%s6358_s8 + $0x594] ss:$8 sps:$4 sm:$0xff]  }
 0x12a   : > { %4936 = vmatprep.mubr.msk.bf16.mxu0 %vm2600_vm0, %v5492_v56  ;;  %4997 = vmatprep.mubr.msk.bf16.mxu1 %vm2600_vm0, %v5494_v57 }
 0x131   : > { %3116 = vmatmul.mubr.bf16.gmra.mrb[56].mxu0 %v5496_v58  ;;  %3604 = vmatmul.mubr.bf16.gmra.mrb[56].mxu1 %v5497_v59 }
 0x132   : > { %4937 = vmatprep.mubr.msk.bf16.mxu0 %vm2600_vm0, %v5498_v60  ;;  %4998 = vmatprep.mubr.msk.bf16.mxu1 %vm2600_vm0, %v5500_v61 }
 0x139   : > { %3124 = vmatmul.mubr.bf16.gmra.mrb[60].mxu0 %v5502_v62  ;;  %3612 = vmatmul.mubr.bf16.gmra.mrb[60].mxu1 %v5503_v63  ;;  %v5580_v62 = vld [vmem:[%s6358_s8 + $0x1c0] ss:$8 sps:$4 sm:$0xff]   ;;  %v5581_v63 = vld [vmem:[%s6358_s8 + $0x590] ss:$8 sps:$4 sm:$0xff]  }
 0x13a   : > { %4938 = vmatprep.mubr.msk.bf16.mxu0 %vm2600_vm0, %v5504_v0  ;;  %4999 = vmatprep.mubr.msk.bf16.mxu1 %vm2600_vm0, %v5506_v1 }
 0x141   : > { %3132 = vmatmul.mubr.bf16.gmra.mrb[64].mxu0 %v5508_v2  ;;  %3620 = vmatmul.mubr.bf16.gmra.mrb[64].mxu1 %v5509_v3  ;;  %v5582_v2 = vld [vmem:[%s6358_s8 + $0x1d4] ss:$8 sps:$4 sm:$0xff]   ;;  %v5584_v3 = vld [vmem:[%s6358_s8 + $0x5a4] ss:$8 sps:$4 sm:$0xff]  }
 0x142   : > { %4939 = vmatprep.mubr.msk.bf16.mxu0 %vm2600_vm0, %v5510_v4  ;;  %5000 = vmatprep.mubr.msk.bf16.mxu1 %vm2600_vm0, %v5512_v5 }
 0x149   : > { %3140 = vmatmul.mubr.bf16.gmra.mrb[68].mxu0 %v5514_v6  ;;  %3628 = vmatmul.mubr.bf16.gmra.mrb[68].mxu1 %v5515_v7 }
 0x14a   : > { %4940 = vmatprep.mubr.msk.bf16.mxu0 %vm2600_vm0, %v5516_v8  ;;  %5001 = vmatprep.mubr.msk.bf16.mxu1 %vm2600_vm0, %v5518_v9 }
 0x151   : > { %3148 = vmatmul.mubr.bf16.gmra.mrb[72].mxu0 %v5520_v10  ;;  %3636 = vmatmul.mubr.bf16.gmra.mrb[72].mxu1 %v5521_v11  ;;  %v5586_v10 = vld [vmem:[%s6358_s8 + $0x1d0] ss:$8 sps:$4 sm:$0xff]   ;;  %v5587_v11 = vld [vmem:[%s6358_s8 + $0x5a0] ss:$8 sps:$4 sm:$0xff]  }
 0x152   : > { %4941 = vmatprep.mubr.msk.bf16.mxu0 %vm2600_vm0, %v5522_v12  ;;  %5002 = vmatprep.mubr.msk.bf16.mxu1 %vm2600_vm0, %v5524_v13 }
 0x159   : > { %3156 = vmatmul.mubr.bf16.gmra.mrb[76].mxu0 %v5526_v14  ;;  %3644 = vmatmul.mubr.bf16.gmra.mrb[76].mxu1 %v5527_v15  ;;  %v5588_v14 = vld [vmem:[%s6358_s8 + $0x1e4] ss:$8 sps:$4 sm:$0xff]   ;;  %v5590_v15 = vld [vmem:[%s6358_s8 + $0x5b4] ss:$8 sps:$4 sm:$0xff]  }
 0x15a   : > { %4942 = vmatprep.mubr.msk.bf16.mxu0 %vm2600_vm0, %v5528_v16  ;;  %5003 = vmatprep.mubr.msk.bf16.mxu1 %vm2600_vm0, %v5530_v17 }
 0x161   : > { %3164 = vmatmul.mubr.bf16.gmra.mrb[80].mxu0 %v5532_v18  ;;  %3652 = vmatmul.mubr.bf16.gmra.mrb[80].mxu1 %v5533_v19 }
 0x162   : > { %4943 = vmatprep.mubr.msk.bf16.mxu0 %vm2600_vm0, %v5534_v20  ;;  %5004 = vmatprep.mubr.msk.bf16.mxu1 %vm2600_vm0, %v5536_v21 }
 0x169   : > { %3172 = vmatmul.mubr.bf16.gmra.mrb[84].mxu0 %v5538_v22  ;;  %3660 = vmatmul.mubr.bf16.gmra.mrb[84].mxu1 %v5539_v23  ;;  %v5592_v22 = vld [vmem:[%s6358_s8 + $0x1e0] ss:$8 sps:$4 sm:$0xff]   ;;  %v5593_v23 = vld [vmem:[%s6358_s8 + $0x5b0] ss:$8 sps:$4 sm:$0xff]  }
 0x16a   : > { %4944 = vmatprep.mubr.msk.bf16.mxu0 %vm2600_vm0, %v5540_v24  ;;  %5005 = vmatprep.mubr.msk.bf16.mxu1 %vm2600_vm0, %v5542_v25 }
 0x171   : > { %3180 = vmatmul.mubr.bf16.gmra.mrb[88].mxu0 %v5544_v26  ;;  %3668 = vmatmul.mubr.bf16.gmra.mrb[88].mxu1 %v5545_v27  ;;  %v5594_v26 = vld [vmem:[%s6358_s8 + $0x1f4] ss:$8 sps:$4 sm:$0xff]   ;;  %v5596_v27 = vld [vmem:[%s6358_s8 + $0x5c4] ss:$8 sps:$4 sm:$0xff]  }
 0x172   : > { %4945 = vmatprep.mubr.msk.bf16.mxu0 %vm2600_vm0, %v5546_v28  ;;  %5006 = vmatprep.mubr.msk.bf16.mxu1 %vm2600_vm0, %v5548_v29 }
 0x179   : > { %3188 = vmatmul.mubr.bf16.gmra.mrb[92].mxu0 %v5550_v30  ;;  %3676 = vmatmul.mubr.bf16.gmra.mrb[92].mxu1 %v5551_v31 }
 0x17a   : > { %4946 = vmatprep.mubr.msk.bf16.mxu0 %vm2600_vm0, %v5552_v32  ;;  %5007 = vmatprep.mubr.msk.bf16.mxu1 %vm2600_vm0, %v5554_v33 }
 0x181   : > { %3196 = vmatmul.mubr.bf16.gmra.mrb[96].mxu0 %v5556_v34  ;;  %3684 = vmatmul.mubr.bf16.gmra.mrb[96].mxu1 %v5557_v35  ;;  %v5598_v34 = vld [vmem:[%s6358_s8 + $0x1f0] ss:$8 sps:$4 sm:$0xff]   ;;  %v5599_v35 = vld [vmem:[%s6358_s8 + $0x5c0] ss:$8 sps:$4 sm:$0xff]  }
 0x182   : > { %4947 = vmatprep.mubr.msk.bf16.mxu0 %vm2600_vm0, %v5558_v36  ;;  %5008 = vmatprep.mubr.msk.bf16.mxu1 %vm2600_vm0, %v5560_v37 }
 0x189   : > { %3204 = vmatmul.mubr.bf16.gmra.mrb[100].mxu0 %v5562_v38  ;;  %3692 = vmatmul.mubr.bf16.gmra.mrb[100].mxu1 %v5563_v39  ;;  %v5600_v38 = vld [vmem:[%s6358_s8 + $0x204] ss:$8 sps:$4 sm:$0xff]   ;;  %v5602_v39 = vld [vmem:[%s6358_s8 + $0x5d4] ss:$8 sps:$4 sm:$0xff]  }
 0x18a   : > { %4948 = vmatprep.mubr.msk.bf16.mxu0 %vm2600_vm0, %v5564_v40  ;;  %5009 = vmatprep.mubr.msk.bf16.mxu1 %vm2600_vm0, %v5566_v41 }
 0x191   : > { %3212 = vmatmul.mubr.bf16.gmra.mrb[104].mxu0 %v5568_v42  ;;  %3700 = vmatmul.mubr.bf16.gmra.mrb[104].mxu1 %v5569_v43 }
 0x192   : > { %4949 = vmatprep.mubr.msk.bf16.mxu0 %vm2600_vm0, %v5570_v44  ;;  %5010 = vmatprep.mubr.msk.bf16.mxu1 %vm2600_vm0, %v5572_v45 }
 0x194   : > { %v6547_v46 = vpop.f32.mrb[0].mxu0  ;;  %v6549_v47 = vpop.f32.mrb[0].mxu1 }
 0x195   : > { %v3007_v48 = vpop.f32.mrb[1].mxu0  ;;  %v3495_v49 = vpop.f32.mrb[1].mxu1 }
 0x196   : > { %v6553_v52 = vpop.f32.mrb[2].mxu0  ;;  %v6555_v53 = vpop.f32.mrb[2].mxu1  ;;  %v5604_v48 = vld [vmem:[%s6358_s8 + $0x200] ss:$8 sps:$4 sm:$0xff]   ;;  %v5605_v49 = vld [vmem:[%s6358_s8 + $0x5d0] ss:$8 sps:$4 sm:$0xff]  }
 0x197   : > { %v3010_v56 = vpop.f32.mrb[3].mxu0  ;;  %v3498_v57 = vpop.f32.mrb[3].mxu1 }
 0x199   : > { %3220 = vmatmul.mubr.bf16.gmra.mrb[108].mxu0 %v5574_v50  ;;  %3708 = vmatmul.mubr.bf16.gmra.mrb[108].mxu1 %v5575_v51 }
 0x19a   : > { %4950 = vmatprep.mubr.msk.bf16.mxu0 %vm2600_vm0, %v5576_v54  ;;  %5011 = vmatprep.mubr.msk.bf16.mxu1 %vm2600_vm0, %v5578_v55  ;;  %v5606_v54 = vld [vmem:[%s6358_s8 + $0x214] ss:$8 sps:$4 sm:$0xff]   ;;  %v5608_v55 = vld [vmem:[%s6358_s8 + $0x5e4] ss:$8 sps:$4 sm:$0xff]  }
 0x19c   : > { %v6561_v58 = vpop.f32.mrb[4].mxu0  ;;  %v6563_v59 = vpop.f32.mrb[4].mxu1 }
 0x19d   : > { %v3015_v60 = vpop.f32.mrb[5].mxu0  ;;  %v3503_v61 = vpop.f32.mrb[5].mxu1 }
 0x19e   : > { %v6567_v0 = vpop.f32.mrb[6].mxu0  ;;  %v6569_v1 = vpop.f32.mrb[6].mxu1 }
 0x19f   : > { %v3018_v4 = vpop.f32.mrb[7].mxu0  ;;  %v3506_v5 = vpop.f32.mrb[7].mxu1 }
 0x1a1   : > { %3228 = vmatmul.mubr.bf16.gmra.mrb[112].mxu0 %v5580_v62  ;;  %3716 = vmatmul.mubr.bf16.gmra.mrb[112].mxu1 %v5581_v63 }
 0x1a2   : > { %4951 = vmatprep.mubr.msk.bf16.mxu0 %vm2600_vm0, %v5582_v2  ;;  %5012 = vmatprep.mubr.msk.bf16.mxu1 %vm2600_vm0, %v5584_v3  ;;  %v5610_v2 = vld [vmem:[%s6358_s8 + $0x210] ss:$8 sps:$4 sm:$0xff]   ;;  %v5611_v3 = vld [vmem:[%s6358_s8 + $0x5e0] ss:$8 sps:$4 sm:$0xff]  }
 0x1a4   : > { %v6575_v6 = vpop.f32.mrb[8].mxu0  ;;  %v6577_v7 = vpop.f32.mrb[8].mxu1 }
 0x1a5   : > { %v3023_v8 = vpop.f32.mrb[9].mxu0  ;;  %v3511_v9 = vpop.f32.mrb[9].mxu1 }
 0x1a6   : > { %v6581_v12 = vpop.f32.mrb[10].mxu0  ;;  %v6583_v13 = vpop.f32.mrb[10].mxu1  ;;  %v5612_v8 = vld [vmem:[%s6358_s8 + $0x224] ss:$8 sps:$4 sm:$0xff]   ;;  %v5614_v9 = vld [vmem:[%s6358_s8 + $0x5f4] ss:$8 sps:$4 sm:$0xff]  }
 0x1a7   : > { %v3026_v16 = vpop.f32.mrb[11].mxu0  ;;  %v3514_v17 = vpop.f32.mrb[11].mxu1 }
 0x1a9   : > { %3236 = vmatmul.mubr.bf16.gmra.mrb[116].mxu0 %v5586_v10  ;;  %3724 = vmatmul.mubr.bf16.gmra.mrb[116].mxu1 %v5587_v11 }
 0x1aa   : > { %4952 = vmatprep.mubr.msk.bf16.mxu0 %vm2600_vm0, %v5588_v14  ;;  %5013 = vmatprep.mubr.msk.bf16.mxu1 %vm2600_vm0, %v5590_v15 }
 0x1ac   : > { %v6589_v18 = vpop.f32.mrb[12].mxu0  ;;  %v6591_v19 = vpop.f32.mrb[12].mxu1 }
 0x1ad   : > { %v3031_v20 = vpop.f32.mrb[13].mxu0  ;;  %v3519_v21 = vpop.f32.mrb[13].mxu1 }
 0x1ae   : > { %v6595_v24 = vpop.f32.mrb[14].mxu0  ;;  %v6597_v25 = vpop.f32.mrb[14].mxu1  ;;  %v5616_v20 = vld [vmem:[%s6358_s8 + $0x220] ss:$8 sps:$4 sm:$0xff]   ;;  %v5617_v21 = vld [vmem:[%s6358_s8 + $0x5f0] ss:$8 sps:$4 sm:$0xff]  }
 0x1af   : > { %v3034_v28 = vpop.f32.mrb[15].mxu0  ;;  %v3522_v29 = vpop.f32.mrb[15].mxu1 }
 0x1b1   : > { %3244 = vmatmul.mubr.bf16.gmra.mrb[120].mxu0 %v5592_v22  ;;  %3732 = vmatmul.mubr.bf16.gmra.mrb[120].mxu1 %v5593_v23 }
 0x1b2   : > { %4953 = vmatprep.mubr.msk.bf16.mxu0 %vm2600_vm0, %v5594_v26  ;;  %5014 = vmatprep.mubr.msk.bf16.mxu1 %vm2600_vm0, %v5596_v27  ;;  %v5618_v26 = vld [vmem:[%s6358_s8 + $0x234] ss:$8 sps:$4 sm:$0xff]   ;;  %v5620_v27 = vld [vmem:[%s6358_s8 + $0x604] ss:$8 sps:$4 sm:$0xff]  }
 0x1b4   : > { %v6603_v30 = vpop.f32.mrb[16].mxu0  ;;  %v6605_v31 = vpop.f32.mrb[16].mxu1 }
 0x1b5   : > { %v3039_v32 = vpop.f32.mrb[17].mxu0  ;;  %v3527_v33 = vpop.f32.mrb[17].mxu1 }
 0x1b6   : > { %v6609_v36 = vpop.f32.mrb[18].mxu0  ;;  %v6611_v37 = vpop.f32.mrb[18].mxu1 }
 0x1b7   : > { %v3042_v40 = vpop.f32.mrb[19].mxu0  ;;  %v3530_v41 = vpop.f32.mrb[19].mxu1 }
 0x1b9   : > { %3252 = vmatmul.mubr.bf16.gmra.mrb[124].mxu0 %v5598_v34  ;;  %3740 = vmatmul.mubr.bf16.gmra.mrb[124].mxu1 %v5599_v35 }
 0x1ba   : > { %4954 = vmatprep.mubr.msk.bf16.mxu0 %vm2600_vm0, %v5600_v38  ;;  %5015 = vmatprep.mubr.msk.bf16.mxu1 %vm2600_vm0, %v5602_v39  ;;  %v5622_v38 = vld [vmem:[%s6358_s8 + $0x230] ss:$8 sps:$4 sm:$0xff]   ;;  %v5623_v39 = vld [vmem:[%s6358_s8 + $0x600] ss:$8 sps:$4 sm:$0xff]  }
 0x1bc   : > { %v6617_v42 = vpop.f32.mrb[20].mxu0  ;;  %v6619_v43 = vpop.f32.mrb[20].mxu1 }
 0x1bd   : > { %v3047_v44 = vpop.f32.mrb[21].mxu0  ;;  %v3535_v45 = vpop.f32.mrb[21].mxu1 }
 0x1be   : > { %v6623_v50 = vpop.f32.mrb[22].mxu0  ;;  %v6625_v51 = vpop.f32.mrb[22].mxu1  ;;  %v5624_v44 = vld [vmem:[%s6358_s8 + $0x244] ss:$8 sps:$4 sm:$0xff]   ;;  %v5626_v45 = vld [vmem:[%s6358_s8 + $0x614] ss:$8 sps:$4 sm:$0xff]  }
 0x1bf   : > { %v3050_v56 = vpop.f32.mrb[23].mxu0  ;;  %v3538_v57 = vpop.f32.mrb[23].mxu1 }
 0x1c1   : > { %3260 = vmatmul.mubr.bf16.gmra.mrb[128].mxu0 %v5604_v48  ;;  %3748 = vmatmul.mubr.bf16.gmra.mrb[128].mxu1 %v5605_v49 }
 0x1c2   : > { %4955 = vmatprep.mubr.msk.bf16.mxu0 %vm2600_vm0, %v5606_v54  ;;  %5016 = vmatprep.mubr.msk.bf16.mxu1 %vm2600_vm0, %v5608_v55 }
 0x1c4   : > { %v6631_v60 = vpop.f32.mrb[24].mxu0  ;;  %v6633_v61 = vpop.f32.mrb[24].mxu1 }
 0x1c5   : > { %v3055_v62 = vpop.f32.mrb[25].mxu0  ;;  %v3543_v63 = vpop.f32.mrb[25].mxu1 }
 0x1c6   : > { %v6637_v4 = vpop.f32.mrb[26].mxu0  ;;  %v6639_v5 = vpop.f32.mrb[26].mxu1  ;;  %v5628_v62 = vld [vmem:[%s6358_s8 + $0x240] ss:$8 sps:$4 sm:$0xff]   ;;  %v5629_v63 = vld [vmem:[%s6358_s8 + $0x610] ss:$8 sps:$4 sm:$0xff]  }
 0x1c7   : > { %v3058_v10 = vpop.f32.mrb[27].mxu0  ;;  %v3546_v11 = vpop.f32.mrb[27].mxu1 }
 0x1c9   : > { %3268 = vmatmul.mubr.bf16.gmra.mrb[132].mxu0 %v5610_v2  ;;  %3756 = vmatmul.mubr.bf16.gmra.mrb[132].mxu1 %v5611_v3 }
 0x1ca   : > { %4956 = vmatprep.mubr.msk.bf16.mxu0 %vm2600_vm0, %v5612_v8  ;;  %5017 = vmatprep.mubr.msk.bf16.mxu1 %vm2600_vm0, %v5614_v9  ;;  %v5630_v8 = vld [vmem:[%s6358_s8 + $0x254] ss:$8 sps:$4 sm:$0xff]   ;;  %v5632_v9 = vld [vmem:[%s6358_s8 + $0x624] ss:$8 sps:$4 sm:$0xff]  }
 0x1cc   : > { %v6645_v14 = vpop.f32.mrb[28].mxu0  ;;  %v6647_v15 = vpop.f32.mrb[28].mxu1 }
 0x1cd   : > { %v3063_v16 = vpop.f32.mrb[29].mxu0  ;;  %v3551_v17 = vpop.f32.mrb[29].mxu1 }
 0x1ce   : > { %v6651_v22 = vpop.f32.mrb[30].mxu0  ;;  %v6653_v23 = vpop.f32.mrb[30].mxu1 }
 0x1cf   : > { %v3066_v28 = vpop.f32.mrb[31].mxu0  ;;  %v3554_v29 = vpop.f32.mrb[31].mxu1 }
 0x1d1   : > { %3276 = vmatmul.mubr.bf16.gmra.mrb[136].mxu0 %v5616_v20  ;;  %3764 = vmatmul.mubr.bf16.gmra.mrb[136].mxu1 %v5617_v21 }
 0x1d2   : > { %4957 = vmatprep.mubr.msk.bf16.mxu0 %vm2600_vm0, %v5618_v26  ;;  %5018 = vmatprep.mubr.msk.bf16.mxu1 %vm2600_vm0, %v5620_v27  ;;  %v5634_v26 = vld [vmem:[%s6358_s8 + $0x250] ss:$8 sps:$4 sm:$0xff]   ;;  %v5635_v27 = vld [vmem:[%s6358_s8 + $0x620] ss:$8 sps:$4 sm:$0xff]  }
 0x1d4   : > { %v6659_v32 = vpop.f32.mrb[32].mxu0  ;;  %v6661_v33 = vpop.f32.mrb[32].mxu1 }
 0x1d5   : > { %v3071_v34 = vpop.f32.mrb[33].mxu0  ;;  %v3559_v35 = vpop.f32.mrb[33].mxu1 }
 0x1d6   : > { %v6665_v40 = vpop.f32.mrb[34].mxu0  ;;  %v6667_v41 = vpop.f32.mrb[34].mxu1  ;;  %v5636_v34 = vld [vmem:[%s6358_s8 + $0x264] ss:$8 sps:$4 sm:$0xff]   ;;  %v5638_v35 = vld [vmem:[%s6358_s8 + $0x634] ss:$8 sps:$4 sm:$0xff]  }
 0x1d7   : > { %v3074_v48 = vpop.f32.mrb[35].mxu0  ;;  %v3562_v49 = vpop.f32.mrb[35].mxu1 }
 0x1d9   : > { %3284 = vmatmul.mubr.bf16.gmra.mrb[140].mxu0 %v5622_v38  ;;  %3772 = vmatmul.mubr.bf16.gmra.mrb[140].mxu1 %v5623_v39 }
 0x1da   : > { %4958 = vmatprep.mubr.msk.bf16.mxu0 %vm2600_vm0, %v5624_v44  ;;  %5019 = vmatprep.mubr.msk.bf16.mxu1 %vm2600_vm0, %v5626_v45 }
 0x1dc   : > { %v6673_v54 = vpop.f32.mrb[36].mxu0  ;;  %v6675_v55 = vpop.f32.mrb[36].mxu1 }
 0x1dd   : > { %v3079_v56 = vpop.f32.mrb[37].mxu0  ;;  %v3567_v57 = vpop.f32.mrb[37].mxu1 }
 0x1de   : > { %v6679_v2 = vpop.f32.mrb[38].mxu0  ;;  %v6681_v3 = vpop.f32.mrb[38].mxu1  ;;  %v5640_v56 = vld [vmem:[%s6358_s8 + $0x260] ss:$8 sps:$4 sm:$0xff]   ;;  %v5641_v57 = vld [vmem:[%s6358_s8 + $0x630] ss:$8 sps:$4 sm:$0xff]  }
 0x1df   : > { %v3082_v10 = vpop.f32.mrb[39].mxu0  ;;  %v3570_v11 = vpop.f32.mrb[39].mxu1 }
 0x1e1   : > { %3292 = vmatmul.mubr.bf16.gmra.mrb[144].mxu0 %v5628_v62  ;;  %3780 = vmatmul.mubr.bf16.gmra.mrb[144].mxu1 %v5629_v63 }
 0x1e2   : > { %4959 = vmatprep.mubr.msk.bf16.mxu0 %vm2600_vm0, %v5630_v8  ;;  %5020 = vmatprep.mubr.msk.bf16.mxu1 %vm2600_vm0, %v5632_v9  ;;  %v5642_v8 = vld [vmem:[%s6358_s8 + $0x274] ss:$8 sps:$4 sm:$0xff]   ;;  %v5644_v9 = vld [vmem:[%s6358_s8 + $0x644] ss:$8 sps:$4 sm:$0xff]  }
 0x1e4   : > { %v6687_v16 = vpop.f32.mrb[40].mxu0  ;;  %v6689_v17 = vpop.f32.mrb[40].mxu1 }
 0x1e5   : > { %v3087_v20 = vpop.f32.mrb[41].mxu0  ;;  %v3575_v21 = vpop.f32.mrb[41].mxu1 }
 0x1e6   : > { %v6693_v28 = vpop.f32.mrb[42].mxu0  ;;  %v6695_v29 = vpop.f32.mrb[42].mxu1 }
 0x1e7   : > { %v3090_v38 = vpop.f32.mrb[43].mxu0  ;;  %v3578_v39 = vpop.f32.mrb[43].mxu1 }
 0x1e9   : > { %3300 = vmatmul.mubr.bf16.gmra.mrb[148].mxu0 %v5634_v26  ;;  %3788 = vmatmul.mubr.bf16.gmra.mrb[148].mxu1 %v5635_v27 }
 0x1ea   : > { %4960 = vmatprep.mubr.msk.bf16.mxu0 %vm2600_vm0, %v5636_v34  ;;  %5021 = vmatprep.mubr.msk.bf16.mxu1 %vm2600_vm0, %v5638_v35  ;;  %v5646_v34 = vld [vmem:[%s6358_s8 + $0x270] ss:$8 sps:$4 sm:$0xff]   ;;  %v5647_v35 = vld [vmem:[%s6358_s8 + $0x640] ss:$8 sps:$4 sm:$0xff]  }
 0x1ec   : > { %v6701_v44 = vpop.f32.mrb[44].mxu0  ;;  %v6703_v45 = vpop.f32.mrb[44].mxu1 }
 0x1ed   : > { %v3095_v48 = vpop.f32.mrb[45].mxu0  ;;  %v3583_v49 = vpop.f32.mrb[45].mxu1 }
 0x1ee   : > { %v6707_v62 = vpop.f32.mrb[46].mxu0  ;;  %v6709_v63 = vpop.f32.mrb[46].mxu1  ;;  %v5648_v48 = vld [vmem:[%s6358_s8 + $0x284] ss:$8 sps:$4 sm:$0xff]   ;;  %v5650_v49 = vld [vmem:[%s6358_s8 + $0x654] ss:$8 sps:$4 sm:$0xff]  }
 0x1ef   : > { %7236 = vst [vmem:[#allocation3_spill] sm:$0xff] %v6707_v62  ;;  %7237 = vst [vmem:[#allocation4_spill] sm:$0xff] %v6709_v63  ;;  %v3098_v10 = vpop.f32.mrb[47].mxu0  ;;  %v3586_v11 = vpop.f32.mrb[47].mxu1 }
 0x1f1   : > { %3308 = vmatmul.mubr.bf16.gmra.mrb[152].mxu0 %v5640_v56  ;;  %3796 = vmatmul.mubr.bf16.gmra.mrb[152].mxu1 %v5641_v57 }
 0x1f2   : > { %4961 = vmatprep.mubr.msk.bf16.mxu0 %vm2600_vm0, %v5642_v8  ;;  %5022 = vmatprep.mubr.msk.bf16.mxu1 %vm2600_vm0, %v5644_v9 }
 0x1f4   : > { %v6715_v20 = vpop.f32.mrb[48].mxu0  ;;  %v6717_v21 = vpop.f32.mrb[48].mxu1 }
 0x1f5   : > { %7238 = vst [vmem:[#allocation5_spill] sm:$0xff] %v6715_v20  ;;  %7239 = vst [vmem:[#allocation6_spill] sm:$0xff] %v6717_v21  ;;  %v3103_v26 = vpop.f32.mrb[49].mxu0  ;;  %v3591_v27 = vpop.f32.mrb[49].mxu1 }
 0x1f6   : > { %v6721_v38 = vpop.f32.mrb[50].mxu0  ;;  %v6723_v39 = vpop.f32.mrb[50].mxu1  ;;  %v5652_v26 = vld [vmem:[%s6358_s8 + $0x280] ss:$8 sps:$4 sm:$0xff]   ;;  %v5653_v27 = vld [vmem:[%s6358_s8 + $0x650] ss:$8 sps:$4 sm:$0xff]  }
 0x1f7   : > { %7240 = vst [vmem:[#allocation7_spill] sm:$0xff] %v6721_v38  ;;  %7241 = vst [vmem:[#allocation8_spill] sm:$0xff] %v6723_v39  ;;  %v3106_v56 = vpop.f32.mrb[51].mxu0  ;;  %v3594_v57 = vpop.f32.mrb[51].mxu1 }
 0x1f9   : > { %3316 = vmatmul.mubr.bf16.gmra.mrb[156].mxu0 %v5646_v34  ;;  %3804 = vmatmul.mubr.bf16.gmra.mrb[156].mxu1 %v5647_v35  ;;  %v5654_v34 = vld [vmem:[%s6358_s8 + $0x294] ss:$8 sps:$4 sm:$0xff]   ;;  %v5656_v35 = vld [vmem:[%s6358_s8 + $0x664] ss:$8 sps:$4 sm:$0xff]  }
 0x1fa   : > { %4962 = vmatprep.mubr.msk.bf16.mxu0 %vm2600_vm0, %v5648_v48  ;;  %5023 = vmatprep.mubr.msk.bf16.mxu1 %vm2600_vm0, %v5650_v49 }
 0x1fc   : > { %v6729_v8 = vpop.f32.mrb[52].mxu0  ;;  %v6731_v9 = vpop.f32.mrb[52].mxu1 }
 0x1fd   : > { %7242 = vst [vmem:[#allocation9_spill] sm:$0xff] %v6729_v8  ;;  %7243 = vst [vmem:[#allocation10_spill] sm:$0xff] %v6731_v9  ;;  %v3111_v10 = vpop.f32.mrb[53].mxu0  ;;  %v3599_v11 = vpop.f32.mrb[53].mxu1  ;;  %v5658_v9 = vld [vmem:[%s6358_s8 + $0x290] ss:$8 sps:$4 sm:$0xff]  }
 0x1fe   : > { %v6735_v39 = vpop.f32.mrb[54].mxu0  ;;  %v6737_v56 = vpop.f32.mrb[54].mxu1 }
 0x1ff   : > { %7244 = vst [vmem:[#allocation11_spill] sm:$0xff] %v6735_v39  ;;  %7245 = vst [vmem:[#allocation12_spill] sm:$0xff] %v6737_v56  ;;  %v3114_v48 = vpop.f32.mrb[55].mxu0  ;;  %v3602_v49 = vpop.f32.mrb[55].mxu1  ;;  %v5659_v56 = vld [vmem:[%s6358_s8 + $0x660] ss:$8 sps:$4 sm:$0xff]  }
 0x201   : > { %3324 = vmatmul.mubr.bf16.gmra.mrb[160].mxu0 %v5652_v26  ;;  %3812 = vmatmul.mubr.bf16.gmra.mrb[160].mxu1 %v5653_v27  ;;  %v5660_v26 = vld [vmem:[%s6358_s8 + $0x2a4] ss:$8 sps:$4 sm:$0xff]   ;;  %v5662_v27 = vld [vmem:[%s6358_s8 + $0x674] ss:$8 sps:$4 sm:$0xff]  }
 0x202   : > { %4963 = vmatprep.mubr.msk.bf16.mxu0 %vm2600_vm0, %v5654_v34  ;;  %5024 = vmatprep.mubr.msk.bf16.mxu1 %vm2600_vm0, %v5656_v35 }
 0x204   : > { %v6743_v57 = vpop.f32.mrb[56].mxu0  ;;  %v6745_v10 = vpop.f32.mrb[56].mxu1 }
 0x205   : > { %7246 = vst [vmem:[#allocation13_spill] sm:$0xff] %v6743_v57  ;;  %7247 = vst [vmem:[#allocation14_spill] sm:$0xff] %v6745_v10  ;;  %v3119_v11 = vpop.f32.mrb[57].mxu0  ;;  %v3607_v39 = vpop.f32.mrb[57].mxu1  ;;  %v5664_v10 = vld [vmem:[%s6358_s8 + $0x2a0] ss:$8 sps:$4 sm:$0xff]  }
 0x206   : > { %v6749_v8 = vpop.f32.mrb[58].mxu0  ;;  %v6751_v48 = vpop.f32.mrb[58].mxu1 }
 0x207   : > { %7248 = vst [vmem:[#allocation15_spill] sm:$0xff] %v6749_v8  ;;  %7249 = vst [vmem:[#allocation16_spill] sm:$0xff] %v6751_v48  ;;  %v3122_v34 = vpop.f32.mrb[59].mxu0  ;;  %v3610_v35 = vpop.f32.mrb[59].mxu1  ;;  %v5665_v48 = vld [vmem:[%s6358_s8 + $0x670] ss:$8 sps:$4 sm:$0xff]  }
 0x209   : > { %3332 = vmatmul.mubr.bf16.gmra.mrb[164].mxu0 %v5658_v9  ;;  %3820 = vmatmul.mubr.bf16.gmra.mrb[164].mxu1 %v5659_v56  ;;  %v5666_v9 = vld [vmem:[%s6358_s8 + $0x2b4] ss:$8 sps:$4 sm:$0xff]   ;;  %v5668_v56 = vld [vmem:[%s6358_s8 + $0x684] ss:$8 sps:$4 sm:$0xff]  }
 0x20a   : > { %4964 = vmatprep.mubr.msk.bf16.mxu0 %vm2600_vm0, %v5660_v26  ;;  %5025 = vmatprep.mubr.msk.bf16.mxu1 %vm2600_vm0, %v5662_v27 }
 0x20c   : > { %v6757_v39 = vpop.f32.mrb[60].mxu0  ;;  %v6759_v49 = vpop.f32.mrb[60].mxu1 }
 0x20d   : > { %7250 = vst [vmem:[#allocation17_spill] sm:$0xff] %v6757_v39  ;;  %7251 = vst [vmem:[#allocation18_spill] sm:$0xff] %v6759_v49  ;;  %v3127_v11 = vpop.f32.mrb[61].mxu0  ;;  %v3615_v8 = vpop.f32.mrb[61].mxu1  ;;  %v5670_v49 = vld [vmem:[%s6358_s8 + $0x2b0] ss:$8 sps:$4 sm:$0xff]  }
 0x20e   : > { %v6763_v57 = vpop.f32.mrb[62].mxu0  ;;  %v6765_v34 = vpop.f32.mrb[62].mxu1 }
 0x20f   : > { %7252 = vst [vmem:[#allocation19_spill] sm:$0xff] %v6763_v57  ;;  %7253 = vst [vmem:[#allocation20_spill] sm:$0xff] %v6765_v34  ;;  %v3130_v26 = vpop.f32.mrb[63].mxu0  ;;  %v3618_v27 = vpop.f32.mrb[63].mxu1  ;;  %v5671_v34 = vld [vmem:[%s6358_s8 + $0x680] ss:$8 sps:$4 sm:$0xff]  }
 0x211   : > { %3340 = vmatmul.mubr.bf16.gmra.mrb[168].mxu0 %v5664_v10  ;;  %3828 = vmatmul.mubr.bf16.gmra.mrb[168].mxu1 %v5665_v48  ;;  %v5672_v10 = vld [vmem:[%s6358_s8 + $0x2c4] ss:$8 sps:$4 sm:$0xff]   ;;  %v5674_v48 = vld [vmem:[%s6358_s8 + $0x694] ss:$8 sps:$4 sm:$0xff]  }
 0x212   : > { %4965 = vmatprep.mubr.msk.bf16.mxu0 %vm2600_vm0, %v5666_v9  ;;  %5026 = vmatprep.mubr.msk.bf16.mxu1 %vm2600_vm0, %v5668_v56 }
 0x214   : > { %v6771_v8 = vpop.f32.mrb[64].mxu0  ;;  %v6773_v35 = vpop.f32.mrb[64].mxu1 }
 0x215   : > { %7254 = vst [vmem:[#allocation21_spill] sm:$0xff] %v6771_v8  ;;  %7255 = vst [vmem:[#allocation22_spill] sm:$0xff] %v6773_v35  ;;  %v3135_v11 = vpop.f32.mrb[65].mxu0  ;;  %v3623_v57 = vpop.f32.mrb[65].mxu1  ;;  %v5676_v35 = vld [vmem:[%s6358_s8 + $0x2c0] ss:$8 sps:$4 sm:$0xff]  }
 0x216   : > { %v6777_v39 = vpop.f32.mrb[66].mxu0  ;;  %v6779_v26 = vpop.f32.mrb[66].mxu1 }
 0x217   : > { %7256 = vst [vmem:[#allocation23_spill] sm:$0xff] %v6777_v39  ;;  %7257 = vst [vmem:[#allocation24_spill] sm:$0xff] %v6779_v26  ;;  %v3138_v9 = vpop.f32.mrb[67].mxu0  ;;  %v3626_v56 = vpop.f32.mrb[67].mxu1  ;;  %v5677_v26 = vld [vmem:[%s6358_s8 + $0x690] ss:$8 sps:$4 sm:$0xff]  }
 0x219   : > { %3348 = vmatmul.mubr.bf16.gmra.mrb[172].mxu0 %v5670_v49  ;;  %3836 = vmatmul.mubr.bf16.gmra.mrb[172].mxu1 %v5671_v34  ;;  %v5678_v49 = vld [vmem:[%s6358_s8 + $0x2d4] ss:$8 sps:$4 sm:$0xff]   ;;  %v5680_v34 = vld [vmem:[%s6358_s8 + $0x6a4] ss:$8 sps:$4 sm:$0xff]  }
 0x21a   : > { %4966 = vmatprep.mubr.msk.bf16.mxu0 %vm2600_vm0, %v5672_v10  ;;  %5027 = vmatprep.mubr.msk.bf16.mxu1 %vm2600_vm0, %v5674_v48 }
 0x21c   : > { %v6785_v57 = vpop.f32.mrb[68].mxu0  ;;  %v6787_v27 = vpop.f32.mrb[68].mxu1 }
 0x21d   : > { %7258 = vst [vmem:[#allocation25_spill] sm:$0xff] %v6785_v57  ;;  %7259 = vst [vmem:[#allocation26_spill] sm:$0xff] %v6787_v27  ;;  %v3143_v11 = vpop.f32.mrb[69].mxu0  ;;  %v3631_v39 = vpop.f32.mrb[69].mxu1  ;;  %v5682_v27 = vld [vmem:[%s6358_s8 + $0x2d0] ss:$8 sps:$4 sm:$0xff]  }
 0x21e   : > { %v6791_v8 = vpop.f32.mrb[70].mxu0  ;;  %v6793_v9 = vpop.f32.mrb[70].mxu1 }
 0x21f   : > { %7260 = vst [vmem:[#allocation27_spill] sm:$0xff] %v6791_v8  ;;  %7261 = vst [vmem:[#allocation28_spill] sm:$0xff] %v6793_v9  ;;  %v3146_v10 = vpop.f32.mrb[71].mxu0  ;;  %v3634_v48 = vpop.f32.mrb[71].mxu1  ;;  %v5683_v9 = vld [vmem:[%s6358_s8 + $0x6a0] ss:$8 sps:$4 sm:$0xff]  }
 0x221   : > { %3356 = vmatmul.mubr.bf16.gmra.mrb[176].mxu0 %v5676_v35  ;;  %3844 = vmatmul.mubr.bf16.gmra.mrb[176].mxu1 %v5677_v26  ;;  %v5684_v35 = vld [vmem:[%s6358_s8 + $0x2e4] ss:$8 sps:$4 sm:$0xff]   ;;  %v5686_v26 = vld [vmem:[%s6358_s8 + $0x6b4] ss:$8 sps:$4 sm:$0xff]  }
 0x222   : > { %4967 = vmatprep.mubr.msk.bf16.mxu0 %vm2600_vm0, %v5678_v49  ;;  %5028 = vmatprep.mubr.msk.bf16.mxu1 %vm2600_vm0, %v5680_v34 }
 0x224   : > { %v6799_v39 = vpop.f32.mrb[72].mxu0  ;;  %v6801_v56 = vpop.f32.mrb[72].mxu1 }
 0x225   : > { %7262 = vst [vmem:[#allocation29_spill] sm:$0xff] %v6799_v39  ;;  %7263 = vst [vmem:[#allocation30_spill] sm:$0xff] %v6801_v56  ;;  %v3151_v11 = vpop.f32.mrb[73].mxu0  ;;  %v3639_v8 = vpop.f32.mrb[73].mxu1  ;;  %v5688_v56 = vld [vmem:[%s6358_s8 + $0x2e0] ss:$8 sps:$4 sm:$0xff]  }
 0x226   : > { %v6805_v57 = vpop.f32.mrb[74].mxu0  ;;  %v6807_v10 = vpop.f32.mrb[74].mxu1 }
 0x227   : > { %7264 = vst [vmem:[#allocation31_spill] sm:$0xff] %v6805_v57  ;;  %7265 = vst [vmem:[#allocation32_spill] sm:$0xff] %v6807_v10  ;;  %v3154_v49 = vpop.f32.mrb[75].mxu0  ;;  %v3642_v34 = vpop.f32.mrb[75].mxu1  ;;  %v5689_v10 = vld [vmem:[%s6358_s8 + $0x6b0] ss:$8 sps:$4 sm:$0xff]  }
 0x229   : > { %3364 = vmatmul.mubr.bf16.gmra.mrb[180].mxu0 %v5682_v27  ;;  %3852 = vmatmul.mubr.bf16.gmra.mrb[180].mxu1 %v5683_v9  ;;  %v5690_v27 = vld [vmem:[%s6358_s8 + $0x2f4] ss:$8 sps:$4 sm:$0xff]   ;;  %v5692_v9 = vld [vmem:[%s6358_s8 + $0x6c4] ss:$8 sps:$4 sm:$0xff]  }
 0x22a   : > { %4968 = vmatprep.mubr.msk.bf16.mxu0 %vm2600_vm0, %v5684_v35  ;;  %5029 = vmatprep.mubr.msk.bf16.mxu1 %vm2600_vm0, %v5686_v26 }
 0x22c   : > { %v6813_v8 = vpop.f32.mrb[76].mxu0  ;;  %v6815_v48 = vpop.f32.mrb[76].mxu1 }
 0x22d   : > { %7266 = vst [vmem:[#allocation33_spill] sm:$0xff] %v6813_v8  ;;  %7267 = vst [vmem:[#allocation34_spill] sm:$0xff] %v6815_v48  ;;  %v3159_v11 = vpop.f32.mrb[77].mxu0  ;;  %v3647_v57 = vpop.f32.mrb[77].mxu1  ;;  %v5694_v48 = vld [vmem:[%s6358_s8 + $0x2f0] ss:$8 sps:$4 sm:$0xff]  }
 0x22e   : > { %v6819_v39 = vpop.f32.mrb[78].mxu0  ;;  %v6821_v49 = vpop.f32.mrb[78].mxu1 }
 0x22f   : > { %7268 = vst [vmem:[#allocation35_spill] sm:$0xff] %v6819_v39  ;;  %7269 = vst [vmem:[#allocation36_spill] sm:$0xff] %v6821_v49  ;;  %v3162_v35 = vpop.f32.mrb[79].mxu0  ;;  %v3650_v26 = vpop.f32.mrb[79].mxu1  ;;  %v5695_v49 = vld [vmem:[%s6358_s8 + $0x6c0] ss:$8 sps:$4 sm:$0xff]  }
 0x231   : > { %3372 = vmatmul.mubr.bf16.gmra.mrb[184].mxu0 %v5688_v56  ;;  %3860 = vmatmul.mubr.bf16.gmra.mrb[184].mxu1 %v5689_v10  ;;  %v5696_v56 = vld [vmem:[%s6358_s8 + $0x304] ss:$8 sps:$4 sm:$0xff]   ;;  %v5698_v10 = vld [vmem:[%s6358_s8 + $0x6d4] ss:$8 sps:$4 sm:$0xff]  }
 0x232   : > { %4969 = vmatprep.mubr.msk.bf16.mxu0 %vm2600_vm0, %v5690_v27  ;;  %5030 = vmatprep.mubr.msk.bf16.mxu1 %vm2600_vm0, %v5692_v9 }
 0x234   : > { %v6827_v57 = vpop.f32.mrb[80].mxu0  ;;  %v6829_v34 = vpop.f32.mrb[80].mxu1 }
 0x235   : > { %7270 = vst [vmem:[#allocation37_spill] sm:$0xff] %v6827_v57  ;;  %7271 = vst [vmem:[#allocation38_spill] sm:$0xff] %v6829_v34  ;;  %v3167_v11 = vpop.f32.mrb[81].mxu0  ;;  %v3655_v39 = vpop.f32.mrb[81].mxu1  ;;  %v5700_v34 = vld [vmem:[%s6358_s8 + $0x300] ss:$8 sps:$4 sm:$0xff]  }
 0x236   : > { %v6833_v8 = vpop.f32.mrb[82].mxu0  ;;  %v6835_v35 = vpop.f32.mrb[82].mxu1 }
 0x237   : > { %7272 = vst [vmem:[#allocation39_spill] sm:$0xff] %v6833_v8  ;;  %7273 = vst [vmem:[#allocation40_spill] sm:$0xff] %v6835_v35  ;;  %v3170_v27 = vpop.f32.mrb[83].mxu0  ;;  %v3658_v9 = vpop.f32.mrb[83].mxu1  ;;  %v5701_v35 = vld [vmem:[%s6358_s8 + $0x6d0] ss:$8 sps:$4 sm:$0xff]  }
 0x239   : > { %3380 = vmatmul.mubr.bf16.gmra.mrb[188].mxu0 %v5694_v48  ;;  %3868 = vmatmul.mubr.bf16.gmra.mrb[188].mxu1 %v5695_v49  ;;  %v5702_v48 = vld [vmem:[%s6358_s8 + $0x314] ss:$8 sps:$4 sm:$0xff]   ;;  %v5704_v49 = vld [vmem:[%s6358_s8 + $0x6e4] ss:$8 sps:$4 sm:$0xff]  }
 0x23a   : > { %4970 = vmatprep.mubr.msk.bf16.mxu0 %vm2600_vm0, %v5696_v56  ;;  %5031 = vmatprep.mubr.msk.bf16.mxu1 %vm2600_vm0, %v5698_v10 }
 0x23c   : > { %v6841_v39 = vpop.f32.mrb[84].mxu0  ;;  %v6843_v26 = vpop.f32.mrb[84].mxu1 }
 0x23d   : > { %7274 = vst [vmem:[#allocation41_spill] sm:$0xff] %v6841_v39  ;;  %7275 = vst [vmem:[#allocation42_spill] sm:$0xff] %v6843_v26  ;;  %v3175_v11 = vpop.f32.mrb[85].mxu0  ;;  %v3663_v8 = vpop.f32.mrb[85].mxu1  ;;  %v5706_v26 = vld [vmem:[%s6358_s8 + $0x310] ss:$8 sps:$4 sm:$0xff]  }
 0x23e   : > { %v6847_v57 = vpop.f32.mrb[86].mxu0  ;;  %v6849_v27 = vpop.f32.mrb[86].mxu1 }
 0x23f   : > { %7276 = vst [vmem:[#allocation43_spill] sm:$0xff] %v6847_v57  ;;  %7277 = vst [vmem:[#allocation44_spill] sm:$0xff] %v6849_v27  ;;  %v3178_v56 = vpop.f32.mrb[87].mxu0  ;;  %v3666_v10 = vpop.f32.mrb[87].mxu1  ;;  %v5707_v27 = vld [vmem:[%s6358_s8 + $0x6e0] ss:$8 sps:$4 sm:$0xff]  }
 0x241   : > { %3388 = vmatmul.mubr.bf16.gmra.mrb[192].mxu0 %v5700_v34  ;;  %3876 = vmatmul.mubr.bf16.gmra.mrb[192].mxu1 %v5701_v35  ;;  %v5708_v34 = vld [vmem:[%s6358_s8 + $0x324] ss:$8 sps:$4 sm:$0xff]   ;;  %v5710_v35 = vld [vmem:[%s6358_s8 + $0x6f4] ss:$8 sps:$4 sm:$0xff]  }
 0x242   : > { %4971 = vmatprep.mubr.msk.bf16.mxu0 %vm2600_vm0, %v5702_v48  ;;  %5032 = vmatprep.mubr.msk.bf16.mxu1 %vm2600_vm0, %v5704_v49 }
 0x244   : > { %v6855_v8 = vpop.f32.mrb[88].mxu0  ;;  %v6857_v9 = vpop.f32.mrb[88].mxu1 }
 0x245   : > { %7278 = vst [vmem:[#allocation45_spill] sm:$0xff] %v6855_v8  ;;  %7279 = vst [vmem:[#allocation46_spill] sm:$0xff] %v6857_v9  ;;  %v3183_v11 = vpop.f32.mrb[89].mxu0  ;;  %v3671_v57 = vpop.f32.mrb[89].mxu1  ;;  %v5712_v9 = vld [vmem:[%s6358_s8 + $0x320] ss:$8 sps:$4 sm:$0xff]  }
 0x246   : > { %v6861_v39 = vpop.f32.mrb[90].mxu0  ;;  %v6863_v56 = vpop.f32.mrb[90].mxu1 }
 0x247   : > { %7280 = vst [vmem:[#allocation47_spill] sm:$0xff] %v6861_v39  ;;  %7281 = vst [vmem:[#allocation48_spill] sm:$0xff] %v6863_v56  ;;  %v3186_v48 = vpop.f32.mrb[91].mxu0  ;;  %v3674_v49 = vpop.f32.mrb[91].mxu1  ;;  %v5713_v56 = vld [vmem:[%s6358_s8 + $0x6f0] ss:$8 sps:$4 sm:$0xff]  }
 0x249   : > { %3396 = vmatmul.mubr.bf16.gmra.mrb[196].mxu0 %v5706_v26  ;;  %3884 = vmatmul.mubr.bf16.gmra.mrb[196].mxu1 %v5707_v27  ;;  %v5714_v26 = vld [vmem:[%s6358_s8 + $0x334] ss:$8 sps:$4 sm:$0xff]   ;;  %v5716_v27 = vld [vmem:[%s6358_s8 + $0x704] ss:$8 sps:$4 sm:$0xff]  }
 0x24a   : > { %4972 = vmatprep.mubr.msk.bf16.mxu0 %vm2600_vm0, %v5708_v34  ;;  %5033 = vmatprep.mubr.msk.bf16.mxu1 %vm2600_vm0, %v5710_v35 }
 0x24c   : > { %v6869_v57 = vpop.f32.mrb[92].mxu0  ;;  %v6871_v10 = vpop.f32.mrb[92].mxu1 }
 0x24d   : > { %7282 = vst [vmem:[#allocation49_spill] sm:$0xff] %v6869_v57  ;;  %7283 = vst [vmem:[#allocation50_spill] sm:$0xff] %v6871_v10  ;;  %v3191_v11 = vpop.f32.mrb[93].mxu0  ;;  %v3679_v39 = vpop.f32.mrb[93].mxu1  ;;  %v5718_v10 = vld [vmem:[%s6358_s8 + $0x330] ss:$8 sps:$4 sm:$0xff]  }
 0x24e   : > { %v6875_v8 = vpop.f32.mrb[94].mxu0  ;;  %v6877_v48 = vpop.f32.mrb[94].mxu1 }
 0x24f   : > { %7284 = vst [vmem:[#allocation51_spill] sm:$0xff] %v6875_v8  ;;  %7285 = vst [vmem:[#allocation52_spill] sm:$0xff] %v6877_v48  ;;  %v3194_v34 = vpop.f32.mrb[95].mxu0  ;;  %v3682_v35 = vpop.f32.mrb[95].mxu1  ;;  %v5719_v48 = vld [vmem:[%s6358_s8 + $0x700] ss:$8 sps:$4 sm:$0xff]  }
 0x251   : > { %3404 = vmatmul.mubr.bf16.gmra.mrb[200].mxu0 %v5712_v9  ;;  %3892 = vmatmul.mubr.bf16.gmra.mrb[200].mxu1 %v5713_v56  ;;  %v5720_v9 = vld [vmem:[%s6358_s8 + $0x344] ss:$8 sps:$4 sm:$0xff]   ;;  %v5722_v56 = vld [vmem:[%s6358_s8 + $0x714] ss:$8 sps:$4 sm:$0xff]  }
 0x252   : > { %4973 = vmatprep.mubr.msk.bf16.mxu0 %vm2600_vm0, %v5714_v26  ;;  %5034 = vmatprep.mubr.msk.bf16.mxu1 %vm2600_vm0, %v5716_v27 }
 0x254   : > { %v6883_v39 = vpop.f32.mrb[96].mxu0  ;;  %v6885_v49 = vpop.f32.mrb[96].mxu1 }
 0x255   : > { %7286 = vst [vmem:[#allocation53_spill] sm:$0xff] %v6883_v39  ;;  %7287 = vst [vmem:[#allocation54_spill] sm:$0xff] %v6885_v49  ;;  %v3199_v11 = vpop.f32.mrb[97].mxu0  ;;  %v3687_v8 = vpop.f32.mrb[97].mxu1  ;;  %v5724_v49 = vld [vmem:[%s6358_s8 + $0x340] ss:$8 sps:$4 sm:$0xff]  }
 0x256   : > { %v6889_v57 = vpop.f32.mrb[98].mxu0  ;;  %v6891_v34 = vpop.f32.mrb[98].mxu1 }
 0x257   : > { %7288 = vst [vmem:[#allocation55_spill] sm:$0xff] %v6889_v57  ;;  %7289 = vst [vmem:[#allocation56_spill] sm:$0xff] %v6891_v34  ;;  %v3202_v26 = vpop.f32.mrb[99].mxu0  ;;  %v3690_v27 = vpop.f32.mrb[99].mxu1  ;;  %v5725_v34 = vld [vmem:[%s6358_s8 + $0x710] ss:$8 sps:$4 sm:$0xff]  }
 0x259   : > { %3412 = vmatmul.mubr.bf16.gmra.mrb[204].mxu0 %v5718_v10  ;;  %3900 = vmatmul.mubr.bf16.gmra.mrb[204].mxu1 %v5719_v48  ;;  %v5726_v10 = vld [vmem:[%s6358_s8 + $0x354] ss:$8 sps:$4 sm:$0xff]   ;;  %v5728_v48 = vld [vmem:[%s6358_s8 + $0x724] ss:$8 sps:$4 sm:$0xff]  }
 0x25a   : > { %4974 = vmatprep.mubr.msk.bf16.mxu0 %vm2600_vm0, %v5720_v9  ;;  %5035 = vmatprep.mubr.msk.bf16.mxu1 %vm2600_vm0, %v5722_v56 }
 0x25c   : > { %v6897_v8 = vpop.f32.mrb[100].mxu0  ;;  %v6899_v35 = vpop.f32.mrb[100].mxu1 }
 0x25d   : > { %7290 = vst [vmem:[#allocation57_spill] sm:$0xff] %v6897_v8  ;;  %7291 = vst [vmem:[#allocation58_spill] sm:$0xff] %v6899_v35  ;;  %v3207_v11 = vpop.f32.mrb[101].mxu0  ;;  %v3695_v57 = vpop.f32.mrb[101].mxu1  ;;  %v5730_v35 = vld [vmem:[%s6358_s8 + $0x350] ss:$8 sps:$4 sm:$0xff]  }
 0x25e   : > { %v6903_v39 = vpop.f32.mrb[102].mxu0  ;;  %v6905_v26 = vpop.f32.mrb[102].mxu1 }
 0x25f   : > { %7292 = vst [vmem:[#allocation59_spill] sm:$0xff] %v6903_v39  ;;  %7293 = vst [vmem:[#allocation60_spill] sm:$0xff] %v6905_v26  ;;  %v3210_v9 = vpop.f32.mrb[103].mxu0  ;;  %v3698_v56 = vpop.f32.mrb[103].mxu1  ;;  %v5731_v26 = vld [vmem:[%s6358_s8 + $0x720] ss:$8 sps:$4 sm:$0xff]  }
 0x261   : > { %3420 = vmatmul.mubr.bf16.gmra.mrb[208].mxu0 %v5724_v49  ;;  %3908 = vmatmul.mubr.bf16.gmra.mrb[208].mxu1 %v5725_v34  ;;  %v5732_v49 = vld [vmem:[%s6358_s8 + $0x364] ss:$8 sps:$4 sm:$0xff]   ;;  %v5734_v34 = vld [vmem:[%s6358_s8 + $0x734] ss:$8 sps:$4 sm:$0xff]  }
 0x262   : > { %4975 = vmatprep.mubr.msk.bf16.mxu0 %vm2600_vm0, %v5726_v10  ;;  %5036 = vmatprep.mubr.msk.bf16.mxu1 %vm2600_vm0, %v5728_v48 }
 0x264   : > { %v6911_v57 = vpop.f32.mrb[104].mxu0  ;;  %v6913_v27 = vpop.f32.mrb[104].mxu1 }
 0x265   : > { %7294 = vst [vmem:[#allocation61_spill] sm:$0xff] %v6911_v57  ;;  %7295 = vst [vmem:[#allocation62_spill] sm:$0xff] %v6913_v27  ;;  %v3215_v11 = vpop.f32.mrb[105].mxu0  ;;  %v3703_v39 = vpop.f32.mrb[105].mxu1  ;;  %v5736_v27 = vld [vmem:[%s6358_s8 + $0x360] ss:$8 sps:$4 sm:$0xff]  }
 0x266   : > { %v6917_v8 = vpop.f32.mrb[106].mxu0  ;;  %v6919_v9 = vpop.f32.mrb[106].mxu1 }
 0x267   : > { %7296 = vst [vmem:[#allocation63_spill] sm:$0xff] %v6917_v8  ;;  %7297 = vst [vmem:[#allocation64_spill] sm:$0xff] %v6919_v9  ;;  %v3218_v10 = vpop.f32.mrb[107].mxu0  ;;  %v3706_v48 = vpop.f32.mrb[107].mxu1  ;;  %v5737_v9 = vld [vmem:[%s6358_s8 + $0x730] ss:$8 sps:$4 sm:$0xff]  }
 0x269   : > { %3428 = vmatmul.mubr.bf16.gmra.mrb[212].mxu0 %v5730_v35  ;;  %3916 = vmatmul.mubr.bf16.gmra.mrb[212].mxu1 %v5731_v26  ;;  %v5738_v35 = vld [vmem:[%s6358_s8 + $0x374] ss:$8 sps:$4 sm:$0xff]   ;;  %v5740_v26 = vld [vmem:[%s6358_s8 + $0x744] ss:$8 sps:$4 sm:$0xff]  }
 0x26a   : > { %4976 = vmatprep.mubr.msk.bf16.mxu0 %vm2600_vm0, %v5732_v49  ;;  %5037 = vmatprep.mubr.msk.bf16.mxu1 %vm2600_vm0, %v5734_v34 }
 0x26c   : > { %v6925_v39 = vpop.f32.mrb[108].mxu0  ;;  %v6927_v56 = vpop.f32.mrb[108].mxu1 }
 0x26d   : > { %7298 = vst [vmem:[#allocation65_spill] sm:$0xff] %v6925_v39  ;;  %7299 = vst [vmem:[#allocation66_spill] sm:$0xff] %v6927_v56  ;;  %v3223_v11 = vpop.f32.mrb[109].mxu0  ;;  %v3711_v8 = vpop.f32.mrb[109].mxu1  ;;  %v5742_v56 = vld [vmem:[%s6358_s8 + $0x370] ss:$8 sps:$4 sm:$0xff]  }
 0x26e   : > { %v6931_v57 = vpop.f32.mrb[110].mxu0  ;;  %v6933_v10 = vpop.f32.mrb[110].mxu1 }
 0x26f   : > { %7300 = vst [vmem:[#allocation67_spill] sm:$0xff] %v6931_v57  ;;  %7301 = vst [vmem:[#allocation68_spill] sm:$0xff] %v6933_v10  ;;  %v3226_v49 = vpop.f32.mrb[111].mxu0  ;;  %v3714_v34 = vpop.f32.mrb[111].mxu1  ;;  %v5743_v10 = vld [vmem:[%s6358_s8 + $0x740] ss:$8 sps:$4 sm:$0xff]  }
 0x271   : > { %3436 = vmatmul.mubr.bf16.gmra.mrb[216].mxu0 %v5736_v27  ;;  %3924 = vmatmul.mubr.bf16.gmra.mrb[216].mxu1 %v5737_v9  ;;  %v5744_v27 = vld [vmem:[%s6358_s8 + $0x384] ss:$8 sps:$4 sm:$0xff]   ;;  %v5746_v9 = vld [vmem:[%s6358_s8 + $0x754] ss:$8 sps:$4 sm:$0xff]  }
 0x272   : > { %4977 = vmatprep.mubr.msk.bf16.mxu0 %vm2600_vm0, %v5738_v35  ;;  %5038 = vmatprep.mubr.msk.bf16.mxu1 %vm2600_vm0, %v5740_v26 }
 0x274   : > { %v6939_v8 = vpop.f32.mrb[112].mxu0  ;;  %v6941_v48 = vpop.f32.mrb[112].mxu1 }
 0x275   : > { %7302 = vst [vmem:[#allocation69_spill] sm:$0xff] %v6939_v8  ;;  %7303 = vst [vmem:[#allocation70_spill] sm:$0xff] %v6941_v48  ;;  %v3231_v11 = vpop.f32.mrb[113].mxu0  ;;  %v3719_v57 = vpop.f32.mrb[113].mxu1  ;;  %v5749_v48 = vld [vmem:[%s6358_s8 + $0x750] ss:$8 sps:$4 sm:$0xff]  }
 0x276   : > { %v6945_v39 = vpop.f32.mrb[114].mxu0  ;;  %v6947_v49 = vpop.f32.mrb[114].mxu1 }
 0x277   : > { %7304 = vst [vmem:[#allocation71_spill] sm:$0xff] %v6945_v39  ;;  %7305 = vst [vmem:[#allocation72_spill] sm:$0xff] %v6947_v49  ;;  %v3234_v35 = vpop.f32.mrb[115].mxu0  ;;  %v3722_v26 = vpop.f32.mrb[115].mxu1  ;;  %v5748_v49 = vld [vmem:[%s6358_s8 + $0x380] ss:$8 sps:$4 sm:$0xff]  }
 0x279   : > { %3444 = vmatmul.mubr.bf16.gmra.mrb[220].mxu0 %v5742_v56  ;;  %3932 = vmatmul.mubr.bf16.gmra.mrb[220].mxu1 %v5743_v10  ;;  %v5750_v56 = vld [vmem:[%s6358_s8 + $0x394] ss:$8 sps:$4 sm:$0xff]   ;;  %v5752_v10 = vld [vmem:[%s6358_s8 + $0x764] ss:$8 sps:$4 sm:$0xff]  }
 0x27a   : > { %4978 = vmatprep.mubr.msk.bf16.mxu0 %vm2600_vm0, %v5744_v27  ;;  %5039 = vmatprep.mubr.msk.bf16.mxu1 %vm2600_vm0, %v5746_v9 }
 0x27c   : > { %v6953_v57 = vpop.f32.mrb[116].mxu0  ;;  %v6955_v34 = vpop.f32.mrb[116].mxu1 }
 0x27d   : > { %7306 = vst [vmem:[#allocation73_spill] sm:$0xff] %v6953_v57  ;;  %7307 = vst [vmem:[#allocation74_spill] sm:$0xff] %v6955_v34  ;;  %v3239_v11 = vpop.f32.mrb[117].mxu0  ;;  %v3727_v39 = vpop.f32.mrb[117].mxu1 }
 0x27e   : > { %v6959_v8 = vpop.f32.mrb[118].mxu0  ;;  %v6961_v35 = vpop.f32.mrb[118].mxu1  ;;  %v5754_v11 = vld [vmem:[%s6358_s8 + $0x390] ss:$8 sps:$4 sm:$0xff]  }
 0x27f   : > { %7308 = vst [vmem:[#allocation75_spill] sm:$0xff] %v6959_v8  ;;  %7309 = vst [vmem:[#allocation76_spill] sm:$0xff] %v6961_v35  ;;  %v3242_v27 = vpop.f32.mrb[119].mxu0  ;;  %v3730_v9 = vpop.f32.mrb[119].mxu1  ;;  %v5755_v35 = vld [vmem:[%s6358_s8 + $0x760] ss:$8 sps:$4 sm:$0xff]  }
 0x280   : > { %v5756_v9 = vld [vmem:[%s6358_s8 + $0x3a4] ss:$8 sps:$4 sm:$0xff]  }
 0x281   : > { %3452 = vmatmul.mubr.bf16.gmra.mrb[224].mxu0 %v5748_v49  ;;  %3940 = vmatmul.mubr.bf16.gmra.mrb[224].mxu1 %v5749_v48  ;;  %v5758_v49 = vld [vmem:[%s6358_s8 + $0x774] ss:$8 sps:$4 sm:$0xff]  }
 0x282   : > { %4979 = vmatprep.mubr.msk.bf16.mxu0 %vm2600_vm0, %v5750_v56  ;;  %5040 = vmatprep.mubr.msk.bf16.mxu1 %vm2600_vm0, %v5752_v10 }
 0x284   : > { %v6967_v39 = vpop.f32.mrb[120].mxu0  ;;  %v6969_v26 = vpop.f32.mrb[120].mxu1 }
 0x285   : > { %7310 = vst [vmem:[#allocation77_spill] sm:$0xff] %v6967_v39  ;;  %7311 = vst [vmem:[#allocation78_spill] sm:$0xff] %v6969_v26  ;;  %v3247_v8 = vpop.f32.mrb[121].mxu0  ;;  %v3735_v34 = vpop.f32.mrb[121].mxu1 }
 0x286   : > { %v3248_v57 = vpop.f32.mrb[122].mxu0  ;;  %v3736_v27 = vpop.f32.mrb[122].mxu1  ;;  %v6984_v8 = vld [vmem:[%s7234_s2] ss:$0 sm:$0xff] }
 0x287   : > { %v3980_v48 = vmax.f32 %v6547_v46, %v3248_v57  ;;  %v4041_v56 = vmax.f32 %v6549_v47, %v3736_v27  ;;  %v3250_v10 = vpop.f32.mrb[123].mxu0  ;;  %v3738_v38 = vpop.f32.mrb[123].mxu1  ;;  %v5760_v57 = vld [vmem:[%s6358_s8 + $0x3a0] ss:$8 sps:$4 sm:$0xff]   ;;  %v5761_v27 = vld [vmem:[%s6358_s8 + $0x770] ss:$8 sps:$4 sm:$0xff]  }
 0x289   : > { %v4102_v39 = vmax.f32 %v3980_v48, %v4041_v56  ;;  %3460 = vmatmul.mubr.bf16.gmra.mrb[228].mxu0 %v5754_v11  ;;  %3948 = vmatmul.mubr.bf16.gmra.mrb[228].mxu1 %v5755_v35  ;;  %v5762_v56 = vld [vmem:[%s6358_s8 + $0x3b4] ss:$8 sps:$4 sm:$0xff]  }
 0x28a   : > { %4980 = vmatprep.mubr.msk.bf16.mxu0 %vm2600_vm0, %v5756_v9  ;;  %5041 = vmatprep.mubr.msk.bf16.mxu1 %vm2600_vm0, %v5758_v49  ;;  %v5764_v49 = vld [vmem:[%s6358_s8 + $0x784] ss:$8 sps:$4 sm:$0xff]  }
 0x28b   : > { %v4170_v10 = vadd.f32 %v6984_v8, %v4102_v39 }
 0x28c   : > { %v3253_v46 = vpop.f32.mrb[124].mxu0  ;;  %v3741_v47 = vpop.f32.mrb[124].mxu1 }
 0x28d   : > { %v3981_v38 = vmax.f32 %v6553_v52, %v3253_v46  ;;  %v4042_v34 = vmax.f32 %v6555_v53, %v3741_v47  ;;  %v3255_v35 = vpop.f32.mrb[125].mxu0  ;;  %v3743_v11 = vpop.f32.mrb[125].mxu1  ;;  %v4231_v39 = vmax.f32 %v4170_v10, 0.0  ;;  %v5766_v47 = vld [vmem:[%s6358_s8 + $0x3b0] ss:$8 sps:$4 sm:$0xff]  }
 0x28e   : > { %v3256_v48 = vpop.f32.mrb[126].mxu0  ;;  %v3744_v9 = vpop.f32.mrb[126].mxu1  ;;  %v5768_v35 = vld [vmem:[%s6358_s8 + $0x3c4] ss:$8 sps:$4 sm:$0xff]   ;;  %v5770_v11 = vld [vmem:[%s6358_s8 + $0x794] ss:$8 sps:$4 sm:$0xff]  }
 0x28f   : > { %v4103_v26 = vmax.f32 %v3981_v38, %v4042_v34  ;;  %v3982_v21 = vmax.f32 %v6561_v58, %v3256_v48  ;;  %v4043_v20 = vmax.f32 %v6563_v59, %v3744_v9  ;;  %v3258_v63 = vpop.f32.mrb[127].mxu0  ;;  %v3746_v62 = vpop.f32.mrb[127].mxu1 }
 0x291   : > { %v4171_v52 = vadd.f32 %v6984_v8, %v4103_v26  ;;  %v4104_v53 = vmax.f32 %v3982_v21, %v4043_v20  ;;  %3468 = vmatmul.mubr.bf16.gmra.mrb[232].mxu0 %v5760_v57  ;;  %3956 = vmatmul.mubr.bf16.gmra.mrb[232].mxu1 %v5761_v27  ;;  %v5767_v57 = vld [vmem:[%s6358_s8 + $0x780] ss:$8 sps:$4 sm:$0xff]  }
 0x292   : > { %4981 = vmatprep.mubr.msk.bf16.mxu0 %vm2600_vm0, %v5762_v56  ;;  %5042 = vmatprep.mubr.msk.bf16.mxu1 %vm2600_vm0, %v5764_v49 }
 0x293   : > { %v4232_v58 = vmax.f32 %v4171_v52, 0.0  ;;  %v4172_v27 = vadd.f32 %v6984_v8, %v4104_v53 }
 0x294   : > { %v3261_v59 = vpop.f32.mrb[128].mxu0  ;;  %v3749_v62 = vpop.f32.mrb[128].mxu1 }
 0x295   : > { %v5174_v63 = vpack.c.bf16 %v4232_v58, %v4231_v39  ;;  %v3983_v20 = vmax.f32 %v6567_v0, %v3261_v59  ;;  %v4044_v21 = vmax.f32 %v6569_v1, %v3749_v62  ;;  %v3263_v26 = vpop.f32.mrb[129].mxu0  ;;  %v3751_v46 = vpop.f32.mrb[129].mxu1  ;;  %v4233_v52 = vmax.f32 %v4172_v27, 0.0 }
 0x296   : > { %v3264_v38 = vpop.f32.mrb[130].mxu0  ;;  %v3752_v34 = vpop.f32.mrb[130].mxu1 }
 0x297   : > { %5175 = vst [vmem:[%s7001_s5] sm:$0xff] %v5174_v63   ;;  %v4105_v48 = vmax.f32 %v3983_v20, %v4044_v21  ;;  %v3984_v9 = vmax.f32 %v6575_v6, %v3264_v38  ;;  %v4045_v56 = vmax.f32 %v6577_v7, %v3752_v34  ;;  %v3266_v49 = vpop.f32.mrb[131].mxu0  ;;  %v3754_v0 = vpop.f32.mrb[131].mxu1  ;;  %v5772_v20 = vld [vmem:[%s6358_s8 + $0x3c0] ss:$8 sps:$4 sm:$0xff]   ;;  %v5773_v21 = vld [vmem:[%s6358_s8 + $0x790] ss:$8 sps:$4 sm:$0xff]  }
 0x299   : > { %v4173_v1 = vadd.f32 %v6984_v8, %v4105_v48  ;;  %v4106_v10 = vmax.f32 %v3984_v9, %v4045_v56  ;;  %3476 = vmatmul.mubr.bf16.gmra.mrb[236].mxu0 %v5766_v47  ;;  %3964 = vmatmul.mubr.bf16.gmra.mrb[236].mxu1 %v5767_v57 }
 0x29a   : > { %4982 = vmatprep.mubr.msk.bf16.mxu0 %vm2600_vm0, %v5768_v35  ;;  %5043 = vmatprep.mubr.msk.bf16.mxu1 %vm2600_vm0, %v5770_v11 }
 0x29b   : > { %v4234_v53 = vmax.f32 %v4173_v1, 0.0  ;;  %v4174_v47 = vadd.f32 %v6984_v8, %v4106_v10 }
 0x29c   : > { %v3269_v39 = vpop.f32.mrb[132].mxu0  ;;  %v3757_v6 = vpop.f32.mrb[132].mxu1 }
 0x29d   : > { %v5179_v58 = vpack.c.bf16 %v4234_v53, %v4233_v52  ;;  %v3985_v7 = vmax.f32 %v6581_v12, %v3269_v39  ;;  %v4046_v59 = vmax.f32 %v6583_v13, %v3757_v6  ;;  %v3271_v62 = vpop.f32.mrb[133].mxu0  ;;  %v3759_v63 = vpop.f32.mrb[133].mxu1  ;;  %v4235_v27 = vmax.f32 %v4174_v47, 0.0 }
 0x29e   : > { %v3272_v26 = vpop.f32.mrb[134].mxu0  ;;  %v3760_v46 = vpop.f32.mrb[134].mxu1 }
 0x29f   : > { %5322 = vst [vmem:[%s7001_s5 + $0x8] sm:$0xff] %v5179_v58   ;;  %v4107_v57 = vmax.f32 %v3985_v7, %v4046_v59  ;;  %v3986_v38 = vmax.f32 %v6589_v18, %v3272_v26  ;;  %v4047_v34 = vmax.f32 %v6591_v19, %v3760_v46  ;;  %v3274_v35 = vpop.f32.mrb[135].mxu0  ;;  %v3762_v11 = vpop.f32.mrb[135].mxu1 }
 0x2a1   : > { %v4175_v12 = vadd.f32 %v6984_v8, %v4107_v57  ;;  %v4108_v13 = vmax.f32 %v3986_v38, %v4047_v34  ;;  %3484 = vmatmul.mubr.bf16.gmra.mrb[240].mxu0 %v5772_v20  ;;  %3972 = vmatmul.mubr.bf16.gmra.mrb[240].mxu1 %v5773_v21 }
 0x2a3   : > { %v4236_v48 = vmax.f32 %v4175_v12, 0.0  ;;  %v4176_v53 = vadd.f32 %v6984_v8, %v4108_v13 }
 0x2a4   : > { %v3277_v9 = vpop.f32.mrb[136].mxu0  ;;  %v3765_v56 = vpop.f32.mrb[136].mxu1 }
 0x2a5   : > { %v5184_v49 = vpack.c.bf16 %v4236_v48, %v4235_v27  ;;  %v3987_v0 = vmax.f32 %v6595_v24, %v3277_v9  ;;  %v4048_v1 = vmax.f32 %v6597_v25, %v3765_v56  ;;  %v3279_v18 = vpop.f32.mrb[137].mxu0  ;;  %v3767_v10 = vpop.f32.mrb[137].mxu1  ;;  %v4237_v63 = vmax.f32 %v4176_v53, 0.0 }
 0x2a6   : > { %v3280_v19 = vpop.f32.mrb[138].mxu0  ;;  %v3768_v52 = vpop.f32.mrb[138].mxu1 }
 0x2a7   : > { %5323 = vst [vmem:[%s7001_s5 + $0x10] sm:$0xff] %v5184_v49   ;;  %v4109_v39 = vmax.f32 %v3987_v0, %v4048_v1  ;;  %v3988_v6 = vmax.f32 %v6603_v30, %v3280_v19  ;;  %v4049_v58 = vmax.f32 %v6605_v31, %v3768_v52  ;;  %v3282_v7 = vpop.f32.mrb[139].mxu0  ;;  %v3770_v59 = vpop.f32.mrb[139].mxu1 }
 0x2a9   : > { %v4177_v62 = vadd.f32 %v6984_v8, %v4109_v39  ;;  %v4110_v24 = vmax.f32 %v3988_v6, %v4049_v58 }
 0x2ab   : > { %v4238_v25 = vmax.f32 %v4177_v62, 0.0  ;;  %v4178_v31 = vadd.f32 %v6984_v8, %v4110_v24 }
 0x2ac   : > { %v3285_v20 = vpop.f32.mrb[140].mxu0  ;;  %v3773_v21 = vpop.f32.mrb[140].mxu1 }
 0x2ad   : > { %v5189_v26 = vpack.c.bf16 %v4238_v25, %v4237_v63  ;;  %v3989_v46 = vmax.f32 %v6609_v36, %v3285_v20  ;;  %v4050_v47 = vmax.f32 %v6611_v37, %v3773_v21  ;;  %v3287_v57 = vpop.f32.mrb[141].mxu0  ;;  %v3775_v38 = vpop.f32.mrb[141].mxu1  ;;  %v4239_v9 = vmax.f32 %v4178_v31, 0.0 }
 0x2ae   : > { %v3288_v30 = vpop.f32.mrb[142].mxu0  ;;  %v3776_v34 = vpop.f32.mrb[142].mxu1 }
 0x2af   : > { %5324 = vst [vmem:[%s7001_s5 + $0x18] sm:$0xff] %v5189_v26   ;;  %v4111_v35 = vmax.f32 %v3989_v46, %v4050_v47  ;;  %v3990_v11 = vmax.f32 %v6617_v42, %v3288_v30  ;;  %v4051_v12 = vmax.f32 %v6619_v43, %v3776_v34  ;;  %v3290_v13 = vpop.f32.mrb[143].mxu0  ;;  %v3778_v27 = vpop.f32.mrb[143].mxu1 }
 0x2b1   : > { %v4179_v48 = vadd.f32 %v6984_v8, %v4111_v35  ;;  %v4112_v36 = vmax.f32 %v3990_v11, %v4051_v12 }
 0x2b3   : > { %v4240_v37 = vmax.f32 %v4179_v48, 0.0  ;;  %v4180_v43 = vadd.f32 %v6984_v8, %v4112_v36 }
 0x2b4   : > { %v3293_v56 = vpop.f32.mrb[144].mxu0  ;;  %v3781_v49 = vpop.f32.mrb[144].mxu1 }
 0x2b5   : > { %v5194_v0 = vpack.c.bf16 %v4240_v37, %v4239_v9  ;;  %v3991_v1 = vmax.f32 %v6623_v50, %v3293_v56  ;;  %v4052_v18 = vmax.f32 %v6625_v51, %v3781_v49  ;;  %v3295_v10 = vpop.f32.mrb[145].mxu0  ;;  %v3783_v19 = vpop.f32.mrb[145].mxu1  ;;  %v4241_v62 = vmax.f32 %v4180_v43, 0.0 }
 0x2b6   : > { %v3296_v42 = vpop.f32.mrb[146].mxu0  ;;  %v3784_v52 = vpop.f32.mrb[146].mxu1 }
 0x2b7   : > { %5325 = vst [vmem:[%s7001_s5 + $0x20] sm:$0xff] %v5194_v0   ;;  %v4113_v53 = vmax.f32 %v3991_v1, %v4052_v18  ;;  %v3992_v39 = vmax.f32 %v6631_v60, %v3296_v42  ;;  %v4053_v6 = vmax.f32 %v6633_v61, %v3784_v52  ;;  %v3298_v58 = vpop.f32.mrb[147].mxu0  ;;  %v3786_v7 = vpop.f32.mrb[147].mxu1 }
 0x2b9   : > { %v4181_v59 = vadd.f32 %v6984_v8, %v4113_v53  ;;  %v4114_v50 = vmax.f32 %v3992_v39, %v4053_v6 }
 0x2bb   : > { %v4242_v51 = vmax.f32 %v4181_v59, 0.0  ;;  %v4182_v61 = vadd.f32 %v6984_v8, %v4114_v50 }
 0x2bc   : > { %v3301_v24 = vpop.f32.mrb[148].mxu0  ;;  %v3789_v63 = vpop.f32.mrb[148].mxu1 }
 0x2bd   : > { %v5199_v25 = vpack.c.bf16 %v4242_v51, %v4241_v62  ;;  %v3993_v20 = vmax.f32 %v6637_v4, %v3301_v24  ;;  %v4054_v21 = vmax.f32 %v6639_v5, %v3789_v63  ;;  %v3303_v26 = vpop.f32.mrb[149].mxu0  ;;  %v3791_v46 = vpop.f32.mrb[149].mxu1  ;;  %v4243_v11 = vmax.f32 %v4182_v61, 0.0 }
 0x2be   : > { %v3304_v60 = vpop.f32.mrb[150].mxu0  ;;  %v3792_v47 = vpop.f32.mrb[150].mxu1 }
 0x2bf   : > { %5326 = vst [vmem:[%s7001_s5 + $0x28] sm:$0xff] %v5199_v25   ;;  %v4115_v57 = vmax.f32 %v3993_v20, %v4054_v21  ;;  %v3994_v38 = vmax.f32 %v6645_v14, %v3304_v60  ;;  %v4055_v30 = vmax.f32 %v6647_v15, %v3792_v47  ;;  %v3306_v34 = vpop.f32.mrb[151].mxu0  ;;  %v3794_v31 = vpop.f32.mrb[151].mxu1 }
 0x2c1   : > { %v4183_v35 = vadd.f32 %v6984_v8, %v4115_v57  ;;  %v4116_v4 = vmax.f32 %v3994_v38, %v4055_v30 }
 0x2c3   : > { %v4244_v5 = vmax.f32 %v4183_v35, 0.0  ;;  %v4184_v15 = vadd.f32 %v6984_v8, %v4116_v4 }
 0x2c4   : > { %v3309_v12 = vpop.f32.mrb[152].mxu0  ;;  %v3797_v13 = vpop.f32.mrb[152].mxu1 }
 0x2c5   : > { %v5204_v27 = vpack.c.bf16 %v4244_v5, %v4243_v11  ;;  %v3995_v48 = vmax.f32 %v6651_v22, %v3309_v12  ;;  %v4056_v36 = vmax.f32 %v6653_v23, %v3797_v13  ;;  %v3311_v9 = vpop.f32.mrb[153].mxu0  ;;  %v3799_v37 = vpop.f32.mrb[153].mxu1  ;;  %v4245_v42 = vmax.f32 %v4184_v15, 0.0 }
 0x2c6   : > { %v3312_v14 = vpop.f32.mrb[154].mxu0  ;;  %v3800_v56 = vpop.f32.mrb[154].mxu1 }
 0x2c7   : > { %5327 = vst [vmem:[%s7001_s5 + $0x30] sm:$0xff] %v5204_v27   ;;  %v4117_v49 = vmax.f32 %v3995_v48, %v4056_v36  ;;  %v3996_v0 = vmax.f32 %v6659_v32, %v3312_v14  ;;  %v4057_v1 = vmax.f32 %v6661_v33, %v3800_v56  ;;  %v3314_v18 = vpop.f32.mrb[155].mxu0  ;;  %v3802_v10 = vpop.f32.mrb[155].mxu1 }
 0x2c9   : > { %v4185_v19 = vadd.f32 %v6984_v8, %v4117_v49  ;;  %v4118_v22 = vmax.f32 %v3996_v0, %v4057_v1 }
 0x2cb   : > { %v4246_v23 = vmax.f32 %v4185_v19, 0.0  ;;  %v4186_v33 = vadd.f32 %v6984_v8, %v4118_v22 }
 0x2cc   : > { %v3317_v52 = vpop.f32.mrb[156].mxu0  ;;  %v3805_v43 = vpop.f32.mrb[156].mxu1 }
 0x2cd   : > { %v5209_v53 = vpack.c.bf16 %v4246_v23, %v4245_v42  ;;  %v3997_v39 = vmax.f32 %v6665_v40, %v3317_v52  ;;  %v4058_v6 = vmax.f32 %v6667_v41, %v3805_v43  ;;  %v3319_v58 = vpop.f32.mrb[157].mxu0  ;;  %v3807_v7 = vpop.f32.mrb[157].mxu1  ;;  %v4247_v20 = vmax.f32 %v4186_v33, 0.0  ;;  %v7312_v23 = vld [vmem:[#allocation3_spill] sm:$0xff]  ;;  %v7313_v43 = vld [vmem:[#allocation4_spill] sm:$0xff]  ;;  %v7315_v33 = vld [vmem:[#allocation6_spill] sm:$0xff] }
 0x2ce   : > { %v3320_v32 = vpop.f32.mrb[158].mxu0  ;;  %v3808_v59 = vpop.f32.mrb[158].mxu1 }
 0x2cf   : > { %5328 = vst [vmem:[%s7001_s5 + $0x38] sm:$0xff] %v5209_v53   ;;  %v4119_v50 = vmax.f32 %v3997_v39, %v4058_v6  ;;  %v3998_v62 = vmax.f32 %v6673_v54, %v3320_v32  ;;  %v4059_v51 = vmax.f32 %v6675_v55, %v3808_v59  ;;  %v3322_v24 = vpop.f32.mrb[159].mxu0  ;;  %v3810_v63 = vpop.f32.mrb[159].mxu1  ;;  %v7314_v32 = vld [vmem:[#allocation5_spill] sm:$0xff] }
 0x2d1   : > { %v4187_v25 = vadd.f32 %v6984_v8, %v4119_v50  ;;  %v4120_v40 = vmax.f32 %v3998_v62, %v4059_v51 }
 0x2d3   : > { %v4248_v41 = vmax.f32 %v4187_v25, 0.0  ;;  %v4188_v55 = vadd.f32 %v6984_v8, %v4120_v40 }
 0x2d4   : > { %v3325_v21 = vpop.f32.mrb[160].mxu0  ;;  %v3813_v26 = vpop.f32.mrb[160].mxu1 }
 0x2d5   : > { %v5214_v46 = vpack.c.bf16 %v4248_v41, %v4247_v20  ;;  %v3999_v60 = vmax.f32 %v6679_v2, %v3325_v21  ;;  %v4060_v47 = vmax.f32 %v6681_v3, %v3813_v26  ;;  %v3327_v61 = vpop.f32.mrb[161].mxu0  ;;  %v3815_v57 = vpop.f32.mrb[161].mxu1  ;;  %v4249_v5 = vmax.f32 %v4188_v55, 0.0  ;;  %v7316_v26 = vld [vmem:[#allocation7_spill] sm:$0xff] }
 0x2d6   : > { %v3328_v54 = vpop.f32.mrb[162].mxu0  ;;  %v3816_v38 = vpop.f32.mrb[162].mxu1 }
 0x2d7   : > { %5329 = vst [vmem:[%s7001_s5 + $0x40] sm:$0xff] %v5214_v46   ;;  %v4121_v30 = vmax.f32 %v3999_v60, %v4060_v47  ;;  %v4000_v34 = vmax.f32 %v6687_v16, %v3328_v54  ;;  %v4061_v31 = vmax.f32 %v6689_v17, %v3816_v38  ;;  %v3330_v35 = vpop.f32.mrb[163].mxu0  ;;  %v3818_v4 = vpop.f32.mrb[163].mxu1  ;;  %v7317_v60 = vld [vmem:[#allocation8_spill] sm:$0xff] }
 0x2d8   : > { %v7319_v35 = vld [vmem:[#allocation10_spill] sm:$0xff] }
 0x2d9   : > { %v4189_v11 = vadd.f32 %v6984_v8, %v4121_v30  ;;  %v4122_v2 = vmax.f32 %v4000_v34, %v4061_v31  ;;  %v7318_v34 = vld [vmem:[#allocation9_spill] sm:$0xff] }
 0x2db   : > { %v4250_v3 = vmax.f32 %v4189_v11, 0.0  ;;  %v4190_v17 = vadd.f32 %v6984_v8, %v4122_v2 }
 0x2dc   : > { %v3333_v12 = vpop.f32.mrb[164].mxu0  ;;  %v3821_v13 = vpop.f32.mrb[164].mxu1 }
 0x2dd   : > { %v5219_v27 = vpack.c.bf16 %v4250_v3, %v4249_v5  ;;  %v4001_v48 = vmax.f32 %v6693_v28, %v3333_v12  ;;  %v4062_v36 = vmax.f32 %v6695_v29, %v3821_v13  ;;  %v3335_v9 = vpop.f32.mrb[165].mxu0  ;;  %v3823_v37 = vpop.f32.mrb[165].mxu1  ;;  %v4251_v10 = vmax.f32 %v4190_v17, 0.0 }
 0x2de   : > { %v3336_v16 = vpop.f32.mrb[166].mxu0  ;;  %v3824_v14 = vpop.f32.mrb[166].mxu1  ;;  %v7320_v9 = vld [vmem:[#allocation11_spill] sm:$0xff] }
 0x2df   : > { %5330 = vst [vmem:[%s7001_s5 + $0x48] sm:$0xff] %v5219_v27   ;;  %v4123_v56 = vmax.f32 %v4001_v48, %v4062_v36  ;;  %v4002_v15 = vmax.f32 %v6701_v44, %v3336_v16  ;;  %v4063_v49 = vmax.f32 %v6703_v45, %v3824_v14  ;;  %v3338_v0 = vpop.f32.mrb[167].mxu0  ;;  %v3826_v1 = vpop.f32.mrb[167].mxu1  ;;  %v7321_v16 = vld [vmem:[#allocation12_spill] sm:$0xff] }
 0x2e1   : > { %v4191_v18 = vadd.f32 %v6984_v8, %v4123_v56  ;;  %v4124_v28 = vmax.f32 %v4002_v15, %v4063_v49 }
 0x2e3   : > { %v4252_v29 = vmax.f32 %v4191_v18, 0.0  ;;  %v4192_v45 = vadd.f32 %v6984_v8, %v4124_v28  ;;  %v7322_v18 = vld [vmem:[#allocation13_spill] sm:$0xff] }
 0x2e4   : > { %v3341_v19 = vpop.f32.mrb[168].mxu0  ;;  %v3829_v22 = vpop.f32.mrb[168].mxu1 }
 0x2e5   : > { %v5224_v42 = vpack.c.bf16 %v4252_v29, %v4251_v10  ;;  %v4003_v52 = vmax.f32 %v7312_v23, %v3341_v19  ;;  %v4064_v53 = vmax.f32 %v7313_v43, %v3829_v22  ;;  %v3343_v39 = vpop.f32.mrb[169].mxu0  ;;  %v3831_v6 = vpop.f32.mrb[169].mxu1  ;;  %v4253_v25 = vmax.f32 %v4192_v45, 0.0  ;;  %v7323_v10 = vld [vmem:[#allocation14_spill] sm:$0xff]  ;;  %v7325_v45 = vld [vmem:[#allocation16_spill] sm:$0xff] }
 0x2e6   : > { %v3344_v44 = vpop.f32.mrb[170].mxu0  ;;  %v3832_v58 = vpop.f32.mrb[170].mxu1 }
 0x2e7   : > { %5331 = vst [vmem:[%s7001_s5 + $0x50] sm:$0xff] %v5224_v42   ;;  %v4125_v7 = vmax.f32 %v4003_v52, %v4064_v53  ;;  %v4004_v59 = vmax.f32 %v7314_v32, %v3344_v44  ;;  %v4065_v50 = vmax.f32 %v7315_v33, %v3832_v58  ;;  %v3346_v62 = vpop.f32.mrb[171].mxu0  ;;  %v3834_v51 = vpop.f32.mrb[171].mxu1  ;;  %v7324_v44 = vld [vmem:[#allocation15_spill] sm:$0xff] }
 0x2e9   : > { %v4193_v24 = vadd.f32 %v6984_v8, %v4125_v7  ;;  %v4126_v63 = vmax.f32 %v4004_v59, %v4065_v50 }
 0x2eb   : > { %v4254_v40 = vmax.f32 %v4193_v24, 0.0  ;;  %v4194_v55 = vadd.f32 %v6984_v8, %v4126_v63  ;;  %v7326_v24 = vld [vmem:[#allocation17_spill] sm:$0xff] }
 0x2ec   : > { %v3349_v20 = vpop.f32.mrb[172].mxu0  ;;  %v3837_v41 = vpop.f32.mrb[172].mxu1 }
 0x2ed   : > { %v5229_v21 = vpack.c.bf16 %v4254_v40, %v4253_v25  ;;  %v4005_v46 = vmax.f32 %v7316_v26, %v3349_v20  ;;  %v4066_v47 = vmax.f32 %v7317_v60, %v3837_v41  ;;  %v3351_v61 = vpop.f32.mrb[173].mxu0  ;;  %v3839_v57 = vpop.f32.mrb[173].mxu1  ;;  %v4255_v12 = vmax.f32 %v4194_v55, 0.0  ;;  %v7327_v25 = vld [vmem:[#allocation18_spill] sm:$0xff]  ;;  %v7329_v55 = vld [vmem:[#allocation20_spill] sm:$0xff] }
 0x2ee   : > { %v3352_v54 = vpop.f32.mrb[174].mxu0  ;;  %v3840_v38 = vpop.f32.mrb[174].mxu1 }
 0x2ef   : > { %5332 = vst [vmem:[%s7001_s5 + $0x58] sm:$0xff] %v5229_v21   ;;  %v4127_v30 = vmax.f32 %v4005_v46, %v4066_v47  ;;  %v4006_v31 = vmax.f32 %v7318_v34, %v3352_v54  ;;  %v4067_v4 = vmax.f32 %v7319_v35, %v3840_v38  ;;  %v3354_v11 = vpop.f32.mrb[175].mxu0  ;;  %v3842_v2 = vpop.f32.mrb[175].mxu1  ;;  %v7328_v54 = vld [vmem:[#allocation19_spill] sm:$0xff] }
 0x2f1   : > { %v4195_v5 = vadd.f32 %v6984_v8, %v4127_v30  ;;  %v4128_v3 = vmax.f32 %v4006_v31, %v4067_v4 }
 0x2f3   : > { %v4256_v13 = vmax.f32 %v4195_v5, 0.0  ;;  %v4196_v0 = vadd.f32 %v6984_v8, %v4128_v3  ;;  %v7330_v5 = vld [vmem:[#allocation21_spill] sm:$0xff] }
 0x2f4   : > { %v3357_v27 = vpop.f32.mrb[176].mxu0  ;;  %v3845_v48 = vpop.f32.mrb[176].mxu1 }
 0x2f5   : > { %v5234_v36 = vpack.c.bf16 %v4256_v13, %v4255_v12  ;;  %v4007_v37 = vmax.f32 %v7320_v9, %v3357_v27  ;;  %v4068_v14 = vmax.f32 %v7321_v16, %v3845_v48  ;;  %v3359_v17 = vpop.f32.mrb[177].mxu0  ;;  %v3847_v56 = vpop.f32.mrb[177].mxu1  ;;  %v4257_v52 = vmax.f32 %v4196_v0, 0.0  ;;  %v7331_v12 = vld [vmem:[#allocation22_spill] sm:$0xff]  ;;  %v7333_v0 = vld [vmem:[#allocation24_spill] sm:$0xff] }
 0x2f6   : > { %v3360_v15 = vpop.f32.mrb[178].mxu0  ;;  %v3848_v49 = vpop.f32.mrb[178].mxu1 }
 0x2f7   : > { %5333 = vst [vmem:[%s7001_s5 + $0x60] sm:$0xff] %v5234_v36   ;;  %v4129_v1 = vmax.f32 %v4007_v37, %v4068_v14  ;;  %v4008_v28 = vmax.f32 %v7322_v18, %v3360_v15  ;;  %v4069_v29 = vmax.f32 %v7323_v10, %v3848_v49  ;;  %v3362_v19 = vpop.f32.mrb[179].mxu0  ;;  %v3850_v22 = vpop.f32.mrb[179].mxu1  ;;  %v7332_v15 = vld [vmem:[#allocation23_spill] sm:$0xff] }
 0x2f9   : > { %v4197_v42 = vadd.f32 %v6984_v8, %v4129_v1  ;;  %v4130_v23 = vmax.f32 %v4008_v28, %v4069_v29 }
 0x2fb   : > { %v4258_v43 = vmax.f32 %v4197_v42, 0.0  ;;  %v4198_v62 = vadd.f32 %v6984_v8, %v4130_v23  ;;  %v7334_v42 = vld [vmem:[#allocation25_spill] sm:$0xff] }
 0x2fc   : > { %v3365_v53 = vpop.f32.mrb[180].mxu0  ;;  %v3853_v39 = vpop.f32.mrb[180].mxu1 }
 0x2fd   : > { %v5239_v6 = vpack.c.bf16 %v4258_v43, %v4257_v52  ;;  %v4009_v58 = vmax.f32 %v7324_v44, %v3365_v53  ;;  %v4070_v7 = vmax.f32 %v7325_v45, %v3853_v39  ;;  %v3367_v32 = vpop.f32.mrb[181].mxu0  ;;  %v3855_v59 = vpop.f32.mrb[181].mxu1  ;;  %v4259_v46 = vmax.f32 %v4198_v62, 0.0  ;;  %v7335_v52 = vld [vmem:[#allocation26_spill] sm:$0xff]  ;;  %v7337_v62 = vld [vmem:[#allocation28_spill] sm:$0xff] }
 0x2fe   : > { %v3368_v33 = vpop.f32.mrb[182].mxu0  ;;  %v3856_v50 = vpop.f32.mrb[182].mxu1 }
 0x2ff   : > { %5334 = vst [vmem:[%s7001_s5 + $0x68] sm:$0xff] %v5239_v6   ;;  %v4131_v51 = vmax.f32 %v4009_v58, %v4070_v7  ;;  %v4010_v63 = vmax.f32 %v7326_v24, %v3368_v33  ;;  %v4071_v40 = vmax.f32 %v7327_v25, %v3856_v50  ;;  %v3370_v20 = vpop.f32.mrb[183].mxu0  ;;  %v3858_v41 = vpop.f32.mrb[183].mxu1  ;;  %v7336_v33 = vld [vmem:[#allocation27_spill] sm:$0xff] }
 0x301   : > { %v4199_v21 = vadd.f32 %v6984_v8, %v4131_v51  ;;  %v4132_v26 = vmax.f32 %v4010_v63, %v4071_v40 }
 0x303   : > { %v4260_v60 = vmax.f32 %v4199_v21, 0.0  ;;  %v4200_v11 = vadd.f32 %v6984_v8, %v4132_v26  ;;  %v7338_v21 = vld [vmem:[#allocation29_spill] sm:$0xff] }
 0x304   : > { %v3373_v47 = vpop.f32.mrb[184].mxu0  ;;  %v3861_v61 = vpop.f32.mrb[184].mxu1 }
 0x305   : > { %v5244_v57 = vpack.c.bf16 %v4260_v60, %v4259_v46  ;;  %v4011_v38 = vmax.f32 %v7328_v54, %v3373_v47  ;;  %v4072_v30 = vmax.f32 %v7329_v55, %v3861_v61  ;;  %v3375_v34 = vpop.f32.mrb[185].mxu0  ;;  %v3863_v31 = vpop.f32.mrb[185].mxu1  ;;  %v4261_v37 = vmax.f32 %v4200_v11, 0.0  ;;  %v7339_v46 = vld [vmem:[#allocation30_spill] sm:$0xff]  ;;  %v7341_v11 = vld [vmem:[#allocation32_spill] sm:$0xff] }
 0x306   : > { %v3376_v35 = vpop.f32.mrb[186].mxu0  ;;  %v3864_v4 = vpop.f32.mrb[186].mxu1 }
 0x307   : > { %5335 = vst [vmem:[%s7001_s5 + $0x70] sm:$0xff] %v5244_v57   ;;  %v4133_v2 = vmax.f32 %v4011_v38, %v4072_v30  ;;  %v4012_v3 = vmax.f32 %v7330_v5, %v3376_v35  ;;  %v4073_v13 = vmax.f32 %v7331_v12, %v3864_v4  ;;  %v3378_v27 = vpop.f32.mrb[187].mxu0  ;;  %v3866_v48 = vpop.f32.mrb[187].mxu1  ;;  %v7340_v35 = vld [vmem:[#allocation31_spill] sm:$0xff] }
 0x309   : > { %v4201_v36 = vadd.f32 %v6984_v8, %v4133_v2  ;;  %v4134_v9 = vmax.f32 %v4012_v3, %v4073_v13 }
 0x30b   : > { %v4262_v16 = vmax.f32 %v4201_v36, 0.0  ;;  %v4202_v19 = vadd.f32 %v6984_v8, %v4134_v9  ;;  %v7342_v36 = vld [vmem:[#allocation33_spill] sm:$0xff] }
 0x30c   : > { %v3381_v14 = vpop.f32.mrb[188].mxu0  ;;  %v3869_v17 = vpop.f32.mrb[188].mxu1 }
 0x30d   : > { %v5249_v56 = vpack.c.bf16 %v4262_v16, %v4261_v37  ;;  %v4013_v49 = vmax.f32 %v7332_v15, %v3381_v14  ;;  %v4074_v1 = vmax.f32 %v7333_v0, %v3869_v17  ;;  %v3383_v18 = vpop.f32.mrb[189].mxu0  ;;  %v3871_v28 = vpop.f32.mrb[189].mxu1  ;;  %v4263_v58 = vmax.f32 %v4202_v19, 0.0  ;;  %v7343_v37 = vld [vmem:[#allocation34_spill] sm:$0xff]  ;;  %v7345_v19 = vld [vmem:[#allocation36_spill] sm:$0xff] }
 0x30e   : > { %v3384_v10 = vpop.f32.mrb[190].mxu0  ;;  %v3872_v29 = vpop.f32.mrb[190].mxu1 }
 0x30f   : > { %5336 = vst [vmem:[%s7001_s5 + $0x78] sm:$0xff] %v5249_v56   ;;  %v4135_v22 = vmax.f32 %v4013_v49, %v4074_v1  ;;  %v4014_v23 = vmax.f32 %v7334_v42, %v3384_v10  ;;  %v4075_v43 = vmax.f32 %v7335_v52, %v3872_v29  ;;  %v3386_v53 = vpop.f32.mrb[191].mxu0  ;;  %v3874_v39 = vpop.f32.mrb[191].mxu1  ;;  %v7344_v10 = vld [vmem:[#allocation35_spill] sm:$0xff] }
 0x311   : > { %v4203_v6 = vadd.f32 %v6984_v8, %v4135_v22  ;;  %v4136_v44 = vmax.f32 %v4014_v23, %v4075_v43 }
 0x313   : > { %v4264_v45 = vmax.f32 %v4203_v6, 0.0  ;;  %v4204_v20 = vadd.f32 %v6984_v8, %v4136_v44  ;;  %v7346_v6 = vld [vmem:[#allocation37_spill] sm:$0xff] }
 0x314   : > { %v3389_v7 = vpop.f32.mrb[192].mxu0  ;;  %v3877_v32 = vpop.f32.mrb[192].mxu1 }
 0x315   : > { %v5254_v59 = vpack.c.bf16 %v4264_v45, %v4263_v58  ;;  %v4015_v50 = vmax.f32 %v7336_v33, %v3389_v7  ;;  %v4076_v51 = vmax.f32 %v7337_v62, %v3877_v32  ;;  %v3391_v24 = vpop.f32.mrb[193].mxu0  ;;  %v3879_v63 = vpop.f32.mrb[193].mxu1  ;;  %v4265_v38 = vmax.f32 %v4204_v20, 0.0  ;;  %v7347_v58 = vld [vmem:[#allocation38_spill] sm:$0xff]  ;;  %v7349_v20 = vld [vmem:[#allocation40_spill] sm:$0xff] }
 0x316   : > { %v3392_v25 = vpop.f32.mrb[194].mxu0  ;;  %v3880_v40 = vpop.f32.mrb[194].mxu1 }
 0x317   : > { %5337 = vst [vmem:[%s7001_s5 + $0x80] sm:$0xff] %v5254_v59   ;;  %v4137_v41 = vmax.f32 %v4015_v50, %v4076_v51  ;;  %v4016_v26 = vmax.f32 %v7338_v21, %v3392_v25  ;;  %v4077_v60 = vmax.f32 %v7339_v46, %v3880_v40  ;;  %v3394_v47 = vpop.f32.mrb[195].mxu0  ;;  %v3882_v61 = vpop.f32.mrb[195].mxu1  ;;  %v7348_v25 = vld [vmem:[#allocation39_spill] sm:$0xff] }
 0x319   : > { %v4205_v57 = vadd.f32 %v6984_v8, %v4137_v41  ;;  %v4138_v54 = vmax.f32 %v4016_v26, %v4077_v60 }
 0x31b   : > { %v4266_v55 = vmax.f32 %v4205_v57, 0.0  ;;  %v4206_v27 = vadd.f32 %v6984_v8, %v4138_v54  ;;  %v7350_v57 = vld [vmem:[#allocation41_spill] sm:$0xff] }
 0x31c   : > { %v3397_v30 = vpop.f32.mrb[196].mxu0  ;;  %v3885_v34 = vpop.f32.mrb[196].mxu1 }
 0x31d   : > { %v5259_v31 = vpack.c.bf16 %v4266_v55, %v4265_v38  ;;  %v4017_v4 = vmax.f32 %v7340_v35, %v3397_v30  ;;  %v4078_v2 = vmax.f32 %v7341_v11, %v3885_v34  ;;  %v3399_v5 = vpop.f32.mrb[197].mxu0  ;;  %v3887_v3 = vpop.f32.mrb[197].mxu1  ;;  %v4267_v49 = vmax.f32 %v4206_v27, 0.0  ;;  %v7351_v38 = vld [vmem:[#allocation42_spill] sm:$0xff]  ;;  %v7353_v27 = vld [vmem:[#allocation44_spill] sm:$0xff] }
 0x31e   : > { %v3400_v12 = vpop.f32.mrb[198].mxu0  ;;  %v3888_v13 = vpop.f32.mrb[198].mxu1 }
 0x31f   : > { %5338 = vst [vmem:[%s7001_s5 + $0x88] sm:$0xff] %v5259_v31   ;;  %v4139_v48 = vmax.f32 %v4017_v4, %v4078_v2  ;;  %v4018_v9 = vmax.f32 %v7342_v36, %v3400_v12  ;;  %v4079_v16 = vmax.f32 %v7343_v37, %v3888_v13  ;;  %v3402_v14 = vpop.f32.mrb[199].mxu0  ;;  %v3890_v17 = vpop.f32.mrb[199].mxu1  ;;  %v7352_v12 = vld [vmem:[#allocation43_spill] sm:$0xff] }
 0x321   : > { %v4207_v56 = vadd.f32 %v6984_v8, %v4139_v48  ;;  %v4140_v15 = vmax.f32 %v4018_v9, %v4079_v16 }
 0x323   : > { %v4268_v0 = vmax.f32 %v4207_v56, 0.0  ;;  %v4208_v53 = vadd.f32 %v6984_v8, %v4140_v15  ;;  %v7354_v56 = vld [vmem:[#allocation45_spill] sm:$0xff] }
 0x324   : > { %v3405_v1 = vpop.f32.mrb[200].mxu0  ;;  %v3893_v18 = vpop.f32.mrb[200].mxu1 }
 0x325   : > { %v5264_v28 = vpack.c.bf16 %v4268_v0, %v4267_v49  ;;  %v4019_v29 = vmax.f32 %v7344_v10, %v3405_v1  ;;  %v4080_v22 = vmax.f32 %v7345_v19, %v3893_v18  ;;  %v3407_v42 = vpop.f32.mrb[201].mxu0  ;;  %v3895_v23 = vpop.f32.mrb[201].mxu1  ;;  %v4269_v50 = vmax.f32 %v4208_v53, 0.0  ;;  %v7355_v49 = vld [vmem:[#allocation46_spill] sm:$0xff]  ;;  %v7357_v53 = vld [vmem:[#allocation48_spill] sm:$0xff] }
 0x326   : > { %v3408_v52 = vpop.f32.mrb[202].mxu0  ;;  %v3896_v43 = vpop.f32.mrb[202].mxu1 }
 0x327   : > { %5339 = vst [vmem:[%s7001_s5 + $0x90] sm:$0xff] %v5264_v28   ;;  %v4141_v39 = vmax.f32 %v4019_v29, %v4080_v22  ;;  %v4020_v44 = vmax.f32 %v7346_v6, %v3408_v52  ;;  %v4081_v45 = vmax.f32 %v7347_v58, %v3896_v43  ;;  %v3410_v7 = vpop.f32.mrb[203].mxu0  ;;  %v3898_v32 = vpop.f32.mrb[203].mxu1  ;;  %v7356_v52 = vld [vmem:[#allocation47_spill] sm:$0xff] }
 0x329   : > { %v4209_v59 = vadd.f32 %v6984_v8, %v4141_v39  ;;  %v4142_v33 = vmax.f32 %v4020_v44, %v4081_v45 }
 0x32b   : > { %v4270_v62 = vmax.f32 %v4209_v59, 0.0  ;;  %v4210_v47 = vadd.f32 %v6984_v8, %v4142_v33  ;;  %v7358_v59 = vld [vmem:[#allocation49_spill] sm:$0xff] }
 0x32c   : > { %v3413_v51 = vpop.f32.mrb[204].mxu0  ;;  %v3901_v24 = vpop.f32.mrb[204].mxu1 }
 0x32d   : > { %v5269_v63 = vpack.c.bf16 %v4270_v62, %v4269_v50  ;;  %v4021_v40 = vmax.f32 %v7348_v25, %v3413_v51  ;;  %v4082_v41 = vmax.f32 %v7349_v20, %v3901_v24  ;;  %v3415_v21 = vpop.f32.mrb[205].mxu0  ;;  %v3903_v26 = vpop.f32.mrb[205].mxu1  ;;  %v4271_v4 = vmax.f32 %v4210_v47, 0.0  ;;  %v7359_v50 = vld [vmem:[#allocation50_spill] sm:$0xff]  ;;  %v7361_v47 = vld [vmem:[#allocation52_spill] sm:$0xff] }
 0x32e   : > { %v3416_v46 = vpop.f32.mrb[206].mxu0  ;;  %v3904_v60 = vpop.f32.mrb[206].mxu1 }
 0x32f   : > { %5340 = vst [vmem:[%s7001_s5 + $0x98] sm:$0xff] %v5269_v63   ;;  %v4143_v61 = vmax.f32 %v4021_v40, %v4082_v41  ;;  %v4022_v54 = vmax.f32 %v7350_v57, %v3416_v46  ;;  %v4083_v55 = vmax.f32 %v7351_v38, %v3904_v60  ;;  %v3418_v30 = vpop.f32.mrb[207].mxu0  ;;  %v3906_v34 = vpop.f32.mrb[207].mxu1  ;;  %v7360_v46 = vld [vmem:[#allocation51_spill] sm:$0xff] }
 0x331   : > { %v4211_v31 = vadd.f32 %v6984_v8, %v4143_v61  ;;  %v4144_v35 = vmax.f32 %v4022_v54, %v4083_v55 }
 0x333   : > { %v4272_v11 = vmax.f32 %v4211_v31, 0.0  ;;  %v4212_v14 = vadd.f32 %v6984_v8, %v4144_v35  ;;  %v7362_v31 = vld [vmem:[#allocation53_spill] sm:$0xff] }
 0x334   : > { %v3421_v2 = vpop.f32.mrb[208].mxu0  ;;  %v3909_v5 = vpop.f32.mrb[208].mxu1 }
 0x335   : > { %v5274_v3 = vpack.c.bf16 %v4272_v11, %v4271_v4  ;;  %v4023_v13 = vmax.f32 %v7352_v12, %v3421_v2  ;;  %v4084_v48 = vmax.f32 %v7353_v27, %v3909_v5  ;;  %v3423_v36 = vpop.f32.mrb[209].mxu0  ;;  %v3911_v9 = vpop.f32.mrb[209].mxu1  ;;  %v4273_v29 = vmax.f32 %v4212_v14, 0.0  ;;  %v7363_v4 = vld [vmem:[#allocation54_spill] sm:$0xff]  ;;  %v7365_v14 = vld [vmem:[#allocation56_spill] sm:$0xff] }
 0x336   : > { %v3424_v37 = vpop.f32.mrb[210].mxu0  ;;  %v3912_v16 = vpop.f32.mrb[210].mxu1 }
 0x337   : > { %5341 = vst [vmem:[%s7001_s5 + $0xa0] sm:$0xff] %v5274_v3   ;;  %v4145_v17 = vmax.f32 %v4023_v13, %v4084_v48  ;;  %v4024_v15 = vmax.f32 %v7354_v56, %v3424_v37  ;;  %v4085_v0 = vmax.f32 %v7355_v49, %v3912_v16  ;;  %v3426_v1 = vpop.f32.mrb[211].mxu0  ;;  %v3914_v18 = vpop.f32.mrb[211].mxu1  ;;  %v7364_v37 = vld [vmem:[#allocation55_spill] sm:$0xff] }
 0x338   : > { %v7178_v1 = vld [vmem:[%s7234_s2] ss:$0 sm:$0xff] }
 0x339   : > { %v4213_v28 = vadd.f32 %v6984_v8, %v4145_v17  ;;  %v4146_v10 = vmax.f32 %v4024_v15, %v4085_v0 }
 0x33b   : > { %v4274_v19 = vmax.f32 %v4213_v28, 0.0  ;;  %v4214_v7 = vadd.f32 %v6984_v8, %v4146_v10  ;;  %v7366_v28 = vld [vmem:[#allocation57_spill] sm:$0xff] }
 0x33c   : > { %v3429_v22 = vpop.f32.mrb[212].mxu0  ;;  %v3917_v42 = vpop.f32.mrb[212].mxu1 }
 0x33d   : > { %v5279_v23 = vpack.c.bf16 %v4274_v19, %v4273_v29  ;;  %v4025_v43 = vmax.f32 %v7356_v52, %v3429_v22  ;;  %v4086_v39 = vmax.f32 %v7357_v53, %v3917_v42  ;;  %v3431_v6 = vpop.f32.mrb[213].mxu0  ;;  %v3919_v44 = vpop.f32.mrb[213].mxu1  ;;  %v4275_v40 = vmax.f32 %v4214_v7, 0.0  ;;  %v7367_v29 = vld [vmem:[#allocation58_spill] sm:$0xff]  ;;  %v7369_v7 = vld [vmem:[#allocation60_spill] sm:$0xff] }
 0x33e   : > { %v3432_v58 = vpop.f32.mrb[214].mxu0  ;;  %v3920_v45 = vpop.f32.mrb[214].mxu1 }
 0x33f   : > { %5342 = vst [vmem:[%s7001_s5 + $0xa8] sm:$0xff] %v5279_v23   ;;  %v4147_v32 = vmax.f32 %v4025_v43, %v4086_v39  ;;  %v4026_v33 = vmax.f32 %v7358_v59, %v3432_v58  ;;  %v4087_v62 = vmax.f32 %v7359_v50, %v3920_v45  ;;  %v3434_v51 = vpop.f32.mrb[215].mxu0  ;;  %v3922_v24 = vpop.f32.mrb[215].mxu1  ;;  %v7368_v58 = vld [vmem:[#allocation59_spill] sm:$0xff] }
 0x341   : > { %v4215_v63 = vadd.f32 %v6984_v8, %v4147_v32  ;;  %v4148_v25 = vmax.f32 %v4026_v33, %v4087_v62 }
 0x343   : > { %v4276_v20 = vmax.f32 %v4215_v63, 0.0  ;;  %v4216_v30 = vadd.f32 %v6984_v8, %v4148_v25  ;;  %v7370_v63 = vld [vmem:[#allocation61_spill] sm:$0xff] }
 0x344   : > { %v3437_v41 = vpop.f32.mrb[216].mxu0  ;;  %v3925_v21 = vpop.f32.mrb[216].mxu1 }
 0x345   : > { %v5284_v26 = vpack.c.bf16 %v4276_v20, %v4275_v40  ;;  %v4027_v60 = vmax.f32 %v7360_v46, %v3437_v41  ;;  %v4088_v61 = vmax.f32 %v7361_v47, %v3925_v21  ;;  %v3439_v57 = vpop.f32.mrb[217].mxu0  ;;  %v3927_v54 = vpop.f32.mrb[217].mxu1  ;;  %v4277_v13 = vmax.f32 %v4216_v30, 0.0  ;;  %v7371_v40 = vld [vmem:[#allocation62_spill] sm:$0xff]  ;;  %v7373_v30 = vld [vmem:[#allocation64_spill] sm:$0xff] }
 0x346   : > { %v3440_v38 = vpop.f32.mrb[218].mxu0  ;;  %v3928_v55 = vpop.f32.mrb[218].mxu1 }
 0x347   : > { %5343 = vst [vmem:[%s7001_s5 + $0xb0] sm:$0xff] %v5284_v26   ;;  %v4149_v34 = vmax.f32 %v4027_v60, %v4088_v61  ;;  %v4028_v35 = vmax.f32 %v7362_v31, %v3440_v38  ;;  %v4089_v11 = vmax.f32 %v7363_v4, %v3928_v55  ;;  %v3442_v2 = vpop.f32.mrb[219].mxu0  ;;  %v3930_v5 = vpop.f32.mrb[219].mxu1  ;;  %v7372_v38 = vld [vmem:[#allocation63_spill] sm:$0xff] }
 0x349   : > { %v4217_v3 = vadd.f32 %v6984_v8, %v4149_v34  ;;  %v4150_v12 = vmax.f32 %v4028_v35, %v4089_v11 }
 0x34b   : > { %v4278_v27 = vmax.f32 %v4217_v3, 0.0  ;;  %v4218_v8 = vadd.f32 %v7178_v1, %v4150_v12  ;;  %v7374_v3 = vld [vmem:[#allocation65_spill] sm:$0xff] }
 0x34c   : > { %v3445_v48 = vpop.f32.mrb[220].mxu0  ;;  %v3933_v36 = vpop.f32.mrb[220].mxu1 }
 0x34d   : > { %v5289_v9 = vpack.c.bf16 %v4278_v27, %v4277_v13  ;;  %v4029_v16 = vmax.f32 %v7364_v37, %v3445_v48  ;;  %v4090_v17 = vmax.f32 %v7365_v14, %v3933_v36  ;;  %v3447_v56 = vpop.f32.mrb[221].mxu0  ;;  %v3935_v15 = vpop.f32.mrb[221].mxu1  ;;  %v4279_v43 = vmax.f32 %v4218_v8, 0.0  ;;  %v7375_v13 = vld [vmem:[#allocation66_spill] sm:$0xff]  ;;  %v7377_v8 = vld [vmem:[#allocation68_spill] sm:$0xff] }
 0x34e   : > { %v3448_v49 = vpop.f32.mrb[222].mxu0  ;;  %v3936_v0 = vpop.f32.mrb[222].mxu1 }
 0x34f   : > { %5344 = vst [vmem:[%s7001_s5 + $0xb8] sm:$0xff] %v5289_v9   ;;  %v4151_v18 = vmax.f32 %v4029_v16, %v4090_v17  ;;  %v4030_v10 = vmax.f32 %v7366_v28, %v3448_v49  ;;  %v4091_v19 = vmax.f32 %v7367_v29, %v3936_v0  ;;  %v3450_v22 = vpop.f32.mrb[223].mxu0  ;;  %v3938_v42 = vpop.f32.mrb[223].mxu1  ;;  %v7376_v49 = vld [vmem:[#allocation67_spill] sm:$0xff] }
 0x351   : > { %v4219_v23 = vadd.f32 %v7178_v1, %v4151_v18  ;;  %v4152_v52 = vmax.f32 %v4030_v10, %v4091_v19 }
 0x353   : > { %v4280_v53 = vmax.f32 %v4219_v23, 0.0  ;;  %v4220_v51 = vadd.f32 %v7178_v1, %v4152_v52  ;;  %v7378_v23 = vld [vmem:[#allocation69_spill] sm:$0xff] }
 0x354   : > { %v3453_v39 = vpop.f32.mrb[224].mxu0  ;;  %v3941_v6 = vpop.f32.mrb[224].mxu1 }
 0x355   : > { %v5294_v44 = vpack.c.bf16 %v4280_v53, %v4279_v43  ;;  %v4031_v45 = vmax.f32 %v7368_v58, %v3453_v39  ;;  %v4092_v32 = vmax.f32 %v7369_v7, %v3941_v6  ;;  %v3455_v59 = vpop.f32.mrb[225].mxu0  ;;  %v3943_v33 = vpop.f32.mrb[225].mxu1  ;;  %v4281_v60 = vmax.f32 %v4220_v51, 0.0  ;;  %v7379_v43 = vld [vmem:[#allocation70_spill] sm:$0xff]  ;;  %v7381_v51 = vld [vmem:[#allocation72_spill] sm:$0xff] }
 0x356   : > { %v3456_v50 = vpop.f32.mrb[226].mxu0  ;;  %v3944_v62 = vpop.f32.mrb[226].mxu1 }
 0x357   : > { %5345 = vst [vmem:[%s7001_s5 + $0xc0] sm:$0xff] %v5294_v44   ;;  %v4153_v24 = vmax.f32 %v4031_v45, %v4092_v32  ;;  %v4032_v25 = vmax.f32 %v7370_v63, %v3456_v50  ;;  %v4093_v20 = vmax.f32 %v7371_v40, %v3944_v62  ;;  %v3458_v41 = vpop.f32.mrb[227].mxu0  ;;  %v3946_v21 = vpop.f32.mrb[227].mxu1  ;;  %v7380_v50 = vld [vmem:[#allocation71_spill] sm:$0xff] }
 0x359   : > { %v4221_v26 = vadd.f32 %v7178_v1, %v4153_v24  ;;  %v4154_v46 = vmax.f32 %v4032_v25, %v4093_v20 }
 0x35b   : > { %v4282_v47 = vmax.f32 %v4221_v26, 0.0  ;;  %v4222_v2 = vadd.f32 %v7178_v1, %v4154_v46  ;;  %v7382_v26 = vld [vmem:[#allocation73_spill] sm:$0xff] }
 0x35c   : > { %v3461_v61 = vpop.f32.mrb[228].mxu0  ;;  %v3949_v57 = vpop.f32.mrb[228].mxu1 }
 0x35d   : > { %v5299_v54 = vpack.c.bf16 %v4282_v47, %v4281_v60  ;;  %v4033_v55 = vmax.f32 %v7372_v38, %v3461_v61  ;;  %v4094_v34 = vmax.f32 %v7373_v30, %v3949_v57  ;;  %v3463_v31 = vpop.f32.mrb[229].mxu0  ;;  %v3951_v35 = vpop.f32.mrb[229].mxu1  ;;  %v4283_v16 = vmax.f32 %v4222_v2, 0.0  ;;  %v7383_v60 = vld [vmem:[#allocation74_spill] sm:$0xff]  ;;  %v7385_v2 = vld [vmem:[#allocation76_spill] sm:$0xff] }
 0x35e   : > { %v3464_v4 = vpop.f32.mrb[230].mxu0  ;;  %v3952_v11 = vpop.f32.mrb[230].mxu1 }
 0x35f   : > { %5346 = vst [vmem:[%s7001_s5 + $0xc8] sm:$0xff] %v5299_v54   ;;  %v4155_v5 = vmax.f32 %v4033_v55, %v4094_v34  ;;  %v4034_v12 = vmax.f32 %v7374_v3, %v3464_v4  ;;  %v4095_v27 = vmax.f32 %v7375_v13, %v3952_v11  ;;  %v3466_v48 = vpop.f32.mrb[231].mxu0  ;;  %v3954_v36 = vpop.f32.mrb[231].mxu1  ;;  %v7384_v4 = vld [vmem:[#allocation75_spill] sm:$0xff] }
 0x361   : > { %v4223_v9 = vadd.f32 %v7178_v1, %v4155_v5  ;;  %v4156_v37 = vmax.f32 %v4034_v12, %v4095_v27 }
 0x363   : > { %v4284_v14 = vmax.f32 %v4223_v9, 0.0  ;;  %v4224_v22 = vadd.f32 %v7178_v1, %v4156_v37  ;;  %v7386_v9 = vld [vmem:[#allocation77_spill] sm:$0xff] }
 0x364   : > { %v3469_v17 = vpop.f32.mrb[232].mxu0  ;;  %v3957_v56 = vpop.f32.mrb[232].mxu1 }
 0x365   : > { %v5304_v15 = vpack.c.bf16 %v4284_v14, %v4283_v16  ;;  %v4035_v0 = vmax.f32 %v7376_v49, %v3469_v17  ;;  %v4096_v18 = vmax.f32 %v7377_v8, %v3957_v56  ;;  %v3471_v28 = vpop.f32.mrb[233].mxu0  ;;  %v3959_v10 = vpop.f32.mrb[233].mxu1  ;;  %v4285_v45 = vmax.f32 %v4224_v22, 0.0  ;;  %v7387_v16 = vld [vmem:[#allocation78_spill] sm:$0xff] }
 0x366   : > { %v3472_v29 = vpop.f32.mrb[234].mxu0  ;;  %v3960_v19 = vpop.f32.mrb[234].mxu1 }
 0x367   : > { %5347 = vst [vmem:[%s7001_s5 + $0xd0] sm:$0xff] %v5304_v15   ;;  %v4157_v42 = vmax.f32 %v4035_v0, %v4096_v18  ;;  %v4036_v52 = vmax.f32 %v7378_v23, %v3472_v29  ;;  %v4097_v53 = vmax.f32 %v7379_v43, %v3960_v19  ;;  %v3474_v39 = vpop.f32.mrb[235].mxu0  ;;  %v3962_v6 = vpop.f32.mrb[235].mxu1 }
 0x369   : > { %v4225_v44 = vadd.f32 %v7178_v1, %v4157_v42  ;;  %v4158_v58 = vmax.f32 %v4036_v52, %v4097_v53 }
 0x36b   : > { %v4286_v7 = vmax.f32 %v4225_v44, 0.0  ;;  %v4226_v41 = vadd.f32 %v7178_v1, %v4158_v58 }
 0x36c   : > { %v3477_v32 = vpop.f32.mrb[236].mxu0  ;;  %v3965_v59 = vpop.f32.mrb[236].mxu1 }
 0x36d   : > { %v5309_v33 = vpack.c.bf16 %v4286_v7, %v4285_v45  ;;  %v4037_v62 = vmax.f32 %v7380_v50, %v3477_v32  ;;  %v4098_v24 = vmax.f32 %v7381_v51, %v3965_v59  ;;  %v3479_v63 = vpop.f32.mrb[237].mxu0  ;;  %v3967_v25 = vpop.f32.mrb[237].mxu1  ;;  %v4287_v55 = vmax.f32 %v4226_v41, 0.0 }
 0x36e   : > { %v3480_v40 = vpop.f32.mrb[238].mxu0  ;;  %v3968_v20 = vpop.f32.mrb[238].mxu1 }
 0x36f   : > { %5348 = vst [vmem:[%s7001_s5 + $0xd8] sm:$0xff] %v5309_v33   ;;  %v4159_v21 = vmax.f32 %v4037_v62, %v4098_v24  ;;  %v4038_v46 = vmax.f32 %v7382_v26, %v3480_v40  ;;  %v4099_v47 = vmax.f32 %v7383_v60, %v3968_v20  ;;  %v3482_v61 = vpop.f32.mrb[239].mxu0  ;;  %v3970_v57 = vpop.f32.mrb[239].mxu1 }
 0x371   : > { %v4227_v54 = vadd.f32 %v7178_v1, %v4159_v21  ;;  %v4160_v38 = vmax.f32 %v4038_v46, %v4099_v47 }
 0x373   : > { %v4288_v30 = vmax.f32 %v4227_v54, 0.0  ;;  %v4228_v48 = vadd.f32 %v7178_v1, %v4160_v38 }
 0x374   : > { %v3485_v34 = vpop.f32.mrb[240].mxu0  ;;  %v3973_v31 = vpop.f32.mrb[240].mxu1 }
 0x375   : > { %v5314_v35 = vpack.c.bf16 %v4288_v30, %v4287_v55  ;;  %v4039_v11 = vmax.f32 %v7384_v4, %v3485_v34  ;;  %v4100_v5 = vmax.f32 %v7385_v2, %v3973_v31  ;;  %v3487_v3 = vpop.f32.mrb[241].mxu0  ;;  %v3975_v12 = vpop.f32.mrb[241].mxu1  ;;  %v4289_v0 = vmax.f32 %v4228_v48, 0.0 }
 0x376   : > { %v3488_v13 = vpop.f32.mrb[242].mxu0  ;;  %v3976_v27 = vpop.f32.mrb[242].mxu1 }
 0x377   : > { %5349 = vst [vmem:[%s7001_s5 + $0xe0] sm:$0xff] %v5314_v35   ;;  %v4161_v36 = vmax.f32 %v4039_v11, %v4100_v5  ;;  %v4040_v37 = vmax.f32 %v7386_v9, %v3488_v13  ;;  %v4101_v14 = vmax.f32 %v7387_v16, %v3976_v27  ;;  %v3490_v17 = vpop.f32.mrb[243].mxu0  ;;  %v3978_v56 = vpop.f32.mrb[243].mxu1 }
 0x379   : > { %v4229_v15 = vadd.f32 %v7178_v1, %v4161_v36  ;;  %v4162_v49 = vmax.f32 %v4040_v37, %v4101_v14 }
 0x37b   : > { %v4290_v8 = vmax.f32 %v4229_v15, 0.0  ;;  %v4230_v18 = vadd.f32 %v7178_v1, %v4162_v49 }
 0x37d   : > { %v5319_v28 = vpack.c.bf16 %v4290_v8, %v4289_v0  ;;  %v4291_v10 = vmax.f32 %v4230_v18, 0.0 }
 0x37f   : > { %5350 = vst [vmem:[%s7001_s5 + $0xe8] sm:$0xff] %v5319_v28   ;;  %v5170_v29 = vpack.c.bf16 %v4291_v10, %v4291_v10 }
 0x381   : > { %4597 = vst [vmem:[%s7001_s5 + $0xf0] sm:$0xf] %v5170_v29 }
 0x382 PF: > { %p10_p9 = scmp.ge.s32.totalorder %s5837_s16, 4   ;;  %s7388_s12 = smov %s5793_s13 }
 0x383   : > { %s7389_s13 = smov %s5846_s19  ;;  %s7390_s14 = smov %s5837_s16 }
 0x384   :  { %12 = sbr.rel (!%p10_p9) target bundleno = 2 (0x2), region = 105 }

// kernel: seedling_forward.5
= control target key start
LH: loop header
LB: loop body
LE: loop exit
PB: predicated region body
PF: predicated region fallthrough
CT: control target
= control target key end

     0   :  { %s1706_s24 = smov 0   ;;  %s1925_s0 = inlined_call_operand.vmem [shape: bf16[8,8192], index: 0, kind: input, shape index: {}]   ;;  %s1926_s1 = inlined_call_operand.vmem [shape: bf16[8192,128], index: 1, kind: input, shape index: {}]   ;;  %s1927_s2 = inlined_call_operand.vmem [shape: f32[1,128], index: 2, kind: input, shape index: {}]   ;;  %s1928_s3 = inlined_call_operand.vmem [shape: f32[128,128], index: 3, kind: input, shape index: {}]   ;;  %s1929_s4 = inlined_call_operand.vmem [shape: f32[1,128], index: 4, kind: input, shape index: {}]   ;;  %s1930_s5 = inlined_call_operand.vmem [shape: f32[128,128], index: 5, kind: input, shape index: {}]   ;;  %s1931_s6 = inlined_call_operand.vmem [shape: f32[1,128], index: 6, kind: input, shape index: {}]   ;;  %s1932_s7 = inlined_call_operand.vmem [shape: f32[8,128], index: 7, kind: output, shape index: {}]  }
   0x1 LB: > { %s1712_s25 = sadd.s32 4294967295, %s1660_s24   ;;  %p1246_p0 = scmp.ge.s32.totalorder %s1660_s24, 1  ;;  %s1660_s24 = sphi %s1706_s24, %s17_s24  }
   0x2   : > { %p244_p1 = scmp.lt.s32.totalorder %s1660_s24, 9 }
   0x4   : > { %p245_p2 = pnand %p1246_p0, %p244_p1 }
   0x5   : > { %s1247_s26 = sshll.u32 (!%p245_p2), %s1712_s25, 3  ;;  %s1249_s27 = sshll.u32 (!%p245_p2), %s1712_s25, 7 }
   0x6   : > { %248 = sbr.rel (%p245_p2) target bundleno = 753 (0x2f1), region = 48  ;;  %p277_p3 = scmp.lt.s32.totalorder (!%p245_p2), %s1247_s26, 63 }
   0x7   : > { %p283_p4 = scmp.lt.s32.totalorder (!%p245_p2), %s1249_s27, 1023  ;;  %p1251_p5 = scmp.ne.s32.totalorder (!%p245_p2), %s1712_s25, 0 }
   0xd   : > { %s1934_s26 = smov (!%p277_p3, %s1247_s26), 63  ;;  %s1936_s27 = smov (!%p283_p4, %s1249_s27), 1023 }
   0xe   : > { %s1248_s28 = sshll.u32 %s1934_s26, 2  ;;  %s1250_s9 = sshll.u32 %s1936_s27, 2  ;;  %v1662_v0 = vmov (!%p1251_p5), 0.0  }
   0xf   : > { %s1721_s8 = scalar_lea.vmem %s1925_s0, %s1248_s28  ;;  %s1726_s12 = scalar_lea.vmem %s1926_s1, %s1250_s9  ;;  %293 = vst [vmem:[#allocation2] sm:$0xff] (!%p1251_p5), %v1662_v0 }
  0x10   : > { %292 = sbr.rel (%p1251_p5) target bundleno = 23 (0x17), region = 52 }
  0x17 PF: > { %v1582_v1 = vld [vmem:[%s1726_s12 + $0x40] sm:$0xff]   ;;  %v1586_v5 = vld [vmem:[%s1726_s12 + $0x48] sm:$0xff]   ;;  %v1590_v9 = vld [vmem:[%s1726_s12 + $0x50] sm:$0xff]   ;;  %p1324_p6 = scmp.ne.s32.totalorder %s1712_s25, 7 }
  0x18   : > { %v1583_v2 = vld [vmem:[%s1726_s12 + $0xc0] sm:$0xff]   ;;  %1330 = vmatprep.subr.bf16.mxu0 %v1582_v1  ;;  %v1587_v6 = vld [vmem:[%s1726_s12 + $0xc8] sm:$0xff]   ;;  %v1591_v10 = vld [vmem:[%s1726_s12 + $0xd0] sm:$0xff]   ;;  %vm1664_vm0 = vmmov (!%p1324_p6), 0  }
  0x19   : > { %v1584_v3 = vld [vmem:[%s1726_s12] sm:$0xff]   ;;  %1352 = vmatprep.subr.bf16.mxu1 %v1583_v2  ;;  %v1588_v7 = vld [vmem:[%s1726_s12 + $0x8] sm:$0xff]   ;;  %v1592_v11 = vld [vmem:[%s1726_s12 + $0x10] sm:$0xff]  }
  0x1a   : > { %v1585_v4 = vld [vmem:[%s1726_s12 + $0x80] sm:$0xff]   ;;  %1331 = vmatpush3.bf16.msra.mxu0 %v1584_v3  ;;  %v1589_v8 = vld [vmem:[%s1726_s12 + $0x88] sm:$0xff]   ;;  %v1593_v12 = vld [vmem:[%s1726_s12 + $0x90] sm:$0xff]  }
  0x1b   : > { %1353 = vmatpush3.bf16.msra.mxu1 %v1585_v4  ;;  %1332 = vmatprep.subr.bf16.mxu0 %v1586_v5  ;;  %v1594_v13 = vld [vmem:[%s1726_s12 + $0x58] sm:$0xff]   ;;  %v1598_v17 = vld [vmem:[%s1726_s12 + $0x60] sm:$0xff]   ;;  %v1602_v21 = vld [vmem:[%s1726_s12 + $0x68] sm:$0xff]  }
  0x1c   : > { %1354 = vmatprep.subr.bf16.mxu1 %v1587_v6  ;;  %v1595_v14 = vld [vmem:[%s1726_s12 + $0xd8] sm:$0xff]   ;;  %v1599_v18 = vld [vmem:[%s1726_s12 + $0xe0] sm:$0xff]   ;;  %v1603_v22 = vld [vmem:[%s1726_s12 + $0xe8] sm:$0xff]  }
  0x1d   : > { %v1596_v15 = vld [vmem:[%s1726_s12 + $0x18] sm:$0xff]   ;;  %v1600_v19 = vld [vmem:[%s1726_s12 + $0x20] sm:$0xff]   ;;  %v1604_v23 = vld [vmem:[%s1726_s12 + $0x28] sm:$0xff]  }
  0x1e   : > { %1333 = vmatpush3.bf16.msra.mxu0 %v1588_v7  ;;  %v1597_v16 = vld [vmem:[%s1726_s12 + $0x98] sm:$0xff]   ;;  %v1601_v20 = vld [vmem:[%s1726_s12 + $0xa0] sm:$0xff]   ;;  %v1605_v24 = vld [vmem:[%s1726_s12 + $0xa8] sm:$0xff]  }
  0x1f   : > { %1355 = vmatpush3.bf16.msra.mxu1 %v1589_v8  ;;  %1334 = vmatprep.subr.bf16.mxu0 %v1590_v9  ;;  %v1606_v25 = vld [vmem:[%s1726_s12 + $0x70] sm:$0xff]   ;;  %v1610_v29 = vld [vmem:[%s1726_s12 + $0x78] sm:$0xff]   ;;  %v295_v33 = vld [vmem:[%s1721_s8] sm:$0xff] }
  0x20   : > { %1356 = vmatprep.subr.bf16.mxu1 %v1591_v10  ;;  %v1607_v26 = vld [vmem:[%s1726_s12 + $0xf0] sm:$0xff]   ;;  %v1611_v30 = vld [vmem:[%s1726_s12 + $0xf8] sm:$0xff]   ;;  %v296_v34 = vld [vmem:[%s1721_s8 + $0x8] sm:$0xff]  ;;  %v1252_v35 = vcombine.low %v295_v33, %v295_v33  ;;  %v1253_v36 = vcombine.high %v295_v33, %v295_v33 }
  0x21   : > { %v1608_v27 = vld [vmem:[%s1726_s12 + $0x30] sm:$0xff]   ;;  %v1612_v31 = vld [vmem:[%s1726_s12 + $0x38] sm:$0xff]   ;;  %v1254_v37 = vcombine.low %v296_v34, %v296_v34  ;;  %v1255_v38 = vcombine.high %v296_v34, %v296_v34  ;;  %v1618_v39 = vld [vmem:[%s1726_s12 + $0x140] sm:$0xff]  }
  0x22   : > { %1335 = vmatpush3.bf16.msra.mxu0 %v1592_v11  ;;  %v1609_v28 = vld [vmem:[%s1726_s12 + $0xb0] sm:$0xff]   ;;  %v1613_v32 = vld [vmem:[%s1726_s12 + $0xb8] sm:$0xff]   ;;  %v1619_v40 = vld [vmem:[%s1726_s12 + $0x1c0] sm:$0xff]   ;;  %871 = vmatprep.mubr.bf16.mxu0 %v1253_v36 }
  0x23   : > { %1357 = vmatpush3.bf16.msra.mxu1 %v1593_v12  ;;  %1336 = vmatprep.subr.bf16.mxu0 %v1594_v13  ;;  %v1620_v41 = vld [vmem:[%s1726_s12 + $0x100] sm:$0xff]   ;;  %v1622_v43 = vld [vmem:[%s1726_s12 + $0x148] sm:$0xff]   ;;  %v1626_v47 = vld [vmem:[%s1726_s12 + $0x150] sm:$0xff]  }
  0x24   : > { %1358 = vmatprep.subr.bf16.mxu1 %v1595_v14  ;;  %911 = vmatprep.mubr.bf16.mxu1 %v1255_v38  ;;  %v1621_v42 = vld [vmem:[%s1726_s12 + $0x180] sm:$0xff]   ;;  %v1623_v44 = vld [vmem:[%s1726_s12 + $0x1c8] sm:$0xff]   ;;  %v1627_v48 = vld [vmem:[%s1726_s12 + $0x1d0] sm:$0xff]  }
  0x25   : > { %v1624_v45 = vld [vmem:[%s1726_s12 + $0x108] sm:$0xff]   ;;  %v1628_v49 = vld [vmem:[%s1726_s12 + $0x110] sm:$0xff]   ;;  %v1630_v51 = vld [vmem:[%s1726_s12 + $0x158] sm:$0xff]  }
  0x26   : > { %1337 = vmatpush3.bf16.msra.mxu0 %v1596_v15  ;;  %v1625_v46 = vld [vmem:[%s1726_s12 + $0x188] sm:$0xff]   ;;  %v1629_v50 = vld [vmem:[%s1726_s12 + $0x190] sm:$0xff]   ;;  %v1631_v52 = vld [vmem:[%s1726_s12 + $0x1d8] sm:$0xff]  }
  0x27   : > { %1359 = vmatpush3.bf16.msra.mxu1 %v1597_v16  ;;  %1338 = vmatprep.subr.bf16.mxu0 %v1598_v17  ;;  %v1632_v53 = vld [vmem:[%s1726_s12 + $0x118] sm:$0xff]   ;;  %v1634_v55 = vld [vmem:[%s1726_s12 + $0x160] sm:$0xff]   ;;  %v1638_v59 = vld [vmem:[%s1726_s12 + $0x168] sm:$0xff]  }
  0x28   : > { %1360 = vmatprep.subr.bf16.mxu1 %v1599_v18  ;;  %v1633_v54 = vld [vmem:[%s1726_s12 + $0x198] sm:$0xff]   ;;  %v1635_v56 = vld [vmem:[%s1726_s12 + $0x1e0] sm:$0xff]   ;;  %v1639_v60 = vld [vmem:[%s1726_s12 + $0x1e8] sm:$0xff]  }
  0x29   : > { %v1636_v57 = vld [vmem:[%s1726_s12 + $0x120] sm:$0xff]   ;;  %v1640_v61 = vld [vmem:[%s1726_s12 + $0x128] sm:$0xff]   ;;  %v1642_v63 = vld [vmem:[%s1726_s12 + $0x170] sm:$0xff]  }
  0x2a   : > { %1339 = vmatpush3.bf16.msra.mxu0 %v1600_v19  ;;  %v1637_v58 = vld [vmem:[%s1726_s12 + $0x1a0] sm:$0xff]   ;;  %v1641_v62 = vld [vmem:[%s1726_s12 + $0x1a8] sm:$0xff]   ;;  %v1643_v0 = vld [vmem:[%s1726_s12 + $0x1f0] sm:$0xff]  }
  0x2b   : > { %1361 = vmatpush3.bf16.msra.mxu1 %v1601_v20  ;;  %1340 = vmatprep.subr.bf16.mxu0 %v1602_v21  ;;  %v1644_v1 = vld [vmem:[%s1726_s12 + $0x130] sm:$0xff]   ;;  %v1646_v3 = vld [vmem:[%s1726_s12 + $0x178] sm:$0xff]   ;;  %v1015_v38 = vld [vmem:[%s1928_s3] sm:$0xff] (!%p1324_p6) }
  0x2c   : > { %1362 = vmatprep.subr.bf16.mxu1 %v1603_v22  ;;  %v1645_v2 = vld [vmem:[%s1726_s12 + $0x1b0] sm:$0xff]   ;;  %v1647_v4 = vld [vmem:[%s1726_s12 + $0x1f8] sm:$0xff]  }
  0x2d   : > { %v1648_v5 = vld [vmem:[%s1726_s12 + $0x138] sm:$0xff]   ;;  %v297_v7 = vld [vmem:[%s1721_s8 + $0x10] sm:$0xff] }
  0x2e   : > { %1341 = vmatpush3.bf16.msra.mxu0 %v1604_v23  ;;  %v1649_v6 = vld [vmem:[%s1726_s12 + $0x1b8] sm:$0xff]   ;;  %v1256_v8 = vcombine.low %v297_v7, %v297_v7  ;;  %v1257_v9 = vcombine.high %v297_v7, %v297_v7 }
  0x2f   : > { %1363 = vmatpush3.bf16.msra.mxu1 %v1605_v24  ;;  %1342 = vmatprep.subr.bf16.mxu0 %v1606_v25  ;;  %v298_v10 = vld [vmem:[%s1721_s8 + $0x18] sm:$0xff] }
  0x30   : > { %1364 = vmatprep.subr.bf16.mxu1 %v1607_v26  ;;  %v1258_v11 = vcombine.low %v298_v10, %v298_v10  ;;  %v1259_v12 = vcombine.high %v298_v10, %v298_v10 }
  0x32   : > { %1343 = vmatpush3.bf16.msra.mxu0 %v1608_v27 }
  0x33   : > { %1365 = vmatpush3.bf16.msra.mxu1 %v1609_v28  ;;  %1344 = vmatprep.subr.bf16.mxu0 %v1610_v29 }
  0x34   : > { %1366 = vmatprep.subr.bf16.mxu1 %v1611_v30 }
  0x36   : > { %1345 = vmatpush3.bf16.msra.mxu0 %v1612_v31 }
  0x37   : > { %1367 = vmatpush3.bf16.msra.mxu1 %v1613_v32  ;;  %1374 = vmatprep.subr.bf16.mxu0 %v1618_v39  ;;  %v1016_v39 = vld [vmem:[%s1928_s3 + $0x8] sm:$0xff] (!%p1324_p6) }
  0x38   : > { %1396 = vmatprep.subr.bf16.mxu1 %v1619_v40  ;;  %v1017_v40 = vld [vmem:[%s1928_s3 + $0x10] sm:$0xff] (!%p1324_p6) }
  0x39   : > { %872 = vmatmul.mubr.bf16.vlgmr.msra.gmra.mrb[0].mxu0 %v1252_v35  ;;  %v294_v35 = vld [vmem:[#allocation2] sm:$0xff] }
  0x3a   : > { %912 = vmatmul.mubr.bf16.vlgmr.msra.gmra.mrb[0].mxu1 %v1254_v37  ;;  %1375 = vmatpush3.bf16.msra.mxu0 %v1620_v41  ;;  %v1663_v41 = vmov (!%p1324_p6), 0.0|0.0  }
  0x3b   : > { %1397 = vmatpush3.bf16.msra.mxu1 %v1621_v42  ;;  %1376 = vmatprep.subr.bf16.mxu0 %v1622_v43  ;;  %v1523_v42 = vpack.c.bf16 (!%p1324_p6), %v1016_v39, %v1015_v38  ;;  %v1018_v43 = vld [vmem:[%s1928_s3 + $0x18] sm:$0xff] (!%p1324_p6) }
  0x3c   : > { %1398 = vmatprep.subr.bf16.mxu1 %v1623_v44  ;;  %951 = vmatprep.mubr.bf16.mxu0 %v1257_v9  ;;  %v1665_v44 = vmov (!%p1324_p6), 0.0   ;;  %v1028_v9 = vld [vmem:[%s1928_s3 + $0x68] sm:$0xff] (!%p1324_p6) }
  0x3d   : > { %991 = vmatprep.mubr.bf16.mxu1 %v1259_v12  ;;  %v1120_v12 = vld [vmem:[%s1930_s5 + $0x58] sm:$0xff] (!%p1324_p6) }
  0x3e   : > { %1377 = vmatpush3.bf16.msra.mxu0 %v1624_v45  ;;  %v1526_v45 = vpack.c.bf16 (!%p1324_p6), %v1018_v43, %v1017_v40 }
  0x3f   : > { %1399 = vmatpush3.bf16.msra.mxu1 %v1625_v46  ;;  %1378 = vmatprep.subr.bf16.mxu0 %v1626_v47  ;;  %v1019_v46 = vld [vmem:[%s1928_s3 + $0x20] sm:$0xff] (!%p1324_p6)  ;;  %v1020_v47 = vld [vmem:[%s1928_s3 + $0x28] sm:$0xff] (!%p1324_p6) }
  0x40   : > { %1400 = vmatprep.subr.bf16.mxu1 %v1627_v48  ;;  %v1109_v48 = vld [vmem:[%s1930_s5] sm:$0xff] (!%p1324_p6) }
  0x42   : > { %1379 = vmatpush3.bf16.msra.mxu0 %v1628_v49  ;;  %v1110_v49 = vld [vmem:[%s1930_s5 + $0x8] sm:$0xff] (!%p1324_p6) }
  0x43   : > { %1401 = vmatpush3.bf16.msra.mxu1 %v1629_v50  ;;  %1380 = vmatprep.subr.bf16.mxu0 %v1630_v51  ;;  %v1111_v50 = vld [vmem:[%s1930_s5 + $0x10] sm:$0xff] (!%p1324_p6)  ;;  %v1529_v51 = vpack.c.bf16 (!%p1324_p6), %v1020_v47, %v1019_v46 }
  0x44   : > { %1402 = vmatprep.subr.bf16.mxu1 %v1631_v52  ;;  %v1547_v52 = vpack.c.bf16 (!%p1324_p6), %v1110_v49, %v1109_v48 }
  0x46   : > { %1381 = vmatpush3.bf16.msra.mxu0 %v1632_v53  ;;  %v1112_v53 = vld [vmem:[%s1930_s5 + $0x18] sm:$0xff] (!%p1324_p6) }
  0x47   : > { %1403 = vmatpush3.bf16.msra.mxu1 %v1633_v54  ;;  %1382 = vmatprep.subr.bf16.mxu0 %v1634_v55  ;;  %v1021_v54 = vld [vmem:[%s1928_s3 + $0x30] sm:$0xff] (!%p1324_p6)  ;;  %v1022_v55 = vld [vmem:[%s1928_s3 + $0x38] sm:$0xff] (!%p1324_p6) }
  0x48   : > { %1404 = vmatprep.subr.bf16.mxu1 %v1635_v56  ;;  %v1550_v56 = vpack.c.bf16 (!%p1324_p6), %v1112_v53, %v1111_v50 }
  0x4a   : > { %1383 = vmatpush3.bf16.msra.mxu0 %v1636_v57  ;;  %v1113_v57 = vld [vmem:[%s1930_s5 + $0x20] sm:$0xff] (!%p1324_p6) }
  0x4b   : > { %1405 = vmatpush3.bf16.msra.mxu1 %v1637_v58  ;;  %1384 = vmatprep.subr.bf16.mxu0 %v1638_v59  ;;  %v1114_v58 = vld [vmem:[%s1930_s5 + $0x28] sm:$0xff] (!%p1324_p6)  ;;  %v1532_v59 = vpack.c.bf16 (!%p1324_p6), %v1022_v55, %v1021_v54 }
  0x4c   : > { %1406 = vmatprep.subr.bf16.mxu1 %v1639_v60  ;;  %v1023_v60 = vld [vmem:[%s1928_s3 + $0x40] sm:$0xff] (!%p1324_p6) }
  0x4e   : > { %1385 = vmatpush3.bf16.msra.mxu0 %v1640_v61  ;;  %v1024_v61 = vld [vmem:[%s1928_s3 + $0x48] sm:$0xff] (!%p1324_p6) }
  0x4f   : > { %1407 = vmatpush3.bf16.msra.mxu1 %v1641_v62  ;;  %1386 = vmatprep.subr.bf16.mxu0 %v1642_v63  ;;  %v1553_v62 = vpack.c.bf16 (!%p1324_p6), %v1114_v58, %v1113_v57  ;;  %v1115_v63 = vld [vmem:[%s1930_s5 + $0x30] sm:$0xff] (!%p1324_p6) }
  0x50   : > { %1408 = vmatprep.subr.bf16.mxu1 %v1643_v0  ;;  %v1116_v0 = vld [vmem:[%s1930_s5 + $0x38] sm:$0xff] (!%p1324_p6) }
  0x52   : > { %1387 = vmatpush3.bf16.msra.mxu0 %v1644_v1  ;;  %v1535_v1 = vpack.c.bf16 (!%p1324_p6), %v1024_v61, %v1023_v60 }
  0x53   : > { %1409 = vmatpush3.bf16.msra.mxu1 %v1645_v2  ;;  %1388 = vmatprep.subr.bf16.mxu0 %v1646_v3  ;;  %v1025_v2 = vld [vmem:[%s1928_s3 + $0x50] sm:$0xff] (!%p1324_p6)  ;;  %v1026_v3 = vld [vmem:[%s1928_s3 + $0x58] sm:$0xff] (!%p1324_p6) }
  0x54   : > { %1410 = vmatprep.subr.bf16.mxu1 %v1647_v4  ;;  %v1556_v4 = vpack.c.bf16 (!%p1324_p6), %v1116_v0, %v1115_v63  ;;  %v1538_v7 = vpack.c.bf16 (!%p1324_p6), %v1026_v3, %v1025_v2 }
  0x56   : > { %1389 = vmatpush3.bf16.msra.mxu0 %v1648_v5  ;;  %v1117_v5 = vld [vmem:[%s1930_s5 + $0x40] sm:$0xff] (!%p1324_p6) }
  0x57   : > { %1411 = vmatpush3.bf16.msra.mxu1 %v1649_v6  ;;  %1522 = vmatprep.subr.bf16.mxu0 (!%p1324_p6), %v1663_v41  ;;  %v1118_v6 = vld [vmem:[%s1930_s5 + $0x48] sm:$0xff] (!%p1324_p6) }
  0x58   : > { %1546 = vmatprep.subr.bf16.mxu1 (!%p1324_p6), %v1663_v41  ;;  %v1559_v10 = vpack.c.bf16 (!%p1324_p6), %v1118_v6, %v1117_v5 }
  0x59   : > { %952 = vmatmul.mubr.bf16.vlgmr.msra.gmra.mrb[4].mxu0 %v1256_v8  ;;  %v1027_v8 = vld [vmem:[%s1928_s3 + $0x60] sm:$0xff] (!%p1324_p6) }
  0x5a   : > { %992 = vmatmul.mubr.bf16.vlgmr.msra.gmra.mrb[4].mxu1 %v1258_v11  ;;  %1484 = vmatprep.mubr.msk.f32.mxu0 (!%p1324_p6), %vm1664_vm0, %v1665_v44  ;;  %v1119_v11 = vld [vmem:[%s1930_s5 + $0x50] sm:$0xff] (!%p1324_p6) }
  0x5b   : > { %1519 = vmatprep.mubr.msk.f32.mxu1 (!%p1324_p6), %vm1664_vm0, %v1665_v44  ;;  %1524 = vmatpush3.bf16.msra.mxu0 (!%p1324_p6), %v1523_v42 }
  0x5c   : > { %1525 = vmatprep.subr.bf16.mxu0 (!%p1324_p6), %v1663_v41  ;;  %1548 = vmatpush3.bf16.msra.mxu1 (!%p1324_p6), %v1547_v52 }
  0x5d   : > { %1549 = vmatprep.subr.bf16.mxu1 (!%p1324_p6), %v1663_v41 }
  0x5f   : > { %1527 = vmatpush3.bf16.msra.mxu0 (!%p1324_p6), %v1526_v45 }
  0x60   : > { %1528 = vmatprep.subr.bf16.mxu0 (!%p1324_p6), %v1663_v41  ;;  %1551 = vmatpush3.bf16.msra.mxu1 (!%p1324_p6), %v1550_v56 }
  0x61   : > { %1552 = vmatprep.subr.bf16.mxu1 (!%p1324_p6), %v1663_v41 }
  0x63   : > { %1530 = vmatpush3.bf16.msra.mxu0 (!%p1324_p6), %v1529_v51 }
  0x64   : > { %1531 = vmatprep.subr.bf16.mxu0 (!%p1324_p6), %v1663_v41  ;;  %1554 = vmatpush3.bf16.msra.mxu1 (!%p1324_p6), %v1553_v62 }
  0x65   : > { %1555 = vmatprep.subr.bf16.mxu1 (!%p1324_p6), %v1663_v41 }
  0x67   : > { %1533 = vmatpush3.bf16.msra.mxu0 (!%p1324_p6), %v1532_v59 }
  0x68   : > { %1534 = vmatprep.subr.bf16.mxu0 (!%p1324_p6), %v1663_v41  ;;  %1557 = vmatpush3.bf16.msra.mxu1 (!%p1324_p6), %v1556_v4 }
  0x69   : > { %1558 = vmatprep.subr.bf16.mxu1 (!%p1324_p6), %v1663_v41 }
  0x6b   : > { %1536 = vmatpush3.bf16.msra.mxu0 (!%p1324_p6), %v1535_v1 }
  0x6c   : > { %1537 = vmatprep.subr.bf16.mxu0 (!%p1324_p6), %v1663_v41  ;;  %1560 = vmatpush3.bf16.msra.mxu1 (!%p1324_p6), %v1559_v10 }
  0x6d   : > { %1561 = vmatprep.subr.bf16.mxu1 (!%p1324_p6), %v1663_v41 }
  0x6f   : > { %1539 = vmatpush3.bf16.msra.mxu0 (!%p1324_p6), %v1538_v7 }
  0x70   : > { %1540 = vmatprep.subr.bf16.mxu0 (!%p1324_p6), %v1663_v41 }
 0x10c   : > { %v1346_v13 = vpop.f32.mrb[0].mxu0 }
 0x10d   : > { %v1368_v14 = vpop.f32.mrb[0].mxu1  ;;  %v1347_v15 = vpop.f32.mrb[1].mxu0 }
 0x10e   : > { %v1369_v16 = vpop.f32.mrb[1].mxu1  ;;  %v1348_v17 = vadd.f32 %v1347_v15, %v1346_v13  ;;  %v1349_v19 = vpop.f32.mrb[2].mxu0  ;;  %v1541_v13 = vpack.c.bf16 (!%p1324_p6), %v1028_v9, %v1027_v8  ;;  %v1325_v15 = vld [vmem:[%s1927_s2] ss:$0 sm:$0xff] (!%p1324_p6) }
 0x10f   : > { %v1370_v18 = vadd.f32 %v1369_v16, %v1368_v14  ;;  %v1371_v20 = vpop.f32.mrb[2].mxu1  ;;  %v1350_v21 = vpop.f32.mrb[3].mxu0  ;;  %v1029_v16 = vld [vmem:[%s1928_s3 + $0x70] sm:$0xff] (!%p1324_p6) }
 0x110   : > { %v1372_v22 = vpop.f32.mrb[3].mxu1  ;;  %v1121_v20 = vld [vmem:[%s1930_s5 + $0x60] sm:$0xff] (!%p1324_p6)  ;;  %v1122_v21 = vld [vmem:[%s1930_s5 + $0x68] sm:$0xff] (!%p1324_p6)  ;;  %1542 = vmatpush3.bf16.msra.mxu0 (!%p1324_p6), %v1541_v13 }
 0x111   : > { %v914_v23 = vadd.f32 %v1370_v18, %v1348_v17  ;;  %v1030_v17 = vld [vmem:[%s1928_s3 + $0x78] sm:$0xff] (!%p1324_p6)  ;;  %v1562_v18 = vpack.c.bf16 (!%p1324_p6), %v1120_v12, %v1119_v11  ;;  %1543 = vmatprep.subr.bf16.mxu0 (!%p1324_p6), %v1663_v41 }
 0x112   : > { %v1544_v22 = vpack.c.bf16 (!%p1324_p6), %v1030_v17, %v1029_v16 }
 0x113   : > { %1563 = vmatpush3.bf16.msra.mxu1 (!%p1324_p6), %v1562_v18 }
 0x114   : > { %1564 = vmatprep.subr.bf16.mxu1 (!%p1324_p6), %v1663_v41  ;;  %1545 = vmatpush3.bf16.msra.mxu0 (!%p1324_p6), %v1544_v22 }
 0x12c   : > { %v1390_v24 = vpop.f32.mrb[4].mxu0 }
 0x12d   : > { %v1412_v25 = vpop.f32.mrb[4].mxu1  ;;  %v1391_v26 = vpop.f32.mrb[5].mxu0 }
 0x12e   : > { %v1413_v27 = vpop.f32.mrb[5].mxu1  ;;  %v1392_v28 = vadd.f32 %v1391_v26, %v1390_v24  ;;  %v1393_v30 = vpop.f32.mrb[6].mxu0  ;;  %v1124_v26 = vld [vmem:[%s1930_s5 + $0x78] sm:$0xff] (!%p1324_p6) }
 0x12f   : > { %v1414_v29 = vadd.f32 %v1413_v27, %v1412_v25  ;;  %v1415_v31 = vpop.f32.mrb[6].mxu1  ;;  %v1394_v32 = vpop.f32.mrb[7].mxu0  ;;  %v1123_v25 = vld [vmem:[%s1930_s5 + $0x70] sm:$0xff] (!%p1324_p6) }
 0x130   : > { %v1416_v33 = vpop.f32.mrb[7].mxu1  ;;  %v954_v34 = vadd.f32 %v1392_v28, %v914_v23  ;;  %1004 = sbr.rel (%p1324_p6) target bundleno = 753 (0x2f1), region = 56  ;;  %v1565_v23 = vpack.c.bf16 (!%p1324_p6), %v1122_v21, %v1121_v20  ;;  %v1568_v27 = vpack.c.bf16 (!%p1324_p6), %v1124_v26, %v1123_v25  ;;  %v1326_v28 = vld [vmem:[%s1929_s4] ss:$0 sm:$0xff] (!%p1324_p6) }
 0x131   : > { %v1327_v33 = vld [vmem:[%s1931_s6] ss:$0 sm:$0xff] (!%p1324_p6) }
 0x132   : > { %v994_v36 = vadd.f32 %v1414_v29, %v954_v34  ;;  %1566 = vmatpush3.bf16.msra.mxu1 (!%p1324_p6), %v1565_v23 }
 0x133   : > { %1567 = vmatprep.subr.bf16.mxu1 (!%p1324_p6), %v1663_v41 }
 0x134   : > { %v999_v37 = vadd.f32 %v994_v36, %v294_v35 }
 0x136   : > { %1000 = vst [vmem:[#allocation2] sm:$0xff] %v999_v37  ;;  %1569 = vmatpush3.bf16.msra.mxu1 (!%p1324_p6), %v1568_v27 }
 0x13d   : > { %v1005_v14 = vld [vmem:[#allocation2] sm:$0xff] }
 0x13e   : > { %v1013_v19 = vadd.f32 %v1325_v15, %v1005_v14 }
 0x140   : > { %v1014_v24 = vmax.f32 %v1013_v19, 0.0 }
 0x142   : > { %1485 = vmatmul.mubr.f32.vlgmr.msra.gmra.mrb[0].mxu0 %v1014_v24 }
 0x215   : > { %v1104_v29 = vpop.f32.mrb[0].mxu0 }
 0x216   : > { %v1105_v30 = vadd.f32 %v1326_v28, %v1104_v29  ;;  %v1486_v31 = vpop.f32.mrb[1].mxu0 }
 0x218   : > { %v1108_v32 = vmax.f32 %v1105_v30, 0.0 }
 0x21a   : > { %1520 = vmatmul.mubr.f32.vlgmr.msra.gmra.mrb[0].mxu1 %v1108_v32 }
 0x2ed   : > { %v1198_v34 = vpop.f32.mrb[0].mxu1 }
 0x2ee   : > { %v1199_v35 = vadd.f32 %v1327_v33, %v1198_v34  ;;  %v1521_v36 = vpop.f32.mrb[1].mxu1 }
 0x2f0   : > { %1202 = vst [vmem:[%s1932_s7] sm:$0xff] %v1199_v35 }
 0x2f1 PF: > { %s17_s24 = sadd.s32 1, %s1660_s24  }
 0x2f2   : > { %p14_p7 = scmp.ge.s32.totalorder %s17_s24, 10  }
 0x2f4   :  { %16 = sbr.rel (!%p14_p7) target bundleno = 1 (0x1), region = 85 }

</bundles_post_ra>
